<compile_context>
chip_gen: v5e
topology: v5e:2x2
jax: 0.10.0
libtpu: 0.0.40
codegen_flags: <defaults>
</compile_context>

<pallas_src>
import functools

import jax
import jax.numpy as jnp
from jax.experimental import pallas as pl
from jax.experimental.pallas import tpu as pltpu

# Model hyper-parameters (from Single_Encoder.__init__)
K1, K2, K3 = 24, 16, 8
C1, C2, C3 = 32, 64, 96
RF = (K1 - 1) + (K2 - 1) + (K3 - 1)     # total receptive-field shrink = 45


def _encoder_kernel(a1_ref, w1_ref, b1_ref, w2_ref, b2_ref, w3_ref, b3_ref,
                    o_ref, *, Bblk, L_pad, L):
    """One grid step = Bblk samples folded into the lane/time axis (N lanes)."""
    # TODO(synk): Dropout(0.1) layers are identity here (inference semantics).

    # ---- Layer 1: pre-staged im2col -> single (32, 96) @ (96, N) MXU pass ----
    y1 = jnp.dot(w1_ref[...], a1_ref[...], preferred_element_type=jnp.float32)
    h = jnp.maximum(y1 + b1_ref[...], 0.0).astype(jnp.bfloat16)      # (32, N)

    def conv_relu(h_bf16, w_ref, b_ref, K, kgroup, out_f32):
        # h_bf16: (Cin, n_in) bf16.  w_ref: (Cout, K*Cin) bf16, column k*Cin+c.
        # Accumulate over k-groups of contraction depth kgroup*Cin == 128
        # instead of materialising the full (K*Cin, n_out) im2col.
        ci, n_in = h_bf16.shape
        n_out = n_in - K + 1
        cout = w_ref.shape[0]
        acc = jnp.zeros((cout, n_out), jnp.float32)
        for g0 in range(0, K, kgroup):
            a = jnp.concatenate(
                [h_bf16[:, k:k + n_out] for k in range(g0, g0 + kgroup)],
                axis=0)                                  # (128, n_out) bf16
            wg = w_ref[:, g0 * ci:(g0 + kgroup) * ci]    # (Cout, 128) bf16 view
            acc = acc + jnp.dot(wg, a, preferred_element_type=jnp.float32)
        y = jnp.maximum(acc + b_ref[...], 0.0)
        return y if out_f32 else y.astype(jnp.bfloat16)

    h = conv_relu(h, w2_ref, b2_ref, K2, 4, out_f32=False)    # (64, N-15) bf16
    h3 = conv_relu(h, w3_ref, b3_ref, K3, 2, out_f32=True)    # (96, N-22) f32

    # ---- AdaptiveMaxPool1d(1) + Flatten ----
    # Per-sample global max over its own valid window.  Each slice starts at a
    # 128-aligned lane offset (b*L_pad); results are stacked and written with
    # a single block store (no per-row masked stores).
    Lf = L - RF
    maxes = [jnp.max(h3[:, b * L_pad:b * L_pad + Lf], axis=-1)
             for b in range(Bblk)]
    o_ref[...] = jnp.stack(maxes, axis=0)                       # (Bblk, 96)


def _plan_batching(B, L_pad):
    """Pick (Bblk, B_pad) from an explicit VMEM budget.

    Peak live VMEM per folded lane (bf16 inputs double-buffered + bf16 h1/h2 +
    f32 accumulators + one 128-row im2col group) is ~1.2-1.6 KB; budget 24 MiB
    so the worst case stays well inside v7x's 64 MiB physical VMEM.
    """
    BYTES_PER_LANE = 1600
    VMEM_BUDGET = 24 << 20
    TARGET_LANES = 8192          # amortise the ~0.35us per-grid-step overhead

    def up8(v):
        return ((v + 7) // 8) * 8

    max_bb = max(8, (VMEM_BUDGET // (BYTES_PER_LANE * L_pad)) // 8 * 8)
    want_bb = up8(max(1, -(-TARGET_LANES // L_pad)))
    bb = min(max_bb, want_bb, up8(B))
    # Prefer >= 2 grid steps so the "parallel" axis can use both v7x cores.
    half = up8(-(-B // 2))
    if B > 8 and bb > half:
        bb = half
    b_pad = -(-B // bb) * bb
    return bb, b_pad


def single_encoder_forward(x, params):
    """x: (B, Cin, L) float32.  Returns (B, 96) float32."""
    B, Cin, L = x.shape
    assert L > RF, f"need L > {RF}"
    w1, b1, w2, b2, w3, b3 = params

    L_pad = ((L + 127) // 128) * 128
    Bblk, B_pad = _plan_batching(B, L_pad)
    nb = B_pad // Bblk
    N = Bblk * L_pad

    def pack_w(w):
        # (Cout, Cin, K) -> lane-dense (Cout, K*Cin) bf16, column k*Cin + c,
        # matching the im2col row order.
        cout, cin, k = w.shape
        return (jnp.transpose(w, (0, 2, 1))
                .reshape(cout, k * cin)
                .astype(jnp.bfloat16))

    w1p, w2p, w3p = pack_w(w1), pack_w(w2), pack_w(w3)
    b1c = b1.reshape(C1, 1)
    b2c = b2.reshape(C2, 1)
    b3c = b3.reshape(C3, 1)

    # Pad batch (to a Bblk multiple) and time (to the 128-aligned stride L_pad),
    # then fold batch into the lane axis: columns sample-major, stride L_pad.
    xp = jnp.pad(x, ((0, B_pad - B), (0, 0), (0, L_pad - L)))
    x2d = (jnp.transpose(xp, (1, 0, 2))
           .reshape(Cin, B_pad * L_pad)
           .astype(jnp.bfloat16))
    # Pre-stage layer-1 im2col in XLA: A1[k*Cin + c, j] = x2d[c, j + k].
    x2d_ext = jnp.pad(x2d, ((0, 0), (0, K1)))
    A1 = jnp.concatenate(
        [x2d_ext[:, k:k + B_pad * L_pad] for k in range(K1)], axis=0)

    kernel = functools.partial(_encoder_kernel, Bblk=Bblk, L_pad=L_pad, L=L)

    out = pl.pallas_call(
        kernel,
        out_shape=jax.ShapeDtypeStruct((B_pad, C3), jnp.float32),
        grid_spec=pltpu.PrefetchScalarGridSpec(
            num_scalar_prefetch=0,
            grid=(nb,),
            in_specs=[
                pl.BlockSpec((Cin * K1, N), lambda i: (0, i)),
                pl.BlockSpec(w1p.shape, lambda i: (0, 0)),
                pl.BlockSpec(b1c.shape, lambda i: (0, 0)),
                pl.BlockSpec(w2p.shape, lambda i: (0, 0)),
                pl.BlockSpec(b2c.shape, lambda i: (0, 0)),
                pl.BlockSpec(w3p.shape, lambda i: (0, 0)),
                pl.BlockSpec(b3c.shape, lambda i: (0, 0)),
            ],
            out_specs=pl.BlockSpec((Bblk, C3), lambda i: (i, 0)),
        ),
        compiler_params=pltpu.CompilerParams(
            dimension_semantics=("parallel",),
            vmem_limit_bytes=48 << 20),
    )(A1, w1p, b1c, w2p, b2c, w3p, b3c)
    return out[:B]


def init_params(key, input_channel_dim):
    ks = jax.random.split(key, 6)

    def uinit(k, shape, fan_in):
        bound = 1.0 / jnp.sqrt(fan_in)
        return jax.random.uniform(k, shape, jnp.float32, -bound, bound)

    w1 = uinit(ks[0], (C1, input_channel_dim, K1), input_channel_dim * K1)
    b1 = uinit(ks[1], (C1,), input_channel_dim * K1)
    w2 = uinit(ks[2], (C2, C1, K2), C1 * K2)
    b2 = uinit(ks[3], (C2,), C1 * K2)
    w3 = uinit(ks[4], (C3, C2, K3), C2 * K3)
    b3 = uinit(ks[5], (C3,), C2 * K3)
    return (w1, b1, w2, b2, w3, b3)


def reference_forward(x, params):
    w1, b1, w2, b2, w3, b3 = params

    def conv1d(h, w, b):
        out = jax.lax.conv_general_dilated(
            h, w, window_strides=(1,), padding="VALID",
            dimension_numbers=("NCH", "OIH", "NCH"))
        return out + b[None, :, None]

    h = jax.nn.relu(conv1d(x, w1, b1))
    h = jax.nn.relu(conv1d(h, w2, b2))
    h = jax.nn.relu(conv1d(h, w3, b3))
    return jnp.max(h, axis=-1)


if __name__ == "__main__":
    key = jax.random.PRNGKey(0)
    k_x, k_p = jax.random.split(key)

    B, Cin, L = 2, 4, 64          # L must exceed the receptive field (45)
    x = jax.random.normal(k_x, (B, Cin, L), jnp.float32)
    params = init_params(k_p, Cin)

    out = jax.block_until_ready(single_encoder_forward(x, params))
    ref = reference_forward(x, params)

    assert out.shape == (B, C3), out.shape
    max_err = float(jnp.max(jnp.abs(out - ref)))
    # bf16 MXU operands vs f32 reference -> loose tolerance (intentional).
    assert jnp.allclose(out, ref, atol=5e-2, rtol=5e-2), max_err
    print("KERNEL_OK")
</pallas_src>

<mosaic_0001>
module attributes {stable_mosaic.version = 11 : i64} {
  func.func @_encoder_kernel(%arg0: i32, %arg1: memref<96x1024xbf16, #tpu.memory_space<vmem>>, %arg2: memref<32x96xbf16, #tpu.memory_space<vmem>>, %arg3: memref<32x1xf32, #tpu.memory_space<vmem>>, %arg4: memref<64x512xbf16, #tpu.memory_space<vmem>>, %arg5: memref<64x1xf32, #tpu.memory_space<vmem>>, %arg6: memref<96x512xbf16, #tpu.memory_space<vmem>>, %arg7: memref<96x1xf32, #tpu.memory_space<vmem>>, %arg8: memref<8x96xf32, #tpu.memory_space<vmem>>) attributes {dimension_semantics = [#tpu.dimension_semantics<parallel>], iteration_bounds = array<i64: 1>, scalar_prefetch = 0 : i64, scratch_operands = 0 : i64, tpu.core_type = #tpu.core_type<tc>, window_params = [{transform_indices = @transform_0, window_bounds = array<i64: 96, 1024>}, {pipeline_mode = #tpu.pipeline_mode<synchronous>, transform_indices = @transform_1, window_bounds = array<i64: 32, 96>}, {pipeline_mode = #tpu.pipeline_mode<synchronous>, transform_indices = @transform_2, window_bounds = array<i64: 32, 1>}, {pipeline_mode = #tpu.pipeline_mode<synchronous>, transform_indices = @transform_3, window_bounds = array<i64: 64, 512>}, {pipeline_mode = #tpu.pipeline_mode<synchronous>, transform_indices = @transform_4, window_bounds = array<i64: 64, 1>}, {pipeline_mode = #tpu.pipeline_mode<synchronous>, transform_indices = @transform_5, window_bounds = array<i64: 96, 512>}, {pipeline_mode = #tpu.pipeline_mode<synchronous>, transform_indices = @transform_6, window_bounds = array<i64: 96, 1>}, {transform_indices = @transform_7, window_bounds = array<i64: 8, 96>}]} {
    %c0 = arith.constant 0 : index
    %c0_0 = arith.constant 0 : index
    %0 = vector.load %arg2[%c0, %c0_0] : memref<32x96xbf16, #tpu.memory_space<vmem>>, vector<32x96xbf16>
    %c0_1 = arith.constant 0 : index
    %c0_2 = arith.constant 0 : index
    %1 = vector.load %arg1[%c0_1, %c0_2] : memref<96x1024xbf16, #tpu.memory_space<vmem>>, vector<96x1024xbf16>
    %cst = arith.constant dense<0.000000e+00> : vector<32x1024xf32>
    %2 = tpu.matmul %0, %1, %cst {dimension_numbers = #tpu.dot_dimension_numbers<[1], [0], [0], [1], [0, 0, 1, 1], [], []>} : vector<32x96xbf16>, vector<96x1024xbf16>, vector<32x1024xf32> -> vector<32x1024xf32>
    %c0_3 = arith.constant 0 : index
    %c0_4 = arith.constant 0 : index
    %3 = vector.load %arg3[%c0_3, %c0_4] : memref<32x1xf32, #tpu.memory_space<vmem>>, vector<32x1xf32>
    %4 = vector.broadcast %3 : vector<32x1xf32> to vector<32x1024xf32>
    %5 = arith.addf %2, %4 : vector<32x1024xf32>
    %cst_5 = arith.constant 0.000000e+00 : f32
    %6 = vector.broadcast %cst_5 : f32 to vector<32x1024xf32>
    %7 = arith.maximumf %5, %6 : vector<32x1024xf32>
    %8 = arith.truncf %7 : vector<32x1024xf32> to vector<32x1024xbf16>
    %cst_6 = arith.constant 0.000000e+00 : f32
    %9 = vector.broadcast %cst_6 : f32 to vector<64x1009xf32>
    %10 = vector.extract_strided_slice %8 {offsets = [0, 0], sizes = [32, 1009], strides = [1, 1]} : vector<32x1024xbf16> to vector<32x1009xbf16>
    %11 = vector.extract_strided_slice %8 {offsets = [0, 1], sizes = [32, 1009], strides = [1, 1]} : vector<32x1024xbf16> to vector<32x1009xbf16>
    %12 = vector.extract_strided_slice %8 {offsets = [0, 2], sizes = [32, 1009], strides = [1, 1]} : vector<32x1024xbf16> to vector<32x1009xbf16>
    %13 = vector.extract_strided_slice %8 {offsets = [0, 3], sizes = [32, 1009], strides = [1, 1]} : vector<32x1024xbf16> to vector<32x1009xbf16>
    %14 = tpu.concatenate %10, %11, %12, %13 in 0 : vector<32x1009xbf16>, vector<32x1009xbf16>, vector<32x1009xbf16>, vector<32x1009xbf16> -> vector<128x1009xbf16>
    %c0_7 = arith.constant 0 : index
    %c0_8 = arith.constant 0 : index
    %15 = vector.load %arg4[%c0_7, %c0_8] : memref<64x512xbf16, #tpu.memory_space<vmem>>, vector<64x128xbf16>
    %cst_9 = arith.constant dense<0.000000e+00> : vector<64x1009xf32>
    %16 = tpu.matmul %15, %14, %cst_9 {dimension_numbers = #tpu.dot_dimension_numbers<[1], [0], [0], [1], [0, 0, 1, 1], [], []>} : vector<64x128xbf16>, vector<128x1009xbf16>, vector<64x1009xf32> -> vector<64x1009xf32>
    %17 = arith.addf %9, %16 : vector<64x1009xf32>
    %18 = vector.extract_strided_slice %8 {offsets = [0, 4], sizes = [32, 1009], strides = [1, 1]} : vector<32x1024xbf16> to vector<32x1009xbf16>
    %19 = vector.extract_strided_slice %8 {offsets = [0, 5], sizes = [32, 1009], strides = [1, 1]} : vector<32x1024xbf16> to vector<32x1009xbf16>
    %20 = vector.extract_strided_slice %8 {offsets = [0, 6], sizes = [32, 1009], strides = [1, 1]} : vector<32x1024xbf16> to vector<32x1009xbf16>
    %21 = vector.extract_strided_slice %8 {offsets = [0, 7], sizes = [32, 1009], strides = [1, 1]} : vector<32x1024xbf16> to vector<32x1009xbf16>
    %22 = tpu.concatenate %18, %19, %20, %21 in 0 : vector<32x1009xbf16>, vector<32x1009xbf16>, vector<32x1009xbf16>, vector<32x1009xbf16> -> vector<128x1009xbf16>
    %c0_10 = arith.constant 0 : index
    %c128 = arith.constant 128 : index
    %23 = vector.load %arg4[%c0_10, %c128] : memref<64x512xbf16, #tpu.memory_space<vmem>>, vector<64x128xbf16>
    %cst_11 = arith.constant dense<0.000000e+00> : vector<64x1009xf32>
    %24 = tpu.matmul %23, %22, %cst_11 {dimension_numbers = #tpu.dot_dimension_numbers<[1], [0], [0], [1], [0, 0, 1, 1], [], []>} : vector<64x128xbf16>, vector<128x1009xbf16>, vector<64x1009xf32> -> vector<64x1009xf32>
    %25 = arith.addf %17, %24 : vector<64x1009xf32>
    %26 = vector.extract_strided_slice %8 {offsets = [0, 8], sizes = [32, 1009], strides = [1, 1]} : vector<32x1024xbf16> to vector<32x1009xbf16>
    %27 = vector.extract_strided_slice %8 {offsets = [0, 9], sizes = [32, 1009], strides = [1, 1]} : vector<32x1024xbf16> to vector<32x1009xbf16>
    %28 = vector.extract_strided_slice %8 {offsets = [0, 10], sizes = [32, 1009], strides = [1, 1]} : vector<32x1024xbf16> to vector<32x1009xbf16>
    %29 = vector.extract_strided_slice %8 {offsets = [0, 11], sizes = [32, 1009], strides = [1, 1]} : vector<32x1024xbf16> to vector<32x1009xbf16>
    %30 = tpu.concatenate %26, %27, %28, %29 in 0 : vector<32x1009xbf16>, vector<32x1009xbf16>, vector<32x1009xbf16>, vector<32x1009xbf16> -> vector<128x1009xbf16>
    %c0_12 = arith.constant 0 : index
    %c256 = arith.constant 256 : index
    %31 = vector.load %arg4[%c0_12, %c256] : memref<64x512xbf16, #tpu.memory_space<vmem>>, vector<64x128xbf16>
    %cst_13 = arith.constant dense<0.000000e+00> : vector<64x1009xf32>
    %32 = tpu.matmul %31, %30, %cst_13 {dimension_numbers = #tpu.dot_dimension_numbers<[1], [0], [0], [1], [0, 0, 1, 1], [], []>} : vector<64x128xbf16>, vector<128x1009xbf16>, vector<64x1009xf32> -> vector<64x1009xf32>
    %33 = arith.addf %25, %32 : vector<64x1009xf32>
    %34 = vector.extract_strided_slice %8 {offsets = [0, 12], sizes = [32, 1009], strides = [1, 1]} : vector<32x1024xbf16> to vector<32x1009xbf16>
    %35 = vector.extract_strided_slice %8 {offsets = [0, 13], sizes = [32, 1009], strides = [1, 1]} : vector<32x1024xbf16> to vector<32x1009xbf16>
    %36 = vector.extract_strided_slice %8 {offsets = [0, 14], sizes = [32, 1009], strides = [1, 1]} : vector<32x1024xbf16> to vector<32x1009xbf16>
    %37 = vector.extract_strided_slice %8 {offsets = [0, 15], sizes = [32, 1009], strides = [1, 1]} : vector<32x1024xbf16> to vector<32x1009xbf16>
    %38 = tpu.concatenate %34, %35, %36, %37 in 0 : vector<32x1009xbf16>, vector<32x1009xbf16>, vector<32x1009xbf16>, vector<32x1009xbf16> -> vector<128x1009xbf16>
    %c0_14 = arith.constant 0 : index
    %c384 = arith.constant 384 : index
    %39 = vector.load %arg4[%c0_14, %c384] : memref<64x512xbf16, #tpu.memory_space<vmem>>, vector<64x128xbf16>
    %cst_15 = arith.constant dense<0.000000e+00> : vector<64x1009xf32>
    %40 = tpu.matmul %39, %38, %cst_15 {dimension_numbers = #tpu.dot_dimension_numbers<[1], [0], [0], [1], [0, 0, 1, 1], [], []>} : vector<64x128xbf16>, vector<128x1009xbf16>, vector<64x1009xf32> -> vector<64x1009xf32>
    %41 = arith.addf %33, %40 : vector<64x1009xf32>
    %c0_16 = arith.constant 0 : index
    %c0_17 = arith.constant 0 : index
    %42 = vector.load %arg5[%c0_16, %c0_17] : memref<64x1xf32, #tpu.memory_space<vmem>>, vector<64x1xf32>
    %43 = vector.broadcast %42 : vector<64x1xf32> to vector<64x1009xf32>
    %44 = arith.addf %41, %43 : vector<64x1009xf32>
    %cst_18 = arith.constant 0.000000e+00 : f32
    %45 = vector.broadcast %cst_18 : f32 to vector<64x1009xf32>
    %46 = arith.maximumf %44, %45 : vector<64x1009xf32>
    %47 = arith.truncf %46 : vector<64x1009xf32> to vector<64x1009xbf16>
    %cst_19 = arith.constant 0.000000e+00 : f32
    %48 = vector.broadcast %cst_19 : f32 to vector<96x1002xf32>
    %49 = vector.extract_strided_slice %47 {offsets = [0, 0], sizes = [64, 1002], strides = [1, 1]} : vector<64x1009xbf16> to vector<64x1002xbf16>
    %50 = vector.extract_strided_slice %47 {offsets = [0, 1], sizes = [64, 1002], strides = [1, 1]} : vector<64x1009xbf16> to vector<64x1002xbf16>
    %51 = tpu.concatenate %49, %50 in 0 : vector<64x1002xbf16>, vector<64x1002xbf16> -> vector<128x1002xbf16>
    %c0_20 = arith.constant 0 : index
    %c0_21 = arith.constant 0 : index
    %52 = vector.load %arg6[%c0_20, %c0_21] : memref<96x512xbf16, #tpu.memory_space<vmem>>, vector<96x128xbf16>
    %cst_22 = arith.constant dense<0.000000e+00> : vector<96x1002xf32>
    %53 = tpu.matmul %52, %51, %cst_22 {dimension_numbers = #tpu.dot_dimension_numbers<[1], [0], [0], [1], [0, 0, 1, 1], [], []>} : vector<96x128xbf16>, vector<128x1002xbf16>, vector<96x1002xf32> -> vector<96x1002xf32>
    %54 = arith.addf %48, %53 : vector<96x1002xf32>
    %55 = vector.extract_strided_slice %47 {offsets = [0, 2], sizes = [64, 1002], strides = [1, 1]} : vector<64x1009xbf16> to vector<64x1002xbf16>
    %56 = vector.extract_strided_slice %47 {offsets = [0, 3], sizes = [64, 1002], strides = [1, 1]} : vector<64x1009xbf16> to vector<64x1002xbf16>
    %57 = tpu.concatenate %55, %56 in 0 : vector<64x1002xbf16>, vector<64x1002xbf16> -> vector<128x1002xbf16>
    %c0_23 = arith.constant 0 : index
    %c128_24 = arith.constant 128 : index
    %58 = vector.load %arg6[%c0_23, %c128_24] : memref<96x512xbf16, #tpu.memory_space<vmem>>, vector<96x128xbf16>
    %cst_25 = arith.constant dense<0.000000e+00> : vector<96x1002xf32>
    %59 = tpu.matmul %58, %57, %cst_25 {dimension_numbers = #tpu.dot_dimension_numbers<[1], [0], [0], [1], [0, 0, 1, 1], [], []>} : vector<96x128xbf16>, vector<128x1002xbf16>, vector<96x1002xf32> -> vector<96x1002xf32>
    %60 = arith.addf %54, %59 : vector<96x1002xf32>
    %61 = vector.extract_strided_slice %47 {offsets = [0, 4], sizes = [64, 1002], strides = [1, 1]} : vector<64x1009xbf16> to vector<64x1002xbf16>
    %62 = vector.extract_strided_slice %47 {offsets = [0, 5], sizes = [64, 1002], strides = [1, 1]} : vector<64x1009xbf16> to vector<64x1002xbf16>
    %63 = tpu.concatenate %61, %62 in 0 : vector<64x1002xbf16>, vector<64x1002xbf16> -> vector<128x1002xbf16>
    %c0_26 = arith.constant 0 : index
    %c256_27 = arith.constant 256 : index
    %64 = vector.load %arg6[%c0_26, %c256_27] : memref<96x512xbf16, #tpu.memory_space<vmem>>, vector<96x128xbf16>
    %cst_28 = arith.constant dense<0.000000e+00> : vector<96x1002xf32>
    %65 = tpu.matmul %64, %63, %cst_28 {dimension_numbers = #tpu.dot_dimension_numbers<[1], [0], [0], [1], [0, 0, 1, 1], [], []>} : vector<96x128xbf16>, vector<128x1002xbf16>, vector<96x1002xf32> -> vector<96x1002xf32>
    %66 = arith.addf %60, %65 : vector<96x1002xf32>
    %67 = vector.extract_strided_slice %47 {offsets = [0, 6], sizes = [64, 1002], strides = [1, 1]} : vector<64x1009xbf16> to vector<64x1002xbf16>
    %68 = vector.extract_strided_slice %47 {offsets = [0, 7], sizes = [64, 1002], strides = [1, 1]} : vector<64x1009xbf16> to vector<64x1002xbf16>
    %69 = tpu.concatenate %67, %68 in 0 : vector<64x1002xbf16>, vector<64x1002xbf16> -> vector<128x1002xbf16>
    %c0_29 = arith.constant 0 : index
    %c384_30 = arith.constant 384 : index
    %70 = vector.load %arg6[%c0_29, %c384_30] : memref<96x512xbf16, #tpu.memory_space<vmem>>, vector<96x128xbf16>
    %cst_31 = arith.constant dense<0.000000e+00> : vector<96x1002xf32>
    %71 = tpu.matmul %70, %69, %cst_31 {dimension_numbers = #tpu.dot_dimension_numbers<[1], [0], [0], [1], [0, 0, 1, 1], [], []>} : vector<96x128xbf16>, vector<128x1002xbf16>, vector<96x1002xf32> -> vector<96x1002xf32>
    %72 = arith.addf %66, %71 : vector<96x1002xf32>
    %c0_32 = arith.constant 0 : index
    %c0_33 = arith.constant 0 : index
    %73 = vector.load %arg7[%c0_32, %c0_33] : memref<96x1xf32, #tpu.memory_space<vmem>>, vector<96x1xf32>
    %74 = vector.broadcast %73 : vector<96x1xf32> to vector<96x1002xf32>
    %75 = arith.addf %72, %74 : vector<96x1002xf32>
    %cst_34 = arith.constant 0.000000e+00 : f32
    %76 = vector.broadcast %cst_34 : f32 to vector<96x1002xf32>
    %77 = arith.maximumf %75, %76 : vector<96x1002xf32>
    %78 = vector.extract_strided_slice %77 {offsets = [0, 0], sizes = [96, 19], strides = [1, 1]} : vector<96x1002xf32> to vector<96x19xf32>
    %cst_35 = arith.constant dense<0xFF800000> : vector<96xf32>
    %79 = vector.multi_reduction <maximumf>, %78, %cst_35 [1] : vector<96x19xf32> to vector<96xf32>
    %80 = vector.extract_strided_slice %77 {offsets = [0, 128], sizes = [96, 19], strides = [1, 1]} : vector<96x1002xf32> to vector<96x19xf32>
    %cst_36 = arith.constant dense<0xFF800000> : vector<96xf32>
    %81 = vector.multi_reduction <maximumf>, %80, %cst_36 [1] : vector<96x19xf32> to vector<96xf32>
    %82 = vector.extract_strided_slice %77 {offsets = [0, 256], sizes = [96, 19], strides = [1, 1]} : vector<96x1002xf32> to vector<96x19xf32>
    %cst_37 = arith.constant dense<0xFF800000> : vector<96xf32>
    %83 = vector.multi_reduction <maximumf>, %82, %cst_37 [1] : vector<96x19xf32> to vector<96xf32>
    %84 = vector.extract_strided_slice %77 {offsets = [0, 384], sizes = [96, 19], strides = [1, 1]} : vector<96x1002xf32> to vector<96x19xf32>
    %cst_38 = arith.constant dense<0xFF800000> : vector<96xf32>
    %85 = vector.multi_reduction <maximumf>, %84, %cst_38 [1] : vector<96x19xf32> to vector<96xf32>
    %86 = vector.extract_strided_slice %77 {offsets = [0, 512], sizes = [96, 19], strides = [1, 1]} : vector<96x1002xf32> to vector<96x19xf32>
    %cst_39 = arith.constant dense<0xFF800000> : vector<96xf32>
    %87 = vector.multi_reduction <maximumf>, %86, %cst_39 [1] : vector<96x19xf32> to vector<96xf32>
    %88 = vector.extract_strided_slice %77 {offsets = [0, 640], sizes = [96, 19], strides = [1, 1]} : vector<96x1002xf32> to vector<96x19xf32>
    %cst_40 = arith.constant dense<0xFF800000> : vector<96xf32>
    %89 = vector.multi_reduction <maximumf>, %88, %cst_40 [1] : vector<96x19xf32> to vector<96xf32>
    %90 = vector.extract_strided_slice %77 {offsets = [0, 768], sizes = [96, 19], strides = [1, 1]} : vector<96x1002xf32> to vector<96x19xf32>
    %cst_41 = arith.constant dense<0xFF800000> : vector<96xf32>
    %91 = vector.multi_reduction <maximumf>, %90, %cst_41 [1] : vector<96x19xf32> to vector<96xf32>
    %92 = vector.extract_strided_slice %77 {offsets = [0, 896], sizes = [96, 19], strides = [1, 1]} : vector<96x1002xf32> to vector<96x19xf32>
    %cst_42 = arith.constant dense<0xFF800000> : vector<96xf32>
    %93 = vector.multi_reduction <maximumf>, %92, %cst_42 [1] : vector<96x19xf32> to vector<96xf32>
    %94 = vector.shape_cast %79 : vector<96xf32> to vector<1x96xf32>
    %95 = vector.shape_cast %81 : vector<96xf32> to vector<1x96xf32>
    %96 = vector.shape_cast %83 : vector<96xf32> to vector<1x96xf32>
    %97 = vector.shape_cast %85 : vector<96xf32> to vector<1x96xf32>
    %98 = vector.shape_cast %87 : vector<96xf32> to vector<1x96xf32>
    %99 = vector.shape_cast %89 : vector<96xf32> to vector<1x96xf32>
    %100 = vector.shape_cast %91 : vector<96xf32> to vector<1x96xf32>
    %101 = vector.shape_cast %93 : vector<96xf32> to vector<1x96xf32>
    %102 = tpu.concatenate %94, %95, %96, %97, %98, %99, %100, %101 in 0 : vector<1x96xf32>, vector<1x96xf32>, vector<1x96xf32>, vector<1x96xf32>, vector<1x96xf32>, vector<1x96xf32>, vector<1x96xf32>, vector<1x96xf32> -> vector<8x96xf32>
    %c0_43 = arith.constant 0 : index
    %c0_44 = arith.constant 0 : index
    %103 = vector.load %arg8[%c0_43, %c0_44] : memref<8x96xf32, #tpu.memory_space<vmem>>, vector<8x96xf32>
    tpu.vector_store %arg8[%c0_43, %c0_44], %102 {strides = array<i32>} : memref<8x96xf32, #tpu.memory_space<vmem>>, vector<8x96xf32>,
    return
  }
  func.func @transform_0(%arg0: i32) -> (i32, i32) {
    %c0_i32 = arith.constant 0 : i32
    %c0_i32_0 = arith.constant 0 : i32
    return %c0_i32, %arg0 : i32, i32
  }
  func.func @transform_1(%arg0: i32) -> (i32, i32) {
    %c0_i32 = arith.constant 0 : i32
    %c0_i32_0 = arith.constant 0 : i32
    %c0_i32_1 = arith.constant 0 : i32
    return %c0_i32, %c0_i32_0 : i32, i32
  }
  func.func @transform_2(%arg0: i32) -> (i32, i32) {
    %c0_i32 = arith.constant 0 : i32
    %c0_i32_0 = arith.constant 0 : i32
    %c0_i32_1 = arith.constant 0 : i32
    return %c0_i32, %c0_i32_0 : i32, i32
  }
  func.func @transform_3(%arg0: i32) -> (i32, i32) {
    %c0_i32 = arith.constant 0 : i32
    %c0_i32_0 = arith.constant 0 : i32
    %c0_i32_1 = arith.constant 0 : i32
    return %c0_i32, %c0_i32_0 : i32, i32
  }
  func.func @transform_4(%arg0: i32) -> (i32, i32) {
    %c0_i32 = arith.constant 0 : i32
    %c0_i32_0 = arith.constant 0 : i32
    %c0_i32_1 = arith.constant 0 : i32
    return %c0_i32, %c0_i32_0 : i32, i32
  }
  func.func @transform_5(%arg0: i32) -> (i32, i32) {
    %c0_i32 = arith.constant 0 : i32
    %c0_i32_0 = arith.constant 0 : i32
    %c0_i32_1 = arith.constant 0 : i32
    return %c0_i32, %c0_i32_0 : i32, i32
  }
  func.func @transform_6(%arg0: i32) -> (i32, i32) {
    %c0_i32 = arith.constant 0 : i32
    %c0_i32_0 = arith.constant 0 : i32
    %c0_i32_1 = arith.constant 0 : i32
    return %c0_i32, %c0_i32_0 : i32, i32
  }
  func.func @transform_7(%arg0: i32) -> (i32, i32) {
    %c0_i32 = arith.constant 0 : i32
    %c0_i32_0 = arith.constant 0 : i32
    return %arg0, %c0_i32 : i32, i32
  }
}

</mosaic_0001>

<bundles_post_ra>
// kernel: tpu_custom_call.1
= control target key start
LH: loop header
LB: loop body
LE: loop exit
PB: predicated region body
PF: predicated region fallthrough
CT: control target
= control target key end

     0   :  { %12 = vsyncpa [#allocation3], 0  ;;  %s12483_s0 = inlined_call_operand.hbm [shape: bf16[96,1024], index: 0, kind: input, shape index: {}]   ;;  %s12484_s1 = inlined_call_operand.vmem [shape: bf16[32,96], index: 1, kind: input, shape index: {}]   ;;  %s12485_s2 = inlined_call_operand.vmem [shape: f32[32,1], index: 2, kind: input, shape index: {}]   ;;  %s12486_s3 = inlined_call_operand.vmem [shape: bf16[64,512], index: 3, kind: input, shape index: {}]   ;;  %s12487_s4 = inlined_call_operand.vmem [shape: f32[64,1], index: 4, kind: input, shape index: {}]   ;;  %s12488_s5 = inlined_call_operand.hbm [shape: bf16[96,512], index: 5, kind: input, shape index: {}]   ;;  %s12489_s6 = inlined_call_operand.vmem [shape: f32[96,1], index: 6, kind: input, shape index: {}]   ;;  %s12490_s7 = inlined_call_operand.hbm [shape: f32[8,96], index: 7, kind: output, shape index: {}]  }
   0x1   :  { %13 = vsyncpa [#allocation6], 0 }
   0x2   :  { %14 = vsyncpa [#allocation4], 0  ;;  %s19_s26 = sshll.u32 %s12483_s0, 4  ;;  %s7122_s27 = smov [#allocation2]   ;;  %s20_s26 = int_to_ptr.hbm [resolvable:$true] %s19_s26 }
   0x3   :  { %s21_s28 = sshll.u32 %s7122_s27, 4  ;;  %s40_s8 = sshll.u32 %s12488_s5, 4  ;;  %s22_s28 = int_to_ptr.vmem [resolvable:$true] %s21_s28  ;;  %s41_s8 = int_to_ptr.hbm [resolvable:$true] %s40_s8 }
   0x4   :  { %s7123_s9 = smov 512   ;;  %s7124_s10 = smov 32  }
   0x5   :  { %27 = dma.hbm_to_vmem [thread:$0]  %s20_s26, 6144, %s22_s28, [#allocation3], %s7123_s9, %s7123_s9, %s7124_s10  }
   0x6   :  { %s7125_s11 = smov [#allocation5]   ;;  %s7126_s13 = smov 256  }
   0x7   :  { %s42_s12 = sshll.u32 %s7125_s11, 4  ;;  %s7127_s14 = smov 16   ;;  %s43_s12 = int_to_ptr.vmem [resolvable:$true] %s42_s12 }
   0x8   :  { %48 = dma.hbm_to_vmem [thread:$0]  %s41_s8, 3072, %s43_s12, [#allocation6], %s7126_s13, %s7126_s13, %s7127_s14  }
   0x9   :  { %7116 = dma.done.wait [#allocation3], 6144  }
   0xa   :  { %7117 = vsyncadd [#allocation3], 4294961152 }
   0xb   :  { %7118 = dma.done.wait [#allocation6], 3072  }
   0xc   :  { %7119 = vsyncadd [#allocation6], 4294964224  ;;  %v7128_v0 = vmov 0   ;;  %v6730_v1 = vld [vmem:[#allocation2 + $0x140] sm:$0xf]  ;;  %vm386_vm0 = vcmask 785408  }
   0xd   :  { %7042 = vset.pattern.permute.xlu1 %v7128_v0  ;;  %7041 = vset.pattern.permute.xlu0 %v7128_v0  ;;  %v6982_v2 = vld [vmem:[#allocation2 + $0x15c] sm:$0xf0]  ;;  %v6978_v3 = vld [vmem:[#allocation2 + $0x144] sm:$0xf]  ;;  %v6738_v6 = vld [vmem:[#allocation2 + $0x148] sm:$0xf] }
   0xe   :  { %7043 = vset.pattern.permute.xlu2 %v7128_v0  ;;  %v6731_v4 = vor.u32 %v6982_v2, %v6730_v1  ;;  %v6732_v5 = vld [vmem:[#allocation2 + $0x160] sm:$0xf0]  ;;  %v6983_v7 = vld [vmem:[#allocation2 + $0x164] sm:$0xf0]  ;;  %v6979_v10 = vld [vmem:[#allocation2 + $0x14c] sm:$0xf] }
   0xf   :  { %v6735_v8 = vor.u32 %v6978_v3, %v6732_v5  ;;  %v6739_v9 = vor.u32 %v6983_v7, %v6738_v6  ;;  %v6740_v11 = vld [vmem:[#allocation2 + $0x168] sm:$0xf0]  ;;  %v6698_v12 = vld [vmem:[#allocation2 + $0x100] sm:$0xf]  ;;  %v6970_v15 = vld [vmem:[#allocation2 + $0x104] sm:$0xf] }
  0x10   :  { %395 = vmatpush.bf16.msra.mxu0 %v6731_v4  ;;  %v6743_v13 = vor.u32 %v6979_v10, %v6740_v11  ;;  %v6974_v14 = vld [vmem:[#allocation2 + $0x11c] sm:$0xf0]  ;;  %v6700_v16 = vld [vmem:[#allocation2 + $0x120] sm:$0xf0]  ;;  %v6706_v19 = vld [vmem:[#allocation2 + $0x108] sm:$0xf] }
  0x11   :  { %414 = vmatpush.bf16.msra.mxu1 %v6735_v8  ;;  %433 = vmatpush.bf16.msra.mxu2 %v6739_v9  ;;  %v6699_v17 = vor.u32 %v6974_v14, %v6698_v12  ;;  %v6703_v18 = vor.u32 %v6970_v15, %v6700_v16  ;;  %v6975_v20 = vld [vmem:[#allocation2 + $0x124] sm:$0xf0]  ;;  %v6971_v21 = vld [vmem:[#allocation2 + $0x10c] sm:$0xf]  ;;  %v6666_v24 = vld [vmem:[#allocation2 + $0xc0] sm:$0xf] }
  0x12   :  { %452 = vmatpush.bf16.msra.mxu3 %v6743_v13  ;;  %v6707_v22 = vor.u32 %v6975_v20, %v6706_v19  ;;  %v6708_v23 = vld [vmem:[#allocation2 + $0x128] sm:$0xf0]  ;;  %v6966_v25 = vld [vmem:[#allocation2 + $0xdc] sm:$0xf0]  ;;  %v6962_v27 = vld [vmem:[#allocation2 + $0xc4] sm:$0xf] }
  0x13   :  { %v6711_v26 = vor.u32 %v6971_v21, %v6708_v23  ;;  %v6668_v28 = vld [vmem:[#allocation2 + $0xe0] sm:$0xf0]  ;;  %v6674_v29 = vld [vmem:[#allocation2 + $0xc8] sm:$0xf]  ;;  %v6667_v30 = vor.u32 %v6966_v25, %v6666_v24  ;;  %v6963_v32 = vld [vmem:[#allocation2 + $0xcc] sm:$0xf] }
  0x14   :  { %396 = vmatpush.bf16.msra.mxu0 %v6699_v17  ;;  %v6967_v31 = vld [vmem:[#allocation2 + $0xe4] sm:$0xf0]  ;;  %v6676_v33 = vld [vmem:[#allocation2 + $0xe8] sm:$0xf0]  ;;  %v6671_v34 = vor.u32 %v6962_v27, %v6668_v28  ;;  %v6634_v36 = vld [vmem:[#allocation2 + $0x80] sm:$0xf] }
  0x15   :  { %415 = vmatpush.bf16.msra.mxu1 %v6703_v18  ;;  %434 = vmatpush.bf16.msra.mxu2 %v6707_v22  ;;  %v6675_v35 = vor.u32 %v6967_v31, %v6674_v29  ;;  %v6958_v37 = vld [vmem:[#allocation2 + $0x9c] sm:$0xf0]  ;;  %v6954_v38 = vld [vmem:[#allocation2 + $0x84] sm:$0xf]  ;;  %v6679_v39 = vor.u32 %v6963_v32, %v6676_v33  ;;  %v6642_v41 = vld [vmem:[#allocation2 + $0x88] sm:$0xf] }
  0x16   :  { %453 = vmatpush.bf16.msra.mxu3 %v6711_v26  ;;  %v6636_v40 = vld [vmem:[#allocation2 + $0xa0] sm:$0xf0]  ;;  %v6959_v42 = vld [vmem:[#allocation2 + $0xa4] sm:$0xf0]  ;;  %v6955_v43 = vld [vmem:[#allocation2 + $0x8c] sm:$0xf]  ;;  %v6635_v45 = vor.u32 %v6958_v37, %v6634_v36 }
  0x17   :  { %v6644_v44 = vld [vmem:[#allocation2 + $0xa8] sm:$0xf0]  ;;  %v6639_v46 = vor.u32 %v6954_v38, %v6636_v40  ;;  %v6643_v47 = vor.u32 %v6959_v42, %v6642_v41  ;;  %v6602_v48 = vld [vmem:[#allocation2 + $0x40] sm:$0xf]  ;;  %v6946_v50 = vld [vmem:[#allocation2 + $0x44] sm:$0xf] }
  0x18   :  { %397 = vmatpush.bf16.msra.mxu0 %v6667_v30  ;;  %v6950_v49 = vld [vmem:[#allocation2 + $0x5c] sm:$0xf0]  ;;  %v6647_v51 = vor.u32 %v6955_v43, %v6644_v44  ;;  %v6604_v52 = vld [vmem:[#allocation2 + $0x60] sm:$0xf0]  ;;  %v6610_v53 = vld [vmem:[#allocation2 + $0x48] sm:$0xf] }
  0x19   :  { %416 = vmatpush.bf16.msra.mxu1 %v6671_v34  ;;  %435 = vmatpush.bf16.msra.mxu2 %v6675_v35  ;;  %v6951_v54 = vld [vmem:[#allocation2 + $0x64] sm:$0xf0]  ;;  %v6947_v55 = vld [vmem:[#allocation2 + $0x4c] sm:$0xf]  ;;  %v6603_v57 = vor.u32 %v6950_v49, %v6602_v48  ;;  %v6570_v58 = vld [vmem:[#allocation2] sm:$0xf]  ;;  %v6607_v60 = vor.u32 %v6946_v50, %v6604_v52 }
  0x1a   :  { %454 = vmatpush.bf16.msra.mxu3 %v6679_v39  ;;  %v6612_v56 = vld [vmem:[#allocation2 + $0x68] sm:$0xf0]  ;;  %v6942_v59 = vld [vmem:[#allocation2 + $0x1c] sm:$0xf0]  ;;  %v6611_v61 = vor.u32 %v6951_v54, %v6610_v53  ;;  %v6938_v62 = vld [vmem:[#allocation2 + $0x4] sm:$0xf] }
  0x1b   :  { %v6572_v63 = vld [vmem:[#allocation2 + $0x20] sm:$0xf0]  ;;  %v6615_v1 = vor.u32 %v6947_v55, %v6612_v56  ;;  %v6578_v2 = vld [vmem:[#allocation2 + $0x8] sm:$0xf]  ;;  %v6939_v4 = vld [vmem:[#allocation2 + $0xc] sm:$0xf]  ;;  %v6571_v8 = vor.u32 %v6942_v59, %v6570_v58 }
  0x1c   :  { %398 = vmatpush.bf16.msra.mxu0 %v6635_v45  ;;  %v112_v0 = vld [vmem:[%s12485_s2] sm:$0xff]  ;;  %v6943_v3 = vld [vmem:[#allocation2 + $0x24] sm:$0xf0]  ;;  %v6580_v5 = vld [vmem:[#allocation2 + $0x28] sm:$0xf0]  ;;  %v6575_v11 = vor.u32 %v6938_v62, %v6572_v63  ;;  %s7130_s24 = smov 127  }
  0x1d   :  { %417 = vmatpush.bf16.msra.mxu1 %v6639_v46  ;;  %436 = vmatpush.bf16.msra.mxu2 %v6643_v47  ;;  %v6746_v6 = vld [vmem:[#allocation2 + $0x150] sm:$0xf]  ;;  %v6980_v9 = vld [vmem:[#allocation2 + $0x154] sm:$0xf]  ;;  %v6579_v12 = vor.u32 %v6943_v3, %v6578_v2  ;;  %v6583_v13 = vor.u32 %v6939_v4, %v6580_v5  ;;  %v7189_v14 = vld [vmem:[%s12484_s1] sm:$0xff]  ;;  %s7131_s25 = smov 126  }
  0x1e   :  { %455 = vmatpush.bf16.msra.mxu3 %v6647_v51  ;;  %118 = vperm.xlu1 %7042, %v112_v0   ;;  %v6984_v7 = vld [vmem:[#allocation2 + $0x16c] sm:$0xf0]  ;;  %v6748_v10 = vld [vmem:[#allocation2 + $0x170] sm:$0xf0]  ;;  %v6754_v16 = vld [vmem:[#allocation2 + $0x158] sm:$0xf] }
  0x1f   :  { %v6747_v15 = vor.u32 %v6984_v7, %v6746_v6  ;;  %v6985_v17 = vld [vmem:[#allocation2 + $0x174] sm:$0xf0]  ;;  %v6751_v18 = vor.u32 %v6980_v9, %v6748_v10  ;;  %v6981_v19 = vld [vmem:[#allocation2 + $0x15c] sm:$0xf]  ;;  %v6714_v21 = vld [vmem:[#allocation2 + $0x110] sm:$0xf] }
  0x20   :  { %399 = vmatpush.bf16.msra.mxu0 %v6603_v57  ;;  %v6756_v20 = vld [vmem:[#allocation2 + $0x178] sm:$0xf0]  ;;  %v6976_v22 = vld [vmem:[#allocation2 + $0x12c] sm:$0xf0]  ;;  %v6972_v23 = vld [vmem:[#allocation2 + $0x114] sm:$0xf]  ;;  %v6755_v25 = vor.u32 %v6985_v17, %v6754_v16 }
  0x21   :  { %418 = vmatpush.bf16.msra.mxu1 %v6607_v60  ;;  %437 = vmatpush.bf16.msra.mxu2 %v6611_v61  ;;  %v6716_v24 = vld [vmem:[#allocation2 + $0x130] sm:$0xf0]  ;;  %v6759_v26 = vor.u32 %v6981_v19, %v6756_v20  ;;  %v113_v27 = vld [vmem:[%s12485_s2 + $0x8] sm:$0xff]  ;;  %v6722_v28 = vld [vmem:[#allocation2 + $0x118] sm:$0xf]  ;;  %v6715_v30 = vor.u32 %v6976_v22, %v6714_v21  ;;  %s7132_s26 = smov 124  }
  0x22   :  { %456 = vmatpush.bf16.msra.mxu3 %v6615_v1  ;;  %v6977_v29 = vld [vmem:[#allocation2 + $0x134] sm:$0xf0]  ;;  %v6719_v31 = vor.u32 %v6972_v23, %v6716_v24  ;;  %v6973_v32 = vld [vmem:[#allocation2 + $0x11c] sm:$0xf]  ;;  %v6682_v34 = vld [vmem:[#allocation2 + $0xd0] sm:$0xf] }
  0x23   :  { %v6724_v33 = vld [vmem:[#allocation2 + $0x138] sm:$0xf0]  ;;  %v6968_v35 = vld [vmem:[#allocation2 + $0xec] sm:$0xf0]  ;;  %v6964_v36 = vld [vmem:[#allocation2 + $0xd4] sm:$0xf]  ;;  %v6723_v38 = vor.u32 %v6977_v29, %v6722_v28 }
  0x24   :  { %400 = vmatpush.bf16.msra.mxu0 %v6571_v8  ;;  %v6684_v37 = vld [vmem:[#allocation2 + $0xf0] sm:$0xf0]  ;;  %v6727_v39 = vor.u32 %v6973_v32, %v6724_v33  ;;  %v6690_v40 = vld [vmem:[#allocation2 + $0xd8] sm:$0xf]  ;;  %v6683_v42 = vor.u32 %v6968_v35, %v6682_v34  ;;  %v6965_v44 = vld [vmem:[#allocation2 + $0xdc] sm:$0xf] }
  0x25   :  { %419 = vmatpush.bf16.msra.mxu1 %v6575_v11  ;;  %438 = vmatpush.bf16.msra.mxu2 %v6579_v12  ;;  %v6969_v41 = vld [vmem:[#allocation2 + $0xf4] sm:$0xf0]  ;;  %v6687_v43 = vor.u32 %v6964_v36, %v6684_v37  ;;  %v6692_v45 = vld [vmem:[#allocation2 + $0xf8] sm:$0xf0]  ;;  %v6650_v46 = vld [vmem:[#allocation2 + $0x90] sm:$0xf] }
  0x26   :  { %457 = vmatpush.bf16.msra.mxu3 %v6583_v13  ;;  %123 = vperm.xlu1 %7042, %v113_v27   ;;  %v6960_v47 = vld [vmem:[#allocation2 + $0xac] sm:$0xf0]  ;;  %v6956_v48 = vld [vmem:[#allocation2 + $0x94] sm:$0xf]  ;;  %v6691_v50 = vor.u32 %v6969_v41, %v6690_v40  ;;  %v6695_v51 = vor.u32 %v6965_v44, %v6692_v45  ;;  %v6658_v52 = vld [vmem:[#allocation2 + $0x98] sm:$0xf] }
  0x27   :  { %6760 = vmatmul.msk.bf16.vlgmr.msra.gmra.mxu0 %vm386_vm0, %v7189_v14  ;;  %v6652_v49 = vld [vmem:[#allocation2 + $0xb0] sm:$0xf0]  ;;  %v6961_v53 = vld [vmem:[#allocation2 + $0xb4] sm:$0xf0]  ;;  %v6651_v55 = vor.u32 %v6960_v47, %v6650_v46  ;;  %v6957_v57 = vld [vmem:[#allocation2 + $0x9c] sm:$0xf] }
  0x28   :  { %471 = vmatpush.bf16.msrb.mxu0 %v6747_v15  ;;  %6762 = vmatmul.msk.bf16.vlgmr.msra.gmra.mxu1 %vm386_vm0, %v7189_v14  ;;  %v114_v54 = vld [vmem:[%s12485_s2 + $0x10] sm:$0xff]  ;;  %v6655_v56 = vor.u32 %v6956_v48, %v6652_v49  ;;  %v6660_v58 = vld [vmem:[#allocation2 + $0xb8] sm:$0xf0]  ;;  %v6937_v61 = vld [vmem:[%s12484_s1 + $0x8] sm:$0xff]  ;;  %v6659_v62 = vor.u32 %v6961_v53, %v6658_v52  ;;  %vm831_vm1 = vcmask 1022976   ;;  %vm768_vm2 = vcmask 1031168  }
  0x29   :  { %490 = vmatpush.bf16.msrb.mxu1 %v6751_v18  ;;  %6764 = vmatmul.msk.bf16.vlgmr.msra.gmra.mxu2 %vm386_vm0, %v7189_v14  ;;  %v6948_v59 = vld [vmem:[#allocation2 + $0x54] sm:$0xf]  ;;  %v6663_v63 = vor.u32 %v6957_v57, %v6660_v58  ;;  %v6618_v0 = vld [vmem:[#allocation2 + $0x50] sm:$0xf]  ;;  %v6626_v2 = vld [vmem:[#allocation2 + $0x58] sm:$0xf] }
  0x2a   :  { %6766 = vmatmul.msk.bf16.vlgmr.msra.gmra.mxu3 %vm386_vm0, %v7189_v14  ;;  %509 = vmatpush.bf16.msrb.mxu2 %v6755_v25  ;;  %v6620_v60 = vld [vmem:[#allocation2 + $0x70] sm:$0xf0]  ;;  %v6952_v1 = vld [vmem:[#allocation2 + $0x6c] sm:$0xf0]  ;;  %v6953_v4 = vld [vmem:[#allocation2 + $0x74] sm:$0xf0] }
  0x2b   :  { %528 = vmatpush.bf16.msrb.mxu3 %v6759_v26  ;;  %128 = vperm.xlu0 %7041, %v114_v54   ;;  %v6623_v3 = vor.u32 %v6948_v59, %v6620_v60  ;;  %v6949_v5 = vld [vmem:[#allocation2 + $0x5c] sm:$0xf]  ;;  %v6940_v7 = vld [vmem:[#allocation2 + $0x14] sm:$0xf]  ;;  %v6619_v9 = vor.u32 %v6952_v1, %v6618_v0  ;;  %v6627_v10 = vor.u32 %v6953_v4, %v6626_v2  ;;  %v6586_v12 = vld [vmem:[#allocation2 + $0x10] sm:$0xf] }
  0x2c   :  { %472 = vmatpush.bf16.msrb.mxu0 %v6715_v30  ;;  %v6628_v6 = vld [vmem:[#allocation2 + $0x78] sm:$0xf0]  ;;  %v6588_v8 = vld [vmem:[#allocation2 + $0x30] sm:$0xf0]  ;;  %v6944_v13 = vld [vmem:[#allocation2 + $0x2c] sm:$0xf0] }
  0x2d   :  { %491 = vmatpush.bf16.msrb.mxu1 %v6719_v31  ;;  %v6631_v11 = vor.u32 %v6949_v5, %v6628_v6  ;;  %v6594_v15 = vld [vmem:[#allocation2 + $0x18] sm:$0xf]  ;;  %v6591_v16 = vor.u32 %v6940_v7, %v6588_v8  ;;  %v6941_v18 = vld [vmem:[#allocation2 + $0x1c] sm:$0xf]  ;;  %v6587_v20 = vor.u32 %v6944_v13, %v6586_v12  ;;  %vm705_vm3 = vcmask 1039360   ;;  %s7133_s8 = smov 120  }
  0x2e   :  { %510 = vmatpush.bf16.msrb.mxu2 %v6723_v38  ;;  %v6945_v17 = vld [vmem:[#allocation2 + $0x34] sm:$0xf0]  ;;  %v6596_v19 = vld [vmem:[#allocation2 + $0x38] sm:$0xf0]  ;;  %vm1030_vm4 = vcmask 1014784   ;;  %s7134_s1 = smov 116  }
  0x2f   :  { %529 = vmatpush.bf16.msrb.mxu3 %v6727_v39  ;;  %v115_v21 = vld [vmem:[%s12485_s2 + $0x18] sm:$0xff]  ;;  %v6595_v22 = vor.u32 %v6945_v17, %v6594_v15  ;;  %v6599_v23 = vor.u32 %v6941_v18, %v6596_v19  ;;  %s7129_s2 = smov 125   ;;  %vm1799_vm5 = vcmask 982016   ;;  %vm2376_vm6 = vcmask 949248   ;;  %s6549_s13 = sshll.u32 %s12490_s7, 4  ;;  %s6550_s13 = int_to_ptr.hbm [resolvable:$true] %s6549_s13 }
  0x30   :  { %473 = vmatpush.bf16.msrb.mxu0 %v6683_v42  ;;  %vm5133_vm7 = vcmask 998400   ;;  %vm5926_vm8 = vcmask 154624   ;;  %vm6232_vm9 = vcmask 130112   ;;  %vm6236_vm10 = vcmask 195712  }
  0x31   :  { %492 = vmatpush.bf16.msrb.mxu1 %v6687_v43  ;;  %vm6240_vm11 = vcmask 261312   ;;  %vm6244_vm12 = vcmask 326912   ;;  %vm6248_vm13 = vcmask 392512   ;;  %vm6252_vm14 = vcmask 458112  }
  0x32   :  { %511 = vmatpush.bf16.msrb.mxu2 %v6691_v50  ;;  %vm6256_vm15 = vcmask 523712  }
  0x33   :  { %530 = vmatpush.bf16.msrb.mxu3 %v6695_v51  ;;  %133 = vperm.xlu0 %7041, %v115_v21  }
  0x34   :  { %474 = vmatpush.bf16.msrb.mxu0 %v6651_v55 }
  0x35   :  { %493 = vmatpush.bf16.msrb.mxu1 %v6655_v56 }
  0x36   :  { %512 = vmatpush.bf16.msrb.mxu2 %v6659_v62 }
  0x37   :  { %531 = vmatpush.bf16.msrb.mxu3 %v6663_v63  ;;  %6761 = vmatmul.msk.bf16.gmra.mxu0 %vm386_vm0, %v6937_v61 }
  0x38   :  { %6763 = vmatmul.msk.bf16.gmra.mxu1 %vm386_vm0, %v6937_v61  ;;  %475 = vmatpush.bf16.msrb.mxu0 %v6619_v9 }
  0x39   :  { %494 = vmatpush.bf16.msrb.mxu1 %v6623_v3  ;;  %6765 = vmatmul.msk.bf16.gmra.mxu2 %vm386_vm0, %v6937_v61 }
  0x3a   :  { %6767 = vmatmul.msk.bf16.gmra.mxu3 %vm386_vm0, %v6937_v61  ;;  %513 = vmatpush.bf16.msrb.mxu2 %v6627_v10 }
  0x3b   :  { %532 = vmatpush.bf16.msrb.mxu3 %v6631_v11 }
  0x3c   :  { %476 = vmatpush.bf16.msrb.mxu0 %v6587_v20 }
  0x3d   :  { %495 = vmatpush.bf16.msrb.mxu1 %v6591_v16 }
  0x3e   :  { %514 = vmatpush.bf16.msrb.mxu2 %v6595_v22 }
  0x3f   :  { %533 = vmatpush.bf16.msrb.mxu3 %v6599_v23 }
  0x47   :  { %6768 = vmatmul.msk.bf16.vlgmr.msrb.gmra.mxu0 %vm386_vm0, %v7189_v14 }
  0x48   :  { %6770 = vmatmul.msk.bf16.vlgmr.msrb.gmra.mxu1 %vm386_vm0, %v7189_v14 }
  0x49   :  { %6772 = vmatmul.msk.bf16.vlgmr.msrb.gmra.mxu2 %vm386_vm0, %v7189_v14 }
  0x4a   :  { %6774 = vmatmul.msk.bf16.vlgmr.msrb.gmra.mxu3 %vm386_vm0, %v7189_v14 }
  0x57   :  { %6769 = vmatmul.msk.bf16.gmra.mxu0 %vm386_vm0, %v6937_v61 }
  0x58   :  { %6771 = vmatmul.msk.bf16.gmra.mxu1 %vm386_vm0, %v6937_v61 }
  0x59   :  { %6773 = vmatmul.msk.bf16.gmra.mxu2 %vm386_vm0, %v6937_v61 }
  0x5a   :  { %6775 = vmatmul.msk.bf16.gmra.mxu3 %vm386_vm0, %v6937_v61 }
  0x90   :  { %v7227_v24 = vpop.permute.xlu1 %118 }
  0x98   :  { %v7231_v29 = vpop.permute.xlu1 %123 }
  0x9d   :  { %v7243_v53 = vpop.permute.xlu0 %128 }
  0xa4   :  { %v402_v25 = vpop.f32.mrf.mxu0 }
  0xa5   :  { %v421_v26 = vpop.f32.mrf.mxu1  ;;  %v403_v27 = vadd.f32 %v402_v25, %v7227_v24  ;;  %v7257_v62 = vpop.permute.xlu0 %133 }
  0xa6   :  { %v422_v28 = vadd.f32 %v421_v26, %v7227_v24 }
  0xa7   :  { %v545_v14 = vmax.f32 %v403_v27, 0.0 }
  0xa8   :  { %v546_v31 = vmax.f32 %v422_v28, 0.0 }
  0xaa   :  { %v577_v38 = vpack.c.bf16 %v546_v31, %v545_v14 }
  0xac   :  { %v440_v30 = vpop.f32.mrf.mxu2  ;;  %v404_v33 = vpop.f32.mrf.mxu0  ;;  %v609_v42 = vunpack.c.l.b16 %v577_v38  ;;  %v610_v43 = vunpack.c.h.b16 %v577_v38 }
  0xad   :  { %v459_v32 = vpop.f32.mrf.mxu3  ;;  %v405_v34 = vadd.f32 %v404_v33, %v7231_v29  ;;  %v423_v35 = vpop.f32.mrf.mxu1  ;;  %v441_v51 = vadd.f32 %v440_v30, %v7227_v24 }
  0xae   :  { %v424_v36 = vadd.f32 %v423_v35, %v7231_v29  ;;  %v460_v52 = vadd.f32 %v459_v32, %v7227_v24 }
  0xaf   :  { %v553_v37 = vmax.f32 %v405_v34, 0.0  ;;  %v547_v58 = vmax.f32 %v441_v51, 0.0 }
  0xb0   :  { %v554_v39 = vmax.f32 %v424_v36, 0.0  ;;  %v548_v59 = vmax.f32 %v460_v52, 0.0 }
  0xb2   :  { %v581_v40 = vpack.c.bf16 %v554_v39, %v553_v37  ;;  %v578_v61 = vpack.c.bf16 %v548_v59, %v547_v58 }
  0xb4   :  { %v442_v41 = vpop.f32.mrf.mxu2  ;;  %v617_v44 = vunpack.c.l.b16 %v581_v40  ;;  %v618_v45 = vunpack.c.h.b16 %v581_v40  ;;  %v407_v54 = vpop.f32.mrf.mxu0  ;;  %v611_v0 = vunpack.c.l.b16 %v578_v61  ;;  %v612_v13 = vunpack.c.h.b16 %v578_v61 }
  0xb5   :  { %v461_v46 = vpop.f32.mrf.mxu3  ;;  %v443_v49 = vadd.f32 %v442_v41, %v7231_v29  ;;  %v426_v55 = vpop.f32.mrf.mxu1  ;;  %v408_v3 = vadd.f32 %v407_v54, %v7243_v53 }
  0xb6   :  { %v7235_v47 = vpack.c.b16 %v617_v44, %v609_v42  ;;  %v7237_v48 = vpack.c.b16 %v618_v45, %v610_v43  ;;  %v462_v50 = vadd.f32 %v461_v46, %v7231_v29  ;;  %v427_v4 = vadd.f32 %v426_v55, %v7243_v53 }
  0xb7   :  { %v555_v56 = vmax.f32 %v443_v49, 0.0  ;;  %v561_v8 = vmax.f32 %v408_v3, 0.0 }
  0xb8   :  { %801 = vrot.lane.b32.xlu1 %v7237_v48, %s7129_s2  ;;  %799 = vrot.lane.b32.xlu0 %v7235_v47, %s7129_s2  ;;  %v556_v57 = vmax.f32 %v462_v50, 0.0  ;;  %v562_v9 = vmax.f32 %v427_v4, 0.0 }
  0xb9   :  { %673 = vrot.lane.b32.xlu2 %v7235_v47, %s7130_s24 }
  0xba   :  { %v582_v60 = vpack.c.bf16 %v556_v57, %v555_v56  ;;  %v585_v15 = vpack.c.bf16 %v562_v9, %v561_v8 }
  0xbc   :  { %v619_v63 = vunpack.c.l.b16 %v582_v60  ;;  %v409_v1 = vpop.f32.mrf.mxu0  ;;  %v620_v12 = vunpack.c.h.b16 %v582_v60  ;;  %v625_v18 = vunpack.c.l.b16 %v585_v15  ;;  %v445_v20 = vpop.f32.mrf.mxu2  ;;  %v626_v23 = vunpack.c.h.b16 %v585_v15 }
  0xbd   :  { %v428_v2 = vpop.f32.mrf.mxu1  ;;  %v410_v5 = vadd.f32 %v409_v1, %v7257_v62  ;;  %v464_v21 = vpop.f32.mrf.mxu3  ;;  %v446_v28 = vadd.f32 %v445_v20, %v7243_v53 }
  0xbe   :  { %v429_v6 = vadd.f32 %v428_v2, %v7257_v62  ;;  %v7263_v7 = vpack.c.b16 %v619_v63, %v611_v0  ;;  %v7271_v17 = vpack.c.b16 %v620_v12, %v612_v13  ;;  %v465_v30 = vadd.f32 %v464_v21, %v7243_v53 }
  0xbf   :  { %v569_v10 = vmax.f32 %v410_v5, 0.0  ;;  %v563_v35 = vmax.f32 %v446_v28, 0.0 }
  0xc0   :  { %675 = vrot.lane.b32.xlu1 %v7237_v48, %s7130_s24  ;;  %738 = vrot.lane.b32.xlu0 %v7237_v48, %s7131_s25  ;;  %v570_v11 = vmax.f32 %v429_v6, 0.0  ;;  %12686 = vst [vmem:[#allocation11_spill] sm:$0xff] %v7271_v17  ;;  %v564_v36 = vmax.f32 %v465_v30, 0.0 }
  0xc1   :  { %736 = vrot.lane.b32.xlu2 %v7235_v47, %s7131_s25 }
  0xc2   :  { %v589_v16 = vpack.c.bf16 %v570_v11, %v569_v10  ;;  %v586_v39 = vpack.c.bf16 %v564_v36, %v563_v35 }
  0xc4   :  { %v633_v19 = vunpack.c.l.b16 %v589_v16  ;;  %v634_v25 = vunpack.c.h.b16 %v589_v16  ;;  %v447_v26 = vpop.f32.mrf.mxu2  ;;  %v478_v33 = vpop.f32.mrf.mxu0  ;;  %v627_v41 = vunpack.c.l.b16 %v586_v39  ;;  %v628_v57 = vunpack.c.h.b16 %v586_v39 }
  0xc5   :  { %v466_v27 = vpop.f32.mrf.mxu3  ;;  %v448_v14 = vadd.f32 %v447_v26, %v7257_v62  ;;  %v497_v34 = vpop.f32.mrf.mxu1  ;;  %v479_v50 = vadd.f32 %v478_v33, %v7227_v24 }
  0xc6   :  { %v7279_v22 = vpack.c.b16 %v633_v19, %v625_v18  ;;  %v467_v31 = vadd.f32 %v466_v27, %v7257_v62  ;;  %v7291_v32 = vpack.c.b16 %v634_v25, %v626_v23  ;;  %v498_v51 = vadd.f32 %v497_v34, %v7227_v24 }
  0xc7   :  { %v571_v37 = vmax.f32 %v448_v14, 0.0  ;;  %v549_v59 = vmax.f32 %v479_v50, 0.0 }
  0xc8   :  { %740 = vrot.lane.b32.xlu1 %v7263_v7, %s7131_s25  ;;  %904 = vrot.lane.b32.xlu0 %v7237_v48, %s7132_s26  ;;  %v572_v38 = vmax.f32 %v467_v31, 0.0  ;;  %v550_v60 = vmax.f32 %v498_v51, 0.0 }
  0xc9   :  { %902 = vrot.lane.b32.xlu2 %v7235_v47, %s7132_s26 }
  0xca   :  { %v590_v40 = vpack.c.bf16 %v572_v38, %v571_v37  ;;  %v579_v0 = vpack.c.bf16 %v550_v60, %v549_v59 }
  0xcc   :  { %v635_v42 = vunpack.c.l.b16 %v590_v40  ;;  %v480_v43 = vpop.f32.mrf.mxu0  ;;  %v516_v52 = vpop.f32.mrf.mxu2  ;;  %v636_v58 = vunpack.c.h.b16 %v590_v40  ;;  %v614_v6 = vunpack.c.h.b16 %v579_v0  ;;  %v613_v20 = vunpack.c.l.b16 %v579_v0 }
  0xcd   :  { %v499_v44 = vpop.f32.mrf.mxu1  ;;  %v481_v45 = vadd.f32 %v480_v43, %v7231_v29  ;;  %v535_v54 = vpop.f32.mrf.mxu3  ;;  %v517_v11 = vadd.f32 %v516_v52, %v7227_v24 }
  0xce   :  { %v500_v46 = vadd.f32 %v499_v44, %v7231_v29  ;;  %v7307_v49 = vpack.c.b16 %v635_v42, %v627_v41  ;;  %v7317_v63 = vpack.c.b16 %v636_v58, %v628_v57  ;;  %v536_v12 = vadd.f32 %v535_v54, %v7227_v24 }
  0xcf   :  { %v557_v55 = vmax.f32 %v481_v45, 0.0 }
  0xd0   :  { %906 = vrot.lane.b32.xlu1 %v7263_v7, %s7132_s26  ;;  %805 = vrot.lane.b32.xlu0 %v7271_v17, %s7129_s2  ;;  %v558_v56 = vmax.f32 %v500_v46, 0.0  ;;  %12687 = vst [vmem:[#allocation12_spill] sm:$0xff] %v7317_v63  ;;  %v552_v21 = vmax.f32 %v536_v12, 0.0 }
  0xd1   :  { %803 = vrot.lane.b32.xlu2 %v7263_v7, %s7129_s2 }
  0xd2   :  { %v583_v61 = vpack.c.bf16 %v558_v56, %v557_v55 }
  0xd4   :  { %v483_v1 = vpop.f32.mrf.mxu0  ;;  %v622_v3 = vunpack.c.h.b16 %v583_v61  ;;  %v518_v4 = vpop.f32.mrf.mxu2  ;;  %v621_v13 = vunpack.c.l.b16 %v583_v61 }
  0xd5   :  { %v502_v2 = vpop.f32.mrf.mxu1  ;;  %v537_v5 = vpop.f32.mrf.mxu3  ;;  %v519_v9 = vadd.f32 %v518_v4, %v7231_v29  ;;  %v484_v28 = vadd.f32 %v483_v1, %v7243_v53 }
  0xd6   :  { %v7325_v8 = vpack.c.b16 %v622_v3, %v614_v6  ;;  %v538_v10 = vadd.f32 %v537_v5, %v7231_v29  ;;  %v551_v29 = vmax.f32 %v517_v11, 0.0  ;;  %v7337_v23 = vpack.c.b16 %v621_v13, %v613_v20 }
  0xd7   :  { %v559_v15 = vmax.f32 %v519_v9, 0.0  ;;  %v503_v30 = vadd.f32 %v502_v2, %v7243_v53  ;;  %v565_v35 = vmax.f32 %v484_v28, 0.0 }
  0xd8   :  { %752 = vrot.lane.b32.xlu1 %v7279_v22, %s7131_s25  ;;  %679 = vrot.lane.b32.xlu0 %v7271_v17, %s7130_s24  ;;  %12688 = vst [vmem:[#allocation13_spill] sm:$0xff] %v7325_v8  ;;  %v560_v16 = vmax.f32 %v538_v10, 0.0  ;;  %v580_v27 = vpack.c.bf16 %v552_v21, %v551_v29 }
  0xd9   :  { %742 = vrot.lane.b32.xlu2 %v7271_v17, %s7131_s25  ;;  %12689 = vst [vmem:[#allocation14_spill] sm:$0xff] %v7337_v23  ;;  %v566_v36 = vmax.f32 %v503_v30, 0.0 }
  0xda   :  { %v584_v24 = vpack.c.bf16 %v560_v16, %v559_v15  ;;  %v616_v34 = vunpack.c.h.b16 %v580_v27  ;;  %v615_v45 = vunpack.c.l.b16 %v580_v27 }
  0xdb   :  { %v587_v39 = vpack.c.bf16 %v566_v36, %v565_v35 }
  0xdc   :  { %v485_v18 = vpop.f32.mrf.mxu0  ;;  %v624_v14 = vunpack.c.h.b16 %v584_v24  ;;  %v521_v40 = vpop.f32.mrf.mxu2  ;;  %v623_v42 = vunpack.c.l.b16 %v584_v24 }
  0xdd   :  { %v504_v19 = vpop.f32.mrf.mxu1  ;;  %v486_v25 = vadd.f32 %v485_v18, %v7257_v62  ;;  %v540_v41 = vpop.f32.mrf.mxu3  ;;  %v629_v46 = vunpack.c.l.b16 %v587_v39  ;;  %v522_v58 = vadd.f32 %v521_v40, %v7243_v53  ;;  %v630_v2 = vunpack.c.h.b16 %v587_v39 }
  0xde   :  { %v505_v26 = vadd.f32 %v504_v19, %v7257_v62  ;;  %v7349_v37 = vpack.c.b16 %v624_v14, %v616_v34  ;;  %v7359_v50 = vpack.c.b16 %v623_v42, %v615_v45  ;;  %v541_v59 = vadd.f32 %v540_v41, %v7243_v53 }
  0xdf   :  { %v573_v31 = vmax.f32 %v486_v25, 0.0 }
  0xe0   :  { %691 = vrot.lane.b32.xlu1 %v7291_v32, %s7130_s24  ;;  %817 = vrot.lane.b32.xlu0 %v7291_v32, %s7129_s2  ;;  %v574_v33 = vmax.f32 %v505_v26, 0.0  ;;  %12690 = vst [vmem:[#allocation15_spill] sm:$0xff] %v7349_v37  ;;  %v568_v3 = vmax.f32 %v541_v59, 0.0 }
  0xe1   :  { %677 = vrot.lane.b32.xlu2 %v7263_v7, %s7130_s24  ;;  %12691 = vst [vmem:[#allocation16_spill] sm:$0xff] %v7359_v50 }
  0xe2   :  { %v591_v38 = vpack.c.bf16 %v574_v33, %v573_v31 }
  0xe4   :  { %v637_v43 = vunpack.c.l.b16 %v591_v38  ;;  %v523_v52 = vpop.f32.mrf.mxu2  ;;  %v638_v60 = vunpack.c.h.b16 %v591_v38 }
  0xe5   :  { %v542_v54 = vpop.f32.mrf.mxu3  ;;  %v524_v56 = vadd.f32 %v523_v52, %v7257_v62 }
  0xe6   :  { %v7361_v51 = vpack.c.b16 %v637_v43, %v629_v46  ;;  %v543_v57 = vadd.f32 %v542_v54, %v7257_v62  ;;  %v567_v62 = vmax.f32 %v522_v58, 0.0  ;;  %v7381_v4 = vpack.c.b16 %v638_v60, %v630_v2 }
  0xe7   :  { %v575_v61 = vmax.f32 %v524_v56, 0.0 }
  0xe8   :  { %918 = vrot.lane.b32.xlu1 %v7279_v22, %s7132_s26  ;;  %689 = vrot.lane.b32.xlu0 %v7279_v22, %s7130_s24  ;;  %12692 = vst [vmem:[#allocation17_spill] sm:$0xff] %v7361_v51  ;;  %v576_v0 = vmax.f32 %v543_v57, 0.0  ;;  %v588_v5 = vpack.c.bf16 %v568_v3, %v567_v62 }
  0xe9   :  { %815 = vrot.lane.b32.xlu2 %v7279_v22, %s7129_s2  ;;  %12693 = vst [vmem:[#allocation18_spill] sm:$0xff] %v7381_v4 }
  0xea   :  { %v592_v53 = vpack.c.bf16 %v576_v0, %v575_v61  ;;  %v631_v12 = vunpack.c.l.b16 %v588_v5  ;;  %v632_v20 = vunpack.c.h.b16 %v588_v5 }
  0xec   :  { %v639_v6 = vunpack.c.l.b16 %v592_v53  ;;  %v640_v15 = vunpack.c.h.b16 %v592_v53 }
  0xee   :  { %v7389_v13 = vpack.c.b16 %v639_v6, %v631_v12  ;;  %v7399_v29 = vpack.c.b16 %v640_v15, %v632_v20 }
  0xf0   :  { %819 = vrot.lane.b32.xlu1 %v7307_v49, %s7129_s2  ;;  %756 = vrot.lane.b32.xlu0 %v7307_v49, %s7131_s25  ;;  %12694 = vst [vmem:[#allocation19_spill] sm:$0xff] %v7399_v29 }
  0xf1   :  { %754 = vrot.lane.b32.xlu2 %v7291_v32, %s7131_s25 }
  0xf8   :  { %758 = vrot.lane.b32.xlu1 %v7317_v63, %s7131_s25  ;;  %695 = vrot.lane.b32.xlu0 %v7317_v63, %s7130_s24 }
  0xf9   :  { %920 = vrot.lane.b32.xlu2 %v7291_v32, %s7132_s26 }
 0x100   :  { %809 = vrot.lane.b32.xlu1 %v7325_v8, %s7129_s2  ;;  %922 = vrot.lane.b32.xlu0 %v7307_v49, %s7132_s26 }
 0x101   :  { %821 = vrot.lane.b32.xlu2 %v7317_v63, %s7129_s2 }
 0x108   :  { %681 = vrot.lane.b32.xlu1 %v7337_v23, %s7130_s24  ;;  %807 = vrot.lane.b32.xlu0 %v7337_v23, %s7129_s2 }
 0x109   :  { %693 = vrot.lane.b32.xlu2 %v7307_v49, %s7130_s24 }
 0x110   :  { %813 = vrot.lane.b32.xlu1 %v7349_v37, %s7129_s2  ;;  %746 = vrot.lane.b32.xlu0 %v7325_v8, %s7131_s25 }
 0x111   :  { %924 = vrot.lane.b32.xlu2 %v7317_v63, %s7132_s26 }
 0x113   :  { %v7357_v44 = vpop.permute.xlu2 %673 }
 0x118   :  { %823 = vrot.lane.b32.xlu1 %v7361_v51, %s7129_s2  ;;  %811 = vrot.lane.b32.xlu0 %v7359_v50, %s7129_s2 }
 0x119   :  { %744 = vrot.lane.b32.xlu2 %v7337_v23, %s7131_s25 }
 0x11b   :  { %v737_v55 = vpop.permute.xlu2 %736 }
 0x120   :  { %760 = vrot.lane.b32.xlu1 %v7361_v51, %s7131_s25  ;;  %750 = vrot.lane.b32.xlu0 %v7349_v37, %s7131_s25 }
 0x121   :  { %683 = vrot.lane.b32.xlu2 %v7325_v8, %s7130_s24 }
 0x123   :  { %v7379_v1 = vpop.permute.xlu2 %902 }
 0x128   :  { %699 = vrot.lane.b32.xlu1 %v7381_v4, %s7130_s24  ;;  %687 = vrot.lane.b32.xlu0 %v7349_v37, %s7130_s24 }
 0x129   :  { %748 = vrot.lane.b32.xlu2 %v7359_v50, %s7131_s25 }
 0x12a   :  { %v802_v9 = vpop.permute.xlu1 %801  ;;  %v800_v10 = vpop.permute.xlu0 %799 }
 0x12b   :  { %v804_v11 = vpop.permute.xlu2 %803  ;;  %v7410_v26 = vsel %vm831_vm1, %v800_v10, %v802_v9 }
 0x12c   :  { %v7456_v43 = vsel %vm831_vm1, %v802_v9, %v804_v11 }
 0x130   :  { %764 = vrot.lane.b32.xlu1 %v7389_v13, %s7131_s25  ;;  %697 = vrot.lane.b32.xlu0 %v7361_v51, %s7130_s24 }
 0x131   :  { %685 = vrot.lane.b32.xlu2 %v7359_v50, %s7130_s24 }
 0x132   :  { %v676_v16 = vpop.permute.xlu1 %675  ;;  %v739_v18 = vpop.permute.xlu0 %738 }
 0x133   :  { %v7397_v19 = vpop.permute.xlu2 %742  ;;  %v7423_v14 = vsel %vm768_vm2, %v737_v55, %v739_v18  ;;  %v7433_v35 = vsel %vm705_vm3, %v7357_v44, %v676_v16 }
 0x138   :  { %703 = vrot.lane.b32.xlu1 %v7399_v29, %s7130_s24  ;;  %926 = vrot.lane.b32.xlu0 %v7361_v51, %s7132_s26 }
 0x139   :  { %825 = vrot.lane.b32.xlu2 %v7381_v4, %s7129_s2 }
 0x13a   :  { %v741_v21 = vpop.permute.xlu1 %740  ;;  %v7407_v24 = vpop.permute.xlu0 %904 }
 0x13b   :  { %v678_v25 = vpop.permute.xlu2 %677  ;;  %v7468_v52 = vsel %vm768_vm2, %v741_v21, %v7397_v19  ;;  %v7474_v55 = vsel %vm768_vm2, %v739_v18, %v741_v21 }
 0x13c   :  { %v7436_v36 = vsel %vm705_vm3, %v676_v16, %v678_v25 }
 0x13d   :  { %12695 = vst [vmem:[#allocation20_spill] sm:$0xff] %v7436_v36 }
 0x140   :  { %829 = vrot.lane.b32.xlu0 %v7399_v29, %s7129_s2  ;;  %998 = vrot.lane.b32.xlu1 %v7410_v26, %s7132_s26 }
 0x141   :  { %762 = vrot.lane.b32.xlu2 %v7381_v4, %s7131_s25 }
 0x142   :  { %v7418_v27 = vpop.permute.xlu1 %906  ;;  %v7420_v28 = vpop.permute.xlu0 %805 }
 0x143   :  { %v816_v30 = vpop.permute.xlu2 %815  ;;  %v7448_v41 = vsel %vm831_vm1, %v804_v11, %v7420_v28 }
 0x148   :  { %701 = vrot.lane.b32.xlu0 %v7389_v13, %s7130_s24  ;;  %966 = vrot.lane.b32.xlu1 %v7423_v14, %s7132_s26 }
 0x149   :  { %827 = vrot.lane.b32.xlu2 %v7389_v13, %s7129_s2 }
 0x14a   :  { %v753_v31 = vpop.permute.xlu1 %752  ;;  %v680_v33 = vpop.permute.xlu0 %679 }
 0x14b   :  { %v755_v34 = vpop.permute.xlu2 %754  ;;  %v7490_v61 = vsel %vm705_vm3, %v678_v25, %v680_v33 }
 0x14c   :  { %v7471_v54 = vsel %vm768_vm2, %v753_v31, %v755_v34 }
 0x150   :  { %934 = vrot.lane.b32.xlu0 %v7433_v35, %s7132_s26  ;;  %936 = vrot.lane.b32.xlu1 %v7436_v36, %s7132_s26 }
 0x151   :  { %766 = vrot.lane.b32.xlu2 %v7399_v29, %s7131_s25 }
 0x152   :  { %v692_v38 = vpop.permute.xlu1 %691  ;;  %v818_v39 = vpop.permute.xlu0 %817 }
 0x153   :  { %v7444_v40 = vpop.permute.xlu2 %920  ;;  %v7451_v42 = vsel %vm831_vm1, %v816_v30, %v818_v39 }
 0x158   :  { %1002 = vrot.lane.b32.xlu0 %v7448_v41, %s7132_s26  ;;  %1014 = vrot.lane.b32.xlu1 %v7451_v42, %s7132_s26 }
 0x159   :  { %1000 = vrot.lane.b32.xlu2 %v7456_v43, %s7132_s26 }
 0x15a   :  { %v7462_v44 = vpop.permute.xlu1 %918  ;;  %v690_v45 = vpop.permute.xlu0 %689 }
 0x15b   :  { %v7464_v46 = vpop.permute.xlu2 %821  ;;  %v7483_v59 = vsel %vm705_vm3, %v690_v45, %v692_v38 }
 0x160   :  { %970 = vrot.lane.b32.xlu0 %v7468_v52, %s7132_s26  ;;  %982 = vrot.lane.b32.xlu1 %v7471_v54, %s7132_s26 }
 0x161   :  { %968 = vrot.lane.b32.xlu2 %v7474_v55, %s7132_s26 }
 0x162   :  { %v820_v56 = vpop.permute.xlu1 %819  ;;  %v757_v57 = vpop.permute.xlu0 %756 }
 0x163   :  { %v694_v58 = vpop.permute.xlu2 %693  ;;  %v7487_v60 = vsel %vm831_vm1, %v820_v56, %v7464_v46  ;;  %v7504_v53 = vsel %vm831_vm1, %v818_v39, %v820_v56  ;;  %v7516_v11 = vsel %vm768_vm2, %v755_v34, %v757_v57 }
 0x164   :  { %v7534_v21 = vsel %vm705_vm3, %v692_v38, %v694_v58 }
 0x168   :  { %950 = vrot.lane.b32.xlu1 %v7483_v59, %s7132_s26  ;;  %1018 = vrot.lane.b32.xlu0 %v7487_v60, %s7132_s26 }
 0x169   :  { %938 = vrot.lane.b32.xlu2 %v7490_v61, %s7132_s26 }
 0x16a   :  { %v759_v0 = vpop.permute.xlu1 %758  ;;  %v696_v2 = vpop.permute.xlu0 %695 }
 0x16b   :  { %v7498_v62 = vpop.permute.xlu2 %924  ;;  %v7501_v3 = vsel %vm768_vm2, %v757_v57, %v759_v0  ;;  %v7513_v10 = vsel %vm705_vm3, %v694_v58, %v696_v2 }
 0x170   :  { %986 = vrot.lane.b32.xlu0 %v7501_v3, %s7132_s26 }
 0x171   :  { %1016 = vrot.lane.b32.xlu2 %v7504_v53, %s7132_s26 }
 0x172   :  { %v810_v5 = vpop.permute.xlu1 %809  ;;  %v7510_v6 = vpop.permute.xlu0 %922 }
 0x173   :  { %v745_v9 = vpop.permute.xlu2 %744 }
 0x174   :  { %v7552_v38 = vsel %vm768_vm2, %v7397_v19, %v745_v9 }
 0x175   :  { %12701 = vst [vmem:[#allocation26_spill] sm:$0xff] %v7552_v38 }
 0x178   :  { %954 = vrot.lane.b32.xlu0 %v7513_v10, %s7132_s26 }
 0x179   :  { %984 = vrot.lane.b32.xlu2 %v7516_v11, %s7132_s26 }
 0x17a   :  { %v682_v12 = vpop.permute.xlu1 %681  ;;  %v808_v15 = vpop.permute.xlu0 %807 }
 0x17b   :  { %v684_v16 = vpop.permute.xlu2 %683  ;;  %v7523_v18 = vsel %vm831_vm1, %v808_v15, %v810_v5  ;;  %v7529_v20 = vsel %vm831_vm1, %v7420_v28, %v808_v15  ;;  %v7541_v34 = vsel %vm705_vm3, %v680_v33, %v682_v12 }
 0x17c   :  { %12696 = vst [vmem:[#allocation21_spill] sm:$0xff] %v7523_v18  ;;  %1006 = vrot.lane.b32.xlu1 %v7523_v18, %s7132_s26  ;;  %v7568_v19 = vsel %vm705_vm3, %v682_v12, %v684_v16 }
 0x17d   :  { %12697 = vst [vmem:[#allocation22_spill] sm:$0xff] %v7529_v20 }
 0x17e   :  { %12699 = vst [vmem:[#allocation24_spill] sm:$0xff] %v7541_v34 }
 0x17f   :  { %12704 = vst [vmem:[#allocation29_spill] sm:$0xff] %v7568_v19 }
 0x180   :  { %1004 = vrot.lane.b32.xlu0 %v7529_v20, %s7132_s26 }
 0x181   :  { %952 = vrot.lane.b32.xlu2 %v7534_v21, %s7132_s26 }
 0x182   :  { %v7538_v25 = vpop.permute.xlu1 %813  ;;  %v747_v30 = vpop.permute.xlu0 %746 }
 0x183   :  { %12698 = vst [vmem:[#allocation23_spill] sm:$0xff] %v7538_v25  ;;  %v749_v31 = vpop.permute.xlu2 %748  ;;  %v7546_v28 = vsel %vm768_vm2, %v745_v9, %v747_v30 }
 0x184   :  { %940 = vrot.lane.b32.xlu1 %v7541_v34, %s7132_s26  ;;  %12700 = vst [vmem:[#allocation25_spill] sm:$0xff] %v7546_v28  ;;  %v7586_v12 = vsel %vm768_vm2, %v747_v30, %v749_v31 }
 0x185   :  { %12708 = vst [vmem:[#allocation33_spill] sm:$0xff] %v7586_v12 }
 0x188   :  { %974 = vrot.lane.b32.xlu0 %v7546_v28, %s7132_s26 }
 0x189   :  { %972 = vrot.lane.b32.xlu2 %v7552_v38, %s7132_s26 }
 0x18a   :  { %v824_v39 = vpop.permute.xlu1 %823  ;;  %v812_v45 = vpop.permute.xlu0 %811 }
 0x18b   :  { %v686_v33 = vpop.permute.xlu2 %685  ;;  %v7558_v56 = vsel %vm831_vm1, %v812_v45, %v7538_v25  ;;  %v7563_v57 = vsel %vm831_vm1, %v810_v5, %v812_v45 }
 0x18c   :  { %12702 = vst [vmem:[#allocation27_spill] sm:$0xff] %v7558_v56  ;;  %1010 = vrot.lane.b32.xlu1 %v7558_v56, %s7132_s26  ;;  %v7575_v63 = vsel %vm705_vm3, %v684_v16, %v686_v33 }
 0x18d   :  { %12703 = vst [vmem:[#allocation28_spill] sm:$0xff] %v7563_v57 }
 0x18e   :  { %12706 = vst [vmem:[#allocation31_spill] sm:$0xff] %v7575_v63 }
 0x190   :  { %1008 = vrot.lane.b32.xlu0 %v7563_v57, %s7132_s26 }
 0x191   :  { %942 = vrot.lane.b32.xlu2 %v7568_v19, %s7132_s26 }
 0x192   :  { %v761_v58 = vpop.permute.xlu1 %760  ;;  %v7572_v9 = vpop.permute.xlu0 %750 }
 0x193   :  { %12705 = vst [vmem:[#allocation30_spill] sm:$0xff] %v7572_v9  ;;  %v826_v15 = vpop.permute.xlu2 %825  ;;  %v7581_v5 = vsel %vm768_vm2, %v749_v31, %v7572_v9 }
 0x194   :  { %944 = vrot.lane.b32.xlu1 %v7575_v63, %s7132_s26  ;;  %12707 = vst [vmem:[#allocation32_spill] sm:$0xff] %v7581_v5  ;;  %v7594_v63 = vsel %vm831_vm1, %v7464_v46, %v824_v39  ;;  %v7599_v19 = vsel %vm831_vm1, %v824_v39, %v826_v15 }
 0x198   :  { %978 = vrot.lane.b32.xlu0 %v7581_v5, %s7132_s26  ;;  %v7607_v5 = vsel %vm768_vm2, %v759_v0, %v761_v58 }
 0x199   :  { %976 = vrot.lane.b32.xlu2 %v7586_v12, %s7132_s26  ;;  %12711 = vst [vmem:[#allocation36_spill] sm:$0xff] %v7607_v5 }
 0x19a   :  { %v700_v45 = vpop.permute.xlu1 %699  ;;  %v7590_v51 = vpop.permute.xlu0 %687 }
 0x19b   :  { %12709 = vst [vmem:[#allocation34_spill] sm:$0xff] %v7590_v51  ;;  %v763_v16 = vpop.permute.xlu2 %762 }
 0x19c   :  { %1020 = vrot.lane.b32.xlu1 %v7594_v63, %s7132_s26  ;;  %v7614_v46 = vsel %vm768_vm2, %v761_v58, %v763_v16 }
 0x19d   :  { %12712 = vst [vmem:[#allocation37_spill] sm:$0xff] %v7614_v46 }
 0x1a1   :  { %1022 = vrot.lane.b32.xlu2 %v7599_v19, %s7132_s26 }
 0x1a2   :  { %v765_v30 = vpop.permute.xlu1 %764  ;;  %v698_v31 = vpop.permute.xlu0 %697 }
 0x1a3   :  { %v828_v34 = vpop.permute.xlu2 %827  ;;  %v7604_v12 = vsel %vm705_vm3, %v696_v2, %v698_v31  ;;  %v7625_v0 = vsel %vm705_vm3, %v698_v31, %v700_v45 }
 0x1a4   :  { %12710 = vst [vmem:[#allocation35_spill] sm:$0xff] %v7604_v12  ;;  %956 = vrot.lane.b32.xlu0 %v7604_v12, %s7132_s26  ;;  %988 = vrot.lane.b32.xlu1 %v7607_v5, %s7132_s26  ;;  %v7630_v12 = vsel %vm831_vm1, %v826_v15, %v828_v34 }
 0x1a5   :  { %12715 = vst [vmem:[#allocation40_spill] sm:$0xff] %v7625_v0 }
 0x1a6   :  { %12716 = vst [vmem:[#allocation41_spill] sm:$0xff] %v7630_v12 }
 0x1a9   :  { %990 = vrot.lane.b32.xlu2 %v7614_v46, %s7132_s26  ;;  %v7637_v46 = vsel %vm768_vm2, %v763_v16, %v765_v30 }
 0x1aa   :  { %v7618_v39 = vpop.permute.xlu1 %703  ;;  %v7620_v38 = vpop.permute.xlu0 %926  ;;  %12718 = vst [vmem:[#allocation43_spill] sm:$0xff] %v7637_v46 }
 0x1ab   :  { %12713 = vst [vmem:[#allocation38_spill] sm:$0xff] %v7618_v39  ;;  %v7622_v2 = vpop.permute.xlu2 %766 }
 0x1ac   :  { %12714 = vst [vmem:[#allocation39_spill] sm:$0xff] %v7622_v2  ;;  %958 = vrot.lane.b32.xlu1 %v7625_v0, %s7132_s26  ;;  %v7649_v15 = vsel %vm768_vm2, %v765_v30, %v7622_v2  ;;  %v7665_v30 = vsel %vm705_vm3, %v686_v33, %v7590_v51 }
 0x1ad   :  { %12719 = vst [vmem:[#allocation44_spill] sm:$0xff] %v7649_v15 }
 0x1ae   :  { %12721 = vst [vmem:[#allocation46_spill] sm:$0xff] %v7665_v30 }
 0x1b1   :  { %1024 = vrot.lane.b32.xlu2 %v7630_v12, %s7132_s26 }
 0x1b2   :  { %v999_v58 = vpop.permute.xlu1 %998  ;;  %v7634_v28 = vpop.permute.xlu0 %829 }
 0x1b3   :  { %12717 = vst [vmem:[#allocation42_spill] sm:$0xff] %v7634_v28  ;;  %v1001_v56 = vpop.permute.xlu2 %1000  ;;  %v7641_v31 = vsel %vm831_vm1, %v828_v34, %v7634_v28  ;;  %vm6260_vm1 = vcmask 589312  }
 0x1b4   :  { %992 = vrot.lane.b32.xlu1 %v7637_v46, %s7132_s26  ;;  %1026 = vrot.lane.b32.xlu0 %v7641_v31, %s7132_s26 }
 0x1b9   :  { %994 = vrot.lane.b32.xlu2 %v7649_v15, %s7132_s26 }
 0x1ba   :  { %v702_v0 = vpop.permute.xlu0 %701  ;;  %v967_v16 = vpop.permute.xlu1 %966 }
 0x1bb   :  { %v7653_v57 = vpop.permute.xlu2 %968  ;;  %v7657_v34 = vsel %vm705_vm3, %v702_v0, %v7618_v39  ;;  %v7674_v12 = vsel %vm705_vm3, %v700_v45, %v702_v0  ;;  %v1073_v0 = vsel %vm1030_vm4, %v999_v58, %v1001_v56 }
 0x1bc   :  { %12720 = vst [vmem:[#allocation45_spill] sm:$0xff] %v7657_v34  ;;  %962 = vrot.lane.b32.xlu1 %v7657_v34, %s7132_s26  ;;  %908 = vrot.lane.b32.xlu0 %v7271_v17, %s7132_s26  ;;  %v1059_v58 = vsel %vm1030_vm4, %v967_v16, %v7653_v57 }
 0x1bd   :  { %12722 = vst [vmem:[#allocation47_spill] sm:$0xff] %v7674_v12 }
 0x1c1   :  { %946 = vrot.lane.b32.xlu2 %v7665_v30, %s7132_s26 }
 0x1c2   :  { %v935_v15 = vpop.permute.xlu0 %934  ;;  %v7669_v46 = vpop.permute.xlu1 %936 }
 0x1c3   :  { %v7671_v5 = vpop.permute.xlu2 %938 }
 0x1c4   :  { %910 = vrot.lane.b32.xlu1 %v7337_v23, %s7132_s26  ;;  %960 = vrot.lane.b32.xlu0 %v7674_v12, %s7132_s26 }
 0x1c9   :  { %928 = vrot.lane.b32.xlu2 %v7381_v4, %s7132_s26 }
 0x1ca   :  { %v7682_v33 = vpop.permute.xlu0 %1002  ;;  %v1015_v30 = vpop.permute.xlu1 %1014 }
 0x1cb   :  { %v1017_v17 = vpop.permute.xlu2 %1016 }
 0x1cc   :  { %912 = vrot.lane.b32.xlu1 %v7325_v8, %s7132_s26  ;;  %930 = vrot.lane.b32.xlu0 %v7389_v13, %s7132_s26  ;;  %v1080_v45 = vsel %vm1030_vm4, %v1015_v30, %v1017_v17 }
 0x1cd   :  { %1151 = vmatpush.bf16.msra.mxu0 %v1080_v45 }
 0x1d1   :  { %914 = vrot.lane.b32.xlu2 %v7359_v50, %s7132_s26  ;;  %1152 = vmatpush.bf16.msra.mxu0 %v1073_v0 }
 0x1d2   :  { %v7692_v4 = vpop.permute.xlu0 %970  ;;  %v983_v23 = vpop.permute.xlu1 %982 }
 0x1d3   :  { %v985_v34 = vpop.permute.xlu2 %984 }
 0x1d4   :  { %1012 = vrot.lane.b32.xlu1 %v7538_v25, %s7132_s26  ;;  %1028 = vrot.lane.b32.xlu0 %v7634_v28, %s7132_s26  ;;  %v1066_v8 = vsel %vm1030_vm4, %v983_v23, %v985_v34  ;;  %v1045_v23 = vsel %vm1030_vm4, %v935_v15, %v7669_v46  ;;  %v6990_v15 = vld [vmem:[%s12486_s3 + $0x10] sm:$0xf0] }
 0x1d5   :  { %1153 = vmatpush.bf16.msra.mxu0 %v1066_v8 }
 0x1d9   :  { %996 = vrot.lane.b32.xlu2 %v7622_v2, %s7132_s26  ;;  %1154 = vmatpush.bf16.msra.mxu0 %v1059_v58 }
 0x1da   :  { %v951_v30 = vpop.permute.xlu1 %950  ;;  %v7703_v45 = vpop.permute.xlu0 %1018 }
 0x1db   :  { %v953_v0 = vpop.permute.xlu2 %952  ;;  %v1081_v25 = vsel %vm1030_vm4, %v1017_v17, %v7703_v45  ;;  %v1074_v17 = vsel %vm1030_vm4, %v1001_v56, %v7682_v33  ;;  %v6778_v56 = vld [vmem:[%s12486_s3 + $0x4] sm:$0xf] }
 0x1dc   :  { %964 = vrot.lane.b32.xlu1 %v7618_v39, %s7132_s26  ;;  %980 = vrot.lane.b32.xlu0 %v7572_v9, %s7132_s26  ;;  %v1052_v8 = vsel %vm1030_vm4, %v951_v30, %v953_v0 }
 0x1dd   :  { %1155 = vmatpush.bf16.msra.mxu0 %v1052_v8  ;;  %1180 = vmatpush.bf16.msra.mxu1 %v1081_v25  ;;  %v1038_v25 = vsel %vm1030_vm4, %v7462_v44, %v7444_v40  ;;  %v1060_v44 = vsel %vm1030_vm4, %v7653_v57, %v7692_v4  ;;  %v7745_v8 = vor.u32 %v6990_v15, %v6778_v56 }
 0x1de   :  { %v1046_v57 = vsel %vm1030_vm4, %v7669_v46, %v7671_v5  ;;  %v6782_v46 = vld [vmem:[%s12486_s3 + $0x24] sm:$0xf] }
 0x1e1   :  { %948 = vrot.lane.b32.xlu2 %v7590_v51, %s7132_s26  ;;  %1156 = vmatpush.bf16.msra.mxu0 %v1045_v23 }
 0x1e2   :  { %1181 = vmatpush.bf16.msra.mxu1 %v1074_v17  ;;  %v7718_v16 = vpop.permute.xlu0 %986 }
 0x1e3   :  { %v7720_v58 = vpop.permute.xlu2 %972  ;;  %v1067_v30 = vsel %vm1030_vm4, %v985_v34, %v7718_v16  ;;  %v1031_v34 = vsel %vm1030_vm4, %v7379_v1, %v7407_v24 }
 0x1e4   :  { %916 = vrot.lane.b32.xlu1 %v7349_v37, %s7132_s26  ;;  %932 = vrot.lane.b32.xlu0 %v7399_v29, %s7132_s26 }
 0x1e5   :  { %1157 = vmatpush.bf16.msra.mxu0 %v1038_v25 }
 0x1e6   :  { %1182 = vmatpush.bf16.msra.mxu1 %v1067_v30 }
 0x1e9   :  { %1783 = vrot.lane.b32.xlu2 %v7451_v42, %s7133_s8  ;;  %1158 = vmatpush.bf16.msra.mxu0 %v1031_v34  ;;  %v6991_v34 = vld [vmem:[%s12486_s3 + $0x30] sm:$0xf0] }
 0x1ea   :  { %1183 = vmatpush.bf16.msra.mxu1 %v1060_v44  ;;  %v7747_v23 = vpop.permute.xlu0 %954  ;;  %v1032_v44 = vsel %vm1030_vm4, %v7407_v24, %v7418_v27 }
 0x1eb   :  { %v7749_v17 = vpop.permute.xlu2 %942  ;;  %v1053_v30 = vsel %vm1030_vm4, %v953_v0, %v7747_v23  ;;  %v1039_v0 = vsel %vm1030_vm4, %v7444_v40, %v7510_v6  ;;  %v7785_v40 = vor.u32 %v6991_v34, %v6782_v46  ;;  %v6786_v34 = vld [vmem:[%s12486_s3 + $0x44] sm:$0xf] }
 0x1ec   :  { %1787 = vrot.lane.b32.xlu1 %v7487_v60, %s7133_s8  ;;  %1785 = vrot.lane.b32.xlu0 %v7504_v53, %s7133_s8 }
 0x1ed   :  { %1159 = vmatmul.bf16.vlgmr.msra.gmra.mxu0 %v7745_v8 }
 0x1ee   :  { %1184 = vmatpush.bf16.msra.mxu1 %v1053_v30  ;;  %v1007_v1 = vpop.permute.xlu1 %1006 }
 0x1f1   :  { %1767 = vrot.lane.b32.xlu2 %v7410_v26, %s7133_s8 }
 0x1f2   :  { %1185 = vmatpush.bf16.msra.mxu1 %v1046_v57  ;;  %v1005_v56 = vpop.permute.xlu0 %1004 }
 0x1f3   :  { %v7763_v25 = vpop.permute.xlu2 %976  ;;  %v1075_v50 = vsel %vm1030_vm4, %v7682_v33, %v1005_v56  ;;  %v6993_v33 = vld [vmem:[%s12486_s3 + $0x70] sm:$0xf0] }
 0x1f4   :  { %1771 = vrot.lane.b32.xlu1 %v7448_v41, %s7133_s8  ;;  %1769 = vrot.lane.b32.xlu0 %v7456_v43, %s7133_s8 }
 0x1f6   :  { %1186 = vmatpush.bf16.msra.mxu1 %v1039_v0  ;;  %v7772_v15 = vpop.permute.xlu1 %940 }
 0x1f9   :  { %1751 = vrot.lane.b32.xlu2 %v7471_v54, %s7133_s8 }
 0x1fa   :  { %1187 = vmatpush.bf16.msra.mxu1 %v1032_v44  ;;  %v7795_v0 = vpop.permute.xlu0 %974  ;;  %v6992_v44 = vld [vmem:[%s12486_s3 + $0x50] sm:$0xf0] }
 0x1fb   :  { %v1023_v30 = vpop.permute.xlu2 %1022  ;;  %v7817_v29 = vor.u32 %v6992_v44, %v6786_v34 }
 0x1fc   :  { %1755 = vrot.lane.b32.xlu1 %v7501_v3, %s7133_s8  ;;  %1753 = vrot.lane.b32.xlu0 %v7516_v11, %s7133_s8 }
 0x1fd   :  { %1188 = vmatmul.bf16.vlgmr.msra.gmra.mxu1 %v7745_v8  ;;  %1164 = vmatmul.bf16.gmra.mxu0 %v7785_v40 }
 0x1fe   :  { %v7793_v57 = vpop.permute.xlu1 %1010 }
 0x201   :  { %1735 = vrot.lane.b32.xlu2 %v7423_v14, %s7133_s8 }
 0x202   :  { %v7815_v37 = vpop.permute.xlu0 %1008 }
 0x203   :  { %v7799_v24 = vpop.permute.xlu2 %990  ;;  %v1077_v44 = vsel %vm1030_vm4, %v1007_v1, %v7815_v37 }
 0x204   :  { %1739 = vrot.lane.b32.xlu1 %v7468_v52, %s7133_s8  ;;  %1737 = vrot.lane.b32.xlu0 %v7474_v55, %s7133_s8 }
 0x206   :  { %v7805_v46 = vpop.permute.xlu1 %944 }
 0x209   :  { %1719 = vrot.lane.b32.xlu2 %v7483_v59, %s7133_s8 }
 0x20a   :  { %v7837_v28 = vpop.permute.xlu0 %978 }
 0x20b   :  { %v1025_v51 = vpop.permute.xlu2 %1024 }
 0x20c   :  { %1723 = vrot.lane.b32.xlu1 %v7513_v10, %s7133_s8  ;;  %1721 = vrot.lane.b32.xlu0 %v7534_v21, %s7133_s8  ;;  %v1084_v39 = vsel %vm1030_vm4, %v1023_v30, %v1025_v51 }
 0x20d   :  { %1267 = vmatpush.bf16.msrb.mxu0 %v1084_v39  ;;  %1193 = vmatmul.bf16.gmra.mxu1 %v7785_v40 }
 0x20e   :  { %v1021_v9 = vpop.permute.xlu1 %1020  ;;  %1169 = vmatmul.bf16.gmra.mxu0 %v7817_v29 }
 0x20f   :  { %v1082_v2 = vsel %vm1030_vm4, %v7703_v45, %v1021_v9  ;;  %v1083_v34 = vsel %vm1030_vm4, %v1021_v9, %v1023_v30  ;;  %v1076_v9 = vsel %vm1030_vm4, %v1005_v56, %v1007_v1 }
 0x210   :  { %1209 = vmatpush.bf16.msra.mxu2 %v1082_v2  ;;  %1238 = vmatpush.bf16.msra.mxu3 %v1083_v34 }
 0x211   :  { %1703 = vrot.lane.b32.xlu2 %v7433_v35, %s7133_s8  ;;  %1268 = vmatpush.bf16.msrb.mxu0 %v1077_v44  ;;  %v1062_v44 = vsel %vm1030_vm4, %v7720_v58, %v7795_v0 }
 0x213   :  { %v7833_v39 = vpop.permute.xlu2 %994 }
 0x214   :  { %1210 = vmatpush.bf16.msra.mxu2 %v1075_v50  ;;  %1707 = vrot.lane.b32.xlu1 %v7490_v61, %s7133_s8  ;;  %v6790_v50 = vld [vmem:[%s12486_s3 + $0x64] sm:$0xf] }
 0x215   :  { %1705 = vrot.lane.b32.xlu0 %v7436_v36, %s7133_s8  ;;  %1239 = vmatpush.bf16.msra.mxu3 %v1076_v9  ;;  %v7856_v1 = vor.u32 %v6993_v33, %v6790_v50  ;;  %v1040_v33 = vsel %vm1030_vm4, %v7510_v6, %v7498_v62  ;;  %v1063_v6 = vsel %vm1030_vm4, %v7795_v0, %v7763_v25 }
 0x216   :  { %v989_v2 = vpop.permute.xlu1 %988  ;;  %v957_v34 = vpop.permute.xlu0 %956 }
 0x217   :  { %v1068_v45 = vsel %vm1030_vm4, %v7718_v16, %v989_v2  ;;  %v1069_v30 = vsel %vm1030_vm4, %v989_v2, %v7799_v24  ;;  %v1061_v16 = vsel %vm1030_vm4, %v7692_v4, %v7720_v58  ;;  %v1054_v4 = vsel %vm1030_vm4, %v7747_v23, %v957_v34 }
 0x218   :  { %1211 = vmatpush.bf16.msra.mxu2 %v1068_v45  ;;  %v1047_v45 = vsel %vm1030_vm4, %v7671_v5, %v7772_v15  ;;  %v1048_v23 = vsel %vm1030_vm4, %v7772_v15, %v7749_v17  ;;  %v1041_v15 = vsel %vm1030_vm4, %v7498_v62, %v7620_v38 }
 0x219   :  { %1687 = vrot.lane.b32.xlu2 %v7279_v22, %s7133_s8  ;;  %1240 = vmatpush.bf16.msra.mxu3 %v1069_v30 }
 0x21b   :  { %v7858_v56 = vpop.permute.xlu2 %946 }
 0x21c   :  { %1691 = vrot.lane.b32.xlu1 %v7307_v49, %s7133_s8  ;;  %1212 = vmatpush.bf16.msra.mxu2 %v1061_v16 }
 0x21d   :  { %1689 = vrot.lane.b32.xlu0 %v7291_v32, %s7133_s8  ;;  %1241 = vmatpush.bf16.msra.mxu3 %v1062_v44 }
 0x21e   :  { %v959_v9 = vpop.permute.xlu1 %958  ;;  %1198 = vmatmul.bf16.gmra.mxu1 %v7817_v29  ;;  %1174 = vmatmul.bf16.gmra.mxu0 %v7856_v1 }
 0x21f   :  { %v1055_v2 = vsel %vm1030_vm4, %v957_v34, %v959_v9 }
 0x220   :  { %1213 = vmatpush.bf16.msra.mxu2 %v1054_v4 }
 0x221   :  { %1671 = vrot.lane.b32.xlu2 %v7235_v47, %s7133_s8  ;;  %1242 = vmatpush.bf16.msra.mxu3 %v1055_v2 }
 0x223   :  { %v929_v58 = vpop.permute.xlu2 %928 }
 0x224   :  { %1675 = vrot.lane.b32.xlu1 %v7263_v7, %s7133_s8  ;;  %1214 = vmatpush.bf16.msra.mxu2 %v1047_v45 }
 0x225   :  { %1673 = vrot.lane.b32.xlu0 %v7237_v48, %s7133_s8  ;;  %1243 = vmatpush.bf16.msra.mxu3 %v1048_v23 }
 0x226   :  { %v993_v30 = vpop.permute.xlu1 %992  ;;  %v7887_v50 = vpop.permute.xlu0 %1026 }
 0x227   :  { %v1070_v5 = vsel %vm1030_vm4, %v7799_v24, %v993_v30  ;;  %v1085_v16 = vsel %vm1030_vm4, %v1025_v51, %v7887_v50  ;;  %v1078_v51 = vsel %vm1030_vm4, %v7815_v37, %v7793_v57  ;;  %v1071_v0 = vsel %vm1030_vm4, %v993_v30, %v7833_v39  ;;  %v12723_v37 = vld [vmem:[#allocation41_spill] sm:$0xff] }
 0x228   :  { %1215 = vmatpush.bf16.msra.mxu2 %v1040_v33  ;;  %1269 = vmatpush.bf16.msrb.mxu0 %v1070_v5  ;;  %v12724_v5 = vld [vmem:[#allocation36_spill] sm:$0xff] }
 0x229   :  { %1789 = vrot.lane.b32.xlu2 %v7594_v63, %s7133_s8  ;;  %1244 = vmatpush.bf16.msra.mxu3 %v1041_v15  ;;  %v12725_v15 = vld [vmem:[#allocation28_spill] sm:$0xff] }
 0x22a   :  { %1296 = vmatpush.bf16.msrb.mxu1 %v1085_v16 }
 0x22b   :  { %v7901_v34 = vpop.permute.xlu2 %914 }
 0x22c   :  { %1773 = vrot.lane.b32.xlu1 %v7529_v20, %s7133_s8  ;;  %1270 = vmatpush.bf16.msrb.mxu0 %v1063_v6  ;;  %v1050_v6 = vsel %vm1030_vm4, %v7805_v46, %v7858_v56 }
 0x22d   :  { %1791 = vrot.lane.b32.xlu0 %v7599_v19, %s7133_s8 }
 0x22e   :  { %1297 = vmatpush.bf16.msrb.mxu1 %v1078_v51  ;;  %v7913_v62 = vpop.permute.xlu1 %962  ;;  %v909_v24 = vpop.permute.xlu0 %908 }
 0x22f   :  { %v1033_v44 = vsel %vm1030_vm4, %v7418_v27, %v909_v24  ;;  %1203 = vmatmul.bf16.gmra.mxu1 %v7856_v1  ;;  %v1064_v27 = vsel %vm1030_vm4, %v7763_v25, %v7837_v28  ;;  %v1049_v25 = vsel %vm1030_vm4, %v7749_v17, %v7805_v46 }
 0x230   :  { %1216 = vmatpush.bf16.msra.mxu2 %v1033_v44  ;;  %v1042_v44 = vsel %vm1030_vm4, %v7620_v38, %v929_v58  ;;  %v12729_v38 = vld [vmem:[#allocation26_spill] sm:$0xff] }
 0x231   :  { %1775 = vrot.lane.b32.xlu2 %v7523_v18, %s7133_s8 }
 0x232   :  { %1298 = vmatpush.bf16.msrb.mxu1 %v1071_v0  ;;  %v12727_v0 = vld [vmem:[#allocation27_spill] sm:$0xff] }
 0x233   :  { %v7922_v4 = vpop.permute.xlu2 %996  ;;  %1217 = vmatmul.bf16.vlgmr.msra.gmra.mxu2 %v7745_v8 }
 0x234   :  { %1795 = vrot.lane.b32.xlu1 %v7641_v31, %s7133_s8 }
 0x235   :  { %1793 = vrot.lane.b32.xlu0 %v12723_v37, %s7133_s8 }
 0x236   :  { %1299 = vmatpush.bf16.msrb.mxu1 %v1064_v27  ;;  %v911_v2 = vpop.permute.xlu1 %910  ;;  %v961_v45 = vpop.permute.xlu0 %960 }
 0x237   :  { %v1034_v23 = vsel %vm1030_vm4, %v909_v24, %v911_v2  ;;  %v1056_v30 = vsel %vm1030_vm4, %v959_v9, %v961_v45  ;;  %v1057_v33 = vsel %vm1030_vm4, %v961_v45, %v7913_v62  ;;  %v12726_v9 = vld [vmem:[#allocation37_spill] sm:$0xff] }
 0x238   :  { %1245 = vmatpush.bf16.msra.mxu3 %v1034_v23  ;;  %1271 = vmatpush.bf16.msrb.mxu0 %v1056_v30  ;;  %v12728_v45 = vld [vmem:[#allocation25_spill] sm:$0xff] }
 0x239   :  { %1757 = vrot.lane.b32.xlu2 %v12724_v5, %s7133_s8 }
 0x23a   :  { %1300 = vmatpush.bf16.msrb.mxu1 %v1057_v33  ;;  %v12730_v33 = vld [vmem:[#allocation43_spill] sm:$0xff] }
 0x23b   :  { %v7938_v16 = vpop.permute.xlu2 %948  ;;  %1246 = vmatmul.bf16.vlgmr.msra.gmra.mxu3 %v7745_v8 }
 0x23c   :  { %1777 = vrot.lane.b32.xlu1 %v12725_v15, %s7133_s8  ;;  %1272 = vmatpush.bf16.msrb.mxu0 %v1049_v25 }
 0x23d   :  { %1759 = vrot.lane.b32.xlu0 %v12726_v9, %s7133_s8 }
 0x23e   :  { %1301 = vmatpush.bf16.msrb.mxu1 %v1050_v6  ;;  %v913_v51 = vpop.permute.xlu1 %912  ;;  %v7951_v24 = vpop.permute.xlu0 %930  ;;  %v12731_v6 = vld [vmem:[#allocation35_spill] sm:$0xff] }
 0x23f   :  { %v1043_v17 = vsel %vm1030_vm4, %v929_v58, %v7951_v24  ;;  %v1035_v46 = vsel %vm1030_vm4, %v911_v2, %v913_v51  ;;  %v1036_v58 = vsel %vm1030_vm4, %v913_v51, %v7901_v34  ;;  %v12732_v51 = vld [vmem:[#allocation44_spill] sm:$0xff] }
 0x240   :  { %1273 = vmatpush.bf16.msrb.mxu0 %v1042_v44 }
 0x241   :  { %1779 = vrot.lane.b32.xlu2 %v12727_v0, %s7133_s8 }
 0x242   :  { %1302 = vmatpush.bf16.msrb.mxu1 %v1043_v17 }
 0x243   :  { %v7959_v27 = vpop.permute.xlu2 %1783  ;;  %1222 = vmatmul.bf16.gmra.mxu2 %v7785_v40 }
 0x244   :  { %1743 = vrot.lane.b32.xlu1 %v12728_v45, %s7133_s8  ;;  %1274 = vmatpush.bf16.msrb.mxu0 %v1035_v46  ;;  %v1072_v46 = vsel %vm1030_vm4, %v7833_v39, %v7922_v4  ;;  %v12735_v39 = vld [vmem:[#allocation33_spill] sm:$0xff] }
 0x245   :  { %1741 = vrot.lane.b32.xlu0 %v12729_v38, %s7133_s8 }
 0x246   :  { %1303 = vmatpush.bf16.msrb.mxu1 %v1036_v58  ;;  %v1013_v23 = vpop.permute.xlu1 %1012  ;;  %v1029_v30 = vpop.permute.xlu0 %1028  ;;  %v12733_v58 = vld [vmem:[#allocation40_spill] sm:$0xff] }
 0x247   :  { %1275 = vmatmul.bf16.vlgmr.msrb.gmra.mxu0 %v7745_v8  ;;  %v1086_v2 = vsel %vm1030_vm4, %v7887_v50, %v1029_v30  ;;  %1354 = vmatpush.bf16.msrb.mxu3 %v1029_v30  ;;  %v1079_v50 = vsel %vm1030_vm4, %v7793_v57, %v1013_v23 }
 0x248   :  { %1407 = vmatpush.bf16.msra.mxu0 %v7451_v42  ;;  %1325 = vmatpush.bf16.msrb.mxu2 %v1086_v2 }
 0x249   :  { %1304 = vmatmul.bf16.vlgmr.msrb.gmra.mxu1 %v7745_v8  ;;  %1761 = vrot.lane.b32.xlu2 %v12730_v33, %s7133_s8 }
 0x24a   :  { %1436 = vmatpush.bf16.msra.mxu1 %v7504_v53 }
 0x24b   :  { %v7979_v25 = vpop.permute.xlu2 %1767  ;;  %1251 = vmatmul.bf16.gmra.mxu3 %v7785_v40 }
 0x24c   :  { %1408 = vmatpush.bf16.msra.mxu0 %v7410_v26  ;;  %1355 = vmatpush.bf16.msrb.mxu3 %v1013_v23  ;;  %v12734_v23 = vld [vmem:[#allocation32_spill] sm:$0xff] }
 0x24d   :  { %1725 = vrot.lane.b32.xlu1 %v12731_v6, %s7133_s8  ;;  %1763 = vrot.lane.b32.xlu0 %v12732_v51, %s7133_s8 }
 0x24e   :  { %1437 = vmatpush.bf16.msra.mxu1 %v7456_v43  ;;  %1326 = vmatpush.bf16.msrb.mxu2 %v1079_v50  ;;  %v965_v44 = vpop.permute.xlu1 %964  ;;  %v981_v17 = vpop.permute.xlu0 %980  ;;  %v12736_v50 = vld [vmem:[#allocation24_spill] sm:$0xff] }
 0x24f   :  { %v1065_v30 = vsel %vm1030_vm4, %v7837_v28, %v981_v17  ;;  %v1058_v28 = vsel %vm1030_vm4, %v7913_v62, %v965_v44  ;;  %v1051_v62 = vsel %vm1030_vm4, %v7858_v56, %v7938_v16 }
 0x250   :  { %1409 = vmatpush.bf16.msra.mxu0 %v7471_v54  ;;  %1356 = vmatpush.bf16.msrb.mxu3 %v7922_v4 }
 0x251   :  { %1727 = vrot.lane.b32.xlu2 %v12733_v58, %s7133_s8 }
 0x252   :  { %1438 = vmatpush.bf16.msra.mxu1 %v7516_v11  ;;  %1327 = vmatpush.bf16.msrb.mxu2 %v1072_v46  ;;  %v12737_v46 = vld [vmem:[#allocation29_spill] sm:$0xff] }
 0x253   :  { %v7998_v57 = vpop.permute.xlu2 %1751  ;;  %1227 = vmatmul.bf16.gmra.mxu2 %v7817_v29 }
 0x254   :  { %1410 = vmatpush.bf16.msra.mxu0 %v7423_v14  ;;  %1357 = vmatpush.bf16.msrb.mxu3 %v981_v17 }
 0x255   :  { %1747 = vrot.lane.b32.xlu1 %v12734_v23, %s7133_s8  ;;  %1745 = vrot.lane.b32.xlu0 %v12735_v39, %s7133_s8 }
 0x256   :  { %1439 = vmatpush.bf16.msra.mxu1 %v7474_v55  ;;  %1328 = vmatpush.bf16.msrb.mxu2 %v1065_v30  ;;  %v917_v4 = vpop.permute.xlu1 %916  ;;  %v933_v2 = vpop.permute.xlu0 %932 }
 0x257   :  { %1280 = vmatmul.bf16.gmra.mxu0 %v7785_v40 }
 0x258   :  { %1411 = vmatpush.bf16.msra.mxu0 %v7483_v59  ;;  %1358 = vmatpush.bf16.msrb.mxu3 %v965_v44 }
 0x259   :  { %1309 = vmatmul.bf16.gmra.mxu1 %v7785_v40  ;;  %1709 = vrot.lane.b32.xlu2 %v12736_v50, %s7133_s8 }
 0x25a   :  { %1440 = vmatpush.bf16.msra.mxu1 %v7534_v21  ;;  %1329 = vmatpush.bf16.msrb.mxu2 %v1058_v28  ;;  %v12738_v28 = vld [vmem:[#allocation45_spill] sm:$0xff] }
 0x25b   :  { %v8017_v17 = vpop.permute.xlu2 %1735  ;;  %1256 = vmatmul.bf16.gmra.mxu3 %v7817_v29 }
 0x25c   :  { %1412 = vmatpush.bf16.msra.mxu0 %v7433_v35  ;;  %1359 = vmatpush.bf16.msrb.mxu3 %v7938_v16  ;;  %v12739_v16 = vld [vmem:[#allocation17_spill] sm:$0xff] }
 0x25d   :  { %1729 = vrot.lane.b32.xlu1 %v7674_v12, %s7133_s8  ;;  %1711 = vrot.lane.b32.xlu0 %v12737_v46, %s7133_s8 }
 0x25e   :  { %1441 = vmatpush.bf16.msra.mxu1 %v7436_v36  ;;  %1330 = vmatpush.bf16.msrb.mxu2 %v1051_v62  ;;  %v8029_v44 = vpop.permute.xlu1 %1787  ;;  %v8031_v30 = vpop.permute.xlu0 %1785  ;;  %v1044_v36 = vsel %vm1030_vm4, %v7951_v24, %v933_v2  ;;  %v1037_v24 = vsel %vm1030_vm4, %v7901_v34, %v917_v4  ;;  %v12741_v34 = vld [vmem:[#allocation31_spill] sm:$0xff] }
 0x260   :  { %1413 = vmatpush.bf16.msra.mxu0 %v7279_v22  ;;  %1360 = vmatpush.bf16.msrb.mxu3 %v933_v2 }
 0x261   :  { %1731 = vrot.lane.b32.xlu2 %v12738_v28, %s7133_s8 }
 0x262   :  { %1442 = vmatpush.bf16.msra.mxu1 %v7291_v32  ;;  %1331 = vmatpush.bf16.msrb.mxu2 %v1044_v36  ;;  %v12740_v36 = vld [vmem:[#allocation12_spill] sm:$0xff] }
 0x263   :  { %v8041_v56 = vpop.permute.xlu2 %1719  ;;  %1232 = vmatmul.bf16.gmra.mxu2 %v7856_v1 }
 0x264   :  { %1414 = vmatpush.bf16.msra.mxu0 %v7235_v47  ;;  %1361 = vmatpush.bf16.msrb.mxu3 %v917_v4 }
 0x265   :  { %1695 = vrot.lane.b32.xlu1 %v12739_v16, %s7133_s8  ;;  %1693 = vrot.lane.b32.xlu0 %v12740_v36, %s7133_s8 }
 0x266   :  { %1443 = vmatpush.bf16.msra.mxu1 %v7237_v48  ;;  %1332 = vmatpush.bf16.msrb.mxu2 %v1037_v24  ;;  %v8051_v2 = vpop.permute.xlu1 %1771  ;;  %v8053_v62 = vpop.permute.xlu0 %1769  ;;  %v12742_v24 = vld [vmem:[#allocation11_spill] sm:$0xff] }
 0x267   :  { %1285 = vmatmul.bf16.gmra.mxu0 %v7817_v29 }
 0x268   :  { %1523 = vmatpush.bf16.msrb.mxu0 %v7599_v19  ;;  %1494 = vmatpush.bf16.msra.mxu3 %v7594_v63 }
 0x269   :  { %1314 = vmatmul.bf16.gmra.mxu1 %v7817_v29  ;;  %1713 = vrot.lane.b32.xlu2 %v12741_v34, %s7133_s8 }
 0x26a   :  { %1552 = vmatpush.bf16.msrb.mxu1 %v12723_v37  ;;  %1465 = vmatpush.bf16.msra.mxu2 %v7487_v60 }
 0x26b   :  { %v8065_v4 = vpop.permute.xlu2 %1703  ;;  %1261 = vmatmul.bf16.gmra.mxu3 %v7856_v1 }
 0x26c   :  { %1524 = vmatpush.bf16.msrb.mxu0 %v7523_v18  ;;  %1495 = vmatpush.bf16.msra.mxu3 %v7529_v20  ;;  %v8088_v20 = vpop.f32.mrf.mxu0 }
 0x26d   :  { %1677 = vrot.lane.b32.xlu1 %v12742_v24, %s7133_s8  ;;  %12745 = vst [vmem:[#allocation36_spill] sm:$0xff] %v8088_v20  ;;  %v12747_v20 = vld [vmem:[#allocation13_spill] sm:$0xff] }
 0x26e   :  { %1553 = vmatpush.bf16.msrb.mxu1 %v12725_v15  ;;  %1466 = vmatpush.bf16.msra.mxu2 %v7448_v41  ;;  %v12743_v15 = vld [vmem:[#allocation46_spill] sm:$0xff]  ;;  %v8074_v18 = vpop.permute.xlu1 %1755  ;;  %v8076_v37 = vpop.permute.xlu0 %1753 }
 0x26f   :  { %1715 = vrot.lane.b32.xlu0 %v12743_v15, %s7133_s8 }
 0x270   :  { %1525 = vmatpush.bf16.msrb.mxu0 %v12726_v9  ;;  %1496 = vmatpush.bf16.msra.mxu3 %v12724_v5 }
 0x272   :  { %1554 = vmatpush.bf16.msrb.mxu1 %v12730_v33  ;;  %1467 = vmatpush.bf16.msra.mxu2 %v7501_v3  ;;  %v12744_v33 = vld [vmem:[#allocation14_spill] sm:$0xff] }
 0x273   :  { %1679 = vrot.lane.b32.xlu2 %v12744_v33, %s7133_s8  ;;  %v8086_v9 = vpop.permute.xlu2 %1687  ;;  %1333 = vmatmul.bf16.vlgmr.msrb.gmra.mxu2 %v7745_v8 }
 0x274   :  { %1526 = vmatpush.bf16.msrb.mxu0 %v12728_v45  ;;  %1497 = vmatpush.bf16.msra.mxu3 %v12729_v38 }
 0x275   :  { %1699 = vrot.lane.b32.xlu1 %v7389_v13, %s7133_s8 }
 0x276   :  { %1555 = vmatpush.bf16.msrb.mxu1 %v12735_v39  ;;  %1468 = vmatpush.bf16.msra.mxu2 %v7468_v52  ;;  %v12746_v39 = vld [vmem:[#allocation18_spill] sm:$0xff]  ;;  %v8097_v45 = vpop.permute.xlu1 %1739  ;;  %v8099_v38 = vpop.permute.xlu0 %1737 }
 0x277   :  { %1697 = vrot.lane.b32.xlu0 %v12746_v39, %s7133_s8  ;;  %1290 = vmatmul.bf16.gmra.mxu0 %v7856_v1 }
 0x278   :  { %1527 = vmatpush.bf16.msrb.mxu0 %v12733_v58  ;;  %1498 = vmatpush.bf16.msra.mxu3 %v12731_v6  ;;  %v12751_v6 = vld [vmem:[#allocation16_spill] sm:$0xff] }
 0x279   :  { %1319 = vmatmul.bf16.gmra.mxu1 %v7856_v1 }
 0x27a   :  { %1556 = vmatpush.bf16.msrb.mxu1 %v7674_v12  ;;  %1469 = vmatpush.bf16.msra.mxu2 %v7513_v10  ;;  %v8109_v12 = vpop.f32.mrf.mxu1 }
 0x27b   :  { %1681 = vrot.lane.b32.xlu2 %v12747_v20, %s7133_s8  ;;  %12748 = vst [vmem:[#allocation27_spill] sm:$0xff] %v8109_v12  ;;  %v8113_v58 = vpop.permute.xlu2 %1671  ;;  %1362 = vmatmul.bf16.vlgmr.msrb.gmra.mxu3 %v7745_v8  ;;  %v12752_v8 = vld [vmem:[#allocation23_spill] sm:$0xff] }
 0x27c   :  { %1528 = vmatpush.bf16.msrb.mxu0 %v12737_v46  ;;  %1499 = vmatpush.bf16.msra.mxu3 %v12736_v50  ;;  %v8120_v46 = vpop.f32.mrf.mxu0 }
 0x27d   :  { %12750 = vst [vmem:[#allocation44_spill] sm:$0xff] %v8120_v46  ;;  %v6794_v46 = vld [vmem:[%s12486_s3] sm:$0xf] }
 0x27e   :  { %1557 = vmatpush.bf16.msrb.mxu1 %v12741_v34  ;;  %1470 = vmatpush.bf16.msra.mxu2 %v7490_v61  ;;  %v12749_v34 = vld [vmem:[#allocation42_spill] sm:$0xff]  ;;  %v8124_v12 = vpop.permute.xlu1 %1723  ;;  %v8126_v50 = vpop.permute.xlu0 %1721 }
 0x27f   :  { %1797 = vrot.lane.b32.xlu1 %v12749_v34, %s7133_s8  ;;  %1683 = vrot.lane.b32.xlu0 %v12751_v6, %s7133_s8 }
 0x280   :  { %1529 = vmatpush.bf16.msrb.mxu0 %v12739_v16  ;;  %1500 = vmatpush.bf16.msra.mxu3 %v12740_v36 }
 0x282   :  { %1558 = vmatpush.bf16.msrb.mxu1 %v12746_v39  ;;  %1471 = vmatpush.bf16.msra.mxu2 %v7307_v49  ;;  %v6986_v39 = vld [vmem:[%s12486_s3 + $0xc] sm:$0xf0]  ;;  %v8140_v16 = vpop.f32.mrf.mxu1 }
 0x283   :  { %1781 = vrot.lane.b32.xlu2 %v12752_v8, %s7133_s8  ;;  %12753 = vst [vmem:[#allocation32_spill] sm:$0xff] %v8140_v16  ;;  %1338 = vmatmul.bf16.gmra.mxu2 %v7785_v40 }
 0x284   :  { %1530 = vmatpush.bf16.msrb.mxu0 %v12744_v33  ;;  %1501 = vmatpush.bf16.msra.mxu3 %v12742_v24  ;;  %v8144_v33 = vpop.permute.xlu2 %1789 }
 0x286   :  { %1559 = vmatpush.bf16.msrb.mxu1 %v12747_v20  ;;  %1472 = vmatpush.bf16.msra.mxu2 %v7263_v7  ;;  %v8151_v20 = vor.u32 %v6986_v39, %v6794_v46  ;;  %v8155_v16 = vpop.permute.xlu1 %1707 }
 0x287   :  { %2362 = vrot.lane.b32.xlu1 %v7504_v53, %s7134_s1  ;;  %2360 = vrot.lane.b32.xlu0 %v7451_v42, %s7134_s1  ;;  %v8157_v24 = vpop.permute.xlu0 %1705  ;;  %v1849_v53 = vsel %vm1799_vm5, %v7959_v27, %v8031_v30  ;;  %v1850_v42 = vsel %vm1799_vm5, %v8031_v30, %v8029_v44  ;;  %v1842_v27 = vsel %vm1799_vm5, %v7979_v25, %v8053_v62 }
 0x288   :  { %1610 = vmatpush.bf16.msrb.mxu3 %v12749_v34  ;;  %v8161_v34 = vpop.f32.mrf.mxu0  ;;  %1415 = vmatmul.bf16.vlgmr.msra.gmra.mxu0 %v8151_v20  ;;  %v1843_v30 = vsel %vm1799_vm5, %v8053_v62, %v8051_v2  ;;  %v1835_v25 = vsel %vm1799_vm5, %v7998_v57, %v8076_v37  ;;  %v6798_v62 = vld [vmem:[%s12486_s3 + $0x20] sm:$0xf] }
 0x289   :  { %12754 = vst [vmem:[#allocation45_spill] sm:$0xff] %v8161_v34  ;;  %1444 = vmatmul.bf16.vlgmr.msra.gmra.mxu1 %v8151_v20  ;;  %1920 = vmatpush.bf16.msra.mxu0 %v1849_v53  ;;  %v12756_v34 = vld [vmem:[#allocation39_spill] sm:$0xff] }
 0x28a   :  { %1581 = vmatpush.bf16.msrb.mxu2 %v7641_v31  ;;  %1949 = vmatpush.bf16.msra.mxu1 %v1850_v42  ;;  %v8171_v39 = vpop.f32.mrf.mxu1  ;;  %v6987_v42 = vld [vmem:[%s12486_s3 + $0x2c] sm:$0xf0] }
 0x28b   :  { %12755 = vst [vmem:[#allocation12_spill] sm:$0xff] %v8171_v39  ;;  %2364 = vrot.lane.b32.xlu2 %v7487_v60, %s7134_s1  ;;  %1367 = vmatmul.bf16.gmra.mxu3 %v7785_v40  ;;  %v12757_v40 = vld [vmem:[#allocation30_spill] sm:$0xff] }
 0x28c   :  { %1611 = vmatpush.bf16.msrb.mxu3 %v12752_v8  ;;  %v8175_v46 = vpop.permute.xlu2 %1775  ;;  %v12761_v39 = vld [vmem:[#allocation34_spill] sm:$0xff] }
 0x28d   :  { %1921 = vmatpush.bf16.msra.mxu0 %v1842_v27 }
 0x28e   :  { %1582 = vmatpush.bf16.msrb.mxu2 %v12727_v0  ;;  %1950 = vmatpush.bf16.msra.mxu1 %v1843_v30  ;;  %v8188_v60 = vpop.permute.xlu1 %1691  ;;  %v12759_v30 = vld [vmem:[#allocation38_spill] sm:$0xff] }
 0x28f   :  { %2344 = vrot.lane.b32.xlu1 %v7410_v26, %s7134_s1  ;;  %1765 = vrot.lane.b32.xlu0 %v12756_v34, %s7133_s8  ;;  %v1690_v53 = vpop.permute.xlu0 %1689  ;;  %v1836_v26 = vsel %vm1799_vm5, %v8076_v37, %v8074_v18 }
 0x290   :  { %1612 = vmatpush.bf16.msrb.mxu3 %v12756_v34  ;;  %v8206_v27 = vpop.f32.mrf.mxu0 }
 0x291   :  { %1922 = vmatpush.bf16.msra.mxu0 %v1835_v25  ;;  %12758 = vst [vmem:[#allocation46_spill] sm:$0xff] %v8206_v27  ;;  %v1828_v25 = vsel %vm1799_vm5, %v8017_v17, %v8099_v38  ;;  %v1822_v17 = vsel %vm1799_vm5, %v8126_v50, %v8124_v12 }
 0x292   :  { %1583 = vmatpush.bf16.msrb.mxu2 %v12732_v51  ;;  %1951 = vmatpush.bf16.msra.mxu1 %v1836_v26  ;;  %v8214_v37 = vpop.f32.mrf.mxu1  ;;  %v1829_v26 = vsel %vm1799_vm5, %v8099_v38, %v8097_v45  ;;  %v1821_v38 = vsel %vm1799_vm5, %v8041_v56, %v8126_v50  ;;  %v1814_v56 = vsel %vm1799_vm5, %v8065_v4, %v8157_v24 }
 0x293   :  { %2346 = vrot.lane.b32.xlu2 %v7456_v43, %s7134_s1  ;;  %12760 = vst [vmem:[#allocation16_spill] sm:$0xff] %v8214_v37  ;;  %1343 = vmatmul.bf16.gmra.mxu2 %v7817_v29  ;;  %v8225_v43 = vor.u32 %v6987_v42, %v6798_v62  ;;  %v12762_v62 = vld [vmem:[#allocation19_spill] sm:$0xff]  ;;  %v1815_v50 = vsel %vm1799_vm5, %v8157_v24, %v8155_v16  ;;  %v6802_v24 = vld [vmem:[%s12486_s3 + $0x40] sm:$0xf] }
 0x294   :  { %1613 = vmatpush.bf16.msrb.mxu3 %v12757_v40  ;;  %v8210_v57 = vpop.permute.xlu2 %1757  ;;  %v1807_v4 = vsel %vm1799_vm5, %v8086_v9, %v1690_v53 }
 0x295   :  { %1923 = vmatpush.bf16.msra.mxu0 %v1828_v25 }
 0x296   :  { %1584 = vmatpush.bf16.msrb.mxu2 %v12734_v23  ;;  %1952 = vmatpush.bf16.msra.mxu1 %v1829_v26  ;;  %v8227_v27 = vpop.permute.xlu1 %1675  ;;  %v12763_v26 = vld [vmem:[#allocation15_spill] sm:$0xff] }
 0x297   :  { %1749 = vrot.lane.b32.xlu1 %v12757_v40, %s7133_s8  ;;  %2348 = vrot.lane.b32.xlu0 %v7448_v41, %s7134_s1  ;;  %v1674_v37 = vpop.permute.xlu0 %1673 }
 0x298   :  { %1614 = vmatpush.bf16.msrb.mxu3 %v12759_v30  ;;  %1420 = vmatmul.bf16.gmra.mxu0 %v8225_v43  ;;  %v8247_v42 = vpop.f32.mrf.mxu0  ;;  %v1800_v9 = vsel %vm1799_vm5, %v8113_v58, %v1674_v37 }
 0x299   :  { %1449 = vmatmul.bf16.gmra.mxu1 %v8225_v43  ;;  %1924 = vmatpush.bf16.msra.mxu0 %v1821_v38 }
 0x29a   :  { %1585 = vmatpush.bf16.msrb.mxu2 %v12738_v28  ;;  %1953 = vmatpush.bf16.msra.mxu1 %v1822_v17 }
 0x29b   :  { %2328 = vrot.lane.b32.xlu2 %v7471_v54, %s7134_s1  ;;  %1372 = vmatmul.bf16.gmra.mxu3 %v7817_v29  ;;  %v8260_v25 = vpop.f32.mrf.mxu1 }
 0x29c   :  { %1615 = vmatpush.bf16.msrb.mxu3 %v12761_v39  ;;  %v8243_v41 = vpop.permute.xlu2 %1779 }
 0x29d   :  { %1925 = vmatpush.bf16.msra.mxu0 %v1814_v56 }
 0x29e   :  { %1586 = vmatpush.bf16.msrb.mxu2 %v12743_v15  ;;  %1954 = vmatpush.bf16.msra.mxu1 %v1815_v50  ;;  %v8258_v54 = vpop.permute.xlu1 %1773 }
 0x29f   :  { %2332 = vrot.lane.b32.xlu1 %v7501_v3, %s7134_s1  ;;  %2330 = vrot.lane.b32.xlu0 %v7516_v11, %s7134_s1  ;;  %v8264_v29 = vpop.permute.xlu0 %1791  ;;  %v1808_v3 = vsel %vm1799_vm5, %v1690_v53, %v8188_v60  ;;  %v6988_v11 = vld [vmem:[%s12486_s3 + $0x4c] sm:$0xf0]  ;;  %v1801_v53 = vsel %vm1799_vm5, %v1674_v37, %v8227_v27 }
 0x2a0   :  { %1616 = vmatpush.bf16.msrb.mxu3 %v12762_v62  ;;  %v8289_v17 = vor.u32 %v6988_v11, %v6802_v24  ;;  %v8293_v50 = vpop.f32.mrf.mxu0  ;;  %v1851_v11 = vsel %vm1799_vm5, %v8029_v44, %v8144_v33  ;;  %v1844_v44 = vsel %vm1799_vm5, %v8051_v2, %v8258_v54  ;;  %v1852_v2 = vsel %vm1799_vm5, %v8144_v33, %v8264_v29 }
 0x2a1   :  { %1926 = vmatpush.bf16.msra.mxu0 %v1807_v4  ;;  %v1845_v33 = vsel %vm1799_vm5, %v8258_v54, %v8175_v46 }
 0x2a2   :  { %1587 = vmatpush.bf16.msrb.mxu2 %v7389_v13  ;;  %1955 = vmatpush.bf16.msra.mxu1 %v1808_v3 }
 0x2a3   :  { %1733 = vrot.lane.b32.xlu2 %v12759_v30, %s7133_s8  ;;  %1348 = vmatmul.bf16.gmra.mxu2 %v7856_v1  ;;  %v8299_v58 = vpop.f32.mrf.mxu1 }
 0x2a4   :  { %1617 = vmatpush.bf16.msrb.mxu3 %v12763_v26  ;;  %v8280_v38 = vpop.permute.xlu2 %1761 }
 0x2a5   :  { %1927 = vmatpush.bf16.msra.mxu0 %v1800_v9 }
 0x2a6   :  { %1588 = vmatpush.bf16.msrb.mxu2 %v12751_v6  ;;  %1956 = vmatpush.bf16.msra.mxu1 %v1801_v53  ;;  %v8291_v56 = vpop.permute.xlu1 %1795 }
 0x2a7   :  { %2314 = vrot.lane.b32.xlu1 %v7474_v55, %s7134_s1  ;;  %2312 = vrot.lane.b32.xlu0 %v7423_v14, %s7134_s1  ;;  %v8297_v4 = vpop.permute.xlu0 %1793 }
 0x2a8   :  { %1425 = vmatmul.bf16.gmra.mxu0 %v8289_v17  ;;  %v8316_v3 = vpop.f32.mrf.mxu0 }
 0x2a9   :  { %1454 = vmatmul.bf16.gmra.mxu1 %v8289_v17 }
 0x2ab   :  { %2316 = vrot.lane.b32.xlu2 %v7468_v52, %s7134_s1  ;;  %1377 = vmatmul.bf16.gmra.mxu3 %v7856_v1  ;;  %v6806_v52 = vld [vmem:[%s12486_s3 + $0x60] sm:$0xf]  ;;  %v6989_v1 = vld [vmem:[%s12486_s3 + $0x6c] sm:$0xf0] }
 0x2ac   :  { %v8305_v55 = vpop.permute.xlu2 %1727  ;;  %v8318_v24 = vpop.f32.mrf.mxu1  ;;  %v8336_v9 = vor.u32 %v6989_v1, %v6806_v52 }
 0x2ad   :  { %12764 = vst [vmem:[#allocation23_spill] sm:$0xff] %v8318_v24 }
 0x2ae   :  { %v8310_v37 = vpop.permute.xlu1 %1777 }
 0x2af   :  { %2296 = vrot.lane.b32.xlu1 %v7483_v59, %s7134_s1  ;;  %1717 = vrot.lane.b32.xlu0 %v12761_v39, %s7133_s8  ;;  %v8314_v14 = vpop.permute.xlu0 %1759 }
 0x2b0   :  { %v8349_v52 = vpop.f32.mrf.mxu0 }
 0x2b1   :  { %12766 = vst [vmem:[#allocation30_spill] sm:$0xff] %v8349_v52 }
 0x2b3   :  { %2298 = vrot.lane.b32.xlu2 %v7534_v21, %s7134_s1  ;;  %1473 = vmatmul.bf16.vlgmr.msra.gmra.mxu2 %v8151_v20 }
 0x2b4   :  { %v8328_v59 = vpop.permute.xlu2 %1709  ;;  %1978 = vmatpush.bf16.msra.mxu2 %v1851_v11  ;;  %v8355_v11 = vpop.f32.mrf.mxu1 }
 0x2b5   :  { %12767 = vst [vmem:[#allocation38_spill] sm:$0xff] %v8355_v11  ;;  %v12768_v11 = vld [vmem:[#allocation20_spill] sm:$0xff] }
 0x2b6   :  { %v8338_v53 = vpop.permute.xlu1 %1743  ;;  %v8340_v24 = vpop.f32.mrf.mxu2 }
 0x2b7   :  { %1701 = vrot.lane.b32.xlu1 %v12762_v62, %s7133_s8  ;;  %12765 = vst [vmem:[#allocation39_spill] sm:$0xff] %v8340_v24  ;;  %2300 = vrot.lane.b32.xlu0 %v7513_v10, %s7134_s1  ;;  %v1742_v21 = vpop.permute.xlu0 %1741  ;;  %v1837_v10 = vsel %vm1799_vm5, %v8074_v18, %v8210_v57 }
 0x2b8   :  { %1430 = vmatmul.bf16.gmra.mxu0 %v8336_v9  ;;  %1979 = vmatpush.bf16.msra.mxu2 %v1844_v44  ;;  %v1830_v18 = vsel %vm1799_vm5, %v8097_v45, %v1742_v21  ;;  %v1838_v45 = vsel %vm1799_vm5, %v8210_v57, %v8314_v14  ;;  %v1831_v57 = vsel %vm1799_vm5, %v1742_v21, %v8338_v53 }
 0x2b9   :  { %1459 = vmatmul.bf16.gmra.mxu1 %v8336_v9 }
 0x2bb   :  { %2280 = vrot.lane.b32.xlu2 %v7433_v35, %s7134_s1  ;;  %1502 = vmatmul.bf16.vlgmr.msra.gmra.mxu3 %v8151_v20 }
 0x2bc   :  { %v8353_v1 = vpop.permute.xlu2 %1731  ;;  %1980 = vmatpush.bf16.msra.mxu2 %v1837_v10  ;;  %2007 = vmatpush.bf16.msra.mxu3 %v1852_v2 }
 0x2be   :  { %v8366_v44 = vpop.f32.mrf.mxu2  ;;  %v8372_v24 = vpop.f32.mrf.mxu3 }
 0x2bf   :  { %2284 = vrot.lane.b32.xlu1 %v7490_v61, %s7134_s1  ;;  %v1726_v35 = vpop.permute.xlu1 %1725  ;;  %2282 = vrot.lane.b32.xlu0 %v12768_v11, %s7134_s1  ;;  %v8370_v52 = vpop.permute.xlu0 %1763 }
 0x2c0   :  { %1981 = vmatpush.bf16.msra.mxu2 %v1830_v18  ;;  %2008 = vmatpush.bf16.msra.mxu3 %v1845_v33  ;;  %v1823_v11 = vsel %vm1799_vm5, %v8124_v12, %v1726_v35  ;;  %v1824_v21 = vsel %vm1799_vm5, %v1726_v35, %v8305_v55  ;;  %v1840_v35 = vsel %vm1799_vm5, %v8280_v38, %v8370_v52 }
 0x2c3   :  { %1685 = vrot.lane.b32.xlu2 %v12763_v26, %s7133_s8  ;;  %1478 = vmatmul.bf16.gmra.mxu2 %v8225_v43 }
 0x2c4   :  { %v8381_v61 = vpop.permute.xlu2 %1713  ;;  %v8383_v10 = vpop.f32.mrf.mxu0  ;;  %1982 = vmatpush.bf16.msra.mxu2 %v1823_v11  ;;  %2009 = vmatpush.bf16.msra.mxu3 %v1838_v45  ;;  %v1854_v11 = vsel %vm1799_vm5, %v8297_v4, %v8291_v56 }
 0x2c6   :  { %v8393_v54 = vpop.f32.mrf.mxu1  ;;  %v8399_v33 = vpop.f32.mrf.mxu2 }
 0x2c7   :  { %2266 = vrot.lane.b32.xlu1 %v7291_v32, %s7134_s1  ;;  %v8395_v2 = vpop.permute.xlu1 %1747  ;;  %2264 = vrot.lane.b32.xlu0 %v7279_v22, %s7134_s1  ;;  %v1746_v18 = vpop.permute.xlu0 %1745  ;;  %v1816_v32 = vsel %vm1799_vm5, %v8155_v16, %v8328_v59  ;;  %v1853_v22 = vsel %vm1799_vm5, %v8264_v29, %v8297_v4  ;;  %v1846_v29 = vsel %vm1799_vm5, %v8175_v46, %v8310_v37 }
 0x2c8   :  { %v8401_v12 = vpop.f32.mrf.mxu3  ;;  %1531 = vmatmul.bf16.vlgmr.msrb.gmra.mxu0 %v8151_v20  ;;  %1983 = vmatpush.bf16.msra.mxu2 %v1816_v32 }
 0x2c9   :  { %1560 = vmatmul.bf16.vlgmr.msrb.gmra.mxu1 %v8151_v20  ;;  %2010 = vmatpush.bf16.msra.mxu3 %v1831_v57 }
 0x2ca   :  { %2036 = vmatpush.bf16.msrb.mxu0 %v1853_v22  ;;  %2065 = vmatpush.bf16.msrb.mxu1 %v1854_v11 }
 0x2cb   :  { %2268 = vrot.lane.b32.xlu2 %v7307_v49, %s7134_s1  ;;  %1507 = vmatmul.bf16.gmra.mxu3 %v8225_v43  ;;  %v1847_v49 = vsel %vm1799_vm5, %v8310_v37, %v8243_v41  ;;  %v1839_v37 = vsel %vm1799_vm5, %v8314_v14, %v8280_v38  ;;  %v1832_v14 = vsel %vm1799_vm5, %v8338_v53, %v1746_v18 }
 0x2cc   :  { %v8420_v16 = vpop.f32.mrf.mxu0  ;;  %v1833_v38 = vsel %vm1799_vm5, %v1746_v18, %v8395_v2 }
 0x2cd   :  { %v8418_v45 = vpop.permute.xlu2 %1679  ;;  %12769 = vst [vmem:[#allocation34_spill] sm:$0xff] %v8420_v16  ;;  %2011 = vmatpush.bf16.msra.mxu3 %v1824_v21 }
 0x2ce   :  { %v8433_v4 = vpop.f32.mrf.mxu1  ;;  %2037 = vmatpush.bf16.msrb.mxu0 %v1846_v29  ;;  %2066 = vmatpush.bf16.msrb.mxu1 %v1847_v49  ;;  %v8435_v22 = vpop.f32.mrf.mxu2 }
 0x2cf   :  { %2250 = vrot.lane.b32.xlu1 %v7237_v48, %s7134_s1  ;;  %12770 = vst [vmem:[#allocation19_spill] sm:$0xff] %v8433_v4  ;;  %v1730_v32 = vpop.permute.xlu1 %1729  ;;  %v1712_v57 = vpop.permute.xlu0 %1711  ;;  %2248 = vrot.lane.b32.xlu0 %v7235_v47, %s7134_s1 }
 0x2d0   :  { %v8439_v48 = vpop.f32.mrf.mxu3  ;;  %v1817_v46 = vsel %vm1799_vm5, %v8328_v59, %v1712_v57  ;;  %v1825_v18 = vsel %vm1799_vm5, %v8305_v55, %v1730_v32  ;;  %v1818_v55 = vsel %vm1799_vm5, %v1712_v57, %v8381_v61 }
 0x2d1   :  { %2012 = vmatpush.bf16.msra.mxu3 %v1817_v46  ;;  %v1826_v46 = vsel %vm1799_vm5, %v1730_v32, %v8353_v1 }
 0x2d2   :  { %2038 = vmatpush.bf16.msrb.mxu0 %v1839_v37  ;;  %2067 = vmatpush.bf16.msrb.mxu1 %v1840_v35 }
 0x2d3   :  { %2252 = vrot.lane.b32.xlu2 %v7263_v7, %s7134_s1  ;;  %1483 = vmatmul.bf16.gmra.mxu2 %v8289_v17 }
 0x2d4   :  { %v8453_v11 = vpop.f32.mrf.mxu0 }
 0x2d5   :  { %v8451_v47 = vpop.permute.xlu2 %1681  ;;  %12771 = vst [vmem:[#allocation15_spill] sm:$0xff] %v8453_v11 }
 0x2d6   :  { %v8462_v59 = vpop.f32.mrf.mxu1  ;;  %2039 = vmatpush.bf16.msrb.mxu0 %v1832_v14  ;;  %2068 = vmatpush.bf16.msrb.mxu1 %v1833_v38  ;;  %v8464_v21 = vpop.f32.mrf.mxu2 }
 0x2d7   :  { %2368 = vrot.lane.b32.xlu1 %v7599_v19, %s7134_s1  ;;  %12772 = vst [vmem:[#allocation20_spill] sm:$0xff] %v8462_v59  ;;  %v1696_v7 = vpop.permute.xlu1 %1695  ;;  %2366 = vrot.lane.b32.xlu0 %v7594_v63, %s7134_s1  ;;  %v1694_v29 = vpop.permute.xlu0 %1693  ;;  %v12775_v63 = vld [vmem:[#allocation22_spill] sm:$0xff] }
 0x2d8   :  { %12773 = vst [vmem:[#allocation48_spill] sm:$0xff] %v8464_v21  ;;  %v8468_v49 = vpop.f32.mrf.mxu3  ;;  %1536 = vmatmul.bf16.gmra.mxu0 %v8225_v43  ;;  %v1809_v19 = vsel %vm1799_vm5, %v8188_v60, %v1694_v29  ;;  %v1810_v53 = vsel %vm1799_vm5, %v1694_v29, %v1696_v7  ;;  %v12777_v60 = vld [vmem:[#allocation41_spill] sm:$0xff] }
 0x2d9   :  { %12774 = vst [vmem:[#allocation49_spill] sm:$0xff] %v8468_v49  ;;  %1565 = vmatmul.bf16.gmra.mxu1 %v8225_v43  ;;  %1984 = vmatpush.bf16.msra.mxu2 %v1809_v19  ;;  %v12780_v29 = vld [vmem:[#allocation21_spill] sm:$0xff] }
 0x2da   :  { %2013 = vmatpush.bf16.msra.mxu3 %v1810_v53  ;;  %2040 = vmatpush.bf16.msrb.mxu0 %v1825_v18 }
 0x2db   :  { %2069 = vmatpush.bf16.msrb.mxu1 %v1826_v46  ;;  %2350 = vrot.lane.b32.xlu2 %v12775_v63, %s7134_s1 }
 0x2dc   :  { %v8483_v35 = vpop.f32.mrf.mxu0  ;;  %1512 = vmatmul.bf16.gmra.mxu3 %v8289_v17 }
 0x2dd   :  { %v8481_v37 = vpop.permute.xlu2 %1781  ;;  %12776 = vst [vmem:[#allocation22_spill] sm:$0xff] %v8483_v35 }
 0x2de   :  { %v8490_v32 = vpop.f32.mrf.mxu1  ;;  %2041 = vmatpush.bf16.msrb.mxu0 %v1818_v55  ;;  %v8492_v38 = vpop.f32.mrf.mxu2 }
 0x2df   :  { %2370 = vrot.lane.b32.xlu1 %v12777_v60, %s7134_s1  ;;  %12778 = vst [vmem:[#allocation41_spill] sm:$0xff] %v8490_v32  ;;  %v1678_v14 = vpop.permute.xlu1 %1677  ;;  %2352 = vrot.lane.b32.xlu0 %v12780_v29, %s7134_s1  ;;  %v12782_v60 = vld [vmem:[#allocation37_spill] sm:$0xff]  ;;  %v1804_v32 = vsel %vm1799_vm5, %v8418_v45, %v8451_v47 }
 0x2e0   :  { %12779 = vst [vmem:[#allocation50_spill] sm:$0xff] %v8492_v38  ;;  %v8498_v53 = vpop.f32.mrf.mxu3  ;;  %v1802_v18 = vsel %vm1799_vm5, %v8227_v27, %v1678_v14  ;;  %v1803_v46 = vsel %vm1799_vm5, %v1678_v14, %v8418_v45  ;;  %v12793_v45 = vld [vmem:[#allocation25_spill] sm:$0xff] }
 0x2e1   :  { %v8496_v19 = vpop.permute.xlu0 %1715  ;;  %12781 = vst [vmem:[#allocation21_spill] sm:$0xff] %v8498_v53  ;;  %1985 = vmatpush.bf16.msra.mxu2 %v1802_v18  ;;  %2014 = vmatpush.bf16.msra.mxu3 %v1803_v46 }
 0x2e2   :  { %v1819_v57 = vsel %vm1799_vm5, %v8381_v61, %v8496_v19 }
 0x2e3   :  { %2070 = vmatpush.bf16.msrb.mxu1 %v1819_v57  ;;  %2372 = vrot.lane.b32.xlu2 %v7641_v31, %s7134_s1  ;;  %v12787_v57 = vld [vmem:[#allocation28_spill] sm:$0xff] }
 0x2e4   :  { %1488 = vmatmul.bf16.gmra.mxu2 %v8336_v9  ;;  %v8514_v27 = vpop.f32.mrf.mxu0 }
 0x2e5   :  { %v8509_v63 = vpop.permute.xlu2 %2364  ;;  %12783 = vst [vmem:[#allocation37_spill] sm:$0xff] %v8514_v27 }
 0x2e6   :  { %v8516_v55 = vpop.f32.mrf.mxu1  ;;  %v8520_v29 = vpop.f32.mrf.mxu2 }
 0x2e7   :  { %2336 = vrot.lane.b32.xlu1 %v12782_v60, %s7134_s1  ;;  %12784 = vst [vmem:[#allocation51_spill] sm:$0xff] %v8516_v55  ;;  %v8518_v14 = vpop.permute.xlu1 %1699  ;;  %2334 = vrot.lane.b32.xlu0 %v12724_v5, %s7134_s1  ;;  %v12788_v5 = vld [vmem:[#allocation26_spill] sm:$0xff] }
 0x2e8   :  { %12785 = vst [vmem:[#allocation52_spill] sm:$0xff] %v8520_v29  ;;  %v8524_v31 = vpop.f32.mrf.mxu3  ;;  %1541 = vmatmul.bf16.gmra.mxu0 %v8289_v17 }
 0x2e9   :  { %v1698_v61 = vpop.permute.xlu0 %1697  ;;  %12786 = vst [vmem:[#allocation53_spill] sm:$0xff] %v8524_v31  ;;  %1570 = vmatmul.bf16.gmra.mxu1 %v8289_v17 }
 0x2ea   :  { %v1811_v18 = vsel %vm1799_vm5, %v1696_v7, %v1698_v61  ;;  %v1812_v46 = vsel %vm1799_vm5, %v1698_v61, %v8518_v14 }
 0x2eb   :  { %2042 = vmatpush.bf16.msrb.mxu0 %v1811_v18  ;;  %2071 = vmatpush.bf16.msrb.mxu1 %v1812_v46 }
 0x2ec   :  { %2354 = vrot.lane.b32.xlu2 %v12787_v57, %s7134_s1  ;;  %1517 = vmatmul.bf16.gmra.mxu3 %v8336_v9  ;;  %v8541_v7 = vpop.f32.mrf.mxu0 }
 0x2ed   :  { %v8533_v60 = vpop.permute.xlu2 %2346  ;;  %12789 = vst [vmem:[#allocation28_spill] sm:$0xff] %v8541_v7 }
 0x2ee   :  { %v8543_v35 = vpop.f32.mrf.mxu1  ;;  %v8545_v18 = vpop.f32.mrf.mxu2 }
 0x2ef   :  { %2318 = vrot.lane.b32.xlu1 %v12788_v5, %s7134_s1  ;;  %12790 = vst [vmem:[#allocation26_spill] sm:$0xff] %v8543_v35  ;;  %2043 = vmatpush.bf16.msrb.mxu0 %v1804_v32 }
 0x2f0   :  { %12791 = vst [vmem:[#allocation54_spill] sm:$0xff] %v8545_v18  ;;  %2356 = vrot.lane.b32.xlu0 %v12727_v0, %s7134_s1  ;;  %v8551_v57 = vpop.f32.mrf.mxu3 }
 0x2f1   :  { %v1798_v61 = vpop.permute.xlu1 %1797  ;;  %v8549_v46 = vpop.permute.xlu0 %1683  ;;  %12792 = vst [vmem:[#allocation55_spill] sm:$0xff] %v8551_v57 }
 0x2f2   :  { %v1805_v5 = vsel %vm1799_vm5, %v8451_v47, %v8549_v46  ;;  %v1855_v32 = vsel %vm1799_vm5, %v8291_v56, %v1798_v61  ;;  %v12799_v56 = vld [vmem:[#allocation35_spill] sm:$0xff] }
 0x2f3   :  { %2072 = vmatpush.bf16.msrb.mxu1 %v1805_v5  ;;  %v12796_v5 = vld [vmem:[#allocation43_spill] sm:$0xff] }
 0x2f4   :  { %2320 = vrot.lane.b32.xlu2 %v12793_v45, %s7134_s1  ;;  %1589 = vmatmul.bf16.vlgmr.msrb.gmra.mxu2 %v8151_v20  ;;  %v8565_v0 = vpop.f32.mrf.mxu0 }
 0x2f5   :  { %v8558_v35 = vpop.permute.xlu2 %2328  ;;  %2094 = vmatpush.bf16.msrb.mxu2 %v1855_v32  ;;  %12794 = vst [vmem:[#allocation25_spill] sm:$0xff] %v8565_v0  ;;  %v12803_v0 = vld [vmem:[#allocation40_spill] sm:$0xff] }
 0x2f6   :  { %v8567_v7 = vpop.f32.mrf.mxu1  ;;  %v8573_v16 = vpop.f32.mrf.mxu2 }
 0x2f7   :  { %2340 = vrot.lane.b32.xlu1 %v12732_v51, %s7134_s1  ;;  %12795 = vst [vmem:[#allocation56_spill] sm:$0xff] %v8567_v7  ;;  %v1848_v51 = vsel %vm1799_vm5, %v8243_v41, %v8481_v37 }
 0x2f8   :  { %2338 = vrot.lane.b32.xlu0 %v12796_v5, %s7134_s1  ;;  %v8571_v4 = vpop.f32.mrf.mxu3  ;;  %12798 = vst [vmem:[#allocation57_spill] sm:$0xff] %v8573_v16  ;;  %1546 = vmatmul.bf16.gmra.mxu0 %v8336_v9  ;;  %v12800_v5 = vld [vmem:[#allocation33_spill] sm:$0xff] }
 0x2f9   :  { %v2363_v47 = vpop.permute.xlu1 %2362  ;;  %v2361_v45 = vpop.permute.xlu0 %2360  ;;  %12797 = vst [vmem:[#allocation43_spill] sm:$0xff] %v8571_v4  ;;  %1575 = vmatmul.bf16.gmra.mxu1 %v8336_v9  ;;  %2095 = vmatpush.bf16.msrb.mxu2 %v1848_v51 }
 0x2fc   :  { %2302 = vrot.lane.b32.xlu2 %v12799_v56, %s7134_s1  ;;  %1618 = vmatmul.bf16.vlgmr.msrb.gmra.mxu3 %v8151_v20  ;;  %v8585_v16 = vpop.f32.mrf.mxu0  ;;  %v6994_v56 = vld [vmem:[%s12486_s3 + $0x14] sm:$0xf0] }
 0x2fd   :  { %v1734_v32 = vpop.permute.xlu2 %1733  ;;  %2123 = vmatpush.bf16.msrb.mxu3 %v1798_v61  ;;  %12801 = vst [vmem:[#allocation35_spill] sm:$0xff] %v8585_v16  ;;  %v6810_v61 = vld [vmem:[%s12486_s3 + $0x8] sm:$0xf] }
 0x2fe   :  { %v8587_v4 = vpop.f32.mrf.mxu1  ;;  %v8593_v18 = vpop.f32.mrf.mxu2 }
 0x2ff   :  { %2322 = vrot.lane.b32.xlu1 %v12800_v5, %s7134_s1  ;;  %12802 = vst [vmem:[#allocation33_spill] sm:$0xff] %v8587_v4 }
 0x300   :  { %2304 = vrot.lane.b32.xlu0 %v12803_v0, %s7134_s1  ;;  %v8591_v41 = vpop.f32.mrf.mxu3  ;;  %12805 = vst [vmem:[#allocation58_spill] sm:$0xff] %v8593_v18 }
 0x301   :  { %v2345_v7 = vpop.permute.xlu1 %2344  ;;  %12804 = vst [vmem:[#allocation40_spill] sm:$0xff] %v8591_v41  ;;  %v1766_v51 = vpop.permute.xlu0 %1765  ;;  %2124 = vmatpush.bf16.msrb.mxu3 %v8481_v37  ;;  %v12806_v37 = vld [vmem:[#allocation29_spill] sm:$0xff]  ;;  %v2426_v41 = vsel %vm2376_vm6, %v2361_v45, %v2363_v47 }
 0x302   :  { %v1841_v20 = vsel %vm1799_vm5, %v8370_v52, %v1766_v51  ;;  %v8611_v52 = vor.u32 %v6994_v56, %v6810_v61  ;;  %v12810_v56 = vld [vmem:[#allocation47_spill] sm:$0xff]  ;;  %v2419_v45 = vsel %vm2376_vm6, %v2345_v7, %v8533_v60 }
 0x303   :  { %2096 = vmatpush.bf16.msrb.mxu2 %v1841_v20  ;;  %v12807_v20 = vld [vmem:[#allocation24_spill] sm:$0xff] }
 0x304   :  { %2324 = vrot.lane.b32.xlu2 %v12734_v23, %s7134_s1  ;;  %1594 = vmatmul.bf16.gmra.mxu2 %v8225_v43 }
 0x305   :  { %v8606_v0 = vpop.permute.xlu2 %2316  ;;  %2125 = vmatpush.bf16.msrb.mxu3 %v1766_v51  ;;  %v8613_v5 = vpop.f32.mrf.mxu0  ;;  %v2427_v51 = vsel %vm2376_vm6, %v2363_v47, %v8509_v63 }
 0x306   :  { %v8615_v18 = vpop.f32.mrf.mxu1  ;;  %v8626_v61 = vpop.f32.mrf.mxu2 }
 0x307   :  { %2288 = vrot.lane.b32.xlu1 %v12806_v37, %s7134_s1  ;;  %12809 = vst [vmem:[#allocation24_spill] sm:$0xff] %v8626_v61 }
 0x308   :  { %2286 = vrot.lane.b32.xlu0 %v12807_v20, %s7134_s1  ;;  %v8619_v23 = vpop.f32.mrf.mxu3  ;;  %1928 = vmatmul.bf16.vlgmr.msra.gmra.mxu0 %v8611_v52 }
 0x309   :  { %v1750_v4 = vpop.permute.xlu1 %1749  ;;  %12808 = vst [vmem:[#allocation29_spill] sm:$0xff] %v8619_v23  ;;  %v8624_v37 = vpop.permute.xlu0 %2348  ;;  %1957 = vmatmul.bf16.vlgmr.msra.gmra.mxu1 %v8611_v52  ;;  %2497 = vmatpush.bf16.msra.mxu0 %v2426_v41  ;;  %v1827_v41 = vsel %vm1799_vm5, %v8353_v1, %v1734_v32  ;;  %v6814_v1 = vld [vmem:[%s12486_s3 + $0x28] sm:$0xf] }
 0x30a   :  { %v1834_v16 = vsel %vm1799_vm5, %v8395_v2, %v1750_v4  ;;  %2126 = vmatpush.bf16.msrb.mxu3 %v1750_v4  ;;  %2526 = vmatpush.bf16.msra.mxu1 %v2427_v51  ;;  %v2420_v4 = vsel %vm2376_vm6, %v8533_v60, %v8624_v37 }
 0x30b   :  { %2097 = vmatpush.bf16.msrb.mxu2 %v1834_v16 }
 0x30c   :  { %2306 = vrot.lane.b32.xlu2 %v12810_v56, %s7134_s1  ;;  %1623 = vmatmul.bf16.gmra.mxu3 %v8225_v43 }
 0x30d   :  { %v8634_v2 = vpop.permute.xlu2 %2298  ;;  %2498 = vmatpush.bf16.msra.mxu0 %v2419_v45  ;;  %v8644_v16 = vpop.f32.mrf.mxu0 }
 0x30e   :  { %2127 = vmatpush.bf16.msrb.mxu3 %v1734_v32  ;;  %v8646_v47 = vpop.f32.mrf.mxu1  ;;  %2527 = vmatpush.bf16.msra.mxu1 %v2420_v4  ;;  %v8656_v20 = vpop.f32.mrf.mxu2  ;;  %v6995_v32 = vld [vmem:[%s12486_s3 + $0x34] sm:$0xf0] }
 0x30f   :  { %2270 = vrot.lane.b32.xlu1 %v12740_v36, %s7134_s1  ;;  %2098 = vmatpush.bf16.msrb.mxu2 %v1827_v41  ;;  %12812 = vst [vmem:[#allocation59_spill] sm:$0xff] %v8656_v20 }
 0x310   :  { %2308 = vrot.lane.b32.xlu0 %v12738_v28, %s7134_s1  ;;  %v8654_v36 = vpop.f32.mrf.mxu3  ;;  %v12813_v28 = vld [vmem:[#allocation17_spill] sm:$0xff] }
 0x311   :  { %v8650_v43 = vpop.permute.xlu1 %2332  ;;  %12811 = vst [vmem:[#allocation47_spill] sm:$0xff] %v8654_v36  ;;  %v2331_v7 = vpop.permute.xlu0 %2330  ;;  %v12819_v36 = vld [vmem:[#allocation14_spill] sm:$0xff] }
 0x312   :  { %v2412_v60 = vsel %vm2376_vm6, %v8558_v35, %v2331_v7  ;;  %v2413_v51 = vsel %vm2376_vm6, %v2331_v7, %v8650_v43  ;;  %v8675_v35 = vor.u32 %v6995_v32, %v6814_v1  ;;  %v12814_v7 = vld [vmem:[#allocation31_spill] sm:$0xff] }
 0x313   :  { %2499 = vmatpush.bf16.msra.mxu0 %v2412_v60  ;;  %2528 = vmatpush.bf16.msra.mxu1 %v2413_v51  ;;  %v12817_v1 = vld [vmem:[#allocation11_spill] sm:$0xff] }
 0x314   :  { %2272 = vrot.lane.b32.xlu2 %v12813_v28, %s7134_s1  ;;  %1599 = vmatmul.bf16.gmra.mxu2 %v8289_v17 }
 0x315   :  { %v8670_v56 = vpop.permute.xlu2 %2280  ;;  %v8677_v45 = vpop.f32.mrf.mxu0 }
 0x316   :  { %v8679_v4 = vpop.f32.mrf.mxu1  ;;  %v8687_v20 = vpop.f32.mrf.mxu2 }
 0x317   :  { %2292 = vrot.lane.b32.xlu1 %v12743_v15, %s7134_s1  ;;  %12816 = vst [vmem:[#allocation31_spill] sm:$0xff] %v8687_v20 }
 0x318   :  { %2290 = vrot.lane.b32.xlu0 %v12814_v7, %s7134_s1  ;;  %v8683_v60 = vpop.f32.mrf.mxu3  ;;  %1933 = vmatmul.bf16.gmra.mxu0 %v8675_v35  ;;  %v12818_v7 = vld [vmem:[#allocation18_spill] sm:$0xff] }
 0x319   :  { %v2315_v41 = vpop.permute.xlu1 %2314  ;;  %12815 = vst [vmem:[#allocation17_spill] sm:$0xff] %v8683_v60  ;;  %v2313_v28 = vpop.permute.xlu0 %2312  ;;  %1962 = vmatmul.bf16.gmra.mxu1 %v8675_v35 }
 0x31a   :  { %v2406_v51 = vsel %vm2376_vm6, %v2315_v41, %v8606_v0  ;;  %v2405_v15 = vsel %vm2376_vm6, %v2313_v28, %v2315_v41 }
 0x31b   :  { %2529 = vmatpush.bf16.msra.mxu1 %v2406_v51  ;;  %2500 = vmatpush.bf16.msra.mxu0 %v2405_v15 }
 0x31c   :  { %2254 = vrot.lane.b32.xlu2 %v12817_v1, %s7134_s1  ;;  %1628 = vmatmul.bf16.gmra.mxu3 %v8289_v17  ;;  %v6818_v1 = vld [vmem:[%s12486_s3 + $0x48] sm:$0xf] }
 0x31d   :  { %v1686_v32 = vpop.permute.xlu2 %1685  ;;  %v8697_v60 = vpop.f32.mrf.mxu0 }
 0x31e   :  { %v8699_v23 = vpop.f32.mrf.mxu1  ;;  %v8707_v15 = vpop.f32.mrf.mxu2 }
 0x31f   :  { %2274 = vrot.lane.b32.xlu1 %v12818_v7, %s7134_s1  ;;  %12821 = vst [vmem:[#allocation18_spill] sm:$0xff] %v8707_v15  ;;  %v12822_v15 = vld [vmem:[#allocation13_spill] sm:$0xff] }
 0x320   :  { %2256 = vrot.lane.b32.xlu0 %v12819_v36, %s7134_s1  ;;  %v8703_v41 = vpop.f32.mrf.mxu3  ;;  %v6996_v36 = vld [vmem:[%s12486_s3 + $0x54] sm:$0xf0] }
 0x321   :  { %v2297_v20 = vpop.permute.xlu1 %2296  ;;  %12820 = vst [vmem:[#allocation11_spill] sm:$0xff] %v8703_v41  ;;  %v1718_v28 = vpop.permute.xlu0 %1717 }
 0x322   :  { %v2398_v51 = vsel %vm2376_vm6, %v2297_v20, %v8634_v2  ;;  %2128 = vmatpush.bf16.msrb.mxu3 %v1718_v28  ;;  %v1820_v17 = vsel %vm1799_vm5, %v8496_v19, %v1718_v28  ;;  %v8722_v20 = vor.u32 %v6996_v36, %v6818_v1 }
 0x323   :  { %2501 = vmatpush.bf16.msra.mxu0 %v2398_v51  ;;  %2099 = vmatpush.bf16.msrb.mxu2 %v1820_v17 }
 0x324   :  { %2276 = vrot.lane.b32.xlu2 %v7389_v13, %s7134_s1  ;;  %1604 = vmatmul.bf16.gmra.mxu2 %v8336_v9 }
 0x325   :  { %v8724_v19 = vpop.permute.xlu2 %2268  ;;  %v8726_v7 = vpop.f32.mrf.mxu0 }
 0x326   :  { %v8728_v51 = vpop.f32.mrf.mxu1 }
 0x327   :  { %2260 = vrot.lane.b32.xlu1 %v12751_v6, %s7134_s1  ;;  %v8738_v6 = vpop.f32.mrf.mxu2 }
 0x328   :  { %2258 = vrot.lane.b32.xlu0 %v12822_v15, %s7134_s1  ;;  %v8732_v17 = vpop.f32.mrf.mxu3  ;;  %12824 = vst [vmem:[#allocation13_spill] sm:$0xff] %v8738_v6  ;;  %1938 = vmatmul.bf16.gmra.mxu0 %v8722_v20  ;;  %v12825_v15 = vld [vmem:[#allocation42_spill] sm:$0xff] }
 0x329   :  { %v1702_v28 = vpop.permute.xlu1 %1701  ;;  %12823 = vst [vmem:[#allocation14_spill] sm:$0xff] %v8732_v17  ;;  %v8736_v41 = vpop.permute.xlu0 %2300  ;;  %1967 = vmatmul.bf16.gmra.mxu1 %v8722_v20 }
 0x32a   :  { %2129 = vmatpush.bf16.msrb.mxu3 %v1702_v28  ;;  %v1813_v13 = vsel %vm1799_vm5, %v8518_v14, %v1702_v28  ;;  %v2399_v1 = vsel %vm2376_vm6, %v8634_v2, %v8736_v41  ;;  %v1806_v14 = vsel %vm1799_vm5, %v8549_v46, %v1686_v32  ;;  %vm6527_vm5 = vcmask 1040384  }
 0x32b   :  { %2100 = vmatpush.bf16.msrb.mxu2 %v1813_v13  ;;  %2530 = vmatpush.bf16.msra.mxu1 %v2399_v1 }
 0x32c   :  { %2374 = vrot.lane.b32.xlu2 %v12825_v15, %s7134_s1  ;;  %1633 = vmatmul.bf16.gmra.mxu3 %v8336_v9 }
 0x32d   :  { %v8752_v36 = vpop.permute.xlu2 %2252  ;;  %v8754_v28 = vpop.f32.mrf.mxu0 }
 0x32e   :  { %2130 = vmatpush.bf16.msrb.mxu3 %v1686_v32  ;;  %v8756_v13 = vpop.f32.mrf.mxu1  ;;  %v6822_v32 = vld [vmem:[%s12486_s3 + $0x68] sm:$0xf] }
 0x32f   :  { %2342 = vrot.lane.b32.xlu1 %v12756_v34, %s7134_s1  ;;  %2101 = vmatpush.bf16.msrb.mxu2 %v1806_v14  ;;  %v8764_v15 = vpop.f32.mrf.mxu2  ;;  %v6997_v14 = vld [vmem:[%s12486_s3 + $0x74] sm:$0xf0] }
 0x330   :  { %2358 = vrot.lane.b32.xlu0 %v12752_v8, %s7134_s1  ;;  %v8762_v1 = vpop.f32.mrf.mxu3  ;;  %12827 = vst [vmem:[#allocation60_spill] sm:$0xff] %v8764_v15  ;;  %v8781_v8 = vor.u32 %v6997_v14, %v6822_v32  ;;  %v2799_v32 = vld [vmem:[%s12487_s4 + $0x30] sm:$0xff] }
 0x331   :  { %v8758_v2 = vpop.permute.xlu1 %2284  ;;  %12826 = vst [vmem:[#allocation42_spill] sm:$0xff] %v8762_v1  ;;  %v2283_v9 = vpop.permute.xlu0 %2282 }
 0x332   :  { %v2391_v34 = vsel %vm2376_vm6, %v8670_v56, %v2283_v9  ;;  %v2392_v46 = vsel %vm2376_vm6, %v2283_v9, %v8758_v2 }
 0x333   :  { %2502 = vmatpush.bf16.msra.mxu0 %v2391_v34  ;;  %2531 = vmatpush.bf16.msra.mxu1 %v2392_v46 }
 0x334   :  { %2326 = vrot.lane.b32.xlu2 %v12757_v40, %s7134_s1  ;;  %1986 = vmatmul.bf16.vlgmr.msra.gmra.mxu2 %v8611_v52 }
 0x335   :  { %v8783_v56 = vpop.permute.xlu2 %2350  ;;  %v8785_v9 = vpop.f32.mrf.mxu0 }
 0x336   :  { %v8787_v15 = vpop.f32.mrf.mxu1 }
 0x337   :  { %2294 = vrot.lane.b32.xlu1 %v12761_v39, %s7134_s1  ;;  %v8795_v1 = vpop.f32.mrf.mxu2 }
 0x338   :  { %2310 = vrot.lane.b32.xlu0 %v12759_v30, %s7134_s1  ;;  %v8791_v34 = vpop.f32.mrf.mxu3  ;;  %1943 = vmatmul.bf16.gmra.mxu0 %v8781_v8 }
 0x339   :  { %v2267_v17 = vpop.permute.xlu1 %2266  ;;  %12828 = vst [vmem:[#allocation61_spill] sm:$0xff] %v8791_v34  ;;  %v2265_v46 = vpop.permute.xlu0 %2264  ;;  %1972 = vmatmul.bf16.gmra.mxu1 %v8781_v8 }
 0x33a   :  { %v2385_v40 = vsel %vm2376_vm6, %v2267_v17, %v8724_v19  ;;  %v2384_v39 = vsel %vm2376_vm6, %v2265_v46, %v2267_v17 }
 0x33b   :  { %2532 = vmatpush.bf16.msra.mxu1 %v2385_v40  ;;  %2503 = vmatpush.bf16.msra.mxu0 %v2384_v39  ;;  %v2798_v39 = vld [vmem:[%s12487_s4 + $0x28] sm:$0xff] }
 0x33c   :  { %2278 = vrot.lane.b32.xlu2 %v12762_v62, %s7134_s1  ;;  %2015 = vmatmul.bf16.vlgmr.msra.gmra.mxu3 %v8611_v52 }
 0x33d   :  { %v8806_v30 = vpop.permute.xlu2 %2372  ;;  %v8808_v14 = vpop.f32.mrf.mxu0 }
 0x33e   :  { %v8810_v34 = vpop.f32.mrf.mxu1 }
 0x33f   :  { %2833 = vperm.xlu1 %7042, %v2799_v32   ;;  %v8818_v46 = vpop.f32.mrf.mxu2 }
 0x340   :  { %2262 = vrot.lane.b32.xlu0 %v12763_v26, %s7134_s1  ;;  %v8814_v17 = vpop.f32.mrf.mxu3  ;;  %v2797_v26 = vld [vmem:[%s12487_s4 + $0x20] sm:$0xff] }
 0x341   :  { %v2251_v6 = vpop.permute.xlu1 %2250  ;;  %v2249_v62 = vpop.permute.xlu0 %2248 }
 0x342   :  { %v2378_v40 = vsel %vm2376_vm6, %v2251_v6, %v8752_v36  ;;  %v2377_v32 = vsel %vm2376_vm6, %v2249_v62, %v2251_v6  ;;  %v2793_v62 = vld [vmem:[%s12487_s4] sm:$0xff] }
 0x343   :  { %2533 = vmatpush.bf16.msra.mxu1 %v2378_v40  ;;  %2504 = vmatpush.bf16.msra.mxu0 %v2377_v32 }
 0x344   :  { %1991 = vmatmul.bf16.gmra.mxu2 %v8675_v35 }
 0x345   :  { %v8830_v57 = vpop.f32.mrf.mxu0 }
 0x346   :  { %v8828_v61 = vpop.permute.xlu2 %2354  ;;  %v8832_v40 = vpop.f32.mrf.mxu1 }
 0x347   :  { %2828 = vperm.xlu1 %7042, %v2798_v39   ;;  %v8836_v55 = vpop.f32.mrf.mxu2 }
 0x348   :  { %2823 = vperm.xlu0 %7041, %v2797_v26   ;;  %v8834_v31 = vpop.f32.mrf.mxu3  ;;  %2044 = vmatmul.bf16.vlgmr.msrb.gmra.mxu0 %v8611_v52  ;;  %v2796_v26 = vld [vmem:[%s12487_s4 + $0x18] sm:$0xff] }
 0x349   :  { %v2369_v29 = vpop.permute.xlu1 %2368  ;;  %2073 = vmatmul.bf16.vlgmr.msrb.gmra.mxu1 %v8611_v52  ;;  %v2367_v6 = vpop.permute.xlu0 %2366 }
 0x34a   :  { %v2428_v39 = vsel %vm2376_vm6, %v8509_v63, %v2367_v6  ;;  %v2429_v32 = vsel %vm2376_vm6, %v2367_v6, %v2369_v29  ;;  %v2421_v63 = vsel %vm2376_vm6, %v8624_v37, %v8783_v56 }
 0x34b   :  { %2555 = vmatpush.bf16.msra.mxu2 %v2428_v39  ;;  %2584 = vmatpush.bf16.msra.mxu3 %v2429_v32 }
 0x34c   :  { %2020 = vmatmul.bf16.gmra.mxu3 %v8675_v35 }
 0x34d   :  { %v8852_v38 = vpop.f32.mrf.mxu0 }
 0x34e   :  { %v8850_v27 = vpop.permute.xlu2 %2320  ;;  %12829 = vst [vmem:[#allocation62_spill] sm:$0xff] %v8852_v38  ;;  %v8854_v53 = vpop.f32.mrf.mxu1 }
 0x34f   :  { %2803 = vperm.xlu1 %7042, %v2793_v62   ;;  %12830 = vst [vmem:[#allocation63_spill] sm:$0xff] %v8854_v53  ;;  %2556 = vmatpush.bf16.msra.mxu2 %v2421_v63  ;;  %v8864_v21 = vpop.f32.mrf.mxu2 }
 0x350   :  { %2818 = vperm.xlu0 %7041, %v2796_v26   ;;  %v8859_v39 = vpop.f32.mrf.mxu3 }
 0x351   :  { %v2371_v6 = vpop.permute.xlu1 %2370  ;;  %v2353_v38 = vpop.permute.xlu0 %2352 }
 0x352   :  { %v2430_v62 = vsel %vm2376_vm6, %v2369_v29, %v2371_v6  ;;  %v2431_v32 = vsel %vm2376_vm6, %v2371_v6, %v8806_v30  ;;  %v2422_v53 = vsel %vm2376_vm6, %v8783_v56, %v2353_v38  ;;  %v2423_v37 = vsel %vm2376_vm6, %v2353_v38, %v8828_v61 }
 0x353   :  { %2613 = vmatpush.bf16.msrb.mxu0 %v2430_v62  ;;  %2642 = vmatpush.bf16.msrb.mxu1 %v2431_v32 }
 0x354   :  { %2585 = vmatpush.bf16.msra.mxu3 %v2422_v53  ;;  %1996 = vmatmul.bf16.gmra.mxu2 %v8722_v20 }
 0x355   :  { %v8871_v29 = vpop.f32.mrf.mxu0 }
 0x356   :  { %v2303_v26 = vpop.permute.xlu2 %2302  ;;  %12831 = vst [vmem:[#allocation64_spill] sm:$0xff] %v8871_v29  ;;  %v8873_v63 = vpop.f32.mrf.mxu1 }
 0x357   :  { %2614 = vmatpush.bf16.msrb.mxu0 %v2423_v37  ;;  %12832 = vst [vmem:[#allocation65_spill] sm:$0xff] %v8873_v63  ;;  %v8877_v62 = vpop.f32.mrf.mxu2 }
 0x358   :  { %v8875_v49 = vpop.f32.mrf.mxu3  ;;  %12834 = vst [vmem:[#allocation67_spill] sm:$0xff] %v8877_v62  ;;  %2049 = vmatmul.bf16.gmra.mxu0 %v8675_v35 }
 0x359   :  { %v2337_v6 = vpop.permute.xlu1 %2336  ;;  %12833 = vst [vmem:[#allocation66_spill] sm:$0xff] %v8875_v49  ;;  %2078 = vmatmul.bf16.gmra.mxu1 %v8675_v35  ;;  %v2335_v53 = vpop.permute.xlu0 %2334 }
 0x35a   :  { %v2414_v38 = vsel %vm2376_vm6, %v8650_v43, %v2335_v53  ;;  %v2415_v56 = vsel %vm2376_vm6, %v2335_v53, %v2337_v6 }
 0x35b   :  { %2557 = vmatpush.bf16.msra.mxu2 %v2414_v38  ;;  %2586 = vmatpush.bf16.msra.mxu3 %v2415_v56 }
 0x35c   :  { %2025 = vmatmul.bf16.gmra.mxu3 %v8722_v20 }
 0x35d   :  { %v8887_v37 = vpop.f32.mrf.mxu0 }
 0x35e   :  { %v8885_v32 = vpop.permute.xlu2 %2324  ;;  %12835 = vst [vmem:[#allocation68_spill] sm:$0xff] %v8887_v37  ;;  %v8889_v49 = vpop.f32.mrf.mxu1 }
 0x35f   :  { %12836 = vst [vmem:[#allocation69_spill] sm:$0xff] %v8889_v49  ;;  %v8897_v53 = vpop.f32.mrf.mxu2  ;;  %v2400_v49 = vsel %vm2376_vm6, %v8736_v41, %v2303_v26 }
 0x360   :  { %v8891_v63 = vpop.f32.mrf.mxu3  ;;  %12838 = vst [vmem:[#allocation71_spill] sm:$0xff] %v8897_v53 }
 0x361   :  { %v2319_v62 = vpop.permute.xlu1 %2318  ;;  %12837 = vst [vmem:[#allocation70_spill] sm:$0xff] %v8891_v63 }
 0x362   :  { %v2407_v59 = vsel %vm2376_vm6, %v8606_v0, %v2319_v62  ;;  %v2408_v43 = vsel %vm2376_vm6, %v2319_v62, %v8850_v27  ;;  %v8899_v38 = vpop.permute.xlu0 %2356 }
 0x363   :  { %2558 = vmatpush.bf16.msra.mxu2 %v2407_v59  ;;  %2587 = vmatpush.bf16.msra.mxu3 %v2408_v43  ;;  %v2424_v56 = vsel %vm2376_vm6, %v8828_v61, %v8899_v38 }
 0x364   :  { %2643 = vmatpush.bf16.msrb.mxu1 %v2424_v56  ;;  %2001 = vmatmul.bf16.gmra.mxu2 %v8781_v8 }
 0x365   :  { %v8907_v37 = vpop.f32.mrf.mxu0 }
 0x366   :  { %v2307_v0 = vpop.permute.xlu2 %2306  ;;  %12839 = vst [vmem:[#allocation72_spill] sm:$0xff] %v8907_v37  ;;  %v8909_v62 = vpop.f32.mrf.mxu1 }
 0x367   :  { %2559 = vmatpush.bf16.msra.mxu2 %v2400_v49  ;;  %12840 = vst [vmem:[#allocation73_spill] sm:$0xff] %v8909_v62  ;;  %v8915_v53 = vpop.f32.mrf.mxu2 }
 0x368   :  { %v8913_v43 = vpop.f32.mrf.mxu3  ;;  %12842 = vst [vmem:[#allocation75_spill] sm:$0xff] %v8915_v53  ;;  %2054 = vmatmul.bf16.gmra.mxu0 %v8722_v20 }
 0x369   :  { %v8911_v59 = vpop.permute.xlu1 %2340  ;;  %12841 = vst [vmem:[#allocation74_spill] sm:$0xff] %v8913_v43  ;;  %2083 = vmatmul.bf16.gmra.mxu1 %v8722_v20 }
 0x36a   :  { %v2339_v61 = vpop.permute.xlu0 %2338 }
 0x36b   :  { %v2416_v56 = vsel %vm2376_vm6, %v2337_v6, %v2339_v61  ;;  %v2417_v41 = vsel %vm2376_vm6, %v2339_v61, %v8911_v59 }
 0x36c   :  { %2615 = vmatpush.bf16.msrb.mxu0 %v2416_v56  ;;  %2644 = vmatpush.bf16.msrb.mxu1 %v2417_v41 }
 0x36d   :  { %2030 = vmatmul.bf16.gmra.mxu3 %v8781_v8  ;;  %v8925_v62 = vpop.f32.mrf.mxu0 }
 0x36e   :  { %v8923_v49 = vpop.permute.xlu2 %2272  ;;  %12843 = vst [vmem:[#allocation76_spill] sm:$0xff] %v8925_v62  ;;  %v8927_v43 = vpop.f32.mrf.mxu1 }
 0x36f   :  { %12844 = vst [vmem:[#allocation77_spill] sm:$0xff] %v8927_v43  ;;  %v8935_v61 = vpop.f32.mrf.mxu2 }
 0x370   :  { %v8929_v37 = vpop.f32.mrf.mxu3  ;;  %12846 = vst [vmem:[#allocation79_spill] sm:$0xff] %v8935_v61 }
 0x371   :  { %v2323_v53 = vpop.permute.xlu1 %2322  ;;  %12845 = vst [vmem:[#allocation78_spill] sm:$0xff] %v8929_v37 }
 0x372   :  { %v2409_v63 = vsel %vm2376_vm6, %v8850_v27, %v2323_v53  ;;  %v2410_v6 = vsel %vm2376_vm6, %v2323_v53, %v8885_v32  ;;  %v2305_v56 = vpop.permute.xlu0 %2304 }
 0x373   :  { %2616 = vmatpush.bf16.msrb.mxu0 %v2409_v63  ;;  %2645 = vmatpush.bf16.msrb.mxu1 %v2410_v6  ;;  %v2401_v41 = vsel %vm2376_vm6, %v2303_v26, %v2305_v56  ;;  %v2402_v62 = vsel %vm2376_vm6, %v2305_v56, %v2307_v0 }
 0x374   :  { %2588 = vmatpush.bf16.msra.mxu3 %v2401_v41  ;;  %2102 = vmatmul.bf16.vlgmr.msrb.gmra.mxu2 %v8611_v52 }
 0x375   :  { %v8942_v37 = vpop.f32.mrf.mxu0 }
 0x376   :  { %v8940_v43 = vpop.permute.xlu2 %2254  ;;  %12847 = vst [vmem:[#allocation80_spill] sm:$0xff] %v8942_v37  ;;  %v8944_v27 = vpop.f32.mrf.mxu1 }
 0x377   :  { %2617 = vmatpush.bf16.msrb.mxu0 %v2402_v62  ;;  %12848 = vst [vmem:[#allocation81_spill] sm:$0xff] %v8944_v27  ;;  %v8948_v63 = vpop.f32.mrf.mxu2 }
 0x378   :  { %v8946_v29 = vpop.f32.mrf.mxu3  ;;  %12850 = vst [vmem:[#allocation83_spill] sm:$0xff] %v8948_v63  ;;  %2059 = vmatmul.bf16.gmra.mxu0 %v8781_v8 }
 0x379   :  { %v2289_v53 = vpop.permute.xlu1 %2288  ;;  %12849 = vst [vmem:[#allocation82_spill] sm:$0xff] %v8946_v29  ;;  %2088 = vmatmul.bf16.gmra.mxu1 %v8781_v8 }
 0x37a   :  { %v2287_v26 = vpop.permute.xlu0 %2286 }
 0x37b   :  { %v2393_v6 = vsel %vm2376_vm6, %v8758_v2, %v2287_v26  ;;  %v2394_v62 = vsel %vm2376_vm6, %v2287_v26, %v2289_v53 }
 0x37c   :  { %2560 = vmatpush.bf16.msra.mxu2 %v2393_v6  ;;  %2589 = vmatpush.bf16.msra.mxu3 %v2394_v62  ;;  %v6826_v6 = vld [vmem:[%s12486_s3 + $0xc] sm:$0xf]  ;;  %v6998_v62 = vld [vmem:[%s12486_s3 + $0x18] sm:$0xf0] }
 0x37d   :  { %2131 = vmatmul.bf16.vlgmr.msrb.gmra.mxu3 %v8611_v52  ;;  %v8958_v41 = vpop.f32.mrf.mxu0 }
 0x37e   :  { %v8956_v56 = vpop.permute.xlu2 %2276  ;;  %12851 = vst [vmem:[#allocation84_spill] sm:$0xff] %v8958_v41  ;;  %v8960_v29 = vpop.f32.mrf.mxu1 }
 0x37f   :  { %12852 = vst [vmem:[#allocation85_spill] sm:$0xff] %v8960_v29  ;;  %v8968_v26 = vpop.f32.mrf.mxu2  ;;  %v12855_v29 = vld [vmem:[#allocation36_spill] sm:$0xff] }
 0x380   :  { %v8962_v27 = vpop.f32.mrf.mxu3  ;;  %12854 = vst [vmem:[#allocation87_spill] sm:$0xff] %v8968_v26  ;;  %v12856_v26 = vld [vmem:[#allocation27_spill] sm:$0xff] }
 0x381   :  { %v2271_v63 = vpop.permute.xlu1 %2270  ;;  %12853 = vst [vmem:[#allocation86_spill] sm:$0xff] %v8962_v27  ;;  %v1446_v41 = vadd.f32 %v8615_v18, %v12856_v26 }
 0x382   :  { %v2386_v37 = vsel %vm2376_vm6, %v8724_v19, %v2271_v63  ;;  %v2387_v2 = vsel %vm2376_vm6, %v2271_v63, %v8923_v49  ;;  %v8970_v52 = vpop.permute.xlu0 %2308  ;;  %v1417_v63 = vadd.f32 %v8613_v5, %v12855_v29 }
 0x383   :  { %2561 = vmatpush.bf16.msra.mxu2 %v2386_v37  ;;  %2590 = vmatpush.bf16.msra.mxu3 %v2387_v2  ;;  %v2403_v19 = vsel %vm2376_vm6, %v2307_v0, %v8970_v52  ;;  %v2379_v37 = vsel %vm2376_vm6, %v8752_v36, %v8940_v43  ;;  %v8986_v2 = vor.u32 %v6998_v62, %v6826_v6  ;;  %v2800_v36 = vld [vmem:[%s12487_s4 + $0x38] sm:$0xff] }
 0x384   :  { %2646 = vmatpush.bf16.msrb.mxu1 %v2403_v19  ;;  %2107 = vmatmul.bf16.gmra.mxu2 %v8675_v35 }
 0x385   :  { %v1929_v61 = vpop.f32.mrf.mxu0  ;;  %2838 = vperm.xlu2 %7043, %v2800_v36  }
 0x386   :  { %v2375_v27 = vpop.permute.xlu2 %2374  ;;  %v8990_v11 = vadd.f32 %v1929_v61, %v1417_v63  ;;  %v1958_v0 = vpop.f32.mrf.mxu1  ;;  %v12859_v63 = vld [vmem:[#allocation32_spill] sm:$0xff] }
 0x387   :  { %2562 = vmatpush.bf16.msra.mxu2 %v2379_v37  ;;  %v2432_v5 = vsel %vm2376_vm6, %v8806_v30, %v2375_v27  ;;  %v8999_v6 = vadd.f32 %v1958_v0, %v1446_v41  ;;  %v9003_v18 = vpop.f32.mrf.mxu2  ;;  %v12858_v41 = vld [vmem:[#allocation44_spill] sm:$0xff]  ;;  %v1448_v37 = vadd.f32 %v8646_v47, %v12859_v63  ;;  %v12861_v63 = vld [vmem:[#allocation45_spill] sm:$0xff] }
 0x388   :  { %v9001_v62 = vpop.f32.mrf.mxu3  ;;  %2505 = vmatmul.bf16.vlgmr.msra.gmra.mxu0 %v8986_v2  ;;  %v1419_v19 = vadd.f32 %v8644_v16, %v12858_v41  ;;  %v6830_v41 = vld [vmem:[%s12486_s3 + $0x2c] sm:$0xf] }
 0x389   :  { %v8994_v29 = vpop.permute.xlu1 %2292  ;;  %12857 = vst [vmem:[#allocation36_spill] sm:$0xff] %v9001_v62  ;;  %2534 = vmatmul.bf16.vlgmr.msra.gmra.mxu1 %v8986_v2 }
 0x38a   :  { %v2291_v61 = vpop.permute.xlu0 %2290 }
 0x38b   :  { %2671 = vmatpush.bf16.msrb.mxu2 %v2432_v5  ;;  %v2395_v30 = vsel %vm2376_vm6, %v2289_v53, %v2291_v61  ;;  %v2396_v26 = vsel %vm2376_vm6, %v2291_v61, %v8994_v29  ;;  %v2795_v53 = vld [vmem:[%s12487_s4 + $0x10] sm:$0xff] }
 0x38c   :  { %2618 = vmatpush.bf16.msrb.mxu0 %v2395_v30  ;;  %2647 = vmatpush.bf16.msrb.mxu1 %v2396_v26 }
 0x38d   :  { %2136 = vmatmul.bf16.gmra.mxu3 %v8675_v35  ;;  %v1931_v0 = vpop.f32.mrf.mxu0  ;;  %2813 = vperm.xlu2 %7043, %v2795_v53  }
 0x38e   :  { %v9015_v5 = vadd.f32 %v1931_v0, %v1419_v19  ;;  %v1960_v36 = vpop.f32.mrf.mxu1  ;;  %v6999_v19 = vld [vmem:[%s12486_s3 + $0x38] sm:$0xf0]  ;;  %v12862_v0 = vld [vmem:[#allocation12_spill] sm:$0xff] }
 0x38f   :  { %v9020_v61 = vadd.f32 %v1960_v36, %v1448_v37  ;;  %v9028_v47 = vpop.f32.mrf.mxu2  ;;  %v9041_v37 = vor.u32 %v6999_v19, %v6830_v41  ;;  %v1451_v36 = vadd.f32 %v8679_v4, %v12862_v0  ;;  %v12866_v0 = vld [vmem:[#allocation16_spill] sm:$0xff] }
 0x390   :  { %v9022_v30 = vpop.f32.mrf.mxu3  ;;  %12860 = vst [vmem:[#allocation27_spill] sm:$0xff] %v9028_v47 }
 0x391   :  { %v2275_v62 = vpop.permute.xlu1 %2274 }
 0x392   :  { %v2388_v16 = vsel %vm2376_vm6, %v8923_v49, %v2275_v62  ;;  %v2389_v35 = vsel %vm2376_vm6, %v2275_v62, %v8956_v56  ;;  %v2257_v26 = vpop.permute.xlu0 %2256  ;;  %v1422_v62 = vadd.f32 %v8677_v45, %v12861_v63  ;;  %v12865_v63 = vld [vmem:[#allocation46_spill] sm:$0xff] }
 0x393   :  { %2619 = vmatpush.bf16.msrb.mxu0 %v2388_v16  ;;  %2648 = vmatpush.bf16.msrb.mxu1 %v2389_v35  ;;  %v2380_v49 = vsel %vm2376_vm6, %v8940_v43, %v2257_v26  ;;  %v2794_v43 = vld [vmem:[%s12487_s4 + $0x8] sm:$0xff] }
 0x394   :  { %2591 = vmatpush.bf16.msra.mxu3 %v2380_v49  ;;  %2112 = vmatmul.bf16.gmra.mxu2 %v8722_v20 }
 0x395   :  { %v1934_v53 = vpop.f32.mrf.mxu0  ;;  %2808 = vperm.xlu2 %7043, %v2794_v43  }
 0x396   :  { %v9045_v16 = vadd.f32 %v1934_v53, %v1422_v62  ;;  %v1963_v35 = vpop.f32.mrf.mxu1  ;;  %v1424_v62 = vadd.f32 %v8697_v60, %v12865_v63  ;;  %v6834_v60 = vld [vmem:[%s12486_s3 + $0x4c] sm:$0xf] }
 0x397   :  { %v9050_v49 = vadd.f32 %v1963_v35, %v1451_v36  ;;  %v1453_v36 = vadd.f32 %v8699_v23, %v12866_v0 }
 0x398   :  { %2700 = vmatpush.bf16.msrb.mxu3 %v2375_v27  ;;  %v9054_v45 = vpop.f32.mrf.mxu3  ;;  %v9056_v27 = vpop.f32.mrf.mxu2  ;;  %2510 = vmatmul.bf16.gmra.mxu0 %v9041_v37 }
 0x399   :  { %12863 = vst [vmem:[#allocation44_spill] sm:$0xff] %v9050_v49  ;;  %v9052_v47 = vpop.permute.xlu1 %2260  ;;  %2539 = vmatmul.bf16.gmra.mxu1 %v9041_v37 }
 0x39a   :  { %12864 = vst [vmem:[#allocation32_spill] sm:$0xff] %v9054_v45  ;;  %v2259_v4 = vpop.permute.xlu0 %2258 }
 0x39b   :  { %v2381_v41 = vsel %vm2376_vm6, %v2257_v26, %v2259_v4  ;;  %v2382_v19 = vsel %vm2376_vm6, %v2259_v4, %v9052_v47 }
 0x39c   :  { %2620 = vmatpush.bf16.msrb.mxu0 %v2381_v41  ;;  %2649 = vmatpush.bf16.msrb.mxu1 %v2382_v19  ;;  %v1427_v19 = vadd.f32 %v8726_v7, %v8247_v42 }
 0x39d   :  { %2141 = vmatmul.bf16.gmra.mxu3 %v8722_v20  ;;  %v1936_v53 = vpop.f32.mrf.mxu0  ;;  %v7000_v20 = vld [vmem:[%s12486_s3 + $0x58] sm:$0xf0] }
 0x39e   :  { %v9068_v35 = vadd.f32 %v1936_v53, %v1424_v62  ;;  %v1965_v43 = vpop.f32.mrf.mxu1  ;;  %v9087_v63 = vor.u32 %v7000_v20, %v6834_v60  ;;  %v1456_v62 = vadd.f32 %v8728_v51, %v8260_v25  ;;  %v1458_v60 = vadd.f32 %v8756_v13, %v8299_v58  ;;  %v6838_v58 = vld [vmem:[%s12486_s3 + $0x6c] sm:$0xf] }
 0x39f   :  { %v9070_v45 = vadd.f32 %v1965_v43, %v1453_v36  ;;  %v2327_v43 = vpop.permute.xlu2 %2326 }
 0x3a0   :  { %v9072_v26 = vpop.f32.mrf.mxu3  ;;  %v9074_v49 = vpop.f32.mrf.mxu2  ;;  %v2411_v25 = vsel %vm2376_vm6, %v8885_v32, %v2327_v43 }
 0x3a1   :  { %12867 = vst [vmem:[#allocation45_spill] sm:$0xff] %v9074_v49  ;;  %v2343_v41 = vpop.permute.xlu1 %2342 }
 0x3a2   :  { %v2359_v4 = vpop.permute.xlu0 %2358 }
 0x3a3   :  { %2701 = vmatpush.bf16.msrb.mxu3 %v2359_v4  ;;  %v2425_v23 = vsel %vm2376_vm6, %v8899_v38, %v2359_v4  ;;  %v2418_v38 = vsel %vm2376_vm6, %v8911_v59, %v2343_v41  ;;  %v1429_v59 = vadd.f32 %v8754_v28, %v8293_v50  ;;  %v7001_v28 = vld [vmem:[%s12486_s3 + $0x78] sm:$0xf0]  ;;  %s7135_s3 = smov 122  }
 0x3a4   :  { %2672 = vmatpush.bf16.msrb.mxu2 %v2425_v23 }
 0x3a5   :  { %2117 = vmatmul.bf16.gmra.mxu2 %v8781_v8  ;;  %v1939_v0 = vpop.f32.mrf.mxu0 }
 0x3a6   :  { %v9091_v36 = vadd.f32 %v1939_v0, %v1427_v19  ;;  %v1968_v53 = vpop.f32.mrf.mxu1 }
 0x3a7   :  { %2702 = vmatpush.bf16.msrb.mxu3 %v2343_v41  ;;  %v9095_v4 = vadd.f32 %v1968_v53, %v1456_v62  ;;  %v9131_v53 = vor.u32 %v7001_v28, %v6838_v58  ;;  %v12874_v58 = vld [vmem:[#allocation38_spill] sm:$0xff] }
 0x3a8   :  { %2673 = vmatpush.bf16.msrb.mxu2 %v2418_v38  ;;  %v9097_v42 = vpop.f32.mrf.mxu3  ;;  %v9099_v7 = vpop.f32.mrf.mxu2  ;;  %2515 = vmatmul.bf16.gmra.mxu0 %v9087_v63  ;;  %v12870_v38 = vld [vmem:[#allocation23_spill] sm:$0xff]  ;;  %v1463_v28 = vadd.f32 %v8810_v34, %v12874_v58  ;;  %v1533_v34 = vadd.f32 %v8830_v57, %v8383_v10 }
 0x3a9   :  { %12868 = vst [vmem:[#allocation12_spill] sm:$0xff] %v9097_v42  ;;  %2544 = vmatmul.bf16.gmra.mxu1 %v9087_v63  ;;  %v2295_v62 = vpop.permute.xlu1 %2294  ;;  %v12875_v58 = vld [vmem:[#allocation15_spill] sm:$0xff]  ;;  %v12907_v42 = vld [vmem:[#allocation80_spill] sm:$0xff] }
 0x3aa   :  { %v2311_v51 = vpop.permute.xlu0 %2310  ;;  %v2397_v13 = vsel %vm2376_vm6, %v8994_v29, %v2295_v62 }
 0x3ab   :  { %2703 = vmatpush.bf16.msrb.mxu3 %v2327_v43  ;;  %v2404_v19 = vsel %vm2376_vm6, %v8970_v52, %v2311_v51  ;;  %v1432_v52 = vadd.f32 %v8785_v9, %v8316_v3  ;;  %v1461_v43 = vadd.f32 %v8787_v15, %v12870_v38 }
 0x3ac   :  { %2674 = vmatpush.bf16.msrb.mxu2 %v2411_v25 }
 0x3ad   :  { %2146 = vmatmul.bf16.gmra.mxu3 %v8781_v8  ;;  %v1941_v20 = vpop.f32.mrf.mxu0  ;;  %v2279_v8 = vpop.permute.xlu2 %2278 }
 0x3ae   :  { %v9110_v23 = vadd.f32 %v1941_v20, %v1429_v59  ;;  %v1970_v41 = vpop.f32.mrf.mxu1  ;;  %v2390_v29 = vsel %vm2376_vm6, %v8956_v56, %v2279_v8 }
 0x3af   :  { %2704 = vmatpush.bf16.msrb.mxu3 %v2311_v51  ;;  %v9114_v32 = vadd.f32 %v1970_v41, %v1458_v60  ;;  %v12871_v60 = vld [vmem:[#allocation39_spill] sm:$0xff] }
 0x3b0   :  { %2675 = vmatpush.bf16.msrb.mxu2 %v2404_v19  ;;  %v9116_v0 = vpop.f32.mrf.mxu3  ;;  %v9118_v50 = vpop.f32.mrf.mxu2  ;;  %v1475_v20 = vadd.f32 %v8795_v1, %v12871_v60 }
 0x3b1   :  { %12869 = vst [vmem:[#allocation46_spill] sm:$0xff] %v9118_v50 }
 0x3b2   :  { %v2263_v41 = vpop.permute.xlu0 %2262 }
 0x3b3   :  { %2705 = vmatpush.bf16.msrb.mxu3 %v2295_v62  ;;  %v2383_v56 = vsel %vm2376_vm6, %v9052_v47, %v2263_v41  ;;  %v12873_v62 = vld [vmem:[#allocation30_spill] sm:$0xff]  ;;  %vm6529_vm6 = vcmask 1041408  }
 0x3b4   :  { %2676 = vmatpush.bf16.msrb.mxu2 %v2397_v13  ;;  %v1434_v1 = vadd.f32 %v8808_v14, %v12873_v62 }
 0x3b5   :  { %2563 = vmatmul.bf16.vlgmr.msra.gmra.mxu2 %v8986_v2  ;;  %v1944_v25 = vpop.f32.mrf.mxu0 }
 0x3b6   :  { %v9135_v51 = vadd.f32 %v1944_v25, %v1432_v52  ;;  %v1973_v59 = vpop.f32.mrf.mxu1 }
 0x3b7   :  { %2706 = vmatpush.bf16.msrb.mxu3 %v2279_v8  ;;  %v9141_v3 = vadd.f32 %v1973_v59, %v1461_v43  ;;  %v1504_v8 = vadd.f32 %v8814_v17, %v8372_v24  ;;  %v1477_v43 = vadd.f32 %v8818_v46, %v8366_v44  ;;  %v1562_v24 = vadd.f32 %v8832_v40, %v8393_v54 }
 0x3b8   :  { %2677 = vmatpush.bf16.msrb.mxu2 %v2390_v29  ;;  %v9143_v9 = vpop.f32.mrf.mxu3  ;;  %v1987_v19 = vpop.f32.mrf.mxu2  ;;  %2520 = vmatmul.bf16.gmra.mxu0 %v9131_v53  ;;  %v1506_v44 = vadd.f32 %v8834_v31, %v8401_v12  ;;  %v1509_v31 = vadd.f32 %v8859_v39, %v8439_v48  ;;  %v12879_v39 = vld [vmem:[#allocation49_spill] sm:$0xff] }
 0x3b9   :  { %12872 = vst [vmem:[#allocation16_spill] sm:$0xff] %v9143_v9  ;;  %2549 = vmatmul.bf16.gmra.mxu1 %v9131_v53  ;;  %v9147_v15 = vadd.f32 %v1987_v19, %v1475_v20  ;;  %v1480_v20 = vadd.f32 %v8836_v55, %v8399_v33  ;;  %v1482_v55 = vadd.f32 %v8864_v21, %v8435_v22  ;;  %v12881_v21 = vld [vmem:[#allocation48_spill] sm:$0xff] }
 0x3bb   :  { %2707 = vmatpush.bf16.msrb.mxu3 %v2263_v41 }
 0x3bc   :  { %2678 = vmatpush.bf16.msrb.mxu2 %v2383_v56 }
 0x3bd   :  { %2592 = vmatmul.bf16.vlgmr.msra.gmra.mxu3 %v8986_v2  ;;  %v1946_v13 = vpop.f32.mrf.mxu0 }
 0x3be   :  { %v9158_v52 = vadd.f32 %v1946_v13, %v1434_v1  ;;  %v1975_v38 = vpop.f32.mrf.mxu1 }
 0x3bf   :  { %v9162_v47 = vadd.f32 %v1975_v38, %v1463_v28  ;;  %v12876_v28 = vld [vmem:[#allocation64_spill] sm:$0xff]  ;;  %v12878_v38 = vld [vmem:[#allocation65_spill] sm:$0xff] }
 0x3c0   :  { %v2016_v25 = vpop.f32.mrf.mxu3  ;;  %v1989_v59 = vpop.f32.mrf.mxu2  ;;  %v1538_v13 = vadd.f32 %v12876_v28, %v12875_v58  ;;  %v12885_v28 = vld [vmem:[#allocation50_spill] sm:$0xff] }
 0x3c1   :  { %v9164_v14 = vadd.f32 %v2016_v25, %v1504_v8  ;;  %v9166_v29 = vadd.f32 %v1989_v59, %v1477_v43  ;;  %v12877_v8 = vld [vmem:[#allocation20_spill] sm:$0xff]  ;;  %v12880_v25 = vld [vmem:[#allocation66_spill] sm:$0xff] }
 0x3c2   :  { %v1567_v43 = vadd.f32 %v12878_v38, %v12877_v8  ;;  %v1511_v59 = vadd.f32 %v12880_v25, %v12879_v39  ;;  %v12887_v25 = vld [vmem:[#allocation37_spill] sm:$0xff] }
 0x3c5   :  { %2568 = vmatmul.bf16.gmra.mxu2 %v9041_v37  ;;  %v2045_v17 = vpop.f32.mrf.mxu0 }
 0x3c6   :  { %v9175_v46 = vadd.f32 %v2045_v17, %v1533_v34  ;;  %v2074_v60 = vpop.f32.mrf.mxu1 }
 0x3c7   :  { %v9179_v41 = vadd.f32 %v2074_v60, %v1562_v24  ;;  %v12882_v24 = vld [vmem:[#allocation67_spill] sm:$0xff] }
 0x3c8   :  { %v2018_v19 = vpop.f32.mrf.mxu3  ;;  %v1992_v56 = vpop.f32.mrf.mxu2  ;;  %2621 = vmatmul.bf16.vlgmr.msrb.gmra.mxu0 %v8986_v2  ;;  %v1485_v17 = vadd.f32 %v12882_v24, %v12881_v21  ;;  %v12889_v21 = vld [vmem:[#allocation51_spill] sm:$0xff]  ;;  %v12890_v24 = vld [vmem:[#allocation73_spill] sm:$0xff] }
 0x3c9   :  { %v9181_v10 = vadd.f32 %v2018_v19, %v1506_v44  ;;  %2650 = vmatmul.bf16.vlgmr.msrb.gmra.mxu1 %v8986_v2  ;;  %v9185_v54 = vadd.f32 %v1992_v56, %v1480_v20 }
 0x3cd   :  { %2597 = vmatmul.bf16.gmra.mxu3 %v9041_v37  ;;  %v9188_v12 = vpop.f32.mrf.mxu0 }
 0x3ce   :  { %v9192_v33 = vpop.f32.mrf.mxu1 }
 0x3d0   :  { %v2021_v57 = vpop.f32.mrf.mxu3  ;;  %v1994_v40 = vpop.f32.mrf.mxu2 }
 0x3d1   :  { %v9196_v62 = vadd.f32 %v2021_v57, %v1509_v31  ;;  %v9198_v1 = vadd.f32 %v1994_v40, %v1482_v55  ;;  %v12883_v55 = vld [vmem:[#allocation21_spill] sm:$0xff]  ;;  %v12884_v57 = vld [vmem:[#allocation70_spill] sm:$0xff] }
 0x3d2   :  { %v1514_v40 = vadd.f32 %v12884_v57, %v12883_v55  ;;  %v12892_v55 = vld [vmem:[#allocation74_spill] sm:$0xff] }
 0x3d5   :  { %2573 = vmatmul.bf16.gmra.mxu2 %v9087_v63  ;;  %v2050_v48 = vpop.f32.mrf.mxu0 }
 0x3d6   :  { %v9207_v34 = vadd.f32 %v2050_v48, %v1538_v13  ;;  %v2079_v22 = vpop.f32.mrf.mxu1  ;;  %v12886_v13 = vld [vmem:[#allocation71_spill] sm:$0xff] }
 0x3d7   :  { %v9211_v44 = vadd.f32 %v2079_v22, %v1567_v43  ;;  %v1487_v8 = vadd.f32 %v12886_v13, %v12885_v28  ;;  %v12893_v13 = vld [vmem:[#allocation52_spill] sm:$0xff] }
 0x3d8   :  { %v2023_v60 = vpop.f32.mrf.mxu3  ;;  %v1997_v20 = vpop.f32.mrf.mxu2  ;;  %2626 = vmatmul.bf16.gmra.mxu0 %v9041_v37 }
 0x3d9   :  { %v9213_v19 = vadd.f32 %v2023_v60, %v1511_v59  ;;  %2655 = vmatmul.bf16.gmra.mxu1 %v9041_v37  ;;  %v9217_v56 = vadd.f32 %v1997_v20, %v1485_v17  ;;  %v12888_v59 = vld [vmem:[#allocation72_spill] sm:$0xff]  ;;  %v1572_v17 = vadd.f32 %v12890_v24, %v12889_v21  ;;  %v12891_v20 = vld [vmem:[#allocation53_spill] sm:$0xff]  ;;  %v12899_v21 = vld [vmem:[#allocation55_spill] sm:$0xff] }
 0x3da   :  { %v1543_v22 = vadd.f32 %v12888_v59, %v12887_v25  ;;  %v1516_v57 = vadd.f32 %v12892_v55, %v12891_v20  ;;  %v12900_v24 = vld [vmem:[#allocation78_spill] sm:$0xff]  ;;  %v12903_v55 = vld [vmem:[#allocation79_spill] sm:$0xff] }
 0x3dd   :  { %2602 = vmatmul.bf16.gmra.mxu3 %v9087_v63  ;;  %v9220_v31 = vpop.f32.mrf.mxu0 }
 0x3de   :  { %v9224_v58 = vpop.f32.mrf.mxu1 }
 0x3e0   :  { %v2026_v38 = vpop.f32.mrf.mxu3  ;;  %v1999_v43 = vpop.f32.mrf.mxu2 }
 0x3e1   :  { %v9228_v48 = vadd.f32 %v2026_v38, %v1514_v40  ;;  %v9230_v39 = vadd.f32 %v1999_v43, %v1487_v8  ;;  %v12894_v40 = vld [vmem:[#allocation75_spill] sm:$0xff] }
 0x3e2   :  { %v1490_v38 = vadd.f32 %v12894_v40, %v12893_v13 }
 0x3e5   :  { %2578 = vmatmul.bf16.gmra.mxu2 %v9131_v53  ;;  %v2055_v60 = vpop.f32.mrf.mxu0 }
 0x3e6   :  { %v9239_v9 = vadd.f32 %v2055_v60, %v1543_v22  ;;  %v2084_v28 = vpop.f32.mrf.mxu1  ;;  %v1519_v60 = vadd.f32 %v12900_v24, %v12899_v21  ;;  %v12909_v21 = vld [vmem:[#allocation81_spill] sm:$0xff] }
 0x3e7   :  { %v9243_v8 = vadd.f32 %v2084_v28, %v1572_v17  ;;  %v12902_v17 = vld [vmem:[#allocation54_spill] sm:$0xff] }
 0x3e8   :  { %v2028_v43 = vpop.f32.mrf.mxu3  ;;  %v2002_v50 = vpop.f32.mrf.mxu2  ;;  %2631 = vmatmul.bf16.gmra.mxu0 %v9087_v63  ;;  %v1492_v28 = vadd.f32 %v12903_v55, %v12902_v17 }
 0x3e9   :  { %12895 = vst [vmem:[#allocation23_spill] sm:$0xff] %v9243_v8  ;;  %v9245_v25 = vadd.f32 %v2028_v43, %v1516_v57  ;;  %2660 = vmatmul.bf16.gmra.mxu1 %v9087_v63  ;;  %v9249_v59 = vadd.f32 %v2002_v50, %v1490_v38  ;;  %v9264_v50 = vpop.permute.xlu1 %2833  ;;  %v12906_v38 = vld [vmem:[#allocation25_spill] sm:$0xff] }
 0x3ea   :  { %v1548_v49 = vadd.f32 %v12907_v42, %v12906_v38  ;;  %v9285_v38 = vpop.permute.xlu2 %2838 }
 0x3eb   :  { %12896 = vst [vmem:[#allocation39_spill] sm:$0xff] %v9245_v25  ;;  %v12911_v25 = vld [vmem:[#allocation82_spill] sm:$0xff] }
 0x3ec   :  { %12897 = vst [vmem:[#allocation30_spill] sm:$0xff] %v9249_v59  ;;  %v12910_v59 = vld [vmem:[#allocation43_spill] sm:$0xff] }
 0x3ed   :  { %2607 = vmatmul.bf16.gmra.mxu3 %v9131_v53  ;;  %v9252_v22 = vpop.f32.mrf.mxu0  ;;  %v1521_v17 = vadd.f32 %v12911_v25, %v12910_v59  ;;  %v12918_v59 = vld [vmem:[#allocation40_spill] sm:$0xff] }
 0x3ee   :  { %12898 = vst [vmem:[#allocation38_spill] sm:$0xff] %v9252_v22  ;;  %v9256_v20 = vpop.f32.mrf.mxu1  ;;  %v12908_v22 = vld [vmem:[#allocation56_spill] sm:$0xff] }
 0x3ef   :  { %12901 = vst [vmem:[#allocation15_spill] sm:$0xff] %v9256_v20  ;;  %v1577_v24 = vadd.f32 %v12909_v21, %v12908_v22 }
 0x3f0   :  { %v2031_v57 = vpop.f32.mrf.mxu3  ;;  %v2004_v13 = vpop.f32.mrf.mxu2 }
 0x3f1   :  { %v9260_v40 = vadd.f32 %v2031_v57, %v1519_v60  ;;  %v9262_v43 = vadd.f32 %v2004_v13, %v1492_v28  ;;  %v12912_v57 = vld [vmem:[#allocation57_spill] sm:$0xff]  ;;  %v12913_v28 = vld [vmem:[#allocation83_spill] sm:$0xff] }
 0x3f2   :  { %v1591_v13 = vadd.f32 %v12913_v28, %v12912_v57  ;;  %v9300_v57 = vpop.permute.xlu2 %2813 }
 0x3f3   :  { %12904 = vst [vmem:[#allocation64_spill] sm:$0xff] %v9260_v40 }
 0x3f4   :  { %12905 = vst [vmem:[#allocation20_spill] sm:$0xff] %v9262_v43 }
 0x3f5   :  { %2679 = vmatmul.bf16.vlgmr.msrb.gmra.mxu2 %v8986_v2  ;;  %v2060_v20 = vpop.f32.mrf.mxu0 }
 0x3f6   :  { %v9273_v55 = vadd.f32 %v2060_v20, %v1548_v49  ;;  %v2089_v60 = vpop.f32.mrf.mxu1  ;;  %v9288_v49 = vpop.permute.xlu1 %2828  ;;  %v12919_v20 = vld [vmem:[#allocation86_spill] sm:$0xff] }
 0x3f7   :  { %v9277_v43 = vadd.f32 %v2089_v60, %v1577_v24  ;;  %v1620_v21 = vadd.f32 %v12919_v20, %v12918_v59 }
 0x3f8   :  { %v2033_v40 = vpop.f32.mrf.mxu3  ;;  %v2103_v42 = vpop.f32.mrf.mxu2  ;;  %2636 = vmatmul.bf16.gmra.mxu0 %v9131_v53 }
 0x3f9   :  { %12914 = vst [vmem:[#allocation65_spill] sm:$0xff] %v9277_v43  ;;  %v9279_v8 = vadd.f32 %v2033_v40, %v1521_v17  ;;  %2665 = vmatmul.bf16.gmra.mxu1 %v9131_v53  ;;  %v9283_v22 = vadd.f32 %v2103_v42, %v1591_v13  ;;  %v12923_v42 = vld [vmem:[#allocation24_spill] sm:$0xff] }
 0x3fb   :  { %12915 = vst [vmem:[#allocation49_spill] sm:$0xff] %v9279_v8 }
 0x3fc   :  { %12916 = vst [vmem:[#allocation66_spill] sm:$0xff] %v9283_v22 }
 0x3fd   :  { %2708 = vmatmul.bf16.vlgmr.msrb.gmra.mxu3 %v8986_v2  ;;  %v9290_v25 = vpop.f32.mrf.mxu0 }
 0x3fe   :  { %12917 = vst [vmem:[#allocation48_spill] sm:$0xff] %v9290_v25  ;;  %v9294_v40 = vpop.f32.mrf.mxu1  ;;  %v1596_v25 = vadd.f32 %v9003_v18, %v12923_v42  ;;  %v9306_v22 = vpop.permute.xlu1 %2803  ;;  %v12926_v42 = vld [vmem:[#allocation47_spill] sm:$0xff] }
 0x3ff   :  { %12920 = vst [vmem:[#allocation67_spill] sm:$0xff] %v9294_v40  ;;  %v9316_v18 = vpop.permute.xlu2 %2808 }
 0x400   :  { %v2132_v24 = vpop.f32.mrf.mxu3  ;;  %v9296_v17 = vpop.f32.mrf.mxu2 }
 0x401   :  { %12921 = vst [vmem:[#allocation21_spill] sm:$0xff] %v9296_v17  ;;  %v9298_v60 = vadd.f32 %v2132_v24, %v1620_v21 }
 0x403   :  { %12922 = vst [vmem:[#allocation70_spill] sm:$0xff] %v9298_v60 }
 0x405   :  { %2684 = vmatmul.bf16.gmra.mxu2 %v9041_v37  ;;  %v2506_v28 = vpop.f32.mrf.mxu0 }
 0x406   :  { %v2729_v2 = vadd.f32 %v2506_v28, %v8990_v11  ;;  %v2535_v13 = vpop.f32.mrf.mxu1 }
 0x407   :  { %v2730_v59 = vadd.f32 %v2535_v13, %v8999_v6  ;;  %v1625_v6 = vadd.f32 %v9022_v30, %v12926_v42 }
 0x408   :  { %v9309_v20 = vpop.f32.mrf.mxu3  ;;  %v2841_v21 = vadd.f32 %v9306_v22, %v2729_v2  ;;  %v2108_v24 = vpop.f32.mrf.mxu2 }
 0x409   :  { %12924 = vst [vmem:[#allocation50_spill] sm:$0xff] %v9309_v20  ;;  %v2842_v17 = vadd.f32 %v9306_v22, %v2730_v59  ;;  %v9313_v60 = vadd.f32 %v2108_v24, %v1596_v25  ;;  %v12929_v24 = vld [vmem:[#allocation31_spill] sm:$0xff] }
 0x40a   :  { %v2905_v40 = vmax.f32 %v2841_v21, 0.0  ;;  %v9329_v21 = vpop.permute.xlu0 %2823 }
 0x40b   :  { %12925 = vst [vmem:[#allocation71_spill] sm:$0xff] %v9313_v60  ;;  %v2906_v8 = vmax.f32 %v2842_v17, 0.0 }
 0x40d   :  { %2713 = vmatmul.bf16.gmra.mxu3 %v9041_v37  ;;  %v2969_v11 = vpack.c.bf16 %v2906_v8, %v2905_v40  ;;  %v2508_v28 = vpop.f32.mrf.mxu0 }
 0x40e   :  { %v2737_v13 = vadd.f32 %v2508_v28, %v9015_v5  ;;  %v2537_v20 = vpop.f32.mrf.mxu1 }
 0x40f   :  { %v2738_v2 = vadd.f32 %v2537_v20, %v9020_v61  ;;  %v1601_v61 = vadd.f32 %v9056_v27, %v12929_v24  ;;  %v3033_v20 = vunpack.c.l.b16 %v2969_v11  ;;  %v3034_v42 = vunpack.c.h.b16 %v2969_v11  ;;  %v12932_v24 = vld [vmem:[#allocation11_spill] sm:$0xff] }
 0x410   :  { %v2137_v43 = vpop.f32.mrf.mxu3  ;;  %v9322_v59 = vpop.f32.mrf.mxu2  ;;  %v2849_v17 = vadd.f32 %v9316_v18, %v2737_v13 }
 0x411   :  { %12927 = vst [vmem:[#allocation37_spill] sm:$0xff] %v9322_v59  ;;  %v9324_v25 = vadd.f32 %v2137_v43, %v1625_v6  ;;  %v2850_v37 = vadd.f32 %v9316_v18, %v2738_v2  ;;  %v12930_v6 = vld [vmem:[#allocation44_spill] sm:$0xff] }
 0x412   :  { %v2913_v8 = vmax.f32 %v2849_v17, 0.0 }
 0x413   :  { %12928 = vst [vmem:[#allocation72_spill] sm:$0xff] %v9324_v25  ;;  %v2914_v40 = vmax.f32 %v2850_v37, 0.0 }
 0x415   :  { %2689 = vmatmul.bf16.gmra.mxu2 %v9087_v63  ;;  %v2511_v30 = vpop.f32.mrf.mxu0  ;;  %v2973_v5 = vpack.c.bf16 %v2914_v40, %v2913_v8 }
 0x416   :  { %v2745_v28 = vadd.f32 %v2511_v30, %v9045_v16  ;;  %v2540_v43 = vpop.f32.mrf.mxu1 }
 0x417   :  { %v2746_v13 = vadd.f32 %v2540_v43, %v12930_v6  ;;  %v3042_v2 = vunpack.c.h.b16 %v2973_v5  ;;  %v3041_v17 = vunpack.c.l.b16 %v2973_v5 }
 0x418   :  { %v9335_v59 = vpop.f32.mrf.mxu3  ;;  %v2857_v37 = vadd.f32 %v9300_v57, %v2745_v28  ;;  %v2113_v25 = vpop.f32.mrf.mxu2 }
 0x419   :  { %v2858_v60 = vadd.f32 %v9300_v57, %v2746_v13  ;;  %v9339_v8 = vadd.f32 %v2113_v25, %v1601_v61  ;;  %v9341_v40 = vpack.c.b16 %v3042_v2, %v3034_v42  ;;  %v9343_v27 = vpack.c.b16 %v3041_v17, %v3033_v20  ;;  %v9353_v20 = vpop.permute.xlu0 %2818 }
 0x41a   :  { %v2921_v16 = vmax.f32 %v2857_v37, 0.0  ;;  %v1630_v25 = vadd.f32 %v9072_v26, %v12932_v24  ;;  %v12933_v37 = vld [vmem:[#allocation13_spill] sm:$0xff] }
 0x41b   :  { %12931 = vst [vmem:[#allocation51_spill] sm:$0xff] %v9343_v27  ;;  %v2922_v30 = vmax.f32 %v2858_v60, 0.0  ;;  %3163 = vrot.lane.b32.xlu2 %v9341_v40, %s7130_s24  ;;  %3161 = vrot.lane.b32.xlu1 %v9343_v27, %s7130_s24 }
 0x41d   :  { %2718 = vmatmul.bf16.gmra.mxu3 %v9087_v63  ;;  %v2977_v11 = vpack.c.bf16 %v2922_v30, %v2921_v16  ;;  %v2513_v5 = vpop.f32.mrf.mxu0  ;;  %v1606_v16 = vadd.f32 %v9099_v7, %v12933_v37 }
 0x41e   :  { %v2753_v61 = vadd.f32 %v2513_v5, %v9068_v35  ;;  %v2542_v28 = vpop.f32.mrf.mxu1 }
 0x41f   :  { %v2754_v60 = vadd.f32 %v2542_v28, %v9070_v45  ;;  %v3049_v30 = vunpack.c.l.b16 %v2977_v11  ;;  %v3050_v24 = vunpack.c.h.b16 %v2977_v11 }
 0x420   :  { %v2142_v43 = vpop.f32.mrf.mxu3  ;;  %v2865_v42 = vadd.f32 %v9353_v20, %v2753_v61  ;;  %v9357_v6 = vpop.f32.mrf.mxu2 }
 0x421   :  { %v9359_v13 = vadd.f32 %v2142_v43, %v1630_v25  ;;  %v2866_v63 = vadd.f32 %v9353_v20, %v2754_v60 }
 0x422   :  { %v2929_v2 = vmax.f32 %v2865_v42, 0.0 }
 0x423   :  { %v2930_v17 = vmax.f32 %v2866_v63, 0.0 }
 0x425   :  { %2694 = vmatmul.bf16.gmra.mxu2 %v9131_v53  ;;  %v2981_v26 = vpack.c.bf16 %v2930_v17, %v2929_v2  ;;  %v2516_v35 = vpop.f32.mrf.mxu0 }
 0x426   :  { %v2761_v45 = vadd.f32 %v2516_v35, %v9091_v36  ;;  %v2545_v5 = vpop.f32.mrf.mxu1 }
 0x427   :  { %v3057_v61 = vunpack.c.l.b16 %v2981_v26  ;;  %v3058_v28 = vunpack.c.h.b16 %v2981_v26  ;;  %v2762_v25 = vadd.f32 %v2545_v5, %v9095_v4  ;;  %v12934_v26 = vld [vmem:[#allocation42_spill] sm:$0xff] }
 0x428   :  { %v9367_v43 = vpop.f32.mrf.mxu3  ;;  %v2873_v60 = vadd.f32 %v9329_v21, %v2761_v45  ;;  %v2118_v42 = vpop.f32.mrf.mxu2  ;;  %v1635_v37 = vadd.f32 %v9116_v0, %v12934_v26 }
 0x429   :  { %v9370_v63 = vpack.c.b16 %v3057_v61, %v3049_v30  ;;  %v9372_v2 = vpack.c.b16 %v3058_v28, %v3050_v24  ;;  %v2874_v7 = vadd.f32 %v9329_v21, %v2762_v25  ;;  %v9375_v17 = vadd.f32 %v2118_v42, %v1606_v16 }
 0x42a   :  { %v2937_v36 = vmax.f32 %v2873_v60, 0.0 }
 0x42b   :  { %v2938_v35 = vmax.f32 %v2874_v7, 0.0  ;;  %3179 = vrot.lane.b32.xlu2 %v9372_v2, %s7130_s24  ;;  %3177 = vrot.lane.b32.xlu1 %v9370_v63, %s7130_s24 }
 0x42d   :  { %2723 = vmatmul.bf16.gmra.mxu3 %v9131_v53  ;;  %v2985_v4 = vpack.c.bf16 %v2938_v35, %v2937_v36  ;;  %v2518_v11 = vpop.f32.mrf.mxu0 }
 0x42e   :  { %v2769_v30 = vadd.f32 %v2518_v11, %v9110_v23  ;;  %v2547_v45 = vpop.f32.mrf.mxu1 }
 0x42f   :  { %v2770_v16 = vadd.f32 %v2547_v45, %v9114_v32  ;;  %v3065_v36 = vunpack.c.l.b16 %v2985_v4  ;;  %v3066_v35 = vunpack.c.h.b16 %v2985_v4 }
 0x430   :  { %v2147_v5 = vpop.f32.mrf.mxu3  ;;  %v2881_v24 = vadd.f32 %v9288_v49, %v2769_v30  ;;  %v9387_v61 = vpop.f32.mrf.mxu2 }
 0x431   :  { %v9389_v28 = vadd.f32 %v2147_v5, %v1635_v37  ;;  %v2882_v25 = vadd.f32 %v9288_v49, %v2770_v16 }
 0x432   :  { %v2945_v53 = vmax.f32 %v2881_v24, 0.0 }
 0x433   :  { %v2946_v60 = vmax.f32 %v2882_v25, 0.0 }
 0x435   :  { %v2989_v42 = vpack.c.bf16 %v2946_v60, %v2945_v53  ;;  %v2521_v7 = vpop.f32.mrf.mxu0 }
 0x436   :  { %v2777_v0 = vadd.f32 %v2521_v7, %v9135_v51  ;;  %v2550_v23 = vpop.f32.mrf.mxu1 }
 0x437   :  { %v3073_v11 = vunpack.c.l.b16 %v2989_v42  ;;  %v3074_v32 = vunpack.c.h.b16 %v2989_v42  ;;  %v2778_v26 = vadd.f32 %v2550_v23, %v9141_v3 }
 0x438   :  { %v9394_v30 = vpop.f32.mrf.mxu3  ;;  %v2889_v37 = vadd.f32 %v9264_v50, %v2777_v0  ;;  %v2564_v45 = vpop.f32.mrf.mxu2 }
 0x439   :  { %v9397_v5 = vpack.c.b16 %v3073_v11, %v3065_v36  ;;  %v9399_v16 = vpack.c.b16 %v3074_v32, %v3066_v35  ;;  %v2890_v24 = vadd.f32 %v9264_v50, %v2778_v26  ;;  %v2731_v51 = vadd.f32 %v2564_v45, %v9147_v15 }
 0x43a   :  { %v2953_v25 = vmax.f32 %v2889_v37, 0.0 }
 0x43b   :  { %v2954_v53 = vmax.f32 %v2890_v24, 0.0  ;;  %3195 = vrot.lane.b32.xlu2 %v9399_v16, %s7130_s24  ;;  %3193 = vrot.lane.b32.xlu1 %v9397_v5, %s7130_s24  ;;  %v2843_v0 = vadd.f32 %v9306_v22, %v2731_v51 }
 0x43d   :  { %v2993_v3 = vpack.c.bf16 %v2954_v53, %v2953_v25  ;;  %v2523_v4 = vpop.f32.mrf.mxu0  ;;  %v2907_v45 = vmax.f32 %v2843_v0, 0.0 }
 0x43e   :  { %v2785_v60 = vadd.f32 %v2523_v4, %v9158_v52  ;;  %v2552_v42 = vpop.f32.mrf.mxu1 }
 0x43f   :  { %v2786_v7 = vadd.f32 %v2552_v42, %v9162_v47  ;;  %v3081_v53 = vunpack.c.l.b16 %v2993_v3  ;;  %v3082_v42 = vunpack.c.h.b16 %v2993_v3  ;;  %v12936_v3 = vld [vmem:[#allocation62_spill] sm:$0xff] }
 0x440   :  { %v2593_v36 = vpop.f32.mrf.mxu3  ;;  %v2897_v23 = vadd.f32 %v9285_v38, %v2785_v60  ;;  %v2566_v35 = vpop.f32.mrf.mxu2 }
 0x441   :  { %v2732_v11 = vadd.f32 %v2593_v36, %v9164_v14  ;;  %v2898_v32 = vadd.f32 %v9285_v38, %v2786_v7  ;;  %v2739_v52 = vadd.f32 %v2566_v35, %v9166_v29 }
 0x442   :  { %v2961_v26 = vmax.f32 %v2897_v23, 0.0 }
 0x443   :  { %v2844_v15 = vadd.f32 %v9306_v22, %v2732_v11  ;;  %v2962_v37 = vmax.f32 %v2898_v32, 0.0  ;;  %v2851_v23 = vadd.f32 %v9316_v18, %v2739_v52 }
 0x445   :  { %v2908_v24 = vmax.f32 %v2844_v15, 0.0  ;;  %v2997_v25 = vpack.c.bf16 %v2962_v37, %v2961_v26  ;;  %v2622_v47 = vpop.f32.mrf.mxu0  ;;  %v12935_v26 = vld [vmem:[#allocation34_spill] sm:$0xff] }
 0x446   :  { %v2733_v51 = vadd.f32 %v2622_v47, %v9175_v46  ;;  %v2651_v60 = vpop.f32.mrf.mxu1  ;;  %v1535_v15 = vadd.f32 %v12936_v3, %v12935_v26 }
 0x447   :  { %v2970_v4 = vpack.c.bf16 %v2908_v24, %v2907_v45  ;;  %v3089_v27 = vunpack.c.l.b16 %v2997_v25  ;;  %v3090_v14 = vunpack.c.h.b16 %v2997_v25  ;;  %v2734_v7 = vadd.f32 %v2651_v60, %v9179_v41  ;;  %v12937_v45 = vld [vmem:[#allocation19_spill] sm:$0xff] }
 0x448   :  { %v2595_v36 = vpop.f32.mrf.mxu3  ;;  %v2845_v0 = vadd.f32 %v9306_v22, %v2733_v51  ;;  %v2569_v11 = vpop.f32.mrf.mxu2  ;;  %v12938_v24 = vld [vmem:[#allocation63_spill] sm:$0xff] }
 0x449   :  { %v2740_v29 = vadd.f32 %v2595_v36, %v9181_v10  ;;  %v9420_v35 = vpack.c.b16 %v3089_v27, %v3081_v53  ;;  %v9422_v32 = vpack.c.b16 %v3090_v14, %v3082_v42  ;;  %v2846_v46 = vadd.f32 %v9306_v22, %v2734_v7 }
 0x44a   :  { %v2909_v37 = vmax.f32 %v2845_v0, 0.0  ;;  %v1564_v52 = vadd.f32 %v12938_v24, %v12937_v45  ;;  %v2747_v47 = vadd.f32 %v2569_v11, %v9185_v54  ;;  %v2164_v10 = vadd.f32 %v9188_v12, %v1535_v15 }
 0x44b   :  { %v2852_v41 = vadd.f32 %v9316_v18, %v2740_v29  ;;  %v2910_v25 = vmax.f32 %v2846_v46, 0.0  ;;  %v2915_v27 = vmax.f32 %v2851_v23, 0.0  ;;  %v3035_v0 = vunpack.c.l.b16 %v2970_v4 }
 0x44c   :  { %v2165_v51 = vadd.f32 %v9192_v33, %v1564_v52  ;;  %v3036_v26 = vunpack.c.h.b16 %v2970_v4  ;;  %v2859_v29 = vadd.f32 %v9300_v57, %v2747_v47 }
 0x44d   :  { %v2916_v53 = vmax.f32 %v2852_v41, 0.0  ;;  %v2971_v60 = vpack.c.bf16 %v2910_v25, %v2909_v37  ;;  %v2624_v42 = vpop.f32.mrf.mxu0 }
 0x44e   :  { %v2741_v7 = vadd.f32 %v2624_v42, %v2164_v10  ;;  %v2653_v36 = vpop.f32.mrf.mxu1  ;;  %v2923_v52 = vmax.f32 %v2859_v29, 0.0 }
 0x44f   :  { %v2974_v14 = vpack.c.bf16 %v2916_v53, %v2915_v27  ;;  %v2742_v3 = vadd.f32 %v2653_v36, %v2165_v51  ;;  %v3037_v27 = vunpack.c.l.b16 %v2971_v60 }
 0x450   :  { %v2598_v45 = vpop.f32.mrf.mxu3  ;;  %v2853_v54 = vadd.f32 %v9316_v18, %v2741_v7  ;;  %v2571_v12 = vpop.f32.mrf.mxu2 }
 0x451   :  { %v3043_v46 = vunpack.c.l.b16 %v2974_v14  ;;  %v3044_v24 = vunpack.c.h.b16 %v2974_v14  ;;  %v2748_v23 = vadd.f32 %v2598_v45, %v9196_v62  ;;  %v2854_v33 = vadd.f32 %v9316_v18, %v2742_v3 }
 0x452   :  { %v2917_v37 = vmax.f32 %v2853_v54, 0.0  ;;  %v2755_v25 = vadd.f32 %v2571_v12, %v9198_v1  ;;  %v3038_v14 = vunpack.c.h.b16 %v2971_v60  ;;  %v12941_v54 = vld [vmem:[#allocation22_spill] sm:$0xff]  ;;  %v12942_v60 = vld [vmem:[#allocation68_spill] sm:$0xff] }
 0x453   :  { %v9437_v11 = vpack.c.b16 %v3043_v46, %v3035_v0  ;;  %v9439_v15 = vpack.c.b16 %v3044_v24, %v3036_v26  ;;  %v2860_v4 = vadd.f32 %v9300_v57, %v2748_v23  ;;  %v2918_v41 = vmax.f32 %v2854_v33, 0.0  ;;  %v12943_v33 = vld [vmem:[#allocation41_spill] sm:$0xff] }
 0x454   :  { %v2867_v26 = vadd.f32 %v9353_v20, %v2755_v25  ;;  %v1540_v12 = vadd.f32 %v12942_v60, %v12941_v54 }
 0x455   :  { %v2924_v47 = vmax.f32 %v2860_v4, 0.0  ;;  %3167 = vrot.lane.b32.xlu2 %v9439_v15, %s7130_s24  ;;  %3165 = vrot.lane.b32.xlu1 %v9437_v11, %s7130_s24  ;;  %v2975_v62 = vpack.c.bf16 %v2918_v41, %v2917_v37  ;;  %v2627_v10 = vpop.f32.mrf.mxu0  ;;  %v12944_v37 = vld [vmem:[#allocation69_spill] sm:$0xff] }
 0x456   :  { %v2749_v51 = vadd.f32 %v2627_v10, %v9207_v34  ;;  %v2656_v42 = vpop.f32.mrf.mxu1  ;;  %v1569_v4 = vadd.f32 %v12944_v37, %v12943_v33  ;;  %v2931_v25 = vmax.f32 %v2867_v26, 0.0 }
 0x457   :  { %v2978_v53 = vpack.c.bf16 %v2924_v47, %v2923_v52  ;;  %v3045_v7 = vunpack.c.l.b16 %v2975_v62  ;;  %v3046_v36 = vunpack.c.h.b16 %v2975_v62  ;;  %v2750_v0 = vadd.f32 %v2656_v42, %v9211_v44 }
 0x458   :  { %v2600_v1 = vpop.f32.mrf.mxu3  ;;  %v2861_v29 = vadd.f32 %v9300_v57, %v2749_v51  ;;  %v2574_v3 = vpop.f32.mrf.mxu2  ;;  %v2181_v62 = vadd.f32 %v9224_v58, %v1569_v4 }
 0x459   :  { %v2756_v45 = vadd.f32 %v2600_v1, %v9213_v19  ;;  %v9452_v46 = vpack.c.b16 %v3045_v7, %v3037_v27  ;;  %v9454_v24 = vpack.c.b16 %v3046_v36, %v3038_v14  ;;  %v2862_v34 = vadd.f32 %v9300_v57, %v2750_v0 }
 0x45a   :  { %v2925_v23 = vmax.f32 %v2861_v29, 0.0  ;;  %v2763_v52 = vadd.f32 %v2574_v3, %v9217_v56  ;;  %v2180_v19 = vadd.f32 %v9220_v31, %v1540_v12  ;;  %v3051_v14 = vunpack.c.l.b16 %v2978_v53 }
 0x45b   :  { %12939 = vst [vmem:[#allocation73_spill] sm:$0xff] %v9452_v46  ;;  %v2868_v44 = vadd.f32 %v9353_v20, %v2756_v45  ;;  %v2926_v41 = vmax.f32 %v2862_v34, 0.0  ;;  %3169 = vrot.lane.b32.xlu0 %v9452_v46, %s7130_s24  ;;  %v3052_v7 = vunpack.c.h.b16 %v2978_v53 }
 0x45c   :  { %12940 = vst [vmem:[#allocation53_spill] sm:$0xff] %v9454_v24  ;;  %v2875_v36 = vadd.f32 %v9329_v21, %v2763_v52 }
 0x45d   :  { %v2932_v47 = vmax.f32 %v2868_v44, 0.0  ;;  %3211 = vrot.lane.b32.xlu2 %v9422_v32, %s7130_s24  ;;  %3209 = vrot.lane.b32.xlu1 %v9420_v35, %s7130_s24  ;;  %v2979_v10 = vpack.c.bf16 %v2926_v41, %v2925_v23  ;;  %v2629_v27 = vpop.f32.mrf.mxu0 }
 0x45e   :  { %v2757_v42 = vadd.f32 %v2629_v27, %v2180_v19  ;;  %v2658_v56 = vpop.f32.mrf.mxu1  ;;  %v2939_v23 = vmax.f32 %v2875_v36, 0.0  ;;  %v12945_v27 = vld [vmem:[#allocation23_spill] sm:$0xff] }
 0x45f   :  { %v2982_v51 = vpack.c.bf16 %v2932_v47, %v2931_v25  ;;  %v2758_v31 = vadd.f32 %v2658_v56, %v2181_v62  ;;  %v3053_v4 = vunpack.c.l.b16 %v2979_v10  ;;  %v3054_v25 = vunpack.c.h.b16 %v2979_v10  ;;  %v12950_v10 = vld [vmem:[#allocation76_spill] sm:$0xff] }
 0x460   :  { %v2603_v0 = vpop.f32.mrf.mxu3  ;;  %v2869_v29 = vadd.f32 %v9353_v20, %v2757_v42  ;;  %v2576_v3 = vpop.f32.mrf.mxu2 }
 0x461   :  { %v3059_v1 = vunpack.c.l.b16 %v2982_v51  ;;  %v3060_v26 = vunpack.c.h.b16 %v2982_v51  ;;  %v2764_v45 = vadd.f32 %v2603_v0, %v9228_v48  ;;  %v2870_v58 = vadd.f32 %v9353_v20, %v2758_v31 }
 0x462   :  { %v2933_v60 = vmax.f32 %v2869_v29, 0.0  ;;  %v2771_v44 = vadd.f32 %v2576_v3, %v9230_v39 }
 0x463   :  { %v9475_v34 = vpack.c.b16 %v3059_v1, %v3051_v14  ;;  %v9477_v54 = vpack.c.b16 %v3060_v26, %v3052_v7  ;;  %v2876_v53 = vadd.f32 %v9329_v21, %v2764_v45  ;;  %v2934_v12 = vmax.f32 %v2870_v58, 0.0  ;;  %3171 = vrot.lane.b32.xlu0 %v9454_v24, %s7130_s24  ;;  %v12946_v7 = vld [vmem:[#allocation39_spill] sm:$0xff]  ;;  %v12949_v1 = vld [vmem:[#allocation28_spill] sm:$0xff]  ;;  %v12951_v45 = vld [vmem:[#allocation26_spill] sm:$0xff] }
 0x464   :  { %v2883_v42 = vadd.f32 %v9288_v49, %v2771_v44  ;;  %v1545_v26 = vadd.f32 %v12950_v10, %v12949_v1  ;;  %v12952_v58 = vld [vmem:[#allocation77_spill] sm:$0xff]  ;;  %v12954_v44 = vld [vmem:[#allocation38_spill] sm:$0xff]  ;;  %v12956_v10 = vld [vmem:[#allocation64_spill] sm:$0xff] }
 0x465   :  { %v2940_v33 = vmax.f32 %v2876_v53, 0.0  ;;  %3183 = vrot.lane.b32.xlu2 %v9477_v54, %s7130_s24  ;;  %3181 = vrot.lane.b32.xlu1 %v9475_v34, %s7130_s24  ;;  %v2983_v48 = vpack.c.bf16 %v2934_v12, %v2933_v60  ;;  %v2632_v37 = vpop.f32.mrf.mxu0  ;;  %v1574_v60 = vadd.f32 %v12952_v58, %v12951_v45  ;;  %v12953_v12 = vld [vmem:[#allocation30_spill] sm:$0xff] }
 0x466   :  { %v2765_v52 = vadd.f32 %v2632_v37, %v9239_v9  ;;  %v2661_v19 = vpop.f32.mrf.mxu1 }
 0x467   :  { %v2986_v41 = vpack.c.bf16 %v2940_v33, %v2939_v23  ;;  %v3061_v47 = vunpack.c.l.b16 %v2983_v48  ;;  %v3062_v62 = vunpack.c.h.b16 %v2983_v48  ;;  %v2766_v51 = vadd.f32 %v2661_v19, %v12945_v27 }
 0x468   :  { %v2605_v39 = vpop.f32.mrf.mxu3  ;;  %v2877_v56 = vadd.f32 %v9329_v21, %v2765_v52  ;;  %v2579_v14 = vpop.f32.mrf.mxu2  ;;  %v2196_v33 = vadd.f32 %v12954_v44, %v1545_v26  ;;  %v2947_v48 = vmax.f32 %v2883_v42, 0.0 }
 0x469   :  { %v2772_v36 = vadd.f32 %v2605_v39, %v12946_v7  ;;  %v9492_v31 = vpack.c.b16 %v3061_v47, %v3053_v4  ;;  %v9494_v0 = vpack.c.b16 %v3062_v62, %v3054_v25  ;;  %v2878_v9 = vadd.f32 %v9329_v21, %v2766_v51  ;;  %v12955_v4 = vld [vmem:[#allocation15_spill] sm:$0xff] }
 0x46a   :  { %v2941_v29 = vmax.f32 %v2877_v56, 0.0  ;;  %v2779_v23 = vadd.f32 %v2579_v14, %v12953_v12  ;;  %v2197_v52 = vadd.f32 %v12955_v4, %v1574_v60  ;;  %v3067_v51 = vunpack.c.l.b16 %v2986_v41  ;;  %v12957_v12 = vld [vmem:[#allocation20_spill] sm:$0xff] }
 0x46b   :  { %12947 = vst [vmem:[#allocation74_spill] sm:$0xff] %v9492_v31  ;;  %v2884_v3 = vadd.f32 %v9288_v49, %v2772_v36  ;;  %v2942_v53 = vmax.f32 %v2878_v9, 0.0  ;;  %v3068_v39 = vunpack.c.h.b16 %v2986_v41 }
 0x46c   :  { %12948 = vst [vmem:[#allocation52_spill] sm:$0xff] %v9494_v0  ;;  %v2891_v56 = vadd.f32 %v9264_v50, %v2779_v23 }
 0x46d   :  { %v2948_v37 = vmax.f32 %v2884_v3, 0.0  ;;  %3395 = vrot.lane.b32.xlu2 %v9422_v32, %s7131_s25  ;;  %3393 = vrot.lane.b32.xlu1 %v9420_v35, %s7131_s25  ;;  %v2987_v19 = vpack.c.bf16 %v2942_v53, %v2941_v29  ;;  %v2634_v25 = vpop.f32.mrf.mxu0 }
 0x46e   :  { %v2773_v62 = vadd.f32 %v2634_v25, %v2196_v33  ;;  %v2663_v27 = vpop.f32.mrf.mxu1  ;;  %v2955_v53 = vmax.f32 %v2891_v56, 0.0 }
 0x46f   :  { %v2990_v47 = vpack.c.bf16 %v2948_v37, %v2947_v48  ;;  %v2774_v14 = vadd.f32 %v2663_v27, %v2197_v52  ;;  %v3069_v37 = vunpack.c.l.b16 %v2987_v19 }
 0x470   :  { %v2608_v42 = vpop.f32.mrf.mxu3  ;;  %v2885_v9 = vadd.f32 %v9288_v49, %v2773_v62  ;;  %v2581_v1 = vpop.f32.mrf.mxu2 }
 0x471   :  { %v3075_v7 = vunpack.c.l.b16 %v2990_v47  ;;  %v3076_v36 = vunpack.c.h.b16 %v2990_v47  ;;  %v2780_v26 = vadd.f32 %v2608_v42, %v12956_v10  ;;  %v2886_v3 = vadd.f32 %v9288_v49, %v2774_v14 }
 0x472   :  { %v2949_v58 = vmax.f32 %v2885_v9, 0.0  ;;  %v2787_v23 = vadd.f32 %v2581_v1, %v12957_v12  ;;  %v3070_v47 = vunpack.c.h.b16 %v2987_v19  ;;  %v12965_v12 = vld [vmem:[#allocation33_spill] sm:$0xff] }
 0x473   :  { %v9513_v29 = vpack.c.b16 %v3075_v7, %v3067_v51  ;;  %v9515_v45 = vpack.c.b16 %v3076_v36, %v3068_v39  ;;  %v2892_v41 = vadd.f32 %v9264_v50, %v2780_v26  ;;  %v2950_v60 = vmax.f32 %v2886_v3, 0.0  ;;  %v12958_v51 = vld [vmem:[#allocation65_spill] sm:$0xff]  ;;  %v12962_v26 = vld [vmem:[#allocation66_spill] sm:$0xff]  ;;  %v12963_v3 = vld [vmem:[#allocation35_spill] sm:$0xff] }
 0x474   :  { %v2899_v14 = vadd.f32 %v9285_v38, %v2787_v23  ;;  %v12959_v7 = vld [vmem:[#allocation49_spill] sm:$0xff] }
 0x475   :  { %v2956_v44 = vmax.f32 %v2892_v41, 0.0  ;;  %3383 = vrot.lane.b32.xlu0 %v9515_v45, %s7131_s25  ;;  %3199 = vrot.lane.b32.xlu2 %v9515_v45, %s7130_s24  ;;  %v2991_v33 = vpack.c.bf16 %v2950_v60, %v2949_v58  ;;  %v2637_v48 = vpop.f32.mrf.mxu0  ;;  %v12964_v58 = vld [vmem:[#allocation84_spill] sm:$0xff]  ;;  %v12966_v23 = vld [vmem:[#allocation85_spill] sm:$0xff] }
 0x476   :  { %3197 = vrot.lane.b32.xlu1 %v9513_v29, %s7130_s24  ;;  %v2781_v52 = vadd.f32 %v2637_v48, %v9273_v55  ;;  %v2666_v25 = vpop.f32.mrf.mxu1  ;;  %v1550_v41 = vadd.f32 %v12964_v58, %v12963_v3  ;;  %v12967_v48 = vld [vmem:[#allocation48_spill] sm:$0xff] }
 0x477   :  { %v2994_v4 = vpack.c.bf16 %v2956_v44, %v2955_v53  ;;  %v3077_v62 = vunpack.c.l.b16 %v2991_v33  ;;  %v3078_v27 = vunpack.c.h.b16 %v2991_v33  ;;  %v2782_v39 = vadd.f32 %v2666_v25, %v12958_v51 }
 0x478   :  { %v2610_v56 = vpop.f32.mrf.mxu3  ;;  %v2893_v42 = vadd.f32 %v9264_v50, %v2781_v52  ;;  %v2680_v9 = vpop.f32.mrf.mxu2  ;;  %v1579_v44 = vadd.f32 %v12966_v23, %v12965_v12  ;;  %v2212_v52 = vadd.f32 %v12967_v48, %v1550_v41 }
 0x479   :  { %v2788_v36 = vadd.f32 %v2610_v56, %v12959_v7  ;;  %v9530_v1 = vpack.c.b16 %v3077_v62, %v3069_v37  ;;  %v9532_v10 = vpack.c.b16 %v3078_v27, %v3070_v47  ;;  %v2894_v55 = vadd.f32 %v9264_v50, %v2782_v39  ;;  %v12968_v47 = vld [vmem:[#allocation67_spill] sm:$0xff]  ;;  %v12969_v39 = vld [vmem:[#allocation58_spill] sm:$0xff] }
 0x47a   :  { %v2735_v19 = vadd.f32 %v2680_v9, %v12962_v26  ;;  %v2957_v60 = vmax.f32 %v2893_v42, 0.0  ;;  %v2963_v37 = vmax.f32 %v2899_v14, 0.0  ;;  %v2213_v62 = vadd.f32 %v12968_v47, %v1579_v44  ;;  %v12970_v56 = vld [vmem:[#allocation87_spill] sm:$0xff]  ;;  %v12971_v44 = vld [vmem:[#allocation70_spill] sm:$0xff] }
 0x47b   :  { %12960 = vst [vmem:[#allocation75_spill] sm:$0xff] %v9530_v1  ;;  %v2900_v53 = vadd.f32 %v9285_v38, %v2788_v36  ;;  %v2958_v33 = vmax.f32 %v2894_v55, 0.0  ;;  %v1593_v42 = vadd.f32 %v12970_v56, %v12969_v39  ;;  %v3083_v26 = vunpack.c.l.b16 %v2994_v4 }
 0x47c   :  { %12961 = vst [vmem:[#allocation55_spill] sm:$0xff] %v9532_v10  ;;  %v3084_v3 = vunpack.c.h.b16 %v2994_v4  ;;  %v2847_v55 = vadd.f32 %v9306_v22, %v2735_v19 }
 0x47d   :  { %v2964_v25 = vmax.f32 %v2900_v53, 0.0  ;;  %3381 = vrot.lane.b32.xlu2 %v9513_v29, %s7131_s25  ;;  %v2995_v27 = vpack.c.bf16 %v2958_v33, %v2957_v60  ;;  %v2639_v51 = vpop.f32.mrf.mxu0  ;;  %v12972_v33 = vld [vmem:[#allocation21_spill] sm:$0xff] }
 0x47e   :  { %v2789_v36 = vadd.f32 %v2639_v51, %v2212_v52  ;;  %v2668_v9 = vpop.f32.mrf.mxu1  ;;  %v2166_v48 = vadd.f32 %v12972_v33, %v1593_v42  ;;  %v12975_v51 = vld [vmem:[#allocation36_spill] sm:$0xff]  ;;  %v2911_v56 = vmax.f32 %v2847_v55, 0.0 }
 0x47f   :  { %v2998_v7 = vpack.c.bf16 %v2964_v25, %v2963_v37  ;;  %v2790_v58 = vadd.f32 %v2668_v9, %v2213_v62  ;;  %v12974_v62 = vld [vmem:[#allocation29_spill] sm:$0xff]  ;;  %v12976_v9 = vld [vmem:[#allocation50_spill] sm:$0xff] }
 0x480   :  { %v2709_v14 = vpop.f32.mrf.mxu3  ;;  %v2901_v12 = vadd.f32 %v9285_v38, %v2789_v36  ;;  %v2682_v23 = vpop.f32.mrf.mxu2  ;;  %v1622_v39 = vadd.f32 %v12975_v51, %v12974_v62  ;;  %v12980_v62 = vld [vmem:[#allocation27_spill] sm:$0xff] }
 0x481   :  { %v3091_v41 = vunpack.c.l.b16 %v2998_v7  ;;  %v3092_v53 = vunpack.c.h.b16 %v2998_v7  ;;  %v2736_v60 = vadd.f32 %v2709_v14, %v12971_v44  ;;  %v2902_v47 = vadd.f32 %v9285_v38, %v2790_v58 }
 0x482   :  { %v2965_v4 = vmax.f32 %v2901_v12, 0.0  ;;  %v2743_v7 = vadd.f32 %v2682_v23, %v2166_v48  ;;  %v3085_v58 = vunpack.c.l.b16 %v2995_v27  ;;  %v3086_v14 = vunpack.c.h.b16 %v2995_v27 }
 0x483   :  { %v9552_v37 = vpack.c.b16 %v3091_v41, %v3083_v26  ;;  %v9554_v52 = vpack.c.b16 %v3092_v53, %v3084_v3  ;;  %v2848_v19 = vadd.f32 %v9306_v22, %v2736_v60  ;;  %v2966_v25 = vmax.f32 %v2902_v47, 0.0  ;;  %v12978_v47 = vld [vmem:[#allocation71_spill] sm:$0xff] }
 0x484   :  { %v2167_v26 = vadd.f32 %v12976_v9, %v1622_v39  ;;  %v2855_v12 = vadd.f32 %v9316_v18, %v2743_v7 }
 0x485   :  { %12973 = vst [vmem:[#allocation78_spill] sm:$0xff] %v9552_v37  ;;  %v2912_v36 = vmax.f32 %v2848_v19, 0.0  ;;  %3213 = vrot.lane.b32.xlu0 %v9552_v37, %s7130_s24  ;;  %3215 = vrot.lane.b32.xlu1 %v9554_v52, %s7130_s24  ;;  %v2999_v42 = vpack.c.bf16 %v2966_v25, %v2965_v4  ;;  %v12979_v25 = vld [vmem:[#allocation59_spill] sm:$0xff] }
 0x486   :  { %v2919_v48 = vmax.f32 %v2855_v12, 0.0  ;;  %v1598_v51 = vadd.f32 %v12980_v62, %v12979_v25 }
 0x487   :  { %v2972_v3 = vpack.c.bf16 %v2912_v36, %v2911_v56  ;;  %v3093_v22 = vunpack.c.l.b16 %v2999_v42  ;;  %v3094_v41 = vunpack.c.h.b16 %v2999_v42 }
 0x488   :  { %v2711_v53 = vpop.f32.mrf.mxu3  ;;  %v2685_v55 = vpop.f32.mrf.mxu2 }
 0x489   :  { %v2744_v23 = vadd.f32 %v2711_v53, %v2167_v26  ;;  %v9565_v44 = vpack.c.b16 %v3093_v22, %v3085_v58  ;;  %v9567_v60 = vpack.c.b16 %v3094_v41, %v3086_v14  ;;  %v2751_v4 = vadd.f32 %v2685_v55, %v12978_v47  ;;  %v12981_v58 = vld [vmem:[#allocation72_spill] sm:$0xff]  ;;  %v12982_v22 = vld [vmem:[#allocation37_spill] sm:$0xff]  ;;  %v9582_v53 = vpop.permute.xlu2 %3163 }
 0x48a   :  { %v3039_v39 = vunpack.c.l.b16 %v2972_v3  ;;  %v3040_v56 = vunpack.c.h.b16 %v2972_v3  ;;  %v2182_v41 = vadd.f32 %v12982_v22, %v1598_v51 }
 0x48b   :  { %12977 = vst [vmem:[#allocation54_spill] sm:$0xff] %v9565_v44  ;;  %v2856_v33 = vadd.f32 %v9316_v18, %v2744_v23  ;;  %3217 = vrot.lane.b32.xlu2 %v9565_v44, %s7130_s24  ;;  %v2863_v36 = vadd.f32 %v9300_v57, %v2751_v4 }
 0x48d   :  { %v2920_v27 = vmax.f32 %v2856_v33, 0.0  ;;  %3185 = vrot.lane.b32.xlu0 %v9492_v31, %s7130_s24  ;;  %3399 = vrot.lane.b32.xlu1 %v9554_v52, %s7131_s25  ;;  %v3162_v18 = vpop.permute.xlu1 %3161  ;;  %v12986_v33 = vld [vmem:[#allocation17_spill] sm:$0xff]  ;;  %v2927_v4 = vmax.f32 %v2863_v36, 0.0 }
 0x48e   :  { %v9590_v3 = vsel %vm705_vm3, %v3162_v18, %v9582_v53 }
 0x48f   :  { %v2976_v19 = vpack.c.bf16 %v2920_v27, %v2919_v48  ;;  %12985 = vst [vmem:[#allocation80_spill] sm:$0xff] %v9590_v3  ;;  %v12987_v48 = vld [vmem:[#allocation32_spill] sm:$0xff] }
 0x490   :  { %v2714_v7 = vpop.f32.mrf.mxu3  ;;  %v2687_v26 = vpop.f32.mrf.mxu2  ;;  %v1627_v47 = vadd.f32 %v12987_v48, %v12986_v33 }
 0x491   :  { %v3047_v42 = vunpack.c.l.b16 %v2976_v19  ;;  %v3048_v9 = vunpack.c.h.b16 %v2976_v19  ;;  %v2752_v14 = vadd.f32 %v2714_v7, %v12981_v58  ;;  %v2759_v27 = vadd.f32 %v2687_v26, %v2182_v41  ;;  %v12988_v26 = vld [vmem:[#allocation18_spill] sm:$0xff]  ;;  %v12989_v58 = vld [vmem:[#allocation45_spill] sm:$0xff] }
 0x492   :  { %v2183_v25 = vadd.f32 %v9335_v59, %v1627_v47 }
 0x493   :  { %v9584_v12 = vpack.c.b16 %v3047_v42, %v3039_v39  ;;  %v9586_v55 = vpack.c.b16 %v3048_v9, %v3040_v56  ;;  %v2864_v23 = vadd.f32 %v9300_v57, %v2752_v14  ;;  %3409 = vrot.lane.b32.xlu2 %v9590_v3, %s7131_s25  ;;  %v2871_v57 = vadd.f32 %v9353_v20, %v2759_v27 }
 0x494   :  { %v1603_v14 = vadd.f32 %v12989_v58, %v12988_v26 }
 0x495   :  { %12983 = vst [vmem:[#allocation79_spill] sm:$0xff] %v9584_v12  ;;  %v2928_v19 = vmax.f32 %v2864_v23, 0.0  ;;  %3187 = vrot.lane.b32.xlu0 %v9494_v0, %s7130_s24  ;;  %3401 = vrot.lane.b32.xlu1 %v9565_v44, %s7131_s25  ;;  %v2935_v7 = vmax.f32 %v2871_v57, 0.0 }
 0x496   :  { %12984 = vst [vmem:[#allocation25_spill] sm:$0xff] %v9586_v55 }
 0x497   :  { %v2980_v62 = vpack.c.bf16 %v2928_v19, %v2927_v4 }
 0x498   :  { %v2716_v51 = vpop.f32.mrf.mxu3  ;;  %v2690_v39 = vpop.f32.mrf.mxu2 }
 0x499   :  { %v2760_v56 = vadd.f32 %v2716_v51, %v2183_v25  ;;  %v2767_v36 = vadd.f32 %v2690_v39, %v9339_v8  ;;  %v3055_v59 = vunpack.c.l.b16 %v2980_v62  ;;  %v3056_v22 = vunpack.c.h.b16 %v2980_v62  ;;  %v12992_v25 = vld [vmem:[#allocation14_spill] sm:$0xff]  ;;  %v12993_v51 = vld [vmem:[#allocation12_spill] sm:$0xff] }
 0x49a   :  { %v2198_v8 = vadd.f32 %v9357_v6, %v1603_v14  ;;  %v1632_v57 = vadd.f32 %v12993_v51, %v12992_v25 }
 0x49b   :  { %v2872_v18 = vadd.f32 %v9353_v20, %v2760_v56  ;;  %v2879_v23 = vadd.f32 %v9329_v21, %v2767_v36 }
 0x49c   :  { %v2199_v6 = vadd.f32 %v9367_v43, %v1632_v57 }
 0x49d   :  { %v2936_v42 = vmax.f32 %v2872_v18, 0.0  ;;  %3397 = vrot.lane.b32.xlu0 %v9552_v37, %s7131_s25  ;;  %v2943_v62 = vmax.f32 %v2879_v23, 0.0  ;;  %v9621_v18 = vpop.permute.xlu2 %3179 }
 0x49f   :  { %v2984_v9 = vpack.c.bf16 %v2936_v42, %v2935_v7 }
 0x4a0   :  { %v2719_v41 = vpop.f32.mrf.mxu3  ;;  %v2692_v47 = vpop.f32.mrf.mxu2 }
 0x4a1   :  { %v3063_v33 = vunpack.c.l.b16 %v2984_v9  ;;  %v3064_v48 = vunpack.c.h.b16 %v2984_v9  ;;  %v2768_v20 = vadd.f32 %v2719_v41, %v9359_v13  ;;  %v2775_v39 = vadd.f32 %v2692_v47, %v2198_v8  ;;  %v3178_v13 = vpop.permute.xlu1 %3177 }
 0x4a3   :  { %v9612_v4 = vpack.c.b16 %v3063_v33, %v3055_v59  ;;  %v9614_v27 = vpack.c.b16 %v3064_v48, %v3056_v22  ;;  %v2880_v19 = vadd.f32 %v9329_v21, %v2768_v20  ;;  %v2887_v42 = vadd.f32 %v9288_v49, %v2775_v39  ;;  %v12995_v33 = vld [vmem:[#allocation60_spill] sm:$0xff]  ;;  %v12996_v48 = vld [vmem:[#allocation46_spill] sm:$0xff] }
 0x4a4   :  { %v1608_v47 = vadd.f32 %v12996_v48, %v12995_v33 }
 0x4a5   :  { %12990 = vst [vmem:[#allocation56_spill] sm:$0xff] %v9612_v4  ;;  %v2944_v56 = vmax.f32 %v2880_v19, 0.0  ;;  %3201 = vrot.lane.b32.xlu0 %v9530_v1, %s7130_s24  ;;  %v2951_v58 = vmax.f32 %v2887_v42, 0.0  ;;  %v9629_v22 = vpop.permute.xlu2 %3195 }
 0x4a6   :  { %12991 = vst [vmem:[#allocation81_spill] sm:$0xff] %v9614_v27 }
 0x4a7   :  { %v2988_v7 = vpack.c.bf16 %v2944_v56, %v2943_v62  ;;  %v2214_v62 = vadd.f32 %v9387_v61, %v1608_v47 }
 0x4a8   :  { %v2721_v36 = vpop.f32.mrf.mxu3  ;;  %v2695_v9 = vpop.f32.mrf.mxu2 }
 0x4a9   :  { %v2776_v21 = vadd.f32 %v2721_v36, %v2199_v6  ;;  %v2783_v14 = vadd.f32 %v2695_v9, %v9375_v17  ;;  %v3071_v20 = vunpack.c.l.b16 %v2988_v7  ;;  %v12998_v36 = vld [vmem:[#allocation16_spill] sm:$0xff] }
 0x4ab   :  { %v2888_v26 = vadd.f32 %v9288_v49, %v2776_v21  ;;  %v3072_v49 = vunpack.c.h.b16 %v2988_v7  ;;  %v2895_v8 = vadd.f32 %v9264_v50, %v2783_v14  ;;  %v12997_v7 = vld [vmem:[#allocation61_spill] sm:$0xff] }
 0x4ac   :  { %v1637_v42 = vadd.f32 %v12998_v36, %v12997_v7 }
 0x4ad   :  { %v2952_v59 = vmax.f32 %v2888_v26, 0.0  ;;  %3203 = vrot.lane.b32.xlu0 %v9532_v10, %s7130_s24  ;;  %v3194_v41 = vpop.permute.xlu1 %3193  ;;  %v2959_v9 = vmax.f32 %v2895_v8, 0.0 }
 0x4ae   :  { %v9633_v43 = vsel %vm705_vm3, %v3194_v41, %v9629_v22 }
 0x4af   :  { %v2992_v23 = vpack.c.bf16 %v2952_v59, %v2951_v58  ;;  %12994 = vst [vmem:[#allocation43_spill] sm:$0xff] %v9633_v43  ;;  %3441 = vrot.lane.b32.xlu1 %v9633_v43, %s7131_s25  ;;  %v3168_v48 = vpop.permute.xlu2 %3167 }
 0x4b0   :  { %v2724_v17 = vpop.f32.mrf.mxu3  ;;  %v2697_v57 = vpop.f32.mrf.mxu2 }
 0x4b1   :  { %v3079_v19 = vunpack.c.l.b16 %v2992_v23  ;;  %v3080_v25 = vunpack.c.h.b16 %v2992_v23  ;;  %v2784_v51 = vadd.f32 %v2724_v17, %v9389_v28  ;;  %v2791_v21 = vadd.f32 %v2697_v57, %v2214_v62 }
 0x4b2   :  { %v2215_v28 = vadd.f32 %v9394_v30, %v1637_v42 }
 0x4b3   :  { %v9642_v39 = vpack.c.b16 %v3079_v19, %v3071_v20  ;;  %v9644_v56 = vpack.c.b16 %v3080_v25, %v3072_v49  ;;  %v2896_v6 = vadd.f32 %v9264_v50, %v2784_v51  ;;  %v2903_v61 = vadd.f32 %v9285_v38, %v2791_v21 }
 0x4b4   :  { %v9662_v19 = vsel %vm705_vm3, %v3178_v13, %v9621_v18 }
 0x4b5   :  { %v2960_v26 = vmax.f32 %v2896_v6, 0.0  ;;  %3385 = vrot.lane.b32.xlu0 %v9530_v1, %s7131_s25  ;;  %v2967_v23 = vmax.f32 %v2903_v61, 0.0  ;;  %12999 = vst [vmem:[#allocation82_spill] sm:$0xff] %v9662_v19 }
 0x4b7   :  { %v2996_v58 = vpack.c.bf16 %v2960_v26, %v2959_v9  ;;  %v3212_v51 = vpop.permute.xlu2 %3211 }
 0x4b8   :  { %v2726_v14 = vpop.f32.mrf.mxu3 }
 0x4b9   :  { %v2792_v59 = vadd.f32 %v2726_v14, %v2215_v28  ;;  %v3087_v47 = vunpack.c.l.b16 %v2996_v58  ;;  %v3088_v20 = vunpack.c.h.b16 %v2996_v58 }
 0x4bb   :  { %v2904_v41 = vadd.f32 %v9285_v38, %v2792_v59 }
 0x4bd   :  { %v2968_v50 = vmax.f32 %v2904_v41, 0.0  ;;  %3219 = vrot.lane.b32.xlu0 %v9567_v60, %s7130_s24 }
 0x4bf   :  { %v3000_v33 = vpack.c.bf16 %v2968_v50, %v2967_v23  ;;  %v3184_v6 = vpop.permute.xlu2 %3183 }
 0x4c1   :  { %v3095_v49 = vunpack.c.l.b16 %v3000_v33  ;;  %v3096_v17 = vunpack.c.h.b16 %v3000_v33 }
 0x4c3   :  { %v9656_v8 = vpack.c.b16 %v3095_v49, %v3087_v47  ;;  %v9658_v30 = vpack.c.b16 %v3096_v17, %v3088_v20 }
 0x4c5   :  { %3425 = vrot.lane.b32.xlu0 %v9662_v19, %s7131_s25 }
 0x4c7   :  { %v3166_v38 = vpop.permute.xlu1 %3165  ;;  %v9693_v9 = vpop.permute.xlu2 %3395 }
 0x4c8   :  { %v9667_v25 = vsel %vm705_vm3, %v3166_v38, %v3168_v48  ;;  %v9673_v57 = vsel %vm705_vm3, %v9582_v53, %v3166_v38 }
 0x4c9   :  { %13000 = vst [vmem:[#allocation57_spill] sm:$0xff] %v9667_v25  ;;  %3413 = vrot.lane.b32.xlu1 %v9667_v25, %s7131_s25 }
 0x4ca   :  { %13001 = vst [vmem:[#allocation83_spill] sm:$0xff] %v9673_v57 }
 0x4cd   :  { %3411 = vrot.lane.b32.xlu0 %v9673_v57, %s7131_s25  ;;  %v3170_v53 = vpop.permute.xlu0 %3169 }
 0x4ce   :  { %v9713_v59 = vsel %vm705_vm3, %v3168_v48, %v3170_v53 }
 0x4cf   :  { %v3210_v13 = vpop.permute.xlu1 %3209  ;;  %v3200_v28 = vpop.permute.xlu2 %3199  ;;  %13007 = vst [vmem:[#allocation44_spill] sm:$0xff] %v9713_v59 }
 0x4d0   :  { %v9678_v62 = vsel %vm705_vm3, %v3210_v13, %v3212_v51 }
 0x4d1   :  { %13002 = vst [vmem:[#allocation40_spill] sm:$0xff] %v9678_v62  ;;  %3457 = vrot.lane.b32.xlu2 %v9678_v62, %s7131_s25 }
 0x4d5   :  { %v9697_v26 = vpop.permute.xlu0 %3171 }
 0x4d7   :  { %v3182_v7 = vpop.permute.xlu1 %3181  ;;  %v9755_v13 = vpop.permute.xlu2 %3381 }
 0x4d8   :  { %v9683_v36 = vsel %vm705_vm3, %v3182_v7, %v3184_v6  ;;  %v9687_v42 = vsel %vm705_vm3, %v9621_v18, %v3182_v7 }
 0x4d9   :  { %13003 = vst [vmem:[#allocation86_spill] sm:$0xff] %v9683_v36  ;;  %3429 = vrot.lane.b32.xlu2 %v9683_v36, %s7131_s25  ;;  %3427 = vrot.lane.b32.xlu1 %v9687_v42, %s7131_s25 }
 0x4da   :  { %13004 = vst [vmem:[#allocation24_spill] sm:$0xff] %v9687_v42 }
 0x4df   :  { %v9695_v21 = vpop.permute.xlu1 %3393 }
 0x4e7   :  { %v9710_v61 = vpop.permute.xlu0 %3383 }
 0x4e8   :  { %v3198_v58 = vpop.permute.xlu1 %3197 }
 0x4e9   :  { %v9700_v14 = vsel %vm705_vm3, %v3198_v58, %v3200_v28  ;;  %v9704_v18 = vsel %vm705_vm3, %v9629_v22, %v3198_v58  ;;  %v9722_v22 = vsel %vm705_vm3, %v3170_v53, %v9697_v26  ;;  %v3218_v53 = vpop.permute.xlu2 %3217 }
 0x4ea   :  { %13005 = vst [vmem:[#allocation47_spill] sm:$0xff] %v9700_v14  ;;  %3445 = vrot.lane.b32.xlu0 %v9700_v14, %s7131_s25  ;;  %3443 = vrot.lane.b32.xlu2 %v9704_v18, %s7131_s25 }
 0x4eb   :  { %13006 = vst [vmem:[#allocation31_spill] sm:$0xff] %v9704_v18 }
 0x4ec   :  { %13009 = vst [vmem:[#allocation13_spill] sm:$0xff] %v9722_v22 }
 0x4f2   :  { %3415 = vrot.lane.b32.xlu2 %v9713_v59, %s7131_s25 }
 0x4f7   :  { %v3214_v41 = vpop.permute.xlu0 %3213  ;;  %v3216_v23 = vpop.permute.xlu1 %3215 }
 0x4f8   :  { %v9718_v50 = vsel %vm705_vm3, %v3214_v41, %v3216_v23  ;;  %v9729_v48 = vsel %vm705_vm3, %v3212_v51, %v3214_v41  ;;  %v9770_v58 = vsel %vm705_vm3, %v3216_v23, %v3218_v53 }
 0x4f9   :  { %13008 = vst [vmem:[#allocation11_spill] sm:$0xff] %v9718_v50  ;;  %3461 = vrot.lane.b32.xlu0 %v9718_v50, %s7131_s25 }
 0x4fa   :  { %3417 = vrot.lane.b32.xlu2 %v9722_v22, %s7131_s25  ;;  %13010 = vst [vmem:[#allocation42_spill] sm:$0xff] %v9729_v48 }
 0x4fb   :  { %13015 = vst [vmem:[#allocation22_spill] sm:$0xff] %v9770_v58 }
 0x4ff   :  { %v3186_v33 = vpop.permute.xlu0 %3185 }
 0x500   :  { %v9736_v20 = vsel %vm705_vm3, %v3184_v6, %v3186_v33 }
 0x501   :  { %3459 = vrot.lane.b32.xlu0 %v9729_v48, %s7131_s25  ;;  %13011 = vst [vmem:[#allocation34_spill] sm:$0xff] %v9736_v20 }
 0x507   :  { %v9733_v47 = vpop.permute.xlu0 %3187 }
 0x508   :  { %v9744_v17 = vsel %vm705_vm3, %v3186_v33, %v9733_v47 }
 0x509   :  { %3431 = vrot.lane.b32.xlu0 %v9736_v20, %s7131_s25  ;;  %13012 = vst [vmem:[#allocation62_spill] sm:$0xff] %v9744_v17 }
 0x50f   :  { %v9740_v49 = vpop.permute.xlu0 %3397 }
 0x511   :  { %3433 = vrot.lane.b32.xlu0 %v9744_v17, %s7131_s25  ;;  %v9808_v17 = vpop.permute.xlu1 %3399 }
 0x517   :  { %v3202_v38 = vpop.permute.xlu0 %3201 }
 0x518   :  { %v9749_v51 = vsel %vm705_vm3, %v3200_v28, %v3202_v38 }
 0x519   :  { %13013 = vst [vmem:[#allocation19_spill] sm:$0xff] %v9749_v51  ;;  %3447 = vrot.lane.b32.xlu1 %v9749_v51, %s7131_s25  ;;  %3377 = vrot.lane.b32.xlu0 %v9397_v5, %s7131_s25  ;;  %v9814_v18 = vpop.permute.xlu1 %3401 }
 0x51f   :  { %v9757_v6 = vpop.permute.xlu0 %3203 }
 0x520   :  { %v9761_v7 = vsel %vm705_vm3, %v3202_v38, %v9757_v6  ;;  %v13017_v38 = vld [vmem:[#allocation51_spill] sm:$0xff] }
 0x521   :  { %13014 = vst [vmem:[#allocation63_spill] sm:$0xff] %v9761_v7  ;;  %3449 = vrot.lane.b32.xlu1 %v9761_v7, %s7131_s25  ;;  %3349 = vrot.lane.b32.xlu0 %v9437_v11, %s7131_s25  ;;  %v3442_v20 = vpop.permute.xlu1 %3441 }
 0x527   :  { %v9767_v28 = vpop.permute.xlu0 %3385 }
 0x529   :  { %3463 = vrot.lane.b32.xlu1 %v9770_v58, %s7131_s25  ;;  %3363 = vrot.lane.b32.xlu0 %v9372_v2, %s7131_s25 }
 0x52f   :  { %v9776_v41 = vpop.permute.xlu0 %3219 }
 0x530   :  { %v9780_v33 = vsel %vm705_vm3, %v3218_v53, %v9776_v41  ;;  %v3410_v53 = vpop.permute.xlu2 %3409 }
 0x531   :  { %13016 = vst [vmem:[#allocation68_spill] sm:$0xff] %v9780_v33  ;;  %3465 = vrot.lane.b32.xlu2 %v9780_v33, %s7131_s25  ;;  %3365 = vrot.lane.b32.xlu1 %v9475_v34, %s7131_s25 }
 0x532   :  { %3347 = vrot.lane.b32.xlu0 %v9341_v40, %s7131_s25 }
 0x537   :  { %v3426_v23 = vpop.permute.xlu0 %3425 }
 0x538   :  { %v3458_v42 = vpop.permute.xlu2 %3457 }
 0x539   :  { %3367 = vrot.lane.b32.xlu2 %v9477_v54, %s7131_s25  ;;  %3379 = vrot.lane.b32.xlu1 %v9399_v16, %s7131_s25 }
 0x53a   :  { %3205 = vrot.lane.b32.xlu0 %v9642_v39, %s7130_s24 }
 0x53b   :  { %v3414_v14 = vpop.permute.xlu1 %3413 }
 0x53f   :  { %v3412_v7 = vpop.permute.xlu0 %3411 }
 0x540   :  { %v3430_v36 = vpop.permute.xlu2 %3429 }
 0x541   :  { %3369 = vrot.lane.b32.xlu2 %v9492_v31, %s7131_s25  ;;  %3351 = vrot.lane.b32.xlu1 %v9439_v15, %s7131_s25 }
 0x542   :  { %3191 = vrot.lane.b32.xlu0 %v9614_v27, %s7130_s24 }
 0x548   :  { %v3444_v62 = vpop.permute.xlu2 %3443 }
 0x549   :  { %3361 = vrot.lane.b32.xlu2 %v9370_v63, %s7131_s25  ;;  %3353 = vrot.lane.b32.xlu1 %v9452_v46, %s7131_s25  ;;  %v3515_v50 = vsel %vm768_vm2, %v3442_v20, %v3444_v62 }
 0x54b   :  { %v3428_v3 = vpop.permute.xlu1 %3427 }
 0x54c   :  { %v3508_v25 = vsel %vm768_vm2, %v3426_v23, %v3428_v3  ;;  %v3509_v37 = vsel %vm768_vm2, %v3428_v3, %v3430_v36  ;;  %v3495_v3 = vsel %vm768_vm2, %v9693_v9, %v9740_v49 }
 0x550   :  { %v3416_v19 = vpop.permute.xlu2 %3415 }
 0x551   :  { %3345 = vrot.lane.b32.xlu2 %v13017_v38, %s7131_s25  ;;  %3221 = vrot.lane.b32.xlu1 %v9656_v8, %s7130_s24 }
 0x558   :  { %v9830_v20 = vpop.permute.xlu2 %3417 }
 0x559   :  { %3223 = vrot.lane.b32.xlu2 %v9658_v30, %s7130_s24  ;;  %3207 = vrot.lane.b32.xlu1 %v9644_v56, %s7130_s24 }
 0x55c   :  { %v3446_v43 = vpop.permute.xlu0 %3445 }
 0x55d   :  { %v3516_v58 = vsel %vm768_vm2, %v3444_v62, %v3446_v43 }
 0x561   :  { %3189 = vrot.lane.b32.xlu2 %v9612_v4, %s7130_s24  ;;  %3173 = vrot.lane.b32.xlu1 %v9584_v12, %s7130_s24 }
 0x569   :  { %3175 = vrot.lane.b32.xlu2 %v9586_v55, %s7130_s24 }
 0x56b   :  { %v3462_v48 = vpop.permute.xlu0 %3461 }
 0x573   :  { %v3460_v33 = vpop.permute.xlu0 %3459 }
 0x574   :  { %v3522_v59 = vsel %vm768_vm2, %v3458_v42, %v3460_v33  ;;  %v3523_v51 = vsel %vm768_vm2, %v3460_v33, %v3462_v48  ;;  %v3501_v42 = vsel %vm768_vm2, %v3410_v53, %v3412_v7 }
 0x575   :  { %3593 = vmatpush.bf16.msra.mxu0 %v3522_v59  ;;  %3632 = vmatpush.bf16.msra.mxu1 %v3523_v51  ;;  %v3502_v59 = vsel %vm768_vm2, %v3412_v7, %v3414_v14 }
 0x579   :  { %3594 = vmatpush.bf16.msra.mxu0 %v3515_v50  ;;  %3633 = vmatpush.bf16.msra.mxu1 %v3516_v58  ;;  %v3494_v50 = vsel %vm768_vm2, %v9695_v21, %v9693_v9 }
 0x57b   :  { %v3432_v22 = vpop.permute.xlu0 %3431 }
 0x57c   :  { %v3510_v1 = vsel %vm768_vm2, %v3430_v36, %v3432_v22 }
 0x57d   :  { %3595 = vmatpush.bf16.msra.mxu0 %v3508_v25  ;;  %3634 = vmatpush.bf16.msra.mxu1 %v3509_v37 }
 0x581   :  { %3596 = vmatpush.bf16.msra.mxu0 %v3501_v42  ;;  %3635 = vmatpush.bf16.msra.mxu1 %v3502_v59 }
 0x583   :  { %v9832_v62 = vpop.permute.xlu0 %3433 }
 0x585   :  { %3597 = vmatpush.bf16.msra.mxu0 %v3494_v50  ;;  %3636 = vmatpush.bf16.msra.mxu1 %v3495_v3 }
 0x58b   :  { %v9840_v37 = vpop.permute.xlu2 %3465  ;;  %v3378_v25 = vpop.permute.xlu0 %3377 }
 0x58c   :  { %v3448_v51 = vpop.permute.xlu1 %3447 }
 0x58d   :  { %v3517_v9 = vsel %vm768_vm2, %v3446_v43, %v3448_v51  ;;  %v3504_v43 = vsel %vm768_vm2, %v3416_v19, %v9830_v20 }
 0x593   :  { %v3368_v7 = vpop.permute.xlu2 %3367  ;;  %v3350_v58 = vpop.permute.xlu0 %3349 }
 0x594   :  { %v9842_v33 = vpop.permute.xlu1 %3449 }
 0x595   :  { %v3518_v50 = vsel %vm768_vm2, %v3448_v51, %v9842_v33 }
 0x59b   :  { %v9844_v23 = vpop.permute.xlu2 %3369  ;;  %v3364_v53 = vpop.permute.xlu0 %3363 }
 0x59c   :  { %v3464_v42 = vpop.permute.xlu1 %3463 }
 0x59d   :  { %v3524_v21 = vsel %vm768_vm2, %v3462_v48, %v3464_v42  ;;  %v3525_v59 = vsel %vm768_vm2, %v3464_v42, %v9840_v37  ;;  %v3511_v48 = vsel %vm768_vm2, %v3432_v22, %v9832_v62  ;;  %v3503_v42 = vsel %vm768_vm2, %v3414_v14, %v3416_v19 }
 0x59e   :  { %3671 = vmatpush.bf16.msra.mxu2 %v3524_v21  ;;  %3710 = vmatpush.bf16.msra.mxu3 %v3525_v59  ;;  %v3497_v19 = vsel %vm768_vm2, %v9808_v17, %v9814_v18 }
 0x5a2   :  { %3672 = vmatpush.bf16.msra.mxu2 %v3517_v9  ;;  %3711 = vmatpush.bf16.msra.mxu3 %v3518_v50 }
 0x5a3   :  { %v3362_v3 = vpop.permute.xlu2 %3361 }
 0x5a4   :  { %v3348_v57 = vpop.permute.xlu0 %3347  ;;  %v3366_v44 = vpop.permute.xlu1 %3365  ;;  %v3480_v14 = vsel %vm768_vm2, %v3362_v3, %v3364_v53 }
 0x5a5   :  { %v3481_v22 = vsel %vm768_vm2, %v3364_v53, %v3366_v44  ;;  %v3474_v3 = vsel %vm768_vm2, %v3348_v57, %v3350_v58 }
 0x5a6   :  { %3673 = vmatpush.bf16.msra.mxu2 %v3510_v1  ;;  %3712 = vmatpush.bf16.msra.mxu3 %v3511_v48  ;;  %v3496_v1 = vsel %vm768_vm2, %v9740_v49, %v9808_v17  ;;  %v3490_v49 = vsel %vm768_vm2, %v9710_v61, %v9767_v28 }
 0x5aa   :  { %3674 = vmatpush.bf16.msra.mxu2 %v3503_v42  ;;  %3713 = vmatpush.bf16.msra.mxu3 %v3504_v43 }
 0x5ab   :  { %v3346_v51 = vpop.permute.xlu2 %3345 }
 0x5ac   :  { %v9858_v21 = vpop.permute.xlu0 %3205  ;;  %v3380_v59 = vpop.permute.xlu1 %3379  ;;  %v3473_v53 = vsel %vm768_vm2, %v3346_v51, %v3348_v57 }
 0x5ad   :  { %v3487_v9 = vsel %vm768_vm2, %v3378_v25, %v3380_v59  ;;  %v3488_v36 = vsel %vm768_vm2, %v3380_v59, %v9755_v13  ;;  %v3489_v25 = vsel %vm768_vm2, %v9755_v13, %v9710_v61  ;;  %v3482_v13 = vsel %vm768_vm2, %v3366_v44, %v3368_v7 }
 0x5ae   :  { %3598 = vmatpush.bf16.msra.mxu0 %v3487_v9  ;;  %3637 = vmatpush.bf16.msra.mxu1 %v3488_v36  ;;  %v3483_v61 = vsel %vm768_vm2, %v3368_v7, %v9844_v23 }
 0x5af   :  { %3675 = vmatpush.bf16.msra.mxu2 %v3496_v1  ;;  %3714 = vmatpush.bf16.msra.mxu3 %v3497_v19 }
 0x5b2   :  { %3599 = vmatpush.bf16.msra.mxu0 %v3480_v14  ;;  %3638 = vmatpush.bf16.msra.mxu1 %v3481_v22  ;;  %v7008_v14 = vld [vmem:[#allocation5 + $0x10] sm:$0xf0] }
 0x5b3   :  { %3676 = vmatpush.bf16.msra.mxu2 %v3489_v25  ;;  %3715 = vmatpush.bf16.msra.mxu3 %v3490_v49  ;;  %v9877_v50 = vpop.permute.xlu2 %3223  ;;  %v6846_v49 = vld [vmem:[#allocation5 + $0x24] sm:$0xf] }
 0x5b4   :  { %13018 = vst [vmem:[#allocation41_spill] sm:$0xff] %v9877_v50  ;;  %v9879_v17 = vpop.permute.xlu0 %3191  ;;  %v3352_v48 = vpop.permute.xlu1 %3351 }
 0x5b5   :  { %13019 = vst [vmem:[#allocation69_spill] sm:$0xff] %v9879_v17  ;;  %3439 = vrot.lane.b32.xlu0 %v9879_v17, %s7131_s25  ;;  %v3475_v42 = vsel %vm768_vm2, %v3350_v58, %v3352_v48  ;;  %v9906_v58 = vsel %vm705_vm3, %v9757_v6, %v9858_v21 }
 0x5b6   :  { %3600 = vmatpush.bf16.msra.mxu0 %v3473_v53  ;;  %3639 = vmatpush.bf16.msra.mxu1 %v3474_v3  ;;  %13021 = vst [vmem:[#allocation39_spill] sm:$0xff] %v9906_v58  ;;  %v7010_v3 = vld [vmem:[#allocation5 + $0x50] sm:$0xf0] }
 0x5b7   :  { %3677 = vmatpush.bf16.msra.mxu2 %v3482_v13  ;;  %3716 = vmatpush.bf16.msra.mxu3 %v3483_v61  ;;  %v6854_v61 = vld [vmem:[#allocation5 + $0x64] sm:$0xf] }
 0x5bb   :  { %3678 = vmatpush.bf16.msra.mxu2 %v3475_v42  ;;  %v3190_v43 = vpop.permute.xlu2 %3189  ;;  %v7011_v42 = vld [vmem:[#allocation5 + $0x70] sm:$0xf0] }
 0x5bc   :  { %v9889_v59 = vpop.permute.xlu1 %3353  ;;  %v9893_v51 = vsel %vm705_vm3, %v9733_v47, %v3190_v43 }
 0x5bd   :  { %13020 = vst [vmem:[#allocation23_spill] sm:$0xff] %v9893_v51  ;;  %3435 = vrot.lane.b32.xlu1 %v9893_v51, %s7131_s25  ;;  %v3476_v44 = vsel %vm768_vm2, %v3352_v48, %v9889_v59  ;;  %v7009_v48 = vld [vmem:[#allocation5 + $0x30] sm:$0xf0] }
 0x5be   :  { %3717 = vmatpush.bf16.msra.mxu3 %v3476_v44  ;;  %v9977_v53 = vor.u32 %v7009_v48, %v6846_v49  ;;  %v6858_v44 = vld [vmem:[#allocation5 + $0x84] sm:$0xf] }
 0x5c3   :  { %v9899_v57 = vpop.permute.xlu2 %3175 }
 0x5c4   :  { %v3222_v7 = vpop.permute.xlu1 %3221  ;;  %3423 = vrot.lane.b32.xlu0 %v9899_v57, %s7131_s25 }
 0x5c5   :  { %3451 = vrot.lane.b32.xlu1 %v9906_v58, %s7131_s25  ;;  %v9918_v36 = vsel %vm705_vm3, %v3222_v7, %v9877_v50  ;;  %v9938_v19 = vsel %vm705_vm3, %v9776_v41, %v3222_v7  ;;  %v6842_v41 = vld [vmem:[#allocation5 + $0x4] sm:$0xf]  ;;  %v7012_v7 = vld [vmem:[#allocation5 + $0x90] sm:$0xf0] }
 0x5c6   :  { %13023 = vst [vmem:[#allocation76_spill] sm:$0xff] %v9918_v36  ;;  %v9954_v22 = vor.u32 %v7008_v14, %v6842_v41 }
 0x5c7   :  { %13025 = vst [vmem:[#allocation77_spill] sm:$0xff] %v9938_v19 }
 0x5c8   :  { %3718 = vmatmul.bf16.vlgmr.msra.gmra.mxu3 %v9954_v22  ;;  %3679 = vmatmul.bf16.vlgmr.msra.gmra.mxu2 %v9954_v22 }
 0x5c9   :  { %3601 = vmatmul.bf16.vlgmr.msra.gmra.mxu0 %v9954_v22  ;;  %3640 = vmatmul.bf16.vlgmr.msra.gmra.mxu1 %v9954_v22 }
 0x5cc   :  { %v9910_v47 = vpop.permute.xlu1 %3207 }
 0x5cd   :  { %13022 = vst [vmem:[#allocation28_spill] sm:$0xff] %v9910_v47  ;;  %3455 = vrot.lane.b32.xlu0 %v9910_v47, %s7131_s25  ;;  %3471 = vrot.lane.b32.xlu1 %v9877_v50, %s7131_s25  ;;  %v9965_v25 = vsel %vm705_vm3, %v9858_v21, %v9910_v47  ;;  %v6850_v21 = vld [vmem:[#allocation5 + $0x44] sm:$0xf] }
 0x5ce   :  { %13027 = vst [vmem:[#allocation38_spill] sm:$0xff] %v9965_v25  ;;  %v9995_v13 = vor.u32 %v7010_v3, %v6850_v21  ;;  %v6862_v3 = vld [vmem:[#allocation5 + $0xa4] sm:$0xf] }
 0x5d4   :  { %v3174_v9 = vpop.permute.xlu1 %3173 }
 0x5d5   :  { %3469 = vrot.lane.b32.xlu0 %v9918_v36, %s7131_s25  ;;  %v9924_v6 = vsel %vm705_vm3, %v3174_v9, %v9899_v57  ;;  %v9928_v1 = vsel %vm705_vm3, %v9697_v26, %v3174_v9  ;;  %v9948_v26 = vsel %vm705_vm3, %v3190_v43, %v9879_v17  ;;  %v10013_v43 = vor.u32 %v7011_v42, %v6854_v61  ;;  %v7013_v61 = vld [vmem:[#allocation5 + $0xb0] sm:$0xf0] }
 0x5d6   :  { %13024 = vst [vmem:[#allocation26_spill] sm:$0xff] %v9928_v1  ;;  %3421 = vrot.lane.b32.xlu2 %v9924_v6, %s7131_s25  ;;  %3419 = vrot.lane.b32.xlu1 %v9928_v1, %s7131_s25  ;;  %v10031_v9 = vor.u32 %v7012_v7, %v6858_v44  ;;  %v10055_v44 = vor.u32 %v7013_v61, %v6862_v3  ;;  %vm6268_vm3 = vcmask 720512  }
 0x5d7   :  { %13026 = vst [vmem:[#allocation30_spill] sm:$0xff] %v9948_v26 }
 0x5d8   :  { %3723 = vmatmul.bf16.gmra.mxu3 %v9977_v53  ;;  %3684 = vmatmul.bf16.gmra.mxu2 %v9977_v53  ;;  %13028 = vst [vmem:[#allocation15_spill] sm:$0xff] %v10031_v9 }
 0x5d9   :  { %3606 = vmatmul.bf16.gmra.mxu0 %v9977_v53  ;;  %3645 = vmatmul.bf16.gmra.mxu1 %v9977_v53  ;;  %13029 = vst [vmem:[#allocation64_spill] sm:$0xff] %v10055_v44 }
 0x5dd   :  { %3407 = vrot.lane.b32.xlu0 %v9658_v30, %s7131_s25 }
 0x5de   :  { %3405 = vrot.lane.b32.xlu2 %v9656_v8, %s7131_s25  ;;  %3467 = vrot.lane.b32.xlu1 %v9938_v19, %s7131_s25 }
 0x5e5   :  { %3391 = vrot.lane.b32.xlu0 %v9644_v56, %s7131_s25 }
 0x5e6   :  { %3437 = vrot.lane.b32.xlu2 %v9948_v26, %s7131_s25  ;;  %3403 = vrot.lane.b32.xlu1 %v9567_v60, %s7131_s25 }
 0x5e8   :  { %3728 = vmatmul.bf16.gmra.mxu3 %v9995_v13  ;;  %3689 = vmatmul.bf16.gmra.mxu2 %v9995_v13 }
 0x5e9   :  { %3611 = vmatmul.bf16.gmra.mxu0 %v9995_v13  ;;  %3650 = vmatmul.bf16.gmra.mxu1 %v9995_v13 }
 0x5ed   :  { %3375 = vrot.lane.b32.xlu0 %v9614_v27, %s7131_s25 }
 0x5ee   :  { %3453 = vrot.lane.b32.xlu2 %v9965_v25, %s7131_s25  ;;  %3387 = vrot.lane.b32.xlu1 %v9532_v10, %s7131_s25 }
 0x5f5   :  { %3359 = vrot.lane.b32.xlu0 %v9586_v55, %s7131_s25 }
 0x5f6   :  { %3389 = vrot.lane.b32.xlu2 %v9642_v39, %s7131_s25  ;;  %3371 = vrot.lane.b32.xlu1 %v9494_v0, %s7131_s25 }
 0x5f8   :  { %3733 = vmatmul.bf16.gmra.mxu3 %v10013_v43  ;;  %3694 = vmatmul.bf16.gmra.mxu2 %v10013_v43 }
 0x5f9   :  { %3616 = vmatmul.bf16.gmra.mxu0 %v10013_v43  ;;  %3655 = vmatmul.bf16.gmra.mxu1 %v10013_v43 }
 0x5fd   :  { %4301 = vrot.lane.b32.xlu0 %v13017_v38, %s7132_s26 }
 0x5fe   :  { %3373 = vrot.lane.b32.xlu2 %v9612_v4, %s7131_s25  ;;  %4303 = vrot.lane.b32.xlu1 %v9341_v40, %s7132_s26 }
 0x605   :  { %4307 = vrot.lane.b32.xlu0 %v9439_v15, %s7132_s26 }
 0x606   :  { %3357 = vrot.lane.b32.xlu2 %v9584_v12, %s7131_s25  ;;  %4309 = vrot.lane.b32.xlu1 %v9452_v46, %s7132_s26 }
 0x608   :  { %3738 = vmatmul.bf16.gmra.mxu3 %v10031_v9  ;;  %3699 = vmatmul.bf16.gmra.mxu2 %v10031_v9 }
 0x609   :  { %3621 = vmatmul.bf16.gmra.mxu0 %v10031_v9  ;;  %3660 = vmatmul.bf16.gmra.mxu1 %v10031_v9  ;;  %v13030_v9 = vld [vmem:[#allocation75_spill] sm:$0xff] }
 0x60d   :  { %4313 = vrot.lane.b32.xlu0 %v9584_v12, %s7132_s26 }
 0x60e   :  { %3355 = vrot.lane.b32.xlu2 %v9454_v24, %s7131_s25  ;;  %4315 = vrot.lane.b32.xlu1 %v9586_v55, %s7132_s26 }
 0x615   :  { %4319 = vrot.lane.b32.xlu0 %v9372_v2, %s7132_s26 }
 0x616   :  { %4305 = vrot.lane.b32.xlu2 %v9437_v11, %s7132_s26  ;;  %4321 = vrot.lane.b32.xlu1 %v9475_v34, %s7132_s26 }
 0x618   :  { %3743 = vmatmul.bf16.gmra.mxu3 %v10055_v44  ;;  %3704 = vmatmul.bf16.gmra.mxu2 %v10055_v44 }
 0x619   :  { %3626 = vmatmul.bf16.gmra.mxu0 %v10055_v44  ;;  %3665 = vmatmul.bf16.gmra.mxu1 %v10055_v44  ;;  %v13031_v44 = vld [vmem:[#allocation54_spill] sm:$0xff] }
 0x61d   :  { %4325 = vrot.lane.b32.xlu0 %v9492_v31, %s7132_s26 }
 0x61e   :  { %4311 = vrot.lane.b32.xlu2 %v9454_v24, %s7132_s26  ;;  %4327 = vrot.lane.b32.xlu1 %v9494_v0, %s7132_s26 }
 0x625   :  { %4331 = vrot.lane.b32.xlu0 %v9614_v27, %s7132_s26  ;;  %v13033_v27 = vld [vmem:[#allocation78_spill] sm:$0xff] }
 0x626   :  { %4317 = vrot.lane.b32.xlu2 %v9370_v63, %s7132_s26  ;;  %4333 = vrot.lane.b32.xlu1 %v9397_v5, %s7132_s26 }
 0x627   :  { %v3440_v41 = vpop.permute.xlu0 %3439 }
 0x62d   :  { %4337 = vrot.lane.b32.xlu0 %v9513_v29, %s7132_s26 }
 0x62e   :  { %4323 = vrot.lane.b32.xlu2 %v9477_v54, %s7132_s26  ;;  %4339 = vrot.lane.b32.xlu1 %v9515_v45, %s7132_s26 }
 0x62f   :  { %v10043_v14 = vpop.permute.xlu1 %3435 }
 0x630   :  { %v10045_v49 = vpop.permute.xlu2 %3421 }
 0x635   :  { %4343 = vrot.lane.b32.xlu0 %v9532_v10, %s7132_s26 }
 0x636   :  { %4329 = vrot.lane.b32.xlu2 %v9612_v4, %s7132_s26  ;;  %4345 = vrot.lane.b32.xlu1 %v9642_v39, %s7132_s26  ;;  %v3424_v48 = vpop.permute.xlu0 %3423  ;;  %v13032_v4 = vld [vmem:[#allocation83_spill] sm:$0xff] }
 0x637   :  { %v3452_v21 = vpop.permute.xlu1 %3451 }
 0x638   :  { %v10053_v42 = vpop.permute.xlu2 %3405 }
 0x63d   :  { %4349 = vrot.lane.b32.xlu0 %v9420_v35, %s7132_s26 }
 0x63e   :  { %4335 = vrot.lane.b32.xlu2 %v9399_v16, %s7132_s26  ;;  %4351 = vrot.lane.b32.xlu1 %v9422_v32, %s7132_s26 }
 0x63f   :  { %v3456_v7 = vpop.permute.xlu0 %3455  ;;  %v3472_v3 = vpop.permute.xlu1 %3471 }
 0x640   :  { %v3438_v61 = vpop.permute.xlu2 %3437  ;;  %3866 = vmatpush.bf16.msrb.mxu3 %v3472_v3 }
 0x644   :  { %3867 = vmatpush.bf16.msrb.mxu3 %v3456_v7 }
 0x645   :  { %4355 = vrot.lane.b32.xlu0 %v9554_v52, %s7132_s26 }
 0x646   :  { %4341 = vrot.lane.b32.xlu2 %v13030_v9, %s7132_s26  ;;  %4357 = vrot.lane.b32.xlu1 %v13031_v44, %s7132_s26 }
 0x647   :  { %v3470_v24 = vpop.permute.xlu0 %3469 }
 0x648   :  { %v3454_v46 = vpop.permute.xlu2 %3453  ;;  %v3420_v0 = vpop.permute.xlu1 %3419  ;;  %v3528_v31 = vsel %vm768_vm2, %v3470_v24, %v3472_v3  ;;  %3868 = vmatpush.bf16.msrb.mxu3 %v3440_v41  ;;  %v3514_v3 = vsel %vm768_vm2, %v3438_v61, %v3440_v41  ;;  %v13034_v41 = vld [vmem:[#allocation57_spill] sm:$0xff] }
 0x649   :  { %3827 = vmatpush.bf16.msrb.mxu2 %v3528_v31  ;;  %v3521_v12 = vsel %vm768_vm2, %v3454_v46, %v3456_v7 }
 0x64c   :  { %3869 = vmatpush.bf16.msrb.mxu3 %v3424_v48 }
 0x64d   :  { %4361 = vrot.lane.b32.xlu0 %v9656_v8, %s7132_s26  ;;  %3828 = vmatpush.bf16.msrb.mxu2 %v3521_v12  ;;  %v3507_v12 = vsel %vm768_vm2, %v10045_v49, %v3424_v48 }
 0x64e   :  { %4347 = vrot.lane.b32.xlu2 %v9644_v56, %s7132_s26  ;;  %4363 = vrot.lane.b32.xlu1 %v9658_v30, %s7132_s26 }
 0x64f   :  { %v3408_v55 = vpop.permute.xlu0 %3407 }
 0x650   :  { %v3390_v10 = vpop.permute.xlu2 %3389  ;;  %v3468_v9 = vpop.permute.xlu1 %3467  ;;  %3870 = vmatpush.bf16.msrb.mxu3 %v3408_v55 }
 0x651   :  { %3829 = vmatpush.bf16.msrb.mxu2 %v3514_v3  ;;  %v3526_v31 = vsel %vm768_vm2, %v9840_v37, %v3468_v9  ;;  %v3527_v7 = vsel %vm768_vm2, %v3468_v9, %v3470_v24  ;;  %v3519_v37 = vsel %vm768_vm2, %v9842_v33, %v3452_v21  ;;  %v3520_v24 = vsel %vm768_vm2, %v3452_v21, %v3454_v46  ;;  %v13035_v33 = vld [vmem:[#allocation13_spill] sm:$0xff] }
 0x652   :  { %3749 = vmatpush.bf16.msrb.mxu0 %v3526_v31  ;;  %3788 = vmatpush.bf16.msrb.mxu1 %v3527_v7  ;;  %v3500_v31 = vsel %vm768_vm2, %v10053_v42, %v3408_v55  ;;  %v3512_v7 = vsel %vm768_vm2, %v9832_v62, %v10043_v14  ;;  %v3505_v55 = vsel %vm768_vm2, %v9830_v20, %v3420_v0  ;;  %v13037_v20 = vld [vmem:[#allocation82_spill] sm:$0xff] }
 0x653   :  { %v3506_v62 = vsel %vm768_vm2, %v3420_v0, %v10045_v49  ;;  %v13036_v0 = vld [vmem:[#allocation80_spill] sm:$0xff] }
 0x655   :  { %4367 = vrot.lane.b32.xlu0 %v13032_v4, %s7132_s26  ;;  %3830 = vmatpush.bf16.msrb.mxu2 %v3507_v12  ;;  %v3513_v12 = vsel %vm768_vm2, %v10043_v14, %v3438_v61 }
 0x656   :  { %4353 = vrot.lane.b32.xlu2 %v13033_v27, %s7132_s26  ;;  %4369 = vrot.lane.b32.xlu1 %v13034_v41, %s7132_s26 }
 0x657   :  { %3750 = vmatpush.bf16.msrb.mxu0 %v3519_v37  ;;  %3789 = vmatpush.bf16.msrb.mxu1 %v3520_v24  ;;  %v3392_v9 = vpop.permute.xlu0 %3391 }
 0x658   :  { %v3374_v3 = vpop.permute.xlu2 %3373  ;;  %3871 = vmatpush.bf16.msrb.mxu3 %v3392_v9  ;;  %v3404_v48 = vpop.permute.xlu1 %3403  ;;  %v3493_v46 = vsel %vm768_vm2, %v3390_v10, %v3392_v9 }
 0x659   :  { %3831 = vmatpush.bf16.msrb.mxu2 %v3500_v31  ;;  %v3498_v24 = vsel %vm768_vm2, %v9814_v18, %v3404_v48  ;;  %v3499_v9 = vsel %vm768_vm2, %v3404_v48, %v10053_v42 }
 0x65b   :  { %3751 = vmatpush.bf16.msrb.mxu0 %v3512_v7  ;;  %3790 = vmatpush.bf16.msrb.mxu1 %v3513_v12  ;;  %v13038_v12 = vld [vmem:[#allocation22_spill] sm:$0xff] }
 0x65d   :  { %4373 = vrot.lane.b32.xlu0 %v13035_v33, %s7132_s26  ;;  %3832 = vmatpush.bf16.msrb.mxu2 %v3493_v46 }
 0x65e   :  { %4359 = vrot.lane.b32.xlu2 %v9567_v60, %s7132_s26  ;;  %4375 = vrot.lane.b32.xlu1 %v9928_v1, %s7132_s26 }
 0x65f   :  { %3752 = vmatpush.bf16.msrb.mxu0 %v3505_v55  ;;  %3791 = vmatpush.bf16.msrb.mxu1 %v3506_v62  ;;  %v3376_v14 = vpop.permute.xlu0 %3375  ;;  %v13039_v62 = vld [vmem:[#allocation11_spill] sm:$0xff] }
 0x660   :  { %v3358_v21 = vpop.permute.xlu2 %3357  ;;  %3872 = vmatpush.bf16.msrb.mxu3 %v3376_v14  ;;  %v3388_v61 = vpop.permute.xlu1 %3387  ;;  %v3486_v37 = vsel %vm768_vm2, %v3374_v3, %v3376_v14 }
 0x661   :  { %3833 = vmatpush.bf16.msrb.mxu2 %v3486_v37  ;;  %v3491_v49 = vsel %vm768_vm2, %v9767_v28, %v3388_v61  ;;  %v3492_v31 = vsel %vm768_vm2, %v3388_v61, %v3390_v10  ;;  %v13040_v10 = vld [vmem:[#allocation19_spill] sm:$0xff]  ;;  %v13041_v28 = vld [vmem:[#allocation44_spill] sm:$0xff] }
 0x662   :  { %v13043_v37 = vld [vmem:[#allocation47_spill] sm:$0xff] }
 0x663   :  { %3753 = vmatpush.bf16.msrb.mxu0 %v3498_v24  ;;  %3792 = vmatpush.bf16.msrb.mxu1 %v3499_v9  ;;  %v13044_v24 = vld [vmem:[#allocation40_spill] sm:$0xff] }
 0x665   :  { %4379 = vrot.lane.b32.xlu0 %v9899_v57, %s7132_s26 }
 0x666   :  { %4365 = vrot.lane.b32.xlu2 %v13036_v0, %s7132_s26  ;;  %4381 = vrot.lane.b32.xlu1 %v13037_v20, %s7132_s26 }
 0x667   :  { %3754 = vmatpush.bf16.msrb.mxu0 %v3491_v49  ;;  %3793 = vmatpush.bf16.msrb.mxu1 %v3492_v31  ;;  %v3360_v18 = vpop.permute.xlu0 %3359  ;;  %v13045_v31 = vld [vmem:[#allocation42_spill] sm:$0xff] }
 0x668   :  { %v3356_v42 = vpop.permute.xlu2 %3355  ;;  %3873 = vmatpush.bf16.msrb.mxu3 %v3360_v18  ;;  %v3372_v48 = vpop.permute.xlu1 %3371  ;;  %v3479_v7 = vsel %vm768_vm2, %v3358_v21, %v3360_v18  ;;  %v13046_v18 = vld [vmem:[#allocation34_spill] sm:$0xff] }
 0x669   :  { %3834 = vmatpush.bf16.msrb.mxu2 %v3479_v7  ;;  %v3484_v46 = vsel %vm768_vm2, %v9844_v23, %v3372_v48  ;;  %v3485_v55 = vsel %vm768_vm2, %v3372_v48, %v3374_v3  ;;  %v13042_v23 = vld [vmem:[#allocation68_spill] sm:$0xff]  ;;  %v3477_v3 = vsel %vm768_vm2, %v9889_v59, %v3356_v42  ;;  %v3478_v14 = vsel %vm768_vm2, %v3356_v42, %v3358_v21  ;;  %v10158_v59 = vpop.f32.mrf.mxu0  ;;  %v13048_v21 = vld [vmem:[#allocation86_spill] sm:$0xff]  ;;  %v13049_v42 = vld [vmem:[#allocation43_spill] sm:$0xff]  ;;  %v10165_v7 = vpop.f32.mrf.mxu1 }
 0x66a   :  { %13047 = vst [vmem:[#allocation20_spill] sm:$0xff] %v10158_v59  ;;  %v13050_v48 = vld [vmem:[#allocation31_spill] sm:$0xff]  ;;  %v10183_v59 = vpop.f32.mrf.mxu2  ;;  %vm6264_vm2 = vcmask 654912  }
 0x66b   :  { %3755 = vmatpush.bf16.msrb.mxu0 %v3484_v46  ;;  %3794 = vmatpush.bf16.msrb.mxu1 %v3485_v55  ;;  %13051 = vst [vmem:[#allocation65_spill] sm:$0xff] %v10165_v7  ;;  %v10174_v46 = vpop.f32.mrf.mxu3  ;;  %v13057_v7 = vld [vmem:[#allocation63_spill] sm:$0xff] }
 0x66c   :  { %4058 = vmatpush.bf16.msra.mxu3 %v13038_v12  ;;  %3835 = vmatmul.bf16.vlgmr.msrb.gmra.mxu2 %v9954_v22  ;;  %13052 = vst [vmem:[#allocation49_spill] sm:$0xff] %v10174_v46 }
 0x66d   :  { %4019 = vmatpush.bf16.msra.mxu2 %v13039_v62  ;;  %3874 = vmatmul.bf16.vlgmr.msrb.gmra.mxu3 %v9954_v22  ;;  %13055 = vst [vmem:[#allocation35_spill] sm:$0xff] %v10183_v59 }
 0x66e   :  { %4419 = vrot.lane.b32.xlu0 %v13038_v12, %s7132_s26  ;;  %4371 = vrot.lane.b32.xlu2 %v13041_v28, %s7132_s26  ;;  %v13096_v12 = vld [vmem:[#allocation15_spill] sm:$0xff] }
 0x66f   :  { %4421 = vrot.lane.b32.xlu1 %v13042_v23, %s7132_s26  ;;  %3756 = vmatpush.bf16.msrb.mxu0 %v3477_v3  ;;  %v10146_v61 = vpop.permute.xlu0 %4301 }
 0x670   :  { %4059 = vmatpush.bf16.msra.mxu3 %v13040_v10  ;;  %3795 = vmatpush.bf16.msrb.mxu1 %v3478_v14  ;;  %v10150_v9 = vpop.permute.xlu2 %4305  ;;  %v10152_v49 = vpop.permute.xlu1 %4303  ;;  %v13054_v14 = vld [vmem:[#allocation24_spill] sm:$0xff] }
 0x671   :  { %4020 = vmatpush.bf16.msra.mxu2 %v13043_v37  ;;  %v10190_v46 = vpop.f32.mrf.mxu0 }
 0x672   :  { %3757 = vmatmul.bf16.vlgmr.msrb.gmra.mxu0 %v9954_v22  ;;  %13056 = vst [vmem:[#allocation84_spill] sm:$0xff] %v10190_v46 }
 0x673   :  { %3941 = vmatpush.bf16.msra.mxu0 %v13044_v24  ;;  %3796 = vmatmul.bf16.vlgmr.msrb.gmra.mxu1 %v9954_v22 }
 0x674   :  { %3980 = vmatpush.bf16.msra.mxu1 %v13045_v31  ;;  %4060 = vmatpush.bf16.msra.mxu3 %v13046_v18 }
 0x675   :  { %4021 = vmatpush.bf16.msra.mxu2 %v13048_v21 }
 0x676   :  { %4403 = vrot.lane.b32.xlu0 %v13040_v10, %s7132_s26  ;;  %4377 = vrot.lane.b32.xlu2 %v9924_v6, %s7132_s26  ;;  %v13089_v10 = vld [vmem:[#allocation52_spill] sm:$0xff] }
 0x677   :  { %3942 = vmatpush.bf16.msra.mxu0 %v13049_v42  ;;  %4413 = vrot.lane.b32.xlu1 %v13044_v24, %s7132_s26  ;;  %v10172_v22 = vpop.permute.xlu0 %4307 }
 0x678   :  { %3981 = vmatpush.bf16.msra.mxu1 %v13050_v48  ;;  %4061 = vmatpush.bf16.msra.mxu3 %v13041_v28  ;;  %v10178_v55 = vpop.permute.xlu2 %4311  ;;  %v10180_v3 = vpop.permute.xlu1 %4309 }
 0x679   :  { %4022 = vmatpush.bf16.msra.mxu2 %v13034_v41  ;;  %13053 = vst [vmem:[#allocation66_spill] sm:$0xff] %v10178_v55  ;;  %v10200_v55 = vpop.f32.mrf.mxu1 }
 0x67a   :  { %13059 = vst [vmem:[#allocation85_spill] sm:$0xff] %v10200_v55  ;;  %v10216_v55 = vpop.f32.mrf.mxu2 }
 0x67b   :  { %3943 = vmatpush.bf16.msra.mxu0 %v13037_v20  ;;  %v10211_v20 = vpop.f32.mrf.mxu3  ;;  %13062 = vst [vmem:[#allocation58_spill] sm:$0xff] %v10216_v55 }
 0x67c   :  { %3982 = vmatpush.bf16.msra.mxu1 %v13054_v14  ;;  %4062 = vmatpush.bf16.msra.mxu3 %v9554_v52  ;;  %13061 = vst [vmem:[#allocation67_spill] sm:$0xff] %v10211_v20 }
 0x67d   :  { %4023 = vmatpush.bf16.msra.mxu2 %v13033_v27  ;;  %3879 = vmatmul.bf16.gmra.mxu3 %v9977_v53 }
 0x67e   :  { %3840 = vmatmul.bf16.gmra.mxu2 %v9977_v53  ;;  %4405 = vrot.lane.b32.xlu0 %v13057_v7, %s7132_s26 }
 0x67f   :  { %3944 = vmatpush.bf16.msra.mxu0 %v13036_v0  ;;  %4417 = vrot.lane.b32.xlu2 %v13039_v62, %s7132_s26  ;;  %v10198_v59 = vpop.permute.xlu0 %4313 }
 0x680   :  { %3983 = vmatpush.bf16.msra.mxu1 %v13032_v4  ;;  %4063 = vmatpush.bf16.msra.mxu3 %v9515_v45  ;;  %13058 = vst [vmem:[#allocation33_spill] sm:$0xff] %v10198_v59  ;;  %v10205_v46 = vpop.permute.xlu2 %4317  ;;  %v10207_v24 = vpop.permute.xlu1 %4315 }
 0x681   :  { %4385 = vrot.lane.b32.xlu1 %v13048_v21, %s7132_s26  ;;  %4024 = vmatpush.bf16.msra.mxu2 %v9513_v29  ;;  %13060 = vst [vmem:[#allocation48_spill] sm:$0xff] %v10207_v24  ;;  %v10239_v24 = vpop.f32.mrf.mxu1 }
 0x682   :  { %3762 = vmatmul.bf16.gmra.mxu0 %v9977_v53  ;;  %13064 = vst [vmem:[#allocation70_spill] sm:$0xff] %v10239_v24 }
 0x683   :  { %3945 = vmatpush.bf16.msra.mxu0 %v9420_v35  ;;  %3801 = vmatmul.bf16.gmra.mxu1 %v9977_v53  ;;  %v10228_v53 = vpop.f32.mrf.mxu0 }
 0x684   :  { %3984 = vmatpush.bf16.msra.mxu1 %v9422_v32  ;;  %4064 = vmatpush.bf16.msra.mxu3 %v9477_v54  ;;  %13063 = vst [vmem:[#allocation87_spill] sm:$0xff] %v10228_v53  ;;  %v10243_v53 = vpop.f32.mrf.mxu3 }
 0x685   :  { %4025 = vmatpush.bf16.msra.mxu2 %v9475_v34  ;;  %13065 = vst [vmem:[#allocation21_spill] sm:$0xff] %v10243_v53 }
 0x686   :  { %4397 = vrot.lane.b32.xlu0 %v13049_v42, %s7132_s26 }
 0x687   :  { %3946 = vmatpush.bf16.msra.mxu0 %v9397_v5  ;;  %4401 = vrot.lane.b32.xlu2 %v13043_v37, %s7132_s26  ;;  %v10226_v20 = vpop.permute.xlu0 %4319  ;;  %v13095_v37 = vld [vmem:[#allocation53_spill] sm:$0xff] }
 0x688   :  { %3985 = vmatpush.bf16.msra.mxu1 %v9399_v16  ;;  %4065 = vmatpush.bf16.msra.mxu3 %v9439_v15  ;;  %v10233_v55 = vpop.permute.xlu2 %4323  ;;  %v10235_v59 = vpop.permute.xlu1 %4321 }
 0x689   :  { %4399 = vrot.lane.b32.xlu1 %v13050_v48, %s7132_s26  ;;  %4026 = vmatpush.bf16.msra.mxu2 %v9437_v11  ;;  %v10248_v48 = vpop.f32.mrf.mxu2 }
 0x68a   :  { %13066 = vst [vmem:[#allocation29_spill] sm:$0xff] %v10248_v48 }
 0x68b   :  { %3947 = vmatpush.bf16.msra.mxu0 %v9370_v63  ;;  %v10269_v48 = vpop.f32.mrf.mxu0 }
 0x68c   :  { %4214 = vmatpush.bf16.msrb.mxu3 %v9877_v50  ;;  %3986 = vmatpush.bf16.msra.mxu1 %v9372_v2  ;;  %13069 = vst [vmem:[#allocation71_spill] sm:$0xff] %v10269_v48 }
 0x68d   :  { %4175 = vmatpush.bf16.msrb.mxu2 %v9918_v36  ;;  %3884 = vmatmul.bf16.gmra.mxu3 %v9995_v13 }
 0x68e   :  { %3845 = vmatmul.bf16.gmra.mxu2 %v9995_v13  ;;  %4383 = vrot.lane.b32.xlu0 %v13054_v14, %s7132_s26  ;;  %v10273_v14 = vpop.f32.mrf.mxu1 }
 0x68f   :  { %3948 = vmatpush.bf16.msra.mxu0 %v13017_v38  ;;  %v10254_v24 = vpop.permute.xlu0 %4325  ;;  %4415 = vrot.lane.b32.xlu2 %v13045_v31, %s7132_s26  ;;  %13070 = vst [vmem:[#allocation59_spill] sm:$0xff] %v10273_v14 }
 0x690   :  { %4215 = vmatpush.bf16.msrb.mxu3 %v9910_v47  ;;  %3987 = vmatpush.bf16.msra.mxu1 %v9341_v40  ;;  %v10259_v53 = vpop.permute.xlu2 %4329  ;;  %v10261_v21 = vpop.permute.xlu1 %4327 }
 0x691   :  { %4176 = vmatpush.bf16.msrb.mxu2 %v9965_v25  ;;  %13067 = vst [vmem:[#allocation36_spill] sm:$0xff] %v10259_v53  ;;  %4391 = vrot.lane.b32.xlu1 %v9893_v51, %s7132_s26  ;;  %v13072_v53 = vld [vmem:[#allocation62_spill] sm:$0xff]  ;;  %v10284_v48 = vpop.f32.mrf.mxu2 }
 0x692   :  { %13068 = vst [vmem:[#allocation50_spill] sm:$0xff] %v10261_v21  ;;  %3767 = vmatmul.bf16.gmra.mxu0 %v9995_v13  ;;  %v10277_v21 = vpop.f32.mrf.mxu3 }
 0x693   :  { %4097 = vmatpush.bf16.msrb.mxu0 %v13042_v23  ;;  %3806 = vmatmul.bf16.gmra.mxu1 %v9995_v13  ;;  %13071 = vst [vmem:[#allocation27_spill] sm:$0xff] %v10277_v21  ;;  %v13081_v23 = vld [vmem:[#allocation75_spill] sm:$0xff] }
 0x694   :  { %4136 = vmatpush.bf16.msrb.mxu1 %v9938_v19  ;;  %4216 = vmatpush.bf16.msrb.mxu3 %v9879_v17  ;;  %13074 = vst [vmem:[#allocation37_spill] sm:$0xff] %v10284_v48  ;;  %v10302_v48 = vpop.f32.mrf.mxu0 }
 0x695   :  { %4177 = vmatpush.bf16.msrb.mxu2 %v9948_v26  ;;  %13075 = vst [vmem:[#allocation17_spill] sm:$0xff] %v10302_v48 }
 0x696   :  { %4395 = vrot.lane.b32.xlu0 %v9879_v17, %s7132_s26  ;;  %v10304_v21 = vpop.f32.mrf.mxu1  ;;  %v13079_v17 = vld [vmem:[#allocation81_spill] sm:$0xff] }
 0x697   :  { %4098 = vmatpush.bf16.msrb.mxu0 %v13057_v7  ;;  %v10282_v42 = vpop.permute.xlu0 %4331  ;;  %4387 = vrot.lane.b32.xlu2 %v13046_v18, %s7132_s26  ;;  %13076 = vst [vmem:[#allocation32_spill] sm:$0xff] %v10304_v21  ;;  %v13083_v18 = vld [vmem:[#allocation25_spill] sm:$0xff] }
 0x698   :  { %4137 = vmatpush.bf16.msrb.mxu1 %v9906_v58  ;;  %4217 = vmatpush.bf16.msrb.mxu3 %v9899_v57  ;;  %13073 = vst [vmem:[#allocation72_spill] sm:$0xff] %v10282_v42  ;;  %v10289_v14 = vpop.permute.xlu2 %4335  ;;  %v10291_v13 = vpop.permute.xlu1 %4333 }
 0x699   :  { %4178 = vmatpush.bf16.msrb.mxu2 %v9924_v6  ;;  %4407 = vrot.lane.b32.xlu1 %v9906_v58, %s7132_s26  ;;  %v10325_v42 = vpop.f32.mrf.mxu2 }
 0x69a   :  { %13078 = vst [vmem:[#allocation45_spill] sm:$0xff] %v10325_v42 }
 0x69b   :  { %4099 = vmatpush.bf16.msrb.mxu0 %v13072_v53 }
 0x69c   :  { %4138 = vmatpush.bf16.msrb.mxu1 %v9893_v51  ;;  %4218 = vmatpush.bf16.msrb.mxu3 %v9658_v30  ;;  %v10312_v51 = vpop.f32.mrf.mxu3  ;;  %v10335_v7 = vpop.f32.mrf.mxu0 }
 0x69d   :  { %4179 = vmatpush.bf16.msrb.mxu2 %v9656_v8  ;;  %3889 = vmatmul.bf16.gmra.mxu3 %v10013_v43  ;;  %13077 = vst [vmem:[#allocation18_spill] sm:$0xff] %v10312_v51  ;;  %v13080_v51 = vld [vmem:[#allocation56_spill] sm:$0xff] }
 0x69e   :  { %3850 = vmatmul.bf16.gmra.mxu2 %v10013_v43  ;;  %4411 = vrot.lane.b32.xlu0 %v9910_v47, %s7132_s26  ;;  %v13082_v47 = vld [vmem:[#allocation55_spill] sm:$0xff]  ;;  %13085 = vst [vmem:[#allocation14_spill] sm:$0xff] %v10335_v7  ;;  %v10340_v31 = vpop.f32.mrf.mxu1 }
 0x69f   :  { %4100 = vmatpush.bf16.msrb.mxu0 %v13035_v33  ;;  %v10310_v58 = vpop.permute.xlu0 %4337  ;;  %4389 = vrot.lane.b32.xlu2 %v13072_v53, %s7132_s26  ;;  %v13084_v53 = vld [vmem:[#allocation79_spill] sm:$0xff]  ;;  %13088 = vst [vmem:[#allocation60_spill] sm:$0xff] %v10340_v31 }
 0x6a0   :  { %4139 = vmatpush.bf16.msrb.mxu1 %v9928_v1  ;;  %4219 = vmatpush.bf16.msrb.mxu3 %v9644_v56  ;;  %v10317_v48 = vpop.permute.xlu2 %4341  ;;  %v10319_v21 = vpop.permute.xlu1 %4339 }
 0x6a1   :  { %4180 = vmatpush.bf16.msrb.mxu2 %v9642_v39  ;;  %5005 = vrot.lane.b32.xlu1 %v13017_v38, %s7135_s3  ;;  %v13086_v38 = vld [vmem:[#allocation74_spill] sm:$0xff]  ;;  %v10356_v31 = vpop.f32.mrf.mxu2 }
 0x6a2   :  { %3772 = vmatmul.bf16.gmra.mxu0 %v10013_v43  ;;  %13094 = vst [vmem:[#allocation51_spill] sm:$0xff] %v10356_v31 }
 0x6a3   :  { %4101 = vmatpush.bf16.msrb.mxu0 %v13031_v44  ;;  %3811 = vmatmul.bf16.gmra.mxu1 %v10013_v43 }
 0x6a4   :  { %4140 = vmatpush.bf16.msrb.mxu1 %v9567_v60  ;;  %4220 = vmatpush.bf16.msrb.mxu3 %v13079_v17  ;;  %v10353_v7 = vpop.f32.mrf.mxu3  ;;  %v10373_v31 = vpop.f32.mrf.mxu0 }
 0x6a5   :  { %4181 = vmatpush.bf16.msrb.mxu2 %v13080_v51  ;;  %13092 = vst [vmem:[#allocation16_spill] sm:$0xff] %v10353_v7 }
 0x6a6   :  { %4427 = vrot.lane.b32.xlu0 %v9877_v50, %s7132_s26  ;;  %13097 = vst [vmem:[#allocation54_spill] sm:$0xff] %v10373_v31  ;;  %v10375_v7 = vpop.f32.mrf.mxu1 }
 0x6a7   :  { %4102 = vmatpush.bf16.msrb.mxu0 %v13081_v23  ;;  %v10338_v42 = vpop.permute.xlu0 %4343  ;;  %4393 = vrot.lane.b32.xlu2 %v9948_v26, %s7132_s26  ;;  %13098 = vst [vmem:[#allocation83_spill] sm:$0xff] %v10375_v7 }
 0x6a8   :  { %4141 = vmatpush.bf16.msrb.mxu1 %v13082_v47  ;;  %4221 = vmatpush.bf16.msrb.mxu3 %v13083_v18  ;;  %13087 = vst [vmem:[#allocation12_spill] sm:$0xff] %v10338_v42  ;;  %v10345_v1 = vpop.permute.xlu2 %4347  ;;  %v10347_v43 = vpop.permute.xlu1 %4345  ;;  %v13093_v42 = vld [vmem:[#allocation73_spill] sm:$0xff] }
 0x6a9   :  { %4182 = vmatpush.bf16.msrb.mxu2 %v13084_v53  ;;  %13090 = vst [vmem:[#allocation46_spill] sm:$0xff] %v10345_v1  ;;  %5011 = vrot.lane.b32.xlu1 %v9439_v15, %s7135_s3 }
 0x6aa   :  { %13091 = vst [vmem:[#allocation61_spill] sm:$0xff] %v10347_v43 }
 0x6ab   :  { %4103 = vmatpush.bf16.msrb.mxu0 %v13086_v38 }
 0x6ac   :  { %4142 = vmatpush.bf16.msrb.mxu1 %v13089_v10  ;;  %v10378_v1 = vpop.f32.mrf.mxu3 }
 0x6ad   :  { %3894 = vmatmul.bf16.gmra.mxu3 %v13096_v12  ;;  %13099 = vst [vmem:[#allocation78_spill] sm:$0xff] %v10378_v1  ;;  %v13102_v1 = vld [vmem:[#allocation64_spill] sm:$0xff] }
 0x6ae   :  { %3855 = vmatmul.bf16.gmra.mxu2 %v13096_v12  ;;  %5009 = vrot.lane.b32.xlu0 %v9437_v11, %s7135_s3  ;;  %v10381_v11 = vpop.f32.mrf.mxu2 }
 0x6af   :  { %4104 = vmatpush.bf16.msrb.mxu0 %v13093_v42  ;;  %v10361_v50 = vpop.permute.xlu0 %4349  ;;  %4409 = vrot.lane.b32.xlu2 %v9965_v25, %s7132_s26  ;;  %13100 = vst [vmem:[#allocation57_spill] sm:$0xff] %v10381_v11  ;;  %v10398_v11 = vpop.f32.mrf.mxu1 }
 0x6b0   :  { %4143 = vmatpush.bf16.msrb.mxu1 %v13095_v37  ;;  %v10365_v43 = vpop.permute.xlu2 %4353  ;;  %v10367_v15 = vpop.permute.xlu1 %4351  ;;  %13104 = vst [vmem:[#allocation11_spill] sm:$0xff] %v10398_v11 }
 0x6b1   :  { %5017 = vrot.lane.b32.xlu1 %v13084_v53, %s7135_s3 }
 0x6b2   :  { %3777 = vmatmul.bf16.gmra.mxu0 %v13096_v12 }
 0x6b3   :  { %3816 = vmatmul.bf16.gmra.mxu1 %v13096_v12  ;;  %v10396_v12 = vpop.f32.mrf.mxu0 }
 0x6b4   :  { %13103 = vst [vmem:[#allocation80_spill] sm:$0xff] %v10396_v12  ;;  %v10400_v31 = vpop.f32.mrf.mxu3  ;;  %v7002_v12 = vld [vmem:[#allocation5 + $0xc] sm:$0xf0] }
 0x6b5   :  { %13105 = vst [vmem:[#allocation44_spill] sm:$0xff] %v10400_v31  ;;  %v6866_v31 = vld [vmem:[#allocation5] sm:$0xf] }
 0x6b6   :  { %5015 = vrot.lane.b32.xlu0 %v13095_v37, %s7135_s3  ;;  %v10405_v7 = vpop.f32.mrf.mxu2 }
 0x6b7   :  { %v10383_v26 = vpop.permute.xlu0 %4355  ;;  %5007 = vrot.lane.b32.xlu2 %v9341_v40, %s7135_s3  ;;  %13107 = vst [vmem:[#allocation56_spill] sm:$0xff] %v10405_v7  ;;  %v10421_v11 = vpop.f32.mrf.mxu1 }
 0x6b8   :  { %v10387_v25 = vpop.permute.xlu2 %4359  ;;  %v10389_v53 = vpop.permute.xlu1 %4357  ;;  %13109 = vst [vmem:[#allocation55_spill] sm:$0xff] %v10421_v11 }
 0x6b9   :  { %13101 = vst [vmem:[#allocation13_spill] sm:$0xff] %v10387_v25  ;;  %5023 = vrot.lane.b32.xlu1 %v9372_v2, %s7135_s3 }
 0x6bb   :  { %v10419_v7 = vpop.f32.mrf.mxu0 }
 0x6bc   :  { %13108 = vst [vmem:[#allocation75_spill] sm:$0xff] %v10419_v7  ;;  %v10425_v25 = vpop.f32.mrf.mxu3  ;;  %v7003_v7 = vld [vmem:[#allocation5 + $0x2c] sm:$0xf0] }
 0x6bd   :  { %3899 = vmatmul.bf16.gmra.mxu3 %v13102_v1  ;;  %13110 = vst [vmem:[#allocation25_spill] sm:$0xff] %v10425_v25 }
 0x6be   :  { %3860 = vmatmul.bf16.gmra.mxu2 %v13102_v1  ;;  %5021 = vrot.lane.b32.xlu0 %v9370_v63, %s7135_s3 }
 0x6bf   :  { %v10403_v37 = vpop.permute.xlu0 %4361  ;;  %5013 = vrot.lane.b32.xlu2 %v13093_v42, %s7135_s3 }
 0x6c0   :  { %13106 = vst [vmem:[#allocation81_spill] sm:$0xff] %v10403_v37  ;;  %v10409_v40 = vpop.permute.xlu2 %4365  ;;  %v10411_v2 = vpop.permute.xlu1 %4363  ;;  %v10433_v37 = vor.u32 %v7002_v12, %v6866_v31 }
 0x6c1   :  { %5029 = vrot.lane.b32.xlu1 %v13086_v38, %s7135_s3 }
 0x6c2   :  { %3782 = vmatmul.bf16.gmra.mxu0 %v13102_v1 }
 0x6c3   :  { %3821 = vmatmul.bf16.gmra.mxu1 %v13102_v1  ;;  %v10439_v1 = vpop.f32.mrf.mxu2 }
 0x6c4   :  { %13111 = vst [vmem:[#allocation79_spill] sm:$0xff] %v10439_v1  ;;  %v10459_v12 = vpop.f32.mrf.mxu3 }
 0x6c5   :  { %13115 = vst [vmem:[#allocation53_spill] sm:$0xff] %v10459_v12 }
 0x6c6   :  { %5027 = vrot.lane.b32.xlu0 %v9477_v54, %s7135_s3 }
 0x6c7   :  { %v10423_v63 = vpop.permute.xlu0 %4367  ;;  %5019 = vrot.lane.b32.xlu2 %v13083_v18, %s7135_s3  ;;  %v10457_v18 = vpop.f32.mrf.mxu0 }
 0x6c8   :  { %v10429_v42 = vpop.permute.xlu2 %4371  ;;  %v10431_v38 = vpop.permute.xlu1 %4369  ;;  %13114 = vst [vmem:[#allocation73_spill] sm:$0xff] %v10457_v18 }
 0x6c9   :  { %5035 = vrot.lane.b32.xlu1 %v13079_v17, %s7135_s3  ;;  %v10455_v17 = vpop.f32.mrf.mxu1 }
 0x6ca   :  { %13113 = vst [vmem:[#allocation52_spill] sm:$0xff] %v10455_v17 }
 0x6cb   :  { %v10462_v1 = vpop.f32.mrf.mxu2 }
 0x6cc   :  { %13116 = vst [vmem:[#allocation15_spill] sm:$0xff] %v10462_v1 }
 0x6cd   :  { %4066 = vmatmul.bf16.vlgmr.msra.gmra.mxu3 %v10433_v37 }
 0x6ce   :  { %4027 = vmatmul.bf16.vlgmr.msra.gmra.mxu2 %v10433_v37  ;;  %5033 = vrot.lane.b32.xlu0 %v13080_v51, %s7135_s3  ;;  %v6870_v51 = vld [vmem:[#allocation5 + $0x20] sm:$0xf] }
 0x6cf   :  { %v10443_v25 = vpop.permute.xlu0 %4373  ;;  %5025 = vrot.lane.b32.xlu2 %v9475_v34, %s7135_s3  ;;  %v10471_v17 = vor.u32 %v7003_v7, %v6870_v51  ;;  %v10480_v18 = vpop.f32.mrf.mxu0 }
 0x6d0   :  { %v10447_v54 = vpop.permute.xlu2 %4377  ;;  %v10449_v31 = vpop.permute.xlu1 %4375  ;;  %13118 = vst [vmem:[#allocation88_spill] sm:$0xff] %v10480_v18  ;;  %v7004_v18 = vld [vmem:[#allocation5 + $0x4c] sm:$0xf0] }
 0x6d1   :  { %13112 = vst [vmem:[#allocation74_spill] sm:$0xff] %v10449_v31  ;;  %4423 = vrot.lane.b32.xlu1 %v9938_v19, %s7132_s26  ;;  %v10477_v12 = vpop.f32.mrf.mxu1  ;;  %v10482_v19 = vpop.f32.mrf.mxu3 }
 0x6d2   :  { %3949 = vmatmul.bf16.vlgmr.msra.gmra.mxu0 %v10433_v37  ;;  %13117 = vst [vmem:[#allocation64_spill] sm:$0xff] %v10477_v12 }
 0x6d3   :  { %3988 = vmatmul.bf16.vlgmr.msra.gmra.mxu1 %v10433_v37  ;;  %13119 = vst [vmem:[#allocation89_spill] sm:$0xff] %v10482_v19  ;;  %v6874_v19 = vld [vmem:[#allocation5 + $0x40] sm:$0xf] }
 0x6d6   :  { %5039 = vrot.lane.b32.xlu0 %v9399_v16, %s7135_s3  ;;  %v10484_v16 = vpop.f32.mrf.mxu2 }
 0x6d7   :  { %v10465_v11 = vpop.permute.xlu0 %4379  ;;  %5031 = vrot.lane.b32.xlu2 %v13089_v10, %s7135_s3  ;;  %13120 = vst [vmem:[#allocation90_spill] sm:$0xff] %v10484_v16  ;;  %v10502_v12 = vpop.f32.mrf.mxu0 }
 0x6d8   :  { %v10469_v34 = vpop.permute.xlu1 %4381  ;;  %13122 = vst [vmem:[#allocation92_spill] sm:$0xff] %v10502_v12 }
 0x6d9   :  { %5041 = vrot.lane.b32.xlu1 %v9513_v29, %s7135_s3  ;;  %v4418_v1 = vpop.permute.xlu2 %4417  ;;  %v10504_v31 = vpop.f32.mrf.mxu3 }
 0x6da   :  { %13123 = vst [vmem:[#allocation93_spill] sm:$0xff] %v10504_v31 }
 0x6dd   :  { %4071 = vmatmul.bf16.gmra.mxu3 %v10471_v17 }
 0x6de   :  { %4032 = vmatmul.bf16.gmra.mxu2 %v10471_v17  ;;  %5045 = vrot.lane.b32.xlu0 %v13081_v23, %s7135_s3  ;;  %v10500_v23 = vpop.f32.mrf.mxu1 }
 0x6df   :  { %4425 = vrot.lane.b32.xlu2 %v9918_v36, %s7132_s26  ;;  %13121 = vst [vmem:[#allocation91_spill] sm:$0xff] %v10500_v23  ;;  %v10506_v36 = vpop.f32.mrf.mxu2 }
 0x6e0   :  { %v4420_v7 = vpop.permute.xlu0 %4419  ;;  %13124 = vst [vmem:[#allocation94_spill] sm:$0xff] %v10506_v36 }
 0x6e1   :  { %v10489_v10 = vpop.permute.xlu1 %4421  ;;  %v4480_v29 = vsel %vm1030_vm4, %v4418_v1, %v4420_v7  ;;  %5047 = vrot.lane.b32.xlu1 %v13082_v47, %s7135_s3  ;;  %v4402_v51 = vpop.permute.xlu2 %4401 }
 0x6e2   :  { %v4481_v16 = vsel %vm1030_vm4, %v4420_v7, %v10489_v10  ;;  %4627 = vmatpush.bf16.msra.mxu2 %v4480_v29  ;;  %3954 = vmatmul.bf16.gmra.mxu0 %v10471_v17  ;;  %v10511_v7 = vor.u32 %v7004_v18, %v6874_v19 }
 0x6e3   :  { %4666 = vmatpush.bf16.msra.mxu3 %v4481_v16  ;;  %3993 = vmatmul.bf16.gmra.mxu1 %v10471_v17 }
 0x6e6   :  { %5051 = vrot.lane.b32.xlu0 %v9644_v56, %s7135_s3 }
 0x6e7   :  { %5037 = vrot.lane.b32.xlu2 %v9397_v5, %s7135_s3 }
 0x6e8   :  { %v4404_v47 = vpop.permute.xlu0 %4403 }
 0x6e9   :  { %v4473_v16 = vsel %vm1030_vm4, %v4402_v51, %v4404_v47  ;;  %5053 = vrot.lane.b32.xlu1 %v9420_v35, %s7135_s3  ;;  %v4414_v29 = vpop.permute.xlu1 %4413  ;;  %v4416_v12 = vpop.permute.xlu2 %4415 }
 0x6ea   :  { %4628 = vmatpush.bf16.msra.mxu2 %v4473_v16  ;;  %v4478_v31 = vsel %vm1030_vm4, %v4414_v29, %v4416_v12  ;;  %v4479_v36 = vsel %vm1030_vm4, %v4416_v12, %v4418_v1  ;;  %v7005_v16 = vld [vmem:[#allocation5 + $0x6c] sm:$0xf0] }
 0x6eb   :  { %4549 = vmatpush.bf16.msra.mxu0 %v4478_v31  ;;  %4588 = vmatpush.bf16.msra.mxu1 %v4479_v36 }
 0x6ed   :  { %4076 = vmatmul.bf16.gmra.mxu3 %v10511_v7 }
 0x6ee   :  { %4037 = vmatmul.bf16.gmra.mxu2 %v10511_v7  ;;  %5057 = vrot.lane.b32.xlu0 %v13033_v27, %s7135_s3 }
 0x6ef   :  { %v10521_v56 = vpop.f32.mrf.mxu0  ;;  %5043 = vrot.lane.b32.xlu2 %v9515_v45, %s7135_s3  ;;  %v10535_v36 = vpop.f32.mrf.mxu2 }
 0x6f0   :  { %13125 = vst [vmem:[#allocation95_spill] sm:$0xff] %v10521_v56  ;;  %v10523_v19 = vpop.f32.mrf.mxu1  ;;  %v10527_v5 = vpop.f32.mrf.mxu3 }
 0x6f1   :  { %13126 = vst [vmem:[#allocation96_spill] sm:$0xff] %v10523_v19  ;;  %v10529_v35 = vpop.permute.xlu0 %4405  ;;  %5059 = vrot.lane.b32.xlu1 %v9554_v52, %s7135_s3  ;;  %v4388_v18 = vpop.permute.xlu2 %4387  ;;  %v6878_v52 = vld [vmem:[#allocation5 + $0x60] sm:$0xf] }
 0x6f2   :  { %13127 = vst [vmem:[#allocation97_spill] sm:$0xff] %v10527_v5  ;;  %v4474_v1 = vsel %vm1030_vm4, %v4404_v47, %v10529_v35  ;;  %3959 = vmatmul.bf16.gmra.mxu0 %v10511_v7 }
 0x6f3   :  { %13128 = vst [vmem:[#allocation98_spill] sm:$0xff] %v10535_v36  ;;  %v4386_v31 = vpop.permute.xlu1 %4385  ;;  %4667 = vmatpush.bf16.msra.mxu3 %v4474_v1  ;;  %3998 = vmatmul.bf16.gmra.mxu1 %v10511_v7  ;;  %v4459_v1 = vsel %vm1030_vm4, %v10431_v38, %v10429_v42 }
 0x6f4   :  { %v4466_v27 = vsel %vm1030_vm4, %v4386_v31, %v4388_v18 }
 0x6f5   :  { %4629 = vmatpush.bf16.msra.mxu2 %v4466_v27 }
 0x6f6   :  { %5063 = vrot.lane.b32.xlu0 %v9567_v60, %s7135_s3 }
 0x6f7   :  { %v10542_v12 = vpop.f32.mrf.mxu0  ;;  %5049 = vrot.lane.b32.xlu2 %v9642_v39, %s7135_s3  ;;  %v10557_v27 = vpop.f32.mrf.mxu2 }
 0x6f8   :  { %13129 = vst [vmem:[#allocation99_spill] sm:$0xff] %v10542_v12  ;;  %v10544_v45 = vpop.f32.mrf.mxu1  ;;  %v10548_v47 = vpop.f32.mrf.mxu3 }
 0x6f9   :  { %13130 = vst [vmem:[#allocation100_spill] sm:$0xff] %v10544_v45  ;;  %v4398_v29 = vpop.permute.xlu0 %4397  ;;  %5065 = vrot.lane.b32.xlu1 %v9656_v8, %s7135_s3  ;;  %4630 = vmatpush.bf16.msra.mxu2 %v4459_v1  ;;  %v10559_v45 = vor.u32 %v7005_v16, %v6878_v52  ;;  %v10561_v60 = vpop.permute.xlu2 %4389  ;;  %v4452_v8 = vsel %vm1030_vm4, %v10365_v43, %v10383_v26 }
 0x6fa   :  { %13131 = vst [vmem:[#allocation101_spill] sm:$0xff] %v10548_v47  ;;  %v4467_v39 = vsel %vm1030_vm4, %v4388_v18, %v10561_v60  ;;  %v4460_v18 = vsel %vm1030_vm4, %v10429_v42, %v10443_v25  ;;  %v4438_v42 = vsel %vm1030_vm4, %v10235_v59, %v10233_v55  ;;  %v4453_v1 = vsel %vm1030_vm4, %v10383_v26, %v10389_v53 }
 0x6fb   :  { %13132 = vst [vmem:[#allocation102_spill] sm:$0xff] %v10557_v27  ;;  %v4400_v12 = vpop.permute.xlu1 %4399  ;;  %4668 = vmatpush.bf16.msra.mxu3 %v4467_v39 }
 0x6fc   :  { %v4471_v47 = vsel %vm1030_vm4, %v4398_v29, %v4400_v12  ;;  %v4472_v36 = vsel %vm1030_vm4, %v4400_v12, %v4402_v51 }
 0x6fd   :  { %4550 = vmatpush.bf16.msra.mxu0 %v4471_v47  ;;  %4589 = vmatpush.bf16.msra.mxu1 %v4472_v36  ;;  %v4445_v36 = vsel %vm1030_vm4, %v10310_v58, %v10319_v21 }
 0x6fe   :  { %4631 = vmatpush.bf16.msra.mxu2 %v4452_v8  ;;  %4081 = vmatmul.bf16.gmra.mxu3 %v10559_v45  ;;  %v6882_v8 = vld [vmem:[#allocation5 + $0x80] sm:$0xf] }
 0x6ff   :  { %4042 = vmatmul.bf16.gmra.mxu2 %v10559_v45  ;;  %v10572_v52 = vpop.f32.mrf.mxu0  ;;  %5069 = vrot.lane.b32.xlu0 %v13036_v0, %s7135_s3 }
 0x700   :  { %13133 = vst [vmem:[#allocation103_spill] sm:$0xff] %v10572_v52  ;;  %v10574_v16 = vpop.f32.mrf.mxu1  ;;  %v10578_v51 = vpop.f32.mrf.mxu3  ;;  %5055 = vrot.lane.b32.xlu2 %v9422_v32, %s7135_s3  ;;  %4669 = vmatpush.bf16.msra.mxu3 %v4460_v18  ;;  %v4457_v18 = vsel %vm1030_vm4, %v10409_v40, %v10423_v63 }
 0x701   :  { %13134 = vst [vmem:[#allocation104_spill] sm:$0xff] %v10574_v16  ;;  %5071 = vrot.lane.b32.xlu1 %v13032_v4, %s7135_s3  ;;  %v10590_v12 = vpop.f32.mrf.mxu2  ;;  %v4384_v0 = vpop.permute.xlu0 %4383 }
 0x702   :  { %13135 = vst [vmem:[#allocation105_spill] sm:$0xff] %v10578_v51  ;;  %4632 = vmatpush.bf16.msra.mxu2 %v4445_v36  ;;  %v10592_v47 = vpop.permute.xlu2 %4393  ;;  %v4464_v32 = vsel %vm1030_vm4, %v10469_v34, %v4384_v0  ;;  %v4465_v4 = vsel %vm1030_vm4, %v4384_v0, %v4386_v31  ;;  %3964 = vmatmul.bf16.gmra.mxu0 %v10559_v45  ;;  %v7006_v36 = vld [vmem:[#allocation5 + $0x8c] sm:$0xf0] }
 0x703   :  { %13136 = vst [vmem:[#allocation106_spill] sm:$0xff] %v10590_v12  ;;  %v10594_v29 = vpop.permute.xlu1 %4391  ;;  %4003 = vmatmul.bf16.gmra.mxu1 %v10559_v45  ;;  %4551 = vmatpush.bf16.msra.mxu0 %v4464_v32  ;;  %v4458_v34 = vsel %vm1030_vm4, %v10423_v63, %v10431_v38  ;;  %v4431_v38 = vsel %vm1030_vm4, %v10150_v9, %v10172_v22  ;;  %v5673_v12 = vld [vmem:[%s12489_s6 + $0x58] sm:$0xff] }
 0x704   :  { %4590 = vmatpush.bf16.msra.mxu1 %v4465_v4  ;;  %4670 = vmatpush.bf16.msra.mxu3 %v4453_v1  ;;  %v10635_v63 = vor.u32 %v7006_v36, %v6882_v8  ;;  %v4451_v4 = vsel %vm1030_vm4, %v10367_v15, %v10365_v43  ;;  %v7007_v8 = vld [vmem:[#allocation5 + $0xac] sm:$0xf0] }
 0x706   :  { %4633 = vmatpush.bf16.msra.mxu2 %v4438_v42  ;;  %v4444_v42 = vsel %vm1030_vm4, %v10289_v14, %v10310_v58  ;;  %v4432_v58 = vsel %vm1030_vm4, %v10172_v22, %v10180_v3  ;;  %v4430_v22 = vsel %vm1030_vm4, %v10152_v49, %v10150_v9  ;;  %v13148_v9 = vld [vmem:[#allocation22_spill] sm:$0xff] }
 0x707   :  { %v10610_v39 = vpop.f32.mrf.mxu0  ;;  %5075 = vrot.lane.b32.xlu0 %v13041_v28, %s7135_s3  ;;  %4552 = vmatpush.bf16.msra.mxu0 %v4457_v18  ;;  %v4446_v28 = vsel %vm1030_vm4, %v10319_v21, %v10317_v48  ;;  %v4439_v21 = vsel %vm1030_vm4, %v10233_v55, %v10254_v24 }
 0x708   :  { %13137 = vst [vmem:[#allocation107_spill] sm:$0xff] %v10610_v39  ;;  %v10612_v31 = vpop.f32.mrf.mxu1  ;;  %4591 = vmatpush.bf16.msra.mxu1 %v4458_v34  ;;  %v10619_v26 = vpop.f32.mrf.mxu3  ;;  %5061 = vrot.lane.b32.xlu2 %v13031_v44, %s7135_s3  ;;  %v6886_v34 = vld [vmem:[#allocation5 + $0xa0] sm:$0xf] }
 0x709   :  { %13138 = vst [vmem:[#allocation108_spill] sm:$0xff] %v10612_v31  ;;  %v10626_v0 = vpop.f32.mrf.mxu2  ;;  %5077 = vrot.lane.b32.xlu1 %v13035_v33, %s7135_s3  ;;  %v10633_v40 = vpop.permute.xlu0 %4395  ;;  %4671 = vmatpush.bf16.msra.mxu3 %v4446_v28  ;;  %v4450_v33 = vsel %vm1030_vm4, %v10361_v50, %v10367_v15  ;;  %v4443_v50 = vsel %vm1030_vm4, %v10291_v13, %v10289_v14 }
 0x70a   :  { %13139 = vst [vmem:[#allocation109_spill] sm:$0xff] %v10619_v26  ;;  %4634 = vmatpush.bf16.msra.mxu2 %v4431_v38  ;;  %v10637_v44 = vpop.permute.xlu2 %4409  ;;  %v10709_v38 = vor.u32 %v7007_v8, %v6886_v34 }
 0x70b   :  { %13140 = vst [vmem:[#allocation110_spill] sm:$0xff] %v10626_v0  ;;  %v10639_v32 = vpop.permute.xlu1 %4407  ;;  %4553 = vmatpush.bf16.msra.mxu0 %v4450_v33  ;;  %v13153_v33 = vld [vmem:[#allocation26_spill] sm:$0xff] }
 0x70c   :  { %4592 = vmatpush.bf16.msra.mxu1 %v4451_v4 }
 0x70d   :  { %4672 = vmatpush.bf16.msra.mxu3 %v4439_v21 }
 0x70e   :  { %4086 = vmatmul.bf16.gmra.mxu3 %v10635_v63 }
 0x70f   :  { %4047 = vmatmul.bf16.gmra.mxu2 %v10635_v63  ;;  %5081 = vrot.lane.b32.xlu0 %v9924_v6, %s7135_s3  ;;  %v10666_v15 = vpop.f32.mrf.mxu0 }
 0x710   :  { %4593 = vmatpush.bf16.msra.mxu1 %v4444_v42  ;;  %v10660_v43 = vpop.f32.mrf.mxu1  ;;  %v10662_v55 = vpop.f32.mrf.mxu3  ;;  %4554 = vmatpush.bf16.msra.mxu0 %v4443_v50  ;;  %13143 = vst [vmem:[#allocation113_spill] sm:$0xff] %v10666_v15  ;;  %v13155_v42 = vld [vmem:[#allocation19_spill] sm:$0xff] }
 0x711   :  { %13141 = vst [vmem:[#allocation111_spill] sm:$0xff] %v10660_v43  ;;  %5067 = vrot.lane.b32.xlu2 %v9658_v30, %s7135_s3  ;;  %5083 = vrot.lane.b32.xlu1 %v9899_v57, %s7135_s3  ;;  %v10673_v6 = vpop.permute.xlu0 %4411  ;;  %v10675_v14 = vpop.f32.mrf.mxu2  ;;  %v4437_v30 = vsel %vm1030_vm4, %v10226_v20, %v10235_v59  ;;  %v4436_v57 = vsel %vm1030_vm4, %v10205_v46, %v10226_v20 }
 0x712   :  { %13142 = vst [vmem:[#allocation112_spill] sm:$0xff] %v10662_v55  ;;  %4673 = vmatpush.bf16.msra.mxu3 %v4432_v58  ;;  %v10677_v13 = vpop.permute.xlu2 %5007  ;;  %3969 = vmatmul.bf16.gmra.mxu0 %v10635_v63  ;;  %v4429_v59 = vsel %vm1030_vm4, %v10146_v61, %v10152_v49 }
 0x713   :  { %13144 = vst [vmem:[#allocation114_spill] sm:$0xff] %v10675_v14  ;;  %v10679_v1 = vpop.permute.xlu1 %5005  ;;  %4008 = vmatmul.bf16.gmra.mxu1 %v10635_v63 }
 0x714   :  { %4594 = vmatpush.bf16.msra.mxu1 %v4437_v30  ;;  %4555 = vmatpush.bf16.msra.mxu0 %v4436_v57 }
 0x717   :  { %5121 = vrot.lane.b32.xlu0 %v13039_v62, %s7135_s3  ;;  %v10703_v20 = vpop.f32.mrf.mxu0 }
 0x718   :  { %4595 = vmatpush.bf16.msra.mxu1 %v4430_v22  ;;  %v10697_v36 = vpop.f32.mrf.mxu1  ;;  %v10699_v18 = vpop.f32.mrf.mxu3  ;;  %4556 = vmatpush.bf16.msra.mxu0 %v4429_v59  ;;  %13147 = vst [vmem:[#allocation117_spill] sm:$0xff] %v10703_v20  ;;  %v13157_v22 = vld [vmem:[#allocation42_spill] sm:$0xff] }
 0x719   :  { %13145 = vst [vmem:[#allocation115_spill] sm:$0xff] %v10697_v36  ;;  %5073 = vrot.lane.b32.xlu2 %v13034_v41, %s7135_s3  ;;  %5123 = vrot.lane.b32.xlu1 %v13148_v9, %s7135_s3  ;;  %v4428_v46 = vpop.permute.xlu0 %4427  ;;  %v10707_v62 = vpop.f32.mrf.mxu2  ;;  %v13150_v41 = vld [vmem:[#allocation47_spill] sm:$0xff]  ;;  %v13160_v59 = vld [vmem:[#allocation82_spill] sm:$0xff] }
 0x71a   :  { %13146 = vst [vmem:[#allocation116_spill] sm:$0xff] %v10699_v18  ;;  %v10711_v61 = vpop.permute.xlu2 %5013 }
 0x71b   :  { %13149 = vst [vmem:[#allocation22_spill] sm:$0xff] %v10707_v62  ;;  %v10713_v49 = vpop.permute.xlu1 %5011 }
 0x71e   :  { %4091 = vmatmul.bf16.gmra.mxu3 %v10709_v38 }
 0x71f   :  { %4052 = vmatmul.bf16.gmra.mxu2 %v10709_v38  ;;  %5105 = vrot.lane.b32.xlu0 %v13150_v41, %s7135_s3  ;;  %v10725_v21 = vpop.f32.mrf.mxu0  ;;  %v13162_v41 = vld [vmem:[#allocation63_spill] sm:$0xff] }
 0x720   :  { %v10719_v28 = vpop.f32.mrf.mxu1  ;;  %v10721_v4 = vpop.f32.mrf.mxu3  ;;  %13154 = vst [vmem:[#allocation26_spill] sm:$0xff] %v10725_v21 }
 0x721   :  { %13151 = vst [vmem:[#allocation47_spill] sm:$0xff] %v10719_v28  ;;  %5079 = vrot.lane.b32.xlu2 %v13153_v33, %s7135_s3  ;;  %5107 = vrot.lane.b32.xlu1 %v13155_v42, %s7135_s3  ;;  %v10729_v50 = vpop.permute.xlu0 %5009  ;;  %v10731_v58 = vpop.f32.mrf.mxu2 }
 0x722   :  { %13152 = vst [vmem:[#allocation118_spill] sm:$0xff] %v10721_v4  ;;  %v10733_v30 = vpop.permute.xlu2 %5019  ;;  %3974 = vmatmul.bf16.gmra.mxu0 %v10709_v38 }
 0x723   :  { %13156 = vst [vmem:[#allocation19_spill] sm:$0xff] %v10731_v58  ;;  %v10735_v57 = vpop.permute.xlu1 %5017  ;;  %4013 = vmatmul.bf16.gmra.mxu1 %v10709_v38 }
 0x727   :  { %5119 = vrot.lane.b32.xlu0 %v13157_v22, %s7135_s3  ;;  %v10747_v9 = vpop.f32.mrf.mxu0  ;;  %v13165_v22 = vld [vmem:[#allocation34_spill] sm:$0xff] }
 0x728   :  { %v10741_v34 = vpop.f32.mrf.mxu1  ;;  %v10743_v8 = vpop.f32.mrf.mxu3  ;;  %13161 = vst [vmem:[#allocation82_spill] sm:$0xff] %v10747_v9  ;;  %v13170_v9 = vld [vmem:[#allocation43_spill] sm:$0xff] }
 0x729   :  { %13158 = vst [vmem:[#allocation42_spill] sm:$0xff] %v10741_v34  ;;  %5085 = vrot.lane.b32.xlu2 %v13160_v59, %s7135_s3  ;;  %5109 = vrot.lane.b32.xlu1 %v13162_v41, %s7135_s3  ;;  %v10751_v33 = vpop.permute.xlu0 %5015  ;;  %v10753_v42 = vpop.f32.mrf.mxu2  ;;  %v13168_v41 = vld [vmem:[#allocation68_spill] sm:$0xff] }
 0x72a   :  { %13159 = vst [vmem:[#allocation119_spill] sm:$0xff] %v10743_v8  ;;  %v10755_v58 = vpop.permute.xlu2 %5025 }
 0x72b   :  { %13163 = vst [vmem:[#allocation63_spill] sm:$0xff] %v10751_v33  ;;  %v10757_v4 = vpop.permute.xlu1 %5023 }
 0x72c   :  { %13164 = vst [vmem:[#allocation120_spill] sm:$0xff] %v10753_v42 }
 0x72e   :  { %4222 = vmatmul.bf16.vlgmr.msrb.gmra.mxu3 %v10433_v37 }
 0x72f   :  { %4822 = vmatpush.bf16.msrb.mxu3 %v4428_v46  ;;  %4183 = vmatmul.bf16.vlgmr.msrb.gmra.mxu2 %v10433_v37  ;;  %v10769_v42 = vpop.f32.mrf.mxu0 }
 0x730   :  { %5091 = vrot.lane.b32.xlu0 %v13165_v22, %s7135_s3  ;;  %v10763_v59 = vpop.f32.mrf.mxu1  ;;  %v10765_v8 = vpop.f32.mrf.mxu3  ;;  %13169 = vst [vmem:[#allocation68_spill] sm:$0xff] %v10769_v42 }
 0x731   :  { %13166 = vst [vmem:[#allocation34_spill] sm:$0xff] %v10763_v59  ;;  %5125 = vrot.lane.b32.xlu2 %v13168_v41, %s7135_s3  ;;  %5101 = vrot.lane.b32.xlu1 %v13170_v9, %s7135_s3  ;;  %v10773_v34 = vpop.permute.xlu0 %5021  ;;  %v10775_v21 = vpop.f32.mrf.mxu2  ;;  %v13172_v41 = vld [vmem:[#allocation62_spill] sm:$0xff]  ;;  %v13177_v59 = vld [vmem:[#allocation24_spill] sm:$0xff] }
 0x732   :  { %13167 = vst [vmem:[#allocation121_spill] sm:$0xff] %v10765_v8  ;;  %v10778_v28 = vpop.permute.xlu2 %5031  ;;  %4105 = vmatmul.bf16.vlgmr.msrb.gmra.mxu0 %v10433_v37 }
 0x733   :  { %13171 = vst [vmem:[#allocation43_spill] sm:$0xff] %v10775_v21  ;;  %4823 = vmatpush.bf16.msrb.mxu3 %v10673_v6  ;;  %v10780_v22 = vpop.permute.xlu1 %5029  ;;  %4144 = vmatmul.bf16.vlgmr.msrb.gmra.mxu1 %v10433_v37  ;;  %v13175_v21 = vld [vmem:[#allocation40_spill] sm:$0xff] }
 0x737   :  { %4824 = vmatpush.bf16.msrb.mxu3 %v10633_v40  ;;  %v10793_v42 = vpop.f32.mrf.mxu0 }
 0x738   :  { %5093 = vrot.lane.b32.xlu0 %v13172_v41, %s7135_s3  ;;  %v10787_v9 = vpop.f32.mrf.mxu1  ;;  %v10789_v8 = vpop.f32.mrf.mxu3  ;;  %13176 = vst [vmem:[#allocation40_spill] sm:$0xff] %v10793_v42  ;;  %v13184_v42 = vld [vmem:[#allocation69_spill] sm:$0xff] }
 0x739   :  { %13173 = vst [vmem:[#allocation62_spill] sm:$0xff] %v10787_v9  ;;  %5117 = vrot.lane.b32.xlu2 %v13175_v21, %s7135_s3  ;;  %5087 = vrot.lane.b32.xlu1 %v13177_v59, %s7135_s3  ;;  %v10797_v62 = vpop.permute.xlu0 %5027  ;;  %v10799_v37 = vpop.f32.mrf.mxu2  ;;  %v13179_v21 = vld [vmem:[#allocation30_spill] sm:$0xff] }
 0x73a   :  { %13174 = vst [vmem:[#allocation122_spill] sm:$0xff] %v10789_v8  ;;  %v4426_v18 = vpop.permute.xlu2 %4425  ;;  %v4477_v8 = vsel %vm1030_vm4, %v10637_v44, %v10673_v6 }
 0x73b   :  { %13178 = vst [vmem:[#allocation24_spill] sm:$0xff] %v10799_v37  ;;  %4825 = vmatpush.bf16.msrb.mxu3 %v10465_v11  ;;  %v10802_v41 = vpop.permute.xlu1 %5035  ;;  %v4484_v9 = vsel %vm1030_vm4, %v4426_v18, %v4428_v46  ;;  %v13182_v46 = vld [vmem:[#allocation86_spill] sm:$0xff] }
 0x73c   :  { %4783 = vmatpush.bf16.msrb.mxu2 %v4484_v9 }
 0x73e   :  { %4227 = vmatmul.bf16.gmra.mxu3 %v10471_v17 }
 0x73f   :  { %4826 = vmatpush.bf16.msrb.mxu3 %v10411_v2  ;;  %4188 = vmatmul.bf16.gmra.mxu2 %v10471_v17  ;;  %v10819_v9 = vpop.f32.mrf.mxu0 }
 0x740   :  { %5097 = vrot.lane.b32.xlu0 %v13179_v21, %s7135_s3  ;;  %v10810_v59 = vpop.f32.mrf.mxu1  ;;  %v10812_v37 = vpop.f32.mrf.mxu3  ;;  %13183 = vst [vmem:[#allocation86_spill] sm:$0xff] %v10819_v9  ;;  %4784 = vmatpush.bf16.msrb.mxu2 %v4477_v8 }
 0x741   :  { %13180 = vst [vmem:[#allocation30_spill] sm:$0xff] %v10810_v59  ;;  %5089 = vrot.lane.b32.xlu2 %v13182_v46, %s7135_s3  ;;  %5099 = vrot.lane.b32.xlu1 %v13184_v42, %s7135_s3  ;;  %v10823_v20 = vpop.permute.xlu0 %5033  ;;  %v10825_v21 = vpop.f32.mrf.mxu2  ;;  %v13186_v59 = vld [vmem:[#allocation46_spill] sm:$0xff]  ;;  %v4470_v42 = vsel %vm1030_vm4, %v10592_v47, %v10633_v40  ;;  %v13187_v46 = vld [vmem:[#allocation72_spill] sm:$0xff]  ;;  %v4476_v40 = vsel %vm1030_vm4, %v10639_v32, %v10637_v44 }
 0x742   :  { %13181 = vst [vmem:[#allocation123_spill] sm:$0xff] %v10812_v37  ;;  %v10828_v37 = vpop.permute.xlu2 %5037  ;;  %4110 = vmatmul.bf16.gmra.mxu0 %v10471_v17  ;;  %v4468_v44 = vsel %vm1030_vm4, %v10561_v60, %v10594_v29 }
 0x743   :  { %13185 = vst [vmem:[#allocation69_spill] sm:$0xff] %v10825_v21  ;;  %4827 = vmatpush.bf16.msrb.mxu3 %v13186_v59  ;;  %v4424_v36 = vpop.permute.xlu1 %4423  ;;  %4149 = vmatmul.bf16.gmra.mxu1 %v10471_v17  ;;  %v13188_v21 = vld [vmem:[#allocation38_spill] sm:$0xff] }
 0x744   :  { %v4482_v6 = vsel %vm1030_vm4, %v10489_v10, %v4424_v36  ;;  %v4483_v8 = vsel %vm1030_vm4, %v4424_v36, %v4426_v18  ;;  %4785 = vmatpush.bf16.msrb.mxu2 %v4470_v42  ;;  %v4475_v10 = vsel %vm1030_vm4, %v10529_v35, %v10639_v32  ;;  %v13191_v36 = vld [vmem:[#allocation31_spill] sm:$0xff]  ;;  %v13195_v42 = vld [vmem:[#allocation48_spill] sm:$0xff]  ;;  %v13196_v32 = vld [vmem:[#allocation81_spill] sm:$0xff] }
 0x745   :  { %4705 = vmatpush.bf16.msrb.mxu0 %v4482_v6  ;;  %4744 = vmatpush.bf16.msrb.mxu1 %v4483_v8  ;;  %v4463_v6 = vsel %vm1030_vm4, %v10447_v54, %v10465_v11  ;;  %v4469_v11 = vsel %vm1030_vm4, %v10594_v29, %v10592_v47  ;;  %v13199_v29 = vld [vmem:[#allocation23_spill] sm:$0xff] }
 0x747   :  { %4828 = vmatpush.bf16.msrb.mxu3 %v13187_v46  ;;  %v10850_v18 = vpop.f32.mrf.mxu0 }
 0x748   :  { %5113 = vrot.lane.b32.xlu0 %v13188_v21, %s7135_s3  ;;  %v10841_v9 = vpop.f32.mrf.mxu1  ;;  %v10843_v17 = vpop.f32.mrf.mxu3  ;;  %13192 = vst [vmem:[#allocation38_spill] sm:$0xff] %v10850_v18  ;;  %v13193_v21 = vld [vmem:[#allocation28_spill] sm:$0xff]  ;;  %4786 = vmatpush.bf16.msrb.mxu2 %v4463_v6 }
 0x749   :  { %13189 = vst [vmem:[#allocation46_spill] sm:$0xff] %v10841_v9  ;;  %5103 = vrot.lane.b32.xlu2 %v13191_v36, %s7135_s3  ;;  %4706 = vmatpush.bf16.msrb.mxu0 %v4475_v10  ;;  %v10860_v8 = vpop.permute.xlu0 %5039  ;;  %v10862_v35 = vpop.f32.mrf.mxu2 }
 0x74a   :  { %13190 = vst [vmem:[#allocation72_spill] sm:$0xff] %v10843_v17  ;;  %5115 = vrot.lane.b32.xlu1 %v13193_v21, %s7135_s3  ;;  %4745 = vmatpush.bf16.msrb.mxu1 %v4476_v40  ;;  %v10865_v10 = vpop.permute.xlu2 %5043  ;;  %v4456_v40 = vsel %vm1030_vm4, %v13196_v32, %v10411_v2  ;;  %v13197_v21 = vld [vmem:[#allocation76_spill] sm:$0xff] }
 0x74b   :  { %13194 = vst [vmem:[#allocation31_spill] sm:$0xff] %v10862_v35  ;;  %4829 = vmatpush.bf16.msrb.mxu3 %v13195_v42  ;;  %v10867_v36 = vpop.permute.xlu1 %5041 }
 0x74c   :  { %4787 = vmatpush.bf16.msrb.mxu2 %v4456_v40  ;;  %v13200_v40 = vld [vmem:[#allocation41_spill] sm:$0xff] }
 0x74d   :  { %4707 = vmatpush.bf16.msrb.mxu0 %v4468_v44  ;;  %v13198_v44 = vld [vmem:[#allocation74_spill] sm:$0xff] }
 0x74e   :  { %4746 = vmatpush.bf16.msrb.mxu1 %v4469_v11  ;;  %4232 = vmatmul.bf16.gmra.mxu3 %v10511_v7  ;;  %v4461_v47 = vsel %vm1030_vm4, %v10443_v25, %v13198_v44  ;;  %v4462_v11 = vsel %vm1030_vm4, %v13198_v44, %v10447_v54  ;;  %v13203_v54 = vld [vmem:[#allocation13_spill] sm:$0xff] }
 0x74f   :  { %4193 = vmatmul.bf16.gmra.mxu2 %v10511_v7  ;;  %v10891_v2 = vpop.f32.mrf.mxu0  ;;  %v4454_v44 = vsel %vm1030_vm4, %v10389_v53, %v13203_v54 }
 0x750   :  { %5129 = vrot.lane.b32.xlu0 %v13197_v21, %s7135_s3  ;;  %v10882_v6 = vpop.f32.mrf.mxu1  ;;  %v10884_v60 = vpop.f32.mrf.mxu3  ;;  %v13201_v21 = vld [vmem:[#allocation61_spill] sm:$0xff] }
 0x751   :  { %5095 = vrot.lane.b32.xlu2 %v13199_v29, %s7135_s3  ;;  %4708 = vmatpush.bf16.msrb.mxu0 %v4461_v47  ;;  %v4449_v35 = vsel %vm1030_vm4, %v13201_v21, %v13186_v59  ;;  %v10901_v17 = vpop.permute.xlu0 %5045  ;;  %v10903_v25 = vpop.f32.mrf.mxu2  ;;  %v4455_v59 = vsel %vm1030_vm4, %v13203_v54, %v13196_v32  ;;  %v13207_v32 = vld [vmem:[#allocation12_spill] sm:$0xff] }
 0x752   :  { %5131 = vrot.lane.b32.xlu1 %v13200_v40, %s7135_s3  ;;  %4747 = vmatpush.bf16.msrb.mxu1 %v4462_v11  ;;  %13202 = vst [vmem:[#allocation28_spill] sm:$0xff] %v10903_v25  ;;  %v10905_v29 = vpop.permute.xlu2 %5049  ;;  %v13204_v11 = vld [vmem:[#allocation36_spill] sm:$0xff]  ;;  %v4447_v54 = vsel %vm1030_vm4, %v10317_v48, %v13207_v32 }
 0x753   :  { %4788 = vmatpush.bf16.msrb.mxu2 %v4449_v35  ;;  %v10907_v47 = vpop.permute.xlu1 %5047  ;;  %4154 = vmatmul.bf16.gmra.mxu1 %v10511_v7  ;;  %v5663_v35 = vld [vmem:[%s12489_s6 + $0x8] sm:$0xff]  ;;  %v4442_v40 = vsel %vm1030_vm4, %v13204_v11, %v13187_v46  ;;  %v4448_v46 = vsel %vm1030_vm4, %v13207_v32, %v13201_v21  ;;  %v13215_v32 = vld [vmem:[#allocation66_spill] sm:$0xff] }
 0x754   :  { %4115 = vmatmul.bf16.gmra.mxu0 %v10511_v7  ;;  %v5664_v7 = vld [vmem:[%s12489_s6 + $0x10] sm:$0xff] }
 0x755   :  { %4709 = vmatpush.bf16.msrb.mxu0 %v4454_v44 }
 0x756   :  { %4748 = vmatpush.bf16.msrb.mxu1 %v4455_v59  ;;  %v13208_v59 = vld [vmem:[#allocation39_spill] sm:$0xff] }
 0x757   :  { %4789 = vmatpush.bf16.msrb.mxu2 %v4442_v40  ;;  %v10935_v18 = vpop.f32.mrf.mxu0 }
 0x758   :  { %5681 = vperm.xlu0 %7041, %v5663_v35   ;;  %v10926_v53 = vpop.f32.mrf.mxu3  ;;  %v10928_v44 = vpop.f32.mrf.mxu1  ;;  %13209 = vst [vmem:[#allocation76_spill] sm:$0xff] %v10935_v18  ;;  %v13210_v35 = vld [vmem:[#allocation33_spill] sm:$0xff] }
 0x759   :  { %13205 = vst [vmem:[#allocation48_spill] sm:$0xff] %v10926_v53  ;;  %5111 = vrot.lane.b32.xlu2 %v13208_v59, %s7135_s3  ;;  %4710 = vmatpush.bf16.msrb.mxu0 %v4447_v54  ;;  %v4435_v40 = vsel %vm1030_vm4, %v13210_v35, %v13195_v42  ;;  %v10943_v9 = vpop.permute.xlu0 %5051  ;;  %v10945_v14 = vpop.f32.mrf.mxu2  ;;  %v13212_v54 = vld [vmem:[#allocation50_spill] sm:$0xff] }
 0x75a   :  { %13206 = vst [vmem:[#allocation81_spill] sm:$0xff] %v10928_v44  ;;  %5686 = vperm.xlu1 %7042, %v5664_v7   ;;  %4749 = vmatpush.bf16.msrb.mxu1 %v4448_v46  ;;  %v10947_v48 = vpop.permute.xlu2 %5055  ;;  %v4440_v55 = vsel %vm1030_vm4, %v10254_v24, %v13212_v54  ;;  %v4441_v21 = vsel %vm1030_vm4, %v13212_v54, %v13204_v11  ;;  %v5666_v42 = vld [vmem:[%s12489_s6 + $0x20] sm:$0xff]  ;;  %v5667_v7 = vld [vmem:[%s12489_s6 + $0x28] sm:$0xff]  ;;  %v13216_v46 = vld [vmem:[#allocation77_spill] sm:$0xff] }
 0x75b   :  { %13211 = vst [vmem:[#allocation74_spill] sm:$0xff] %v10945_v14  ;;  %4790 = vmatpush.bf16.msrb.mxu2 %v4435_v40  ;;  %v10949_v59 = vpop.permute.xlu1 %5053  ;;  %v4433_v11 = vsel %vm1030_vm4, %v10180_v3, %v13215_v32  ;;  %v4434_v54 = vsel %vm1030_vm4, %v13215_v32, %v13210_v35  ;;  %v5669_v35 = vld [vmem:[%s12489_s6 + $0x38] sm:$0xff]  ;;  %v5670_v32 = vld [vmem:[%s12489_s6 + $0x40] sm:$0xff]  ;;  %vm6272_vm4 = vcmask 786112  }
 0x75d   :  { %4711 = vmatpush.bf16.msrb.mxu0 %v4440_v55 }
 0x75e   :  { %4750 = vmatpush.bf16.msrb.mxu1 %v4441_v21  ;;  %4237 = vmatmul.bf16.gmra.mxu3 %v10559_v45 }
 0x75f   :  { %4198 = vmatmul.bf16.gmra.mxu2 %v10559_v45  ;;  %v10974_v40 = vpop.f32.mrf.mxu0 }
 0x760   :  { %5696 = vperm.xlu0 %7041, %v5666_v42   ;;  %v10965_v24 = vpop.f32.mrf.mxu3  ;;  %v10967_v55 = vpop.f32.mrf.mxu1  ;;  %13217 = vst [vmem:[#allocation61_spill] sm:$0xff] %v10974_v40 }
 0x761   :  { %13213 = vst [vmem:[#allocation23_spill] sm:$0xff] %v10965_v24  ;;  %5127 = vrot.lane.b32.xlu2 %v13216_v46, %s7135_s3  ;;  %4712 = vmatpush.bf16.msrb.mxu0 %v4433_v11  ;;  %v10979_v21 = vpop.permute.xlu0 %5057  ;;  %v10981_v42 = vpop.f32.mrf.mxu2 }
 0x762   :  { %13214 = vst [vmem:[#allocation41_spill] sm:$0xff] %v10967_v55  ;;  %5701 = vperm.xlu1 %7042, %v5667_v7   ;;  %4751 = vmatpush.bf16.msrb.mxu1 %v4434_v54  ;;  %v5062_v15 = vpop.permute.xlu2 %5061  ;;  %v5662_v7 = vld [vmem:[%s12489_s6] sm:$0xff] }
 0x763   :  { %13218 = vst [vmem:[#allocation13_spill] sm:$0xff] %v10981_v42  ;;  %v5060_v43 = vpop.permute.xlu1 %5059  ;;  %4159 = vmatmul.bf16.gmra.mxu1 %v10559_v45 }
 0x764   :  { %4120 = vmatmul.bf16.gmra.mxu0 %v10559_v45  ;;  %v10987_v3 = vsel %vm5133_vm7, %v10979_v21, %v5060_v43  ;;  %v10990_v11 = vsel %vm5133_vm7, %v5060_v43, %v5062_v15 }
 0x767   :  { %v11005_v43 = vpop.f32.mrf.mxu0 }
 0x768   :  { %5711 = vperm.xlu0 %7041, %v5669_v35   ;;  %v11001_v45 = vpop.f32.mrf.mxu3  ;;  %v11003_v46 = vpop.f32.mrf.mxu1  ;;  %13221 = vst [vmem:[#allocation39_spill] sm:$0xff] %v11005_v43 }
 0x769   :  { %13219 = vst [vmem:[#allocation36_spill] sm:$0xff] %v11001_v45  ;;  %5676 = vperm.xlu2 %7043, %v5662_v7   ;;  %v5064_v54 = vpop.permute.xlu0 %5063  ;;  %v11007_v0 = vpop.f32.mrf.mxu2  ;;  %v5672_v7 = vld [vmem:[%s12489_s6 + $0x50] sm:$0xff] }
 0x76a   :  { %13220 = vst [vmem:[#allocation12_spill] sm:$0xff] %v11003_v46  ;;  %5716 = vperm.xlu1 %7042, %v5670_v32   ;;  %v11014_v31 = vsel %vm5133_vm7, %v5062_v15, %v5064_v54  ;;  %v5665_v32 = vld [vmem:[%s12489_s6 + $0x18] sm:$0xff] }
 0x76b   :  { %13222 = vst [vmem:[#allocation33_spill] sm:$0xff] %v11007_v0  ;;  %v11009_v26 = vpop.permute.xlu2 %5067  ;;  %v11011_v39 = vpop.permute.xlu1 %5065 }
 0x76c   :  { %v11018_v35 = vsel %vm5133_vm7, %v5064_v54, %v11011_v39 }
 0x76e   :  { %4242 = vmatmul.bf16.gmra.mxu3 %v10635_v63 }
 0x76f   :  { %4203 = vmatmul.bf16.gmra.mxu2 %v10635_v63  ;;  %v11035_v51 = vpop.f32.mrf.mxu0 }
 0x770   :  { %5726 = vperm.xlu0 %7041, %v5672_v7   ;;  %v11031_v15 = vpop.f32.mrf.mxu3  ;;  %v11033_v54 = vpop.f32.mrf.mxu1  ;;  %13225 = vst [vmem:[#allocation77_spill] sm:$0xff] %v11035_v51  ;;  %v5668_v7 = vld [vmem:[%s12489_s6 + $0x30] sm:$0xff] }
 0x771   :  { %13223 = vst [vmem:[#allocation50_spill] sm:$0xff] %v11031_v15  ;;  %5691 = vperm.xlu2 %7043, %v5665_v32   ;;  %v11037_v52 = vpop.permute.xlu0 %5069  ;;  %v11039_v16 = vpop.f32.mrf.mxu2 }
 0x772   :  { %13224 = vst [vmem:[#allocation66_spill] sm:$0xff] %v11033_v54  ;;  %5731 = vperm.xlu1 %7042, %v5673_v12  }
 0x773   :  { %13226 = vst [vmem:[#allocation124_spill] sm:$0xff] %v11039_v16  ;;  %v11041_v27 = vpop.permute.xlu2 %5073  ;;  %v11043_v5 = vpop.permute.xlu1 %5071  ;;  %4164 = vmatmul.bf16.gmra.mxu1 %v10635_v63 }
 0x774   :  { %4125 = vmatmul.bf16.gmra.mxu0 %v10635_v63 }
 0x777   :  { %v11054_v12 = vpop.f32.mrf.mxu0 }
 0x778   :  { %v11050_v32 = vpop.f32.mrf.mxu1  ;;  %v11052_v56 = vpop.f32.mrf.mxu3  ;;  %13229 = vst [vmem:[#allocation127_spill] sm:$0xff] %v11054_v12 }
 0x779   :  { %13227 = vst [vmem:[#allocation125_spill] sm:$0xff] %v11050_v32  ;;  %5706 = vperm.xlu2 %7043, %v5668_v7   ;;  %v11056_v19 = vpop.permute.xlu0 %5075  ;;  %v11058_v23 = vpop.f32.mrf.mxu2 }
 0x77a   :  { %13228 = vst [vmem:[#allocation126_spill] sm:$0xff] %v11052_v56  ;;  %v5671_v56 = vld [vmem:[%s12489_s6 + $0x48] sm:$0xff]  ;;  %s7136_s6 = smov [#allocation7]  }
 0x77b   :  { %13230 = vst [vmem:[#allocation128_spill] sm:$0xff] %v11058_v23  ;;  %v5080_v16 = vpop.permute.xlu2 %5079  ;;  %v11060_v15 = vpop.permute.xlu1 %5077  ;;  %s6547_s11 = sshll.u32 %s7136_s6, 4  ;;  %s6548_s11 = int_to_ptr.vmem [resolvable:$true] %s6547_s11 }
 0x77c   :  { %v11064_v63 = vsel %vm5133_vm7, %v11060_v15, %v5080_v16 }
 0x77e   :  { %4247 = vmatmul.bf16.gmra.mxu3 %v10709_v38 }
 0x77f   :  { %4208 = vmatmul.bf16.gmra.mxu2 %v10709_v38  ;;  %v11073_v12 = vpop.f32.mrf.mxu0 }
 0x780   :  { %v11071_v7 = vpop.f32.mrf.mxu1  ;;  %13232 = vst [vmem:[#allocation130_spill] sm:$0xff] %v11073_v12  ;;  %v7014_v12 = vld [vmem:[#allocation5 + $0x14] sm:$0xf0] }
 0x781   :  { %13231 = vst [vmem:[#allocation129_spill] sm:$0xff] %v11071_v7  ;;  %5721 = vperm.xlu2 %7043, %v5671_v56   ;;  %v11075_v23 = vpop.f32.mrf.mxu3  ;;  %v11077_v32 = vpop.permute.xlu0 %5081  ;;  %v6890_v56 = vld [vmem:[#allocation5 + $0x8] sm:$0xf] }
 0x782   :  { %13233 = vst [vmem:[#allocation131_spill] sm:$0xff] %v11075_v23  ;;  %v11079_v51 = vpop.f32.mrf.mxu2  ;;  %v11086_v0 = vsel %vm5133_vm7, %v5080_v16, %v11077_v32  ;;  %v11099_v42 = vor.u32 %v7014_v12, %v6890_v56 }
 0x783   :  { %13234 = vst [vmem:[#allocation132_spill] sm:$0xff] %v11079_v51  ;;  %v11081_v54 = vpop.permute.xlu2 %5085  ;;  %4169 = vmatmul.bf16.gmra.mxu1 %v10709_v38  ;;  %v11088_v45 = vpop.permute.xlu1 %5083 }
 0x784   :  { %4130 = vmatmul.bf16.gmra.mxu0 %v10709_v38 }
 0x787   :  { %v11093_v23 = vpop.f32.mrf.mxu0 }
 0x788   :  { %v11091_v7 = vpop.f32.mrf.mxu1  ;;  %13236 = vst [vmem:[#allocation134_spill] sm:$0xff] %v11093_v23 }
 0x789   :  { %13235 = vst [vmem:[#allocation133_spill] sm:$0xff] %v11091_v7  ;;  %v11095_v43 = vpop.f32.mrf.mxu3  ;;  %v5122_v51 = vpop.permute.xlu0 %5121 }
 0x78a   :  { %13237 = vst [vmem:[#allocation135_spill] sm:$0xff] %v11095_v43  ;;  %v11097_v46 = vpop.f32.mrf.mxu2 }
 0x78b   :  { %13238 = vst [vmem:[#allocation136_spill] sm:$0xff] %v11097_v46  ;;  %v11101_v24 = vpop.permute.xlu2 %5125  ;;  %v5124_v16 = vpop.permute.xlu1 %5123 }
 0x78c   :  { %v5186_v40 = vsel %vm5133_vm7, %v5124_v16, %v11101_v24  ;;  %v5185_v38 = vsel %vm5133_vm7, %v5122_v51, %v5124_v16 }
 0x78e   :  { %4674 = vmatmul.bf16.vlgmr.msra.gmra.mxu3 %v11099_v42 }
 0x78f   :  { %5371 = vmatpush.bf16.msra.mxu3 %v5186_v40  ;;  %4635 = vmatmul.bf16.vlgmr.msra.gmra.mxu2 %v11099_v42  ;;  %v11110_v43 = vpop.f32.mrf.mxu0 }
 0x790   :  { %v11108_v23 = vpop.f32.mrf.mxu1  ;;  %5332 = vmatpush.bf16.msra.mxu2 %v5185_v38  ;;  %13240 = vst [vmem:[#allocation138_spill] sm:$0xff] %v11110_v43  ;;  %v7015_v38 = vld [vmem:[#allocation5 + $0x34] sm:$0xf0] }
 0x791   :  { %13239 = vst [vmem:[#allocation137_spill] sm:$0xff] %v11108_v23  ;;  %v11112_v12 = vpop.f32.mrf.mxu3  ;;  %v5106_v56 = vpop.permute.xlu0 %5105  ;;  %v6894_v23 = vld [vmem:[#allocation5 + $0x28] sm:$0xf] }
 0x792   :  { %13241 = vst [vmem:[#allocation139_spill] sm:$0xff] %v11112_v12  ;;  %v11114_v46 = vpop.f32.mrf.mxu2  ;;  %v11129_v25 = vor.u32 %v7015_v38, %v6894_v23 }
 0x793   :  { %13242 = vst [vmem:[#allocation140_spill] sm:$0xff] %v11114_v46  ;;  %v5118_v7 = vpop.permute.xlu2 %5117  ;;  %4596 = vmatmul.bf16.vlgmr.msra.gmra.mxu1 %v11099_v42  ;;  %v5108_v55 = vpop.permute.xlu1 %5107 }
 0x794   :  { %4557 = vmatmul.bf16.vlgmr.msra.gmra.mxu0 %v11099_v42  ;;  %v5178_v40 = vsel %vm5133_vm7, %v5106_v56, %v5108_v55 }
 0x795   :  { %5333 = vmatpush.bf16.msra.mxu2 %v5178_v40 }
 0x797   :  { %v11121_v14 = vpop.f32.mrf.mxu0 }
 0x798   :  { %v11119_v16 = vpop.f32.mrf.mxu1  ;;  %13243 = vst [vmem:[#allocation141_spill] sm:$0xff] %v11121_v14 }
 0x799   :  { %v11123_v43 = vpop.f32.mrf.mxu3  ;;  %v5120_v12 = vpop.permute.xlu0 %5119 }
 0x79a   :  { %13244 = vst [vmem:[#allocation142_spill] sm:$0xff] %v11123_v43  ;;  %v11125_v18 = vpop.f32.mrf.mxu2  ;;  %v5183_v46 = vsel %vm5133_vm7, %v5118_v7, %v5120_v12  ;;  %v5184_v53 = vsel %vm5133_vm7, %v5120_v12, %v5122_v51 }
 0x79b   :  { %13245 = vst [vmem:[#allocation143_spill] sm:$0xff] %v11125_v18  ;;  %v5090_v44 = vpop.permute.xlu2 %5089  ;;  %v11131_v33 = vpop.permute.xlu1 %5109  ;;  %5254 = vmatpush.bf16.msra.mxu0 %v5183_v46  ;;  %5293 = vmatpush.bf16.msra.mxu1 %v5184_v53 }
 0x79c   :  { %v5179_v40 = vsel %vm5133_vm7, %v5108_v55, %v11131_v33 }
 0x79d   :  { %5372 = vmatpush.bf16.msra.mxu3 %v5179_v40 }
 0x79e   :  { %4679 = vmatmul.bf16.gmra.mxu3 %v11129_v25 }
 0x79f   :  { %4640 = vmatmul.bf16.gmra.mxu2 %v11129_v25  ;;  %v11139_v7 = vpop.f32.mrf.mxu0 }
 0x7a0   :  { %v11137_v18 = vpop.f32.mrf.mxu1  ;;  %13247 = vst [vmem:[#allocation145_spill] sm:$0xff] %v11139_v7  ;;  %v6898_v7 = vld [vmem:[#allocation5 + $0x48] sm:$0xf] }
 0x7a1   :  { %13246 = vst [vmem:[#allocation144_spill] sm:$0xff] %v11137_v18  ;;  %v11141_v51 = vpop.f32.mrf.mxu3  ;;  %v7016_v18 = vld [vmem:[#allocation5 + $0x54] sm:$0xf0] }
 0x7a2   :  { %13248 = vst [vmem:[#allocation146_spill] sm:$0xff] %v11141_v51  ;;  %v5092_v23 = vpop.permute.xlu0 %5091  ;;  %v11143_v12 = vpop.f32.mrf.mxu2  ;;  %v5164_v51 = vsel %vm5133_vm7, %v11041_v27, %v11056_v19 }
 0x7a3   :  { %13249 = vst [vmem:[#allocation147_spill] sm:$0xff] %v11143_v12  ;;  %v5104_v38 = vpop.permute.xlu2 %5103  ;;  %4601 = vmatmul.bf16.gmra.mxu1 %v11129_v25  ;;  %v5171_v53 = vsel %vm5133_vm7, %v5090_v44, %v5092_v23  ;;  %v5102_v55 = vpop.permute.xlu1 %5101 }
 0x7a4   :  { %4562 = vmatmul.bf16.gmra.mxu0 %v11129_v25  ;;  %5334 = vmatpush.bf16.msra.mxu2 %v5171_v53  ;;  %v5177_v46 = vsel %vm5133_vm7, %v5104_v38, %v5106_v56  ;;  %v5176_v40 = vsel %vm5133_vm7, %v5102_v55, %v5104_v38  ;;  %v11165_v55 = vor.u32 %v7016_v18, %v6898_v7 }
 0x7a5   :  { %5294 = vmatpush.bf16.msra.mxu1 %v5177_v46  ;;  %5255 = vmatpush.bf16.msra.mxu0 %v5176_v40  ;;  %v5150_v18 = vsel %vm5133_vm7, %v10867_v36, %v10865_v10  ;;  %v5162_v7 = vsel %vm5133_vm7, %v11037_v52, %v11043_v5  ;;  %v5155_v52 = vsel %vm5133_vm7, %v10949_v59, %v10947_v48 }
 0x7a7   :  { %v11155_v43 = vpop.f32.mrf.mxu0 }
 0x7a8   :  { %5335 = vmatpush.bf16.msra.mxu2 %v5164_v51  ;;  %v11153_v12 = vpop.f32.mrf.mxu1 }
 0x7a9   :  { %v11157_v14 = vpop.f32.mrf.mxu3 }
 0x7aa   :  { %v11159_v53 = vpop.permute.xlu0 %5093  ;;  %v11161_v56 = vpop.f32.mrf.mxu2 }
 0x7ab   :  { %13250 = vst [vmem:[#allocation148_spill] sm:$0xff] %v11161_v56  ;;  %v5172_v38 = vsel %vm5133_vm7, %v5092_v23, %v11159_v53  ;;  %v5088_v46 = vpop.permute.xlu1 %5087  ;;  %v5165_v56 = vsel %vm5133_vm7, %v11056_v19, %v11060_v15  ;;  %v5163_v19 = vsel %vm5133_vm7, %v11043_v5, %v11041_v27  ;;  %v5143_v23 = vsel %vm5133_vm7, %v10755_v58, %v10797_v62 }
 0x7ac   :  { %5336 = vmatpush.bf16.msra.mxu2 %v10987_v3  ;;  %5373 = vmatpush.bf16.msra.mxu3 %v5172_v38  ;;  %v5169_v51 = vsel %vm5133_vm7, %v11081_v54, %v5088_v46  ;;  %v5170_v40 = vsel %vm5133_vm7, %v5088_v46, %v5090_v44  ;;  %v5156_v5 = vsel %vm5133_vm7, %v10947_v48, %v10979_v21  ;;  %v6902_v38 = vld [vmem:[#allocation5 + $0x68] sm:$0xf]  ;;  %v7017_v46 = vld [vmem:[#allocation5 + $0x74] sm:$0xf0] }
 0x7ad   :  { %5256 = vmatpush.bf16.msra.mxu0 %v5169_v51  ;;  %5295 = vmatpush.bf16.msra.mxu1 %v5170_v40  ;;  %v5151_v27 = vsel %vm5133_vm7, %v10865_v10, %v10901_v17  ;;  %v5148_v48 = vsel %vm5133_vm7, %v10828_v37, %v10860_v8  ;;  %v5149_v10 = vsel %vm5133_vm7, %v10860_v8, %v10867_v36 }
 0x7ae   :  { %4684 = vmatmul.bf16.gmra.mxu3 %v11165_v55  ;;  %v5144_v40 = vsel %vm5133_vm7, %v10797_v62, %v10780_v22  ;;  %v5142_v37 = vsel %vm5133_vm7, %v10757_v4, %v10755_v58  ;;  %v5137_v8 = vsel %vm5133_vm7, %v10713_v49, %v10711_v61  ;;  %v5135_v58 = vsel %vm5133_vm7, %v10677_v13, %v10729_v50 }
 0x7af   :  { %4645 = vmatmul.bf16.gmra.mxu2 %v11165_v55  ;;  %v11181_v54 = vpop.f32.mrf.mxu0 }
 0x7b0   :  { %5374 = vmatpush.bf16.msra.mxu3 %v5165_v56  ;;  %v11179_v3 = vpop.f32.mrf.mxu1  ;;  %5337 = vmatpush.bf16.msra.mxu2 %v5150_v18  ;;  %v5136_v56 = vsel %vm5133_vm7, %v10729_v50, %v10713_v49  ;;  %v11228_v18 = vor.u32 %v7017_v46, %v6902_v38 }
 0x7b1   :  { %v11183_v44 = vpop.f32.mrf.mxu3  ;;  %5257 = vmatpush.bf16.msra.mxu0 %v5162_v7  ;;  %5296 = vmatpush.bf16.msra.mxu1 %v5163_v19  ;;  %v5141_v7 = vsel %vm5133_vm7, %v10773_v34, %v10757_v4  ;;  %v5134_v4 = vsel %vm5133_vm7, %v10679_v1, %v10677_v13 }
 0x7b2   :  { %v11191_v15 = vpop.f32.mrf.mxu2 }
 0x7b3   :  { %4606 = vmatmul.bf16.gmra.mxu1 %v11165_v55 }
 0x7b4   :  { %4567 = vmatmul.bf16.gmra.mxu0 %v11165_v55  ;;  %5375 = vmatpush.bf16.msra.mxu3 %v10990_v11 }
 0x7b5   :  { %5338 = vmatpush.bf16.msra.mxu2 %v5143_v23  ;;  %5258 = vmatpush.bf16.msra.mxu0 %v5155_v52  ;;  %v6906_v23 = vld [vmem:[#allocation5 + $0x88] sm:$0xf]  ;;  %v7018_v52 = vld [vmem:[#allocation5 + $0x94] sm:$0xf0] }
 0x7b6   :  { %5297 = vmatpush.bf16.msra.mxu1 %v5156_v5 }
 0x7b7   :  { %v11213_v59 = vpop.f32.mrf.mxu0 }
 0x7b8   :  { %5376 = vmatpush.bf16.msra.mxu3 %v5151_v27  ;;  %v11211_v11 = vpop.f32.mrf.mxu1 }
 0x7b9   :  { %5339 = vmatpush.bf16.msra.mxu2 %v5136_v56  ;;  %v11215_v51 = vpop.f32.mrf.mxu3  ;;  %5259 = vmatpush.bf16.msra.mxu0 %v5148_v48  ;;  %v11265_v56 = vor.u32 %v7018_v52, %v6906_v23  ;;  %v11279_v48 = vpop.permute.xlu0 %5097 }
 0x7ba   :  { %5298 = vmatpush.bf16.msra.mxu1 %v5149_v10  ;;  %v11223_v21 = vpop.f32.mrf.mxu2  ;;  %v5100_v10 = vpop.permute.xlu1 %5099 }
 0x7bb   :  { %v5096_v52 = vpop.permute.xlu2 %5095 }
 0x7bc   :  { %5377 = vmatpush.bf16.msra.mxu3 %v5144_v40 }
 0x7bd   :  { %5260 = vmatpush.bf16.msra.mxu0 %v5141_v7  ;;  %v6910_v7 = vld [vmem:[#allocation5 + $0xa8] sm:$0xf] }
 0x7be   :  { %5299 = vmatpush.bf16.msra.mxu1 %v5142_v37  ;;  %4689 = vmatmul.bf16.gmra.mxu3 %v11228_v18  ;;  %v7019_v37 = vld [vmem:[#allocation5 + $0xb4] sm:$0xf0] }
 0x7bf   :  { %4650 = vmatmul.bf16.gmra.mxu2 %v11228_v18  ;;  %v11243_v36 = vpop.f32.mrf.mxu0  ;;  %v11289_v23 = vor.u32 %v7019_v37, %v6910_v7 }
 0x7c0   :  { %5378 = vmatpush.bf16.msra.mxu3 %v5137_v8  ;;  %v11241_v62 = vpop.f32.mrf.mxu1 }
 0x7c1   :  { %v11245_v34 = vpop.f32.mrf.mxu3  ;;  %5261 = vmatpush.bf16.msra.mxu0 %v5134_v4 }
 0x7c2   :  { %5300 = vmatpush.bf16.msra.mxu1 %v5135_v58  ;;  %v11253_v49 = vpop.f32.mrf.mxu2 }
 0x7c3   :  { %4611 = vmatmul.bf16.gmra.mxu1 %v11228_v18  ;;  %v5112_v7 = vpop.permute.xlu2 %5111 }
 0x7c4   :  { %4572 = vmatmul.bf16.gmra.mxu0 %v11228_v18 }
 0x7c7   :  { %v11259_v5 = vpop.f32.mrf.mxu0 }
 0x7c8   :  { %v11257_v19 = vpop.f32.mrf.mxu1  ;;  %13251 = vst [vmem:[#allocation149_spill] sm:$0xff] %v11259_v5 }
 0x7c9   :  { %v11261_v27 = vpop.f32.mrf.mxu3 }
 0x7ca   :  { %13252 = vst [vmem:[#allocation150_spill] sm:$0xff] %v11261_v27  ;;  %v11263_v1 = vpop.f32.mrf.mxu2 }
 0x7cb   :  { %13253 = vst [vmem:[#allocation151_spill] sm:$0xff] %v11263_v1 }
 0x7ce   :  { %4694 = vmatmul.bf16.gmra.mxu3 %v11265_v56 }
 0x7cf   :  { %4655 = vmatmul.bf16.gmra.mxu2 %v11265_v56 }
 0x7d0   :  { %v11269_v13 = vpop.f32.mrf.mxu1 }
 0x7d1   :  { %13254 = vst [vmem:[#allocation152_spill] sm:$0xff] %v11269_v13  ;;  %v11271_v50 = vpop.f32.mrf.mxu0  ;;  %v11273_v38 = vpop.f32.mrf.mxu3 }
 0x7d2   :  { %13255 = vst [vmem:[#allocation153_spill] sm:$0xff] %v11271_v50  ;;  %v11275_v46 = vpop.f32.mrf.mxu2  ;;  %v5114_v50 = vpop.permute.xlu0 %5113 }
 0x7d3   :  { %13256 = vst [vmem:[#allocation154_spill] sm:$0xff] %v11273_v38  ;;  %4616 = vmatmul.bf16.gmra.mxu1 %v11265_v56  ;;  %v5116_v13 = vpop.permute.xlu1 %5115 }
 0x7d4   :  { %13257 = vst [vmem:[#allocation155_spill] sm:$0xff] %v11275_v46  ;;  %4577 = vmatmul.bf16.gmra.mxu0 %v11265_v56  ;;  %v5182_v5 = vsel %vm5133_vm7, %v5114_v50, %v5116_v13 }
 0x7d8   :  { %v11281_v40 = vpop.f32.mrf.mxu1 }
 0x7d9   :  { %13258 = vst [vmem:[#allocation156_spill] sm:$0xff] %v11281_v40  ;;  %v11283_v8 = vpop.f32.mrf.mxu0  ;;  %v11285_v4 = vpop.f32.mrf.mxu3 }
 0x7da   :  { %13259 = vst [vmem:[#allocation157_spill] sm:$0xff] %v11283_v8  ;;  %v11287_v58 = vpop.f32.mrf.mxu2 }
 0x7db   :  { %13260 = vst [vmem:[#allocation158_spill] sm:$0xff] %v11285_v4  ;;  %v5132_v1 = vpop.permute.xlu1 %5131 }
 0x7dc   :  { %13261 = vst [vmem:[#allocation159_spill] sm:$0xff] %v11287_v58 }
 0x7de   :  { %4699 = vmatmul.bf16.gmra.mxu3 %v11289_v23 }
 0x7df   :  { %4660 = vmatmul.bf16.gmra.mxu2 %v11289_v23 }
 0x7e0   :  { %v11293_v46 = vpop.f32.mrf.mxu1 }
 0x7e1   :  { %13262 = vst [vmem:[#allocation160_spill] sm:$0xff] %v11293_v46  ;;  %v11295_v38 = vpop.f32.mrf.mxu0  ;;  %v11297_v40 = vpop.f32.mrf.mxu3 }
 0x7e2   :  { %13263 = vst [vmem:[#allocation161_spill] sm:$0xff] %v11295_v38  ;;  %v11299_v8 = vpop.f32.mrf.mxu2  ;;  %v5130_v38 = vpop.permute.xlu0 %5129 }
 0x7e3   :  { %13264 = vst [vmem:[#allocation162_spill] sm:$0xff] %v11297_v40  ;;  %4621 = vmatmul.bf16.gmra.mxu1 %v11289_v23  ;;  %v5128_v40 = vpop.permute.xlu2 %5127 }
 0x7e4   :  { %13265 = vst [vmem:[#allocation163_spill] sm:$0xff] %v11299_v8  ;;  %4582 = vmatmul.bf16.gmra.mxu0 %v11289_v23  ;;  %v5189_v8 = vsel %vm5133_vm7, %v5130_v38, %v5132_v1 }
 0x7e8   :  { %v11303_v37 = vpop.f32.mrf.mxu1 }
 0x7e9   :  { %13266 = vst [vmem:[#allocation164_spill] sm:$0xff] %v11303_v37  ;;  %v11305_v58 = vpop.f32.mrf.mxu0  ;;  %v11307_v4 = vpop.f32.mrf.mxu3 }
 0x7ea   :  { %13267 = vst [vmem:[#allocation165_spill] sm:$0xff] %v11305_v58  ;;  %v11309_v46 = vpop.f32.mrf.mxu2 }
 0x7eb   :  { %13268 = vst [vmem:[#allocation166_spill] sm:$0xff] %v11307_v4 }
 0x7ec   :  { %13269 = vst [vmem:[#allocation167_spill] sm:$0xff] %v11309_v46  ;;  %v5187_v46 = vsel %vm5133_vm7, %v11101_v24, %v5128_v40  ;;  %v5181_v24 = vsel %vm5133_vm7, %v5112_v7, %v5114_v50  ;;  %v5174_v50 = vsel %vm5133_vm7, %v5096_v52, %v11279_v48 }
 0x7ee   :  { %4830 = vmatmul.bf16.vlgmr.msrb.gmra.mxu3 %v11099_v42 }
 0x7ef   :  { %5527 = vmatpush.bf16.msrb.mxu3 %v5132_v1  ;;  %4791 = vmatmul.bf16.vlgmr.msrb.gmra.mxu2 %v11099_v42  ;;  %v5188_v1 = vsel %vm5133_vm7, %v5128_v40, %v5130_v38  ;;  %v5168_v38 = vsel %vm5133_vm7, %v11077_v32, %v11088_v45  ;;  %v13273_v40 = vld [vmem:[#allocation20_spill] sm:$0xff] }
 0x7f0   :  { %v11314_v27 = vpop.f32.mrf.mxu1  ;;  %5488 = vmatpush.bf16.msrb.mxu2 %v5189_v8  ;;  %v5175_v8 = vsel %vm5133_vm7, %v11279_v48, %v5100_v10 }
 0x7f1   :  { %v11316_v37 = vpop.f32.mrf.mxu0  ;;  %v11318_v58 = vpop.f32.mrf.mxu3 }
 0x7f2   :  { %13270 = vst [vmem:[#allocation168_spill] sm:$0xff] %v11318_v58  ;;  %v11320_v4 = vpop.f32.mrf.mxu2 }
 0x7f3   :  { %13271 = vst [vmem:[#allocation169_spill] sm:$0xff] %v11320_v4  ;;  %4752 = vmatmul.bf16.vlgmr.msrb.gmra.mxu1 %v11099_v42  ;;  %5528 = vmatpush.bf16.msrb.mxu3 %v5116_v13  ;;  %v5180_v4 = vsel %vm5133_vm7, %v11131_v33, %v5112_v7  ;;  %v5173_v33 = vsel %vm5133_vm7, %v11159_v53, %v5096_v52 }
 0x7f4   :  { %4713 = vmatmul.bf16.vlgmr.msrb.gmra.mxu0 %v11099_v42  ;;  %5489 = vmatpush.bf16.msrb.mxu2 %v5182_v5 }
 0x7f5   :  { %5410 = vmatpush.bf16.msrb.mxu0 %v5187_v46  ;;  %5449 = vmatpush.bf16.msrb.mxu1 %v5188_v1  ;;  %v5161_v46 = vsel %vm5133_vm7, %v11011_v39, %v11009_v26  ;;  %v5154_v39 = vsel %vm5133_vm7, %v10905_v29, %v10943_v9 }
 0x7f7   :  { %5529 = vmatpush.bf16.msrb.mxu3 %v5100_v10 }
 0x7f8   :  { %v11332_v58 = vpop.f32.mrf.mxu1  ;;  %5490 = vmatpush.bf16.msrb.mxu2 %v5175_v8 }
 0x7f9   :  { %5411 = vmatpush.bf16.msrb.mxu0 %v5180_v4  ;;  %v11335_v13 = vpop.f32.mrf.mxu0  ;;  %v11337_v42 = vpop.f32.mrf.mxu3  ;;  %5450 = vmatpush.bf16.msrb.mxu1 %v5181_v24  ;;  %v3951_v4 = vadd.f32 %v10891_v2, %v13273_v40  ;;  %v13276_v2 = vld [vmem:[#allocation35_spill] sm:$0xff]  ;;  %v13277_v24 = vld [vmem:[#allocation28_spill] sm:$0xff] }
 0x7fa   :  { %v11339_v5 = vpop.f32.mrf.mxu2 }
 0x7fb   :  { %5530 = vmatpush.bf16.msrb.mxu3 %v11088_v45 }
 0x7fc   :  { %5491 = vmatpush.bf16.msrb.mxu2 %v5168_v38  ;;  %v4029_v38 = vadd.f32 %v13277_v24, %v13276_v2  ;;  %v13290_v24 = vld [vmem:[#allocation87_spill] sm:$0xff] }
 0x7fd   :  { %5412 = vmatpush.bf16.msrb.mxu0 %v5173_v33  ;;  %5451 = vmatpush.bf16.msrb.mxu1 %v5174_v50 }
 0x7fe   :  { %4835 = vmatmul.bf16.gmra.mxu3 %v11129_v25 }
 0x7ff   :  { %5531 = vmatpush.bf16.msrb.mxu3 %v11009_v26  ;;  %4796 = vmatmul.bf16.gmra.mxu2 %v11129_v25  ;;  %v5147_v26 = vsel %vm5133_vm7, %v10823_v20, %v10802_v41 }
 0x800   :  { %v11355_v45 = vpop.f32.mrf.mxu1  ;;  %5492 = vmatpush.bf16.msrb.mxu2 %v5161_v46  ;;  %v13279_v46 = vld [vmem:[#allocation81_spill] sm:$0xff] }
 0x801   :  { %5413 = vmatpush.bf16.msrb.mxu0 %v11064_v63  ;;  %v11358_v32 = vpop.f32.mrf.mxu0  ;;  %v11360_v53 = vpop.f32.mrf.mxu3  ;;  %5452 = vmatpush.bf16.msrb.mxu1 %v11086_v0  ;;  %v5152_v0 = vsel %vm5133_vm7, %v10901_v17, %v10907_v47  ;;  %v5145_v17 = vsel %vm5133_vm7, %v10780_v22, %v10778_v28  ;;  %v13275_v22 = vld [vmem:[#allocation63_spill] sm:$0xff] }
 0x802   :  { %v11363_v48 = vpop.f32.mrf.mxu2  ;;  %v5138_v7 = vsel %vm5133_vm7, %v10711_v61, %v13275_v22 }
 0x803   :  { %4757 = vmatmul.bf16.gmra.mxu1 %v11129_v25  ;;  %5532 = vmatpush.bf16.msrb.mxu3 %v10943_v9 }
 0x804   :  { %4718 = vmatmul.bf16.gmra.mxu0 %v11129_v25  ;;  %5493 = vmatpush.bf16.msrb.mxu2 %v5154_v39 }
 0x805   :  { %5414 = vmatpush.bf16.msrb.mxu0 %v11014_v31  ;;  %5453 = vmatpush.bf16.msrb.mxu1 %v11018_v35  ;;  %v5153_v31 = vsel %vm5133_vm7, %v10907_v47, %v10905_v29  ;;  %v5146_v29 = vsel %vm5133_vm7, %v10778_v28, %v10823_v20  ;;  %v13272_v47 = vld [vmem:[#allocation65_spill] sm:$0xff]  ;;  %v5139_v20 = vsel %vm5133_vm7, %v13275_v22, %v10735_v57 }
 0x806   :  { %v3990_v10 = vadd.f32 %v10882_v6, %v13272_v47 }
 0x807   :  { %5533 = vmatpush.bf16.msrb.mxu3 %v10802_v41  ;;  %v5140_v41 = vsel %vm5133_vm7, %v10735_v57, %v10733_v30  ;;  %v13278_v57 = vld [vmem:[#allocation85_spill] sm:$0xff]  ;;  %vm6531_vm7 = vcmask 1042432  }
 0x808   :  { %v11380_v63 = vpop.f32.mrf.mxu1  ;;  %5494 = vmatpush.bf16.msrb.mxu2 %v5147_v26  ;;  %v3992_v39 = vadd.f32 %v13279_v46, %v13278_v57  ;;  %v13280_v26 = vld [vmem:[#allocation67_spill] sm:$0xff]  ;;  %v13292_v46 = vld [vmem:[#allocation21_spill] sm:$0xff] }
 0x809   :  { %5415 = vmatpush.bf16.msrb.mxu0 %v5152_v0  ;;  %v11385_v9 = vpop.f32.mrf.mxu0  ;;  %v11387_v25 = vpop.f32.mrf.mxu3  ;;  %5454 = vmatpush.bf16.msrb.mxu1 %v5153_v31  ;;  %v13281_v0 = vld [vmem:[#allocation48_spill] sm:$0xff] }
 0x80a   :  { %v11389_v35 = vpop.f32.mrf.mxu2  ;;  %v4070_v31 = vadd.f32 %v13281_v0, %v13280_v26 }
 0x80b   :  { %5534 = vmatpush.bf16.msrb.mxu3 %v10733_v30  ;;  %v13274_v30 = vld [vmem:[#allocation49_spill] sm:$0xff] }
 0x80c   :  { %5495 = vmatpush.bf16.msrb.mxu2 %v5140_v41  ;;  %v4068_v52 = vadd.f32 %v10884_v60, %v13274_v30  ;;  %v13282_v41 = vld [vmem:[#allocation84_spill] sm:$0xff]  ;;  %v13284_v30 = vld [vmem:[#allocation58_spill] sm:$0xff] }
 0x80d   :  { %5416 = vmatpush.bf16.msrb.mxu0 %v5145_v17  ;;  %5455 = vmatpush.bf16.msrb.mxu1 %v5146_v29  ;;  %v13283_v17 = vld [vmem:[#allocation76_spill] sm:$0xff] }
 0x80e   :  { %4840 = vmatmul.bf16.gmra.mxu3 %v11165_v55  ;;  %v3953_v29 = vadd.f32 %v13283_v17, %v13282_v41  ;;  %v13294_v41 = vld [vmem:[#allocation29_spill] sm:$0xff] }
 0x80f   :  { %4801 = vmatmul.bf16.gmra.mxu2 %v11165_v55  ;;  %v13295_v17 = vld [vmem:[#allocation13_spill] sm:$0xff] }
 0x810   :  { %v4597_v1 = vpop.f32.mrf.mxu1 }
 0x811   :  { %5417 = vmatpush.bf16.msrb.mxu0 %v5138_v7  ;;  %v4558_v28 = vpop.f32.mrf.mxu0  ;;  %v11415_v6 = vadd.f32 %v4597_v1, %v3990_v10  ;;  %v4675_v8 = vpop.f32.mrf.mxu3  ;;  %5456 = vmatpush.bf16.msrb.mxu1 %v5139_v20 }
 0x812   :  { %v11419_v60 = vadd.f32 %v4558_v28, %v3951_v4  ;;  %v11421_v33 = vadd.f32 %v4675_v8, %v4068_v52  ;;  %v4636_v50 = vpop.f32.mrf.mxu2  ;;  %v13285_v52 = vld [vmem:[#allocation74_spill] sm:$0xff]  ;;  %v13289_v8 = vld [vmem:[#allocation41_spill] sm:$0xff] }
 0x813   :  { %4762 = vmatmul.bf16.gmra.mxu1 %v11165_v55  ;;  %v11424_v61 = vadd.f32 %v4636_v50, %v4029_v38  ;;  %v4031_v22 = vadd.f32 %v13285_v52, %v13284_v30  ;;  %v13288_v28 = vld [vmem:[#allocation70_spill] sm:$0xff]  ;;  %v13291_v38 = vld [vmem:[#allocation61_spill] sm:$0xff] }
 0x814   :  { %4723 = vmatmul.bf16.gmra.mxu0 %v11165_v55  ;;  %v3995_v2 = vadd.f32 %v13289_v8, %v13288_v28  ;;  %v3956_v50 = vadd.f32 %v13291_v38, %v13290_v24  ;;  %v13300_v8 = vld [vmem:[#allocation71_spill] sm:$0xff] }
 0x818   :  { %v4599_v47 = vpop.f32.mrf.mxu1 }
 0x819   :  { %v4560_v10 = vpop.f32.mrf.mxu0  ;;  %v11433_v40 = vadd.f32 %v4599_v47, %v3992_v39  ;;  %v4677_v4 = vpop.f32.mrf.mxu3  ;;  %v13293_v39 = vld [vmem:[#allocation23_spill] sm:$0xff] }
 0x81a   :  { %v11437_v7 = vadd.f32 %v4560_v10, %v3953_v29  ;;  %v11439_v55 = vadd.f32 %v4677_v4, %v4070_v31  ;;  %v4638_v1 = vpop.f32.mrf.mxu2  ;;  %v4073_v26 = vadd.f32 %v13293_v39, %v13292_v46  ;;  %v4034_v29 = vadd.f32 %v13295_v17, %v13294_v41  ;;  %v13305_v41 = vld [vmem:[#allocation33_spill] sm:$0xff] }
 0x81b   :  { %v11441_v20 = vadd.f32 %v4638_v1, %v4031_v22  ;;  %v13298_v22 = vld [vmem:[#allocation59_spill] sm:$0xff]  ;;  %v13299_v1 = vld [vmem:[#allocation12_spill] sm:$0xff] }
 0x81c   :  { %13286 = vst [vmem:[#allocation65_spill] sm:$0xff] %v11439_v55  ;;  %v3997_v28 = vadd.f32 %v13299_v1, %v13298_v22  ;;  %v13308_v1 = vld [vmem:[#allocation32_spill] sm:$0xff] }
 0x81d   :  { %13287 = vst [vmem:[#allocation20_spill] sm:$0xff] %v11441_v20 }
 0x81e   :  { %4845 = vmatmul.bf16.gmra.mxu3 %v11228_v18 }
 0x81f   :  { %4806 = vmatmul.bf16.gmra.mxu2 %v11228_v18 }
 0x820   :  { %v4602_v57 = vpop.f32.mrf.mxu1 }
 0x821   :  { %v4563_v0 = vpop.f32.mrf.mxu0  ;;  %v11451_v31 = vadd.f32 %v4602_v57, %v3995_v2  ;;  %v4680_v10 = vpop.f32.mrf.mxu3  ;;  %v13301_v2 = vld [vmem:[#allocation39_spill] sm:$0xff] }
 0x822   :  { %v11455_v47 = vadd.f32 %v4563_v0, %v3956_v50  ;;  %v11457_v4 = vadd.f32 %v4680_v10, %v4073_v26  ;;  %v4641_v30 = vpop.f32.mrf.mxu2  ;;  %v3958_v24 = vadd.f32 %v13301_v2, %v13300_v8  ;;  %v13302_v57 = vld [vmem:[#allocation27_spill] sm:$0xff]  ;;  %v13303_v50 = vld [vmem:[#allocation36_spill] sm:$0xff]  ;;  %v13304_v0 = vld [vmem:[#allocation37_spill] sm:$0xff] }
 0x823   :  { %4767 = vmatmul.bf16.gmra.mxu1 %v11228_v18  ;;  %v11460_v52 = vadd.f32 %v4641_v30, %v4034_v29  ;;  %v4075_v46 = vadd.f32 %v13303_v50, %v13302_v57  ;;  %v4036_v17 = vadd.f32 %v13305_v41, %v13304_v0  ;;  %v13309_v8 = vld [vmem:[#allocation66_spill] sm:$0xff]  ;;  %v13310_v57 = vld [vmem:[#allocation17_spill] sm:$0xff] }
 0x824   :  { %13296 = vst [vmem:[#allocation49_spill] sm:$0xff] %v11457_v4  ;;  %4728 = vmatmul.bf16.gmra.mxu0 %v11228_v18  ;;  %v4000_v2 = vadd.f32 %v13309_v8, %v13308_v1  ;;  %v13311_v50 = vld [vmem:[#allocation77_spill] sm:$0xff]  ;;  %v13312_v0 = vld [vmem:[#allocation18_spill] sm:$0xff] }
 0x825   :  { %13297 = vst [vmem:[#allocation63_spill] sm:$0xff] %v11460_v52 }
 0x828   :  { %v4604_v38 = vpop.f32.mrf.mxu1 }
 0x829   :  { %v4565_v39 = vpop.f32.mrf.mxu0  ;;  %v11469_v26 = vadd.f32 %v4604_v38, %v3997_v28  ;;  %v4682_v10 = vpop.f32.mrf.mxu3  ;;  %v3961_v28 = vadd.f32 %v13311_v50, %v13310_v57  ;;  %v13319_v50 = vld [vmem:[#allocation60_spill] sm:$0xff] }
 0x82a   :  { %v11473_v29 = vadd.f32 %v4565_v39, %v3958_v24  ;;  %v11475_v18 = vadd.f32 %v4682_v10, %v4075_v46  ;;  %v4643_v30 = vpop.f32.mrf.mxu2  ;;  %v13313_v24 = vld [vmem:[#allocation50_spill] sm:$0xff]  ;;  %v13315_v10 = vld [vmem:[#allocation45_spill] sm:$0xff] }
 0x82b   :  { %v11477_v22 = vadd.f32 %v4643_v30, %v4036_v17  ;;  %v4078_v39 = vadd.f32 %v13313_v24, %v13312_v0  ;;  %v13316_v17 = vld [vmem:[#allocation124_spill] sm:$0xff]  ;;  %v13320_v0 = vld [vmem:[#allocation125_spill] sm:$0xff] }
 0x82c   :  { %13306 = vst [vmem:[#allocation35_spill] sm:$0xff] %v11475_v18  ;;  %v4039_v30 = vadd.f32 %v13316_v17, %v13315_v10  ;;  %v4002_v24 = vadd.f32 %v13320_v0, %v13319_v50  ;;  %v13323_v10 = vld [vmem:[#allocation16_spill] sm:$0xff]  ;;  %v13331_v0 = vld [vmem:[#allocation83_spill] sm:$0xff] }
 0x82d   :  { %13307 = vst [vmem:[#allocation28_spill] sm:$0xff] %v11477_v22 }
 0x82e   :  { %4850 = vmatmul.bf16.gmra.mxu3 %v11265_v56 }
 0x82f   :  { %4811 = vmatmul.bf16.gmra.mxu2 %v11265_v56 }
 0x830   :  { %v4607_v38 = vpop.f32.mrf.mxu1 }
 0x831   :  { %v4568_v41 = vpop.f32.mrf.mxu0  ;;  %v11487_v46 = vadd.f32 %v4607_v38, %v4000_v2  ;;  %v4685_v1 = vpop.f32.mrf.mxu3  ;;  %v13321_v2 = vld [vmem:[#allocation14_spill] sm:$0xff]  ;;  %v13322_v38 = vld [vmem:[#allocation127_spill] sm:$0xff] }
 0x832   :  { %v11491_v18 = vadd.f32 %v4568_v41, %v3961_v28  ;;  %v11493_v8 = vadd.f32 %v4685_v1, %v4078_v39  ;;  %v4646_v4 = vpop.f32.mrf.mxu2  ;;  %v3963_v22 = vadd.f32 %v13322_v38, %v13321_v2  ;;  %v13324_v28 = vld [vmem:[#allocation126_spill] sm:$0xff]  ;;  %v13326_v1 = vld [vmem:[#allocation51_spill] sm:$0xff]  ;;  %v13332_v2 = vld [vmem:[#allocation129_spill] sm:$0xff] }
 0x833   :  { %13314 = vst [vmem:[#allocation85_spill] sm:$0xff] %v11487_v46  ;;  %4772 = vmatmul.bf16.gmra.mxu1 %v11265_v56  ;;  %v11496_v57 = vadd.f32 %v4646_v4, %v4039_v30  ;;  %v4080_v41 = vadd.f32 %v13324_v28, %v13323_v10  ;;  %v4005_v38 = vadd.f32 %v13332_v2, %v13331_v0  ;;  %v13333_v10 = vld [vmem:[#allocation54_spill] sm:$0xff] }
 0x834   :  { %13317 = vst [vmem:[#allocation81_spill] sm:$0xff] %v11493_v8  ;;  %4733 = vmatmul.bf16.gmra.mxu0 %v11265_v56  ;;  %v13327_v8 = vld [vmem:[#allocation128_spill] sm:$0xff]  ;;  %v13334_v28 = vld [vmem:[#allocation130_spill] sm:$0xff] }
 0x835   :  { %13318 = vst [vmem:[#allocation67_spill] sm:$0xff] %v11496_v57  ;;  %v4041_v55 = vadd.f32 %v13327_v8, %v13326_v1  ;;  %v13335_v8 = vld [vmem:[#allocation78_spill] sm:$0xff] }
 0x838   :  { %v4609_v52 = vpop.f32.mrf.mxu1 }
 0x839   :  { %v4570_v17 = vpop.f32.mrf.mxu0  ;;  %v11505_v39 = vadd.f32 %v4609_v52, %v4002_v24  ;;  %v4687_v30 = vpop.f32.mrf.mxu3  ;;  %v3966_v52 = vadd.f32 %v13334_v28, %v13333_v10  ;;  %v13343_v28 = vld [vmem:[#allocation11_spill] sm:$0xff] }
 0x83a   :  { %v11509_v4 = vadd.f32 %v4570_v17, %v3963_v22  ;;  %v11511_v56 = vadd.f32 %v4687_v30, %v4080_v41  ;;  %v4648_v57 = vpop.f32.mrf.mxu2  ;;  %v13336_v22 = vld [vmem:[#allocation131_spill] sm:$0xff]  ;;  %v13338_v30 = vld [vmem:[#allocation57_spill] sm:$0xff] }
 0x83b   :  { %13325 = vst [vmem:[#allocation48_spill] sm:$0xff] %v11505_v39  ;;  %v11513_v50 = vadd.f32 %v4648_v57, %v4041_v55  ;;  %v4083_v17 = vadd.f32 %v13336_v22, %v13335_v8  ;;  %v13339_v55 = vld [vmem:[#allocation132_spill] sm:$0xff]  ;;  %v13344_v8 = vld [vmem:[#allocation133_spill] sm:$0xff] }
 0x83c   :  { %13328 = vst [vmem:[#allocation84_spill] sm:$0xff] %v11509_v4  ;;  %v4044_v57 = vadd.f32 %v13339_v55, %v13338_v30  ;;  %v4007_v22 = vadd.f32 %v13344_v8, %v13343_v28  ;;  %v6914_v30 = vld [vmem:[#allocation5 + $0xc] sm:$0xf]  ;;  %v13356_v4 = vld [vmem:[#allocation137_spill] sm:$0xff] }
 0x83d   :  { %13329 = vst [vmem:[#allocation76_spill] sm:$0xff] %v11511_v56  ;;  %v13348_v55 = vld [vmem:[#allocation135_spill] sm:$0xff] }
 0x83e   :  { %13330 = vst [vmem:[#allocation58_spill] sm:$0xff] %v11513_v50  ;;  %4855 = vmatmul.bf16.gmra.mxu3 %v11289_v23 }
 0x83f   :  { %4816 = vmatmul.bf16.gmra.mxu2 %v11289_v23 }
 0x840   :  { %v4612_v24 = vpop.f32.mrf.mxu1 }
 0x841   :  { %v4573_v1 = vpop.f32.mrf.mxu0  ;;  %v11523_v41 = vadd.f32 %v4612_v24, %v4005_v38  ;;  %v4690_v0 = vpop.f32.mrf.mxu3  ;;  %v13345_v38 = vld [vmem:[#allocation80_spill] sm:$0xff]  ;;  %v13346_v24 = vld [vmem:[#allocation134_spill] sm:$0xff] }
 0x842   :  { %v11527_v56 = vadd.f32 %v4573_v1, %v3966_v52  ;;  %v11529_v2 = vadd.f32 %v4690_v0, %v4083_v17  ;;  %v4651_v50 = vpop.f32.mrf.mxu2  ;;  %v7020_v52 = vld [vmem:[#allocation5 + $0x18] sm:$0xf0]  ;;  %v13347_v1 = vld [vmem:[#allocation44_spill] sm:$0xff] }
 0x843   :  { %13337 = vst [vmem:[#allocation74_spill] sm:$0xff] %v11523_v41  ;;  %4777 = vmatmul.bf16.gmra.mxu1 %v11289_v23  ;;  %v11532_v10 = vadd.f32 %v4651_v50, %v4044_v57  ;;  %v3968_v41 = vadd.f32 %v13346_v24, %v13345_v38  ;;  %v4085_v17 = vadd.f32 %v13348_v55, %v13347_v1  ;;  %v13351_v50 = vld [vmem:[#allocation136_spill] sm:$0xff]  ;;  %v13355_v24 = vld [vmem:[#allocation55_spill] sm:$0xff] }
 0x844   :  { %13340 = vst [vmem:[#allocation70_spill] sm:$0xff] %v11527_v56  ;;  %4738 = vmatmul.bf16.gmra.mxu0 %v11289_v23  ;;  %v13350_v56 = vld [vmem:[#allocation56_spill] sm:$0xff]  ;;  %v11549_v8 = vor.u32 %v7020_v52, %v6914_v30  ;;  %v4010_v46 = vadd.f32 %v13356_v4, %v13355_v24  ;;  %v13360_v55 = vld [vmem:[#allocation139_spill] sm:$0xff] }
 0x845   :  { %13341 = vst [vmem:[#allocation41_spill] sm:$0xff] %v11529_v2  ;;  %v4046_v57 = vadd.f32 %v13351_v50, %v13350_v56  ;;  %v13362_v30 = vld [vmem:[#allocation79_spill] sm:$0xff]  ;;  %v13363_v52 = vld [vmem:[#allocation140_spill] sm:$0xff] }
 0x846   :  { %13342 = vst [vmem:[#allocation87_spill] sm:$0xff] %v11532_v10 }
 0x848   :  { %v4614_v39 = vpop.f32.mrf.mxu1 }
 0x849   :  { %v4575_v0 = vpop.f32.mrf.mxu0  ;;  %v11541_v2 = vadd.f32 %v4614_v39, %v4007_v22  ;;  %v4692_v23 = vpop.f32.mrf.mxu3  ;;  %v13357_v39 = vld [vmem:[#allocation75_spill] sm:$0xff]  ;;  %v13358_v22 = vld [vmem:[#allocation138_spill] sm:$0xff] }
 0x84a   :  { %v11545_v10 = vadd.f32 %v4575_v0, %v3968_v41  ;;  %v11547_v20 = vadd.f32 %v4692_v23, %v4085_v17  ;;  %v4653_v28 = vpop.f32.mrf.mxu2  ;;  %v3971_v1 = vadd.f32 %v13358_v22, %v13357_v39  ;;  %v13359_v41 = vld [vmem:[#allocation25_spill] sm:$0xff]  ;;  %v13367_v22 = vld [vmem:[#allocation52_spill] sm:$0xff] }
 0x84b   :  { %13349 = vst [vmem:[#allocation61_spill] sm:$0xff] %v11541_v2  ;;  %v11551_v38 = vadd.f32 %v4653_v28, %v4046_v57  ;;  %v4088_v17 = vadd.f32 %v13360_v55, %v13359_v41  ;;  %v4049_v57 = vadd.f32 %v13363_v52, %v13362_v30  ;;  %v4012_v41 = vadd.f32 %v11119_v16, %v13367_v22  ;;  %v6918_v30 = vld [vmem:[#allocation5 + $0x2c] sm:$0xf]  ;;  %v13371_v52 = vld [vmem:[#allocation142_spill] sm:$0xff]  ;;  %v13377_v2 = vld [vmem:[#allocation144_spill] sm:$0xff] }
 0x84c   :  { %13352 = vst [vmem:[#allocation21_spill] sm:$0xff] %v11545_v10 }
 0x84d   :  { %13353 = vst [vmem:[#allocation23_spill] sm:$0xff] %v11547_v20 }
 0x84e   :  { %13354 = vst [vmem:[#allocation29_spill] sm:$0xff] %v11551_v38  ;;  %5379 = vmatmul.bf16.vlgmr.msra.gmra.mxu3 %v11549_v8  ;;  %v13372_v38 = vld [vmem:[#allocation15_spill] sm:$0xff] }
 0x84f   :  { %5340 = vmatmul.bf16.vlgmr.msra.gmra.mxu2 %v11549_v8 }
 0x850   :  { %v4617_v56 = vpop.f32.mrf.mxu1 }
 0x851   :  { %v4578_v0 = vpop.f32.mrf.mxu0  ;;  %v11561_v50 = vadd.f32 %v4617_v56, %v4010_v46  ;;  %v4695_v4 = vpop.f32.mrf.mxu3  ;;  %v13368_v46 = vld [vmem:[#allocation73_spill] sm:$0xff] }
 0x852   :  { %v11565_v23 = vadd.f32 %v4578_v0, %v3971_v1  ;;  %v11567_v28 = vadd.f32 %v4695_v4, %v4088_v17  ;;  %v4656_v24 = vpop.f32.mrf.mxu2  ;;  %v13369_v56 = vld [vmem:[#allocation141_spill] sm:$0xff] }
 0x853   :  { %13361 = vst [vmem:[#allocation13_spill] sm:$0xff] %v11561_v50  ;;  %5301 = vmatmul.bf16.vlgmr.msra.gmra.mxu1 %v11549_v8  ;;  %v11570_v39 = vadd.f32 %v4656_v24, %v4049_v57  ;;  %v3973_v55 = vadd.f32 %v13369_v56, %v13368_v46  ;;  %v7021_v1 = vld [vmem:[#allocation5 + $0x38] sm:$0xf0]  ;;  %v13373_v57 = vld [vmem:[#allocation143_spill] sm:$0xff]  ;;  %v13376_v56 = vld [vmem:[#allocation64_spill] sm:$0xff] }
 0x854   :  { %13364 = vst [vmem:[#allocation59_spill] sm:$0xff] %v11565_v23  ;;  %5262 = vmatmul.bf16.vlgmr.msra.gmra.mxu0 %v11549_v8  ;;  %v13370_v0 = vld [vmem:[#allocation53_spill] sm:$0xff]  ;;  %v4051_v24 = vadd.f32 %v13373_v57, %v13372_v38  ;;  %v11587_v22 = vor.u32 %v7021_v1, %v6918_v30  ;;  %v4015_v10 = vadd.f32 %v13377_v2, %v13376_v56  ;;  %v13383_v30 = vld [vmem:[#allocation90_spill] sm:$0xff]  ;;  %v13384_v1 = vld [vmem:[#allocation147_spill] sm:$0xff] }
 0x855   :  { %13365 = vst [vmem:[#allocation12_spill] sm:$0xff] %v11567_v28  ;;  %v4090_v17 = vadd.f32 %v13371_v52, %v13370_v0  ;;  %v13381_v52 = vld [vmem:[#allocation146_spill] sm:$0xff]  ;;  %v4054_v57 = vadd.f32 %v13384_v1, %v13383_v30  ;;  %v6922_v30 = vld [vmem:[#allocation5 + $0x4c] sm:$0xf] }
 0x856   :  { %13366 = vst [vmem:[#allocation71_spill] sm:$0xff] %v11570_v39 }
 0x858   :  { %v4619_v20 = vpop.f32.mrf.mxu1 }
 0x859   :  { %v4580_v4 = vpop.f32.mrf.mxu0  ;;  %v11579_v28 = vadd.f32 %v4619_v20, %v4012_v41  ;;  %v4697_v50 = vpop.f32.mrf.mxu3  ;;  %v13378_v20 = vld [vmem:[#allocation88_spill] sm:$0xff]  ;;  %v13379_v41 = vld [vmem:[#allocation145_spill] sm:$0xff] }
 0x85a   :  { %v11583_v39 = vadd.f32 %v4580_v4, %v3973_v55  ;;  %v11585_v23 = vadd.f32 %v4697_v50, %v4090_v17  ;;  %v4658_v16 = vpop.f32.mrf.mxu2  ;;  %v3976_v0 = vadd.f32 %v13379_v41, %v13378_v20  ;;  %v13380_v55 = vld [vmem:[#allocation89_spill] sm:$0xff]  ;;  %v13387_v41 = vld [vmem:[#allocation91_spill] sm:$0xff] }
 0x85b   :  { %v11589_v46 = vadd.f32 %v4658_v16, %v4051_v24  ;;  %v4093_v50 = vadd.f32 %v13381_v52, %v13380_v55  ;;  %v4017_v55 = vadd.f32 %v11153_v12, %v13387_v41 }
 0x85c   :  { %13374 = vst [vmem:[#allocation39_spill] sm:$0xff] %v11585_v23 }
 0x85d   :  { %13375 = vst [vmem:[#allocation27_spill] sm:$0xff] %v11589_v46 }
 0x85e   :  { %5384 = vmatmul.bf16.gmra.mxu3 %v11587_v22 }
 0x85f   :  { %5345 = vmatmul.bf16.gmra.mxu2 %v11587_v22 }
 0x860   :  { %v4622_v38 = vpop.f32.mrf.mxu1 }
 0x861   :  { %v4583_v17 = vpop.f32.mrf.mxu0  ;;  %v11599_v4 = vadd.f32 %v4622_v38, %v4015_v10  ;;  %v4700_v2 = vpop.f32.mrf.mxu3  ;;  %v13388_v10 = vld [vmem:[#allocation92_spill] sm:$0xff] }
 0x862   :  { %v11603_v24 = vadd.f32 %v4583_v17, %v3976_v0  ;;  %v11605_v16 = vadd.f32 %v4700_v2, %v4093_v50  ;;  %v4661_v56 = vpop.f32.mrf.mxu2  ;;  %v3978_v38 = vadd.f32 %v11155_v43, %v13388_v10  ;;  %v7022_v0 = vld [vmem:[#allocation5 + $0x58] sm:$0xf0]  ;;  %v13394_v10 = vld [vmem:[#allocation96_spill] sm:$0xff] }
 0x863   :  { %13382 = vst [vmem:[#allocation36_spill] sm:$0xff] %v11599_v4  ;;  %5306 = vmatmul.bf16.gmra.mxu1 %v11587_v22  ;;  %v11608_v20 = vadd.f32 %v4661_v56, %v4054_v57  ;;  %v13389_v17 = vld [vmem:[#allocation93_spill] sm:$0xff]  ;;  %v13391_v57 = vld [vmem:[#allocation148_spill] sm:$0xff]  ;;  %v11625_v41 = vor.u32 %v7022_v0, %v6922_v30  ;;  %v4146_v4 = vadd.f32 %v11179_v3, %v13394_v10  ;;  %v13397_v30 = vld [vmem:[#allocation98_spill] sm:$0xff] }
 0x864   :  { %13385 = vst [vmem:[#allocation37_spill] sm:$0xff] %v11605_v16  ;;  %5267 = vmatmul.bf16.gmra.mxu0 %v11587_v22  ;;  %v4095_v50 = vadd.f32 %v11157_v14, %v13389_v17  ;;  %v13390_v16 = vld [vmem:[#allocation94_spill] sm:$0xff]  ;;  %v13395_v14 = vld [vmem:[#allocation95_spill] sm:$0xff]  ;;  %v4185_v0 = vadd.f32 %v11191_v15, %v13397_v30 }
 0x865   :  { %13386 = vst [vmem:[#allocation33_spill] sm:$0xff] %v11608_v20  ;;  %v4056_v56 = vadd.f32 %v13391_v57, %v13390_v16  ;;  %v6926_v15 = vld [vmem:[#allocation5 + $0x6c] sm:$0xf] }
 0x868   :  { %v4624_v52 = vpop.f32.mrf.mxu1 }
 0x869   :  { %v4585_v1 = vpop.f32.mrf.mxu0  ;;  %v11617_v2 = vadd.f32 %v4624_v52, %v4017_v55  ;;  %v4702_v23 = vpop.f32.mrf.mxu3  ;;  %v4107_v55 = vadd.f32 %v11181_v54, %v13395_v14  ;;  %v7023_v14 = vld [vmem:[#allocation5 + $0x78] sm:$0xf0] }
 0x86a   :  { %v11621_v20 = vadd.f32 %v4585_v1, %v3978_v38  ;;  %v11623_v46 = vadd.f32 %v4702_v23, %v4095_v50  ;;  %v4663_v12 = vpop.f32.mrf.mxu2  ;;  %v13396_v38 = vld [vmem:[#allocation97_spill] sm:$0xff] }
 0x86b   :  { %v11627_v43 = vadd.f32 %v4663_v12, %v4056_v56  ;;  %v4224_v23 = vadd.f32 %v11183_v44, %v13396_v38  ;;  %v13400_v56 = vld [vmem:[#allocation100_spill] sm:$0xff] }
 0x86c   :  { %13392 = vst [vmem:[#allocation32_spill] sm:$0xff] %v11623_v46  ;;  %v4148_v44 = vadd.f32 %v11211_v11, %v13400_v56  ;;  %v11663_v56 = vor.u32 %v7023_v14, %v6926_v15  ;;  %v13409_v15 = vld [vmem:[#allocation106_spill] sm:$0xff] }
 0x86d   :  { %13393 = vst [vmem:[#allocation66_spill] sm:$0xff] %v11627_v43  ;;  %v4190_v14 = vadd.f32 %v11253_v49, %v13409_v15  ;;  %v6930_v49 = vld [vmem:[#allocation5 + $0x8c] sm:$0xf]  ;;  %v13445_v43 = vld [vmem:[#allocation160_spill] sm:$0xff] }
 0x86e   :  { %5389 = vmatmul.bf16.gmra.mxu3 %v11625_v41 }
 0x86f   :  { %5350 = vmatmul.bf16.gmra.mxu2 %v11625_v41 }
 0x870   :  { %v4753_v16 = vpop.f32.mrf.mxu1 }
 0x871   :  { %v4714_v52 = vpop.f32.mrf.mxu0  ;;  %v11637_v17 = vadd.f32 %v4753_v16, %v4146_v4  ;;  %v4831_v3 = vpop.f32.mrf.mxu3  ;;  %v13401_v4 = vld [vmem:[#allocation99_spill] sm:$0xff] }
 0x872   :  { %v11641_v50 = vadd.f32 %v4714_v52, %v4107_v55  ;;  %v11643_v1 = vadd.f32 %v4831_v3, %v4224_v23  ;;  %v4792_v57 = vpop.f32.mrf.mxu2  ;;  %v4109_v12 = vadd.f32 %v11213_v59, %v13401_v4  ;;  %v13402_v55 = vld [vmem:[#allocation101_spill] sm:$0xff]  ;;  %v13403_v52 = vld [vmem:[#allocation102_spill] sm:$0xff]  ;;  %v13406_v4 = vld [vmem:[#allocation104_spill] sm:$0xff] }
 0x873   :  { %5311 = vmatmul.bf16.gmra.mxu1 %v11625_v41  ;;  %v11646_v54 = vadd.f32 %v4792_v57, %v4185_v0  ;;  %v4226_v16 = vadd.f32 %v11215_v51, %v13402_v55  ;;  %v4187_v30 = vadd.f32 %v11223_v21, %v13403_v52  ;;  %v13407_v51 = vld [vmem:[#allocation103_spill] sm:$0xff] }
 0x874   :  { %13398 = vst [vmem:[#allocation17_spill] sm:$0xff] %v11643_v1  ;;  %5272 = vmatmul.bf16.gmra.mxu0 %v11625_v41  ;;  %v4151_v1 = vadd.f32 %v11241_v62, %v13406_v4 }
 0x875   :  { %13399 = vst [vmem:[#allocation77_spill] sm:$0xff] %v11646_v54 }
 0x878   :  { %v4755_v10 = vpop.f32.mrf.mxu1 }
 0x879   :  { %v4716_v38 = vpop.f32.mrf.mxu0  ;;  %v11655_v23 = vadd.f32 %v4755_v10, %v4148_v44  ;;  %v4833_v3 = vpop.f32.mrf.mxu3  ;;  %v4112_v44 = vadd.f32 %v11243_v36, %v13407_v51 }
 0x87a   :  { %v11659_v0 = vadd.f32 %v4716_v38, %v4109_v12  ;;  %v11661_v57 = vadd.f32 %v4833_v3, %v4226_v16  ;;  %v4794_v11 = vpop.f32.mrf.mxu2  ;;  %v13408_v12 = vld [vmem:[#allocation105_spill] sm:$0xff]  ;;  %v13412_v3 = vld [vmem:[#allocation108_spill] sm:$0xff] }
 0x87b   :  { %v11665_v59 = vadd.f32 %v4794_v11, %v4187_v30  ;;  %v4229_v10 = vadd.f32 %v11245_v34, %v13408_v12  ;;  %v4153_v34 = vadd.f32 %v11257_v19, %v13412_v3  ;;  %v13414_v11 = vld [vmem:[#allocation149_spill] sm:$0xff]  ;;  %v13416_v12 = vld [vmem:[#allocation150_spill] sm:$0xff] }
 0x87c   :  { %13404 = vst [vmem:[#allocation18_spill] sm:$0xff] %v11661_v57 }
 0x87d   :  { %13405 = vst [vmem:[#allocation50_spill] sm:$0xff] %v11665_v59  ;;  %v13423_v59 = vld [vmem:[#allocation152_spill] sm:$0xff] }
 0x87e   :  { %5394 = vmatmul.bf16.gmra.mxu3 %v11663_v56 }
 0x87f   :  { %5355 = vmatmul.bf16.gmra.mxu2 %v11663_v56 }
 0x880   :  { %v4758_v21 = vpop.f32.mrf.mxu1 }
 0x881   :  { %v4719_v55 = vpop.f32.mrf.mxu0  ;;  %v11675_v16 = vadd.f32 %v4758_v21, %v4151_v1  ;;  %v4836_v62 = vpop.f32.mrf.mxu3  ;;  %v13413_v1 = vld [vmem:[#allocation107_spill] sm:$0xff]  ;;  %v13415_v21 = vld [vmem:[#allocation109_spill] sm:$0xff] }
 0x882   :  { %v11679_v38 = vadd.f32 %v4719_v55, %v4112_v44  ;;  %v11681_v52 = vadd.f32 %v4836_v62, %v4229_v10  ;;  %v4797_v30 = vpop.f32.mrf.mxu2  ;;  %v4114_v4 = vadd.f32 %v13414_v11, %v13413_v1  ;;  %v7024_v44 = vld [vmem:[#allocation5 + $0x98] sm:$0xf0]  ;;  %v4231_v10 = vadd.f32 %v13416_v12, %v13415_v21  ;;  %v13418_v62 = vld [vmem:[#allocation110_spill] sm:$0xff]  ;;  %v13422_v11 = vld [vmem:[#allocation111_spill] sm:$0xff] }
 0x883   :  { %5316 = vmatmul.bf16.gmra.mxu1 %v11663_v56  ;;  %v11684_v36 = vadd.f32 %v4797_v30, %v4190_v14  ;;  %v13419_v14 = vld [vmem:[#allocation151_spill] sm:$0xff]  ;;  %v11701_v3 = vor.u32 %v7024_v44, %v6930_v49  ;;  %v4156_v46 = vadd.f32 %v13423_v59, %v13422_v11  ;;  %v13426_v12 = vld [vmem:[#allocation112_spill] sm:$0xff]  ;;  %v13429_v49 = vld [vmem:[#allocation114_spill] sm:$0xff] }
 0x884   :  { %13410 = vst [vmem:[#allocation45_spill] sm:$0xff] %v11681_v52  ;;  %5277 = vmatmul.bf16.gmra.mxu0 %v11663_v56  ;;  %v4192_v30 = vadd.f32 %v13419_v14, %v13418_v62  ;;  %v13430_v44 = vld [vmem:[#allocation155_spill] sm:$0xff] }
 0x885   :  { %13411 = vst [vmem:[#allocation124_spill] sm:$0xff] %v11684_v36  ;;  %v4195_v14 = vadd.f32 %v13430_v44, %v13429_v49  ;;  %v6934_v49 = vld [vmem:[#allocation5 + $0xac] sm:$0xf]  ;;  %v13439_v44 = vld [vmem:[#allocation158_spill] sm:$0xff] }
 0x888   :  { %v4760_v51 = vpop.f32.mrf.mxu1 }
 0x889   :  { %v4721_v55 = vpop.f32.mrf.mxu0  ;;  %v11693_v15 = vadd.f32 %v4760_v51, %v4153_v34  ;;  %v4838_v36 = vpop.f32.mrf.mxu3  ;;  %v13424_v34 = vld [vmem:[#allocation113_spill] sm:$0xff] }
 0x88a   :  { %v11697_v52 = vadd.f32 %v4721_v55, %v4114_v4  ;;  %v11699_v57 = vadd.f32 %v4838_v36, %v4231_v10  ;;  %v4799_v19 = vpop.f32.mrf.mxu2  ;;  %v13425_v51 = vld [vmem:[#allocation153_spill] sm:$0xff]  ;;  %v13427_v55 = vld [vmem:[#allocation154_spill] sm:$0xff] }
 0x88b   :  { %13417 = vst [vmem:[#allocation60_spill] sm:$0xff] %v11693_v15  ;;  %v11703_v1 = vadd.f32 %v4799_v19, %v4192_v30  ;;  %v4117_v21 = vadd.f32 %v13425_v51, %v13424_v34  ;;  %v4234_v36 = vadd.f32 %v13427_v55, %v13426_v12  ;;  %v13434_v51 = vld [vmem:[#allocation115_spill] sm:$0xff]  ;;  %v13435_v12 = vld [vmem:[#allocation156_spill] sm:$0xff] }
 0x88c   :  { %13420 = vst [vmem:[#allocation125_spill] sm:$0xff] %v11699_v57  ;;  %v4158_v55 = vadd.f32 %v13435_v12, %v13434_v51 }
 0x88d   :  { %13421 = vst [vmem:[#allocation14_spill] sm:$0xff] %v11703_v1 }
 0x88e   :  { %5399 = vmatmul.bf16.gmra.mxu3 %v11701_v3 }
 0x88f   :  { %5360 = vmatmul.bf16.gmra.mxu2 %v11701_v3 }
 0x890   :  { %v4763_v4 = vpop.f32.mrf.mxu1 }
 0x891   :  { %v4724_v10 = vpop.f32.mrf.mxu0  ;;  %v11713_v62 = vadd.f32 %v4763_v4, %v4156_v46  ;;  %v4841_v59 = vpop.f32.mrf.mxu3  ;;  %v13436_v46 = vld [vmem:[#allocation117_spill] sm:$0xff] }
 0x892   :  { %v11717_v30 = vadd.f32 %v4724_v10, %v4117_v21  ;;  %v11719_v19 = vadd.f32 %v4841_v59, %v4234_v36  ;;  %v4802_v11 = vpop.f32.mrf.mxu2  ;;  %v13437_v4 = vld [vmem:[#allocation157_spill] sm:$0xff]  ;;  %v13438_v10 = vld [vmem:[#allocation116_spill] sm:$0xff] }
 0x893   :  { %13428 = vst [vmem:[#allocation127_spill] sm:$0xff] %v11713_v62  ;;  %5321 = vmatmul.bf16.gmra.mxu1 %v11701_v3  ;;  %v11722_v34 = vadd.f32 %v4802_v11, %v4195_v14  ;;  %v4119_v57 = vadd.f32 %v13437_v4, %v13436_v46  ;;  %v7025_v21 = vld [vmem:[#allocation5 + $0xb8] sm:$0xf0]  ;;  %v4236_v36 = vadd.f32 %v13439_v44, %v13438_v10  ;;  %v13440_v62 = vld [vmem:[#allocation22_spill] sm:$0xff]  ;;  %v13441_v14 = vld [vmem:[#allocation159_spill] sm:$0xff] }
 0x894   :  { %13431 = vst [vmem:[#allocation16_spill] sm:$0xff] %v11717_v30  ;;  %5282 = vmatmul.bf16.gmra.mxu0 %v11701_v3  ;;  %v4197_v11 = vadd.f32 %v13441_v14, %v13440_v62  ;;  %v11739_v12 = vor.u32 %v7025_v21, %v6934_v49  ;;  %v13444_v4 = vld [vmem:[#allocation47_spill] sm:$0xff]  ;;  %v13448_v62 = vld [vmem:[#allocation118_spill] sm:$0xff] }
 0x895   :  { %13432 = vst [vmem:[#allocation126_spill] sm:$0xff] %v11719_v19  ;;  %v4161_v15 = vadd.f32 %v13445_v43, %v13444_v4  ;;  %v13449_v44 = vld [vmem:[#allocation162_spill] sm:$0xff]  ;;  %v13451_v49 = vld [vmem:[#allocation19_spill] sm:$0xff] }
 0x896   :  { %13433 = vst [vmem:[#allocation51_spill] sm:$0xff] %v11722_v34  ;;  %v13452_v21 = vld [vmem:[#allocation163_spill] sm:$0xff] }
 0x897   :  { %v4200_v14 = vadd.f32 %v13452_v21, %v13451_v49  ;;  %v13460_v49 = vld [vmem:[#allocation119_spill] sm:$0xff] }
 0x898   :  { %v4765_v1 = vpop.f32.mrf.mxu1 }
 0x899   :  { %v4726_v59 = vpop.f32.mrf.mxu0  ;;  %v11731_v19 = vadd.f32 %v4765_v1, %v4158_v55  ;;  %v4843_v30 = vpop.f32.mrf.mxu3  ;;  %v13446_v1 = vld [vmem:[#allocation26_spill] sm:$0xff]  ;;  %v13447_v55 = vld [vmem:[#allocation161_spill] sm:$0xff] }
 0x89a   :  { %v11735_v34 = vadd.f32 %v4726_v59, %v4119_v57  ;;  %v11737_v54 = vadd.f32 %v4843_v30, %v4236_v36  ;;  %v4804_v51 = vpop.f32.mrf.mxu2  ;;  %v4122_v10 = vadd.f32 %v13447_v55, %v13446_v1  ;;  %v4239_v30 = vadd.f32 %v13449_v44, %v13448_v62  ;;  %v13456_v55 = vld [vmem:[#allocation42_spill] sm:$0xff]  ;;  %v13457_v62 = vld [vmem:[#allocation164_spill] sm:$0xff] }
 0x89b   :  { %v11741_v46 = vadd.f32 %v4804_v51, %v4197_v11  ;;  %v4163_v44 = vadd.f32 %v13457_v62, %v13456_v55  ;;  %v13465_v62 = vld [vmem:[#allocation34_spill] sm:$0xff] }
 0x89c   :  { %13442 = vst [vmem:[#allocation128_spill] sm:$0xff] %v11737_v54 }
 0x89d   :  { %13443 = vst [vmem:[#allocation83_spill] sm:$0xff] %v11741_v46 }
 0x89e   :  { %5404 = vmatmul.bf16.gmra.mxu3 %v11739_v12 }
 0x89f   :  { %5365 = vmatmul.bf16.gmra.mxu2 %v11739_v12 }
 0x8a0   :  { %v4768_v57 = vpop.f32.mrf.mxu1 }
 0x8a1   :  { %v4729_v36 = vpop.f32.mrf.mxu0  ;;  %v11751_v59 = vadd.f32 %v4768_v57, %v4161_v15  ;;  %v4846_v43 = vpop.f32.mrf.mxu3  ;;  %v13458_v15 = vld [vmem:[#allocation82_spill] sm:$0xff]  ;;  %v13459_v57 = vld [vmem:[#allocation165_spill] sm:$0xff] }
 0x8a2   :  { %v11755_v11 = vadd.f32 %v4729_v36, %v4122_v10  ;;  %v11757_v51 = vadd.f32 %v4846_v43, %v4239_v30  ;;  %v4807_v4 = vpop.f32.mrf.mxu2  ;;  %v4124_v54 = vadd.f32 %v13459_v57, %v13458_v15  ;;  %v13461_v10 = vld [vmem:[#allocation166_spill] sm:$0xff]  ;;  %v13462_v43 = vld [vmem:[#allocation120_spill] sm:$0xff]  ;;  %v4166_v15 = vadd.f32 %v11314_v27, %v13465_v62 }
 0x8a3   :  { %13450 = vst [vmem:[#allocation129_spill] sm:$0xff] %v11751_v59  ;;  %5326 = vmatmul.bf16.gmra.mxu1 %v11739_v12  ;;  %v11760_v1 = vadd.f32 %v4807_v4, %v4200_v14  ;;  %v4241_v36 = vadd.f32 %v13461_v10, %v13460_v49  ;;  %v13466_v57 = vld [vmem:[#allocation68_spill] sm:$0xff] }
 0x8a4   :  { %13453 = vst [vmem:[#allocation54_spill] sm:$0xff] %v11755_v11  ;;  %5287 = vmatmul.bf16.gmra.mxu0 %v11739_v12 }
 0x8a5   :  { %13454 = vst [vmem:[#allocation130_spill] sm:$0xff] %v11757_v51  ;;  %v13463_v51 = vld [vmem:[#allocation167_spill] sm:$0xff] }
 0x8a6   :  { %13455 = vst [vmem:[#allocation78_spill] sm:$0xff] %v11760_v1  ;;  %v4202_v59 = vadd.f32 %v13463_v51, %v13462_v43  ;;  %v13467_v51 = vld [vmem:[#allocation121_spill] sm:$0xff] }
 0x8a8   :  { %v4770_v46 = vpop.f32.mrf.mxu1 }
 0x8a9   :  { %v4731_v21 = vpop.f32.mrf.mxu0  ;;  %v11769_v30 = vadd.f32 %v4770_v46, %v4163_v44  ;;  %v4848_v4 = vpop.f32.mrf.mxu3  ;;  %v4127_v46 = vadd.f32 %v11316_v37, %v13466_v57  ;;  %v13471_v57 = vld [vmem:[#allocation62_spill] sm:$0xff] }
 0x8aa   :  { %v11773_v14 = vadd.f32 %v4731_v21, %v4124_v54  ;;  %v11775_v1 = vadd.f32 %v4848_v4, %v4241_v36  ;;  %v4809_v11 = vpop.f32.mrf.mxu2  ;;  %v13468_v54 = vld [vmem:[#allocation168_spill] sm:$0xff]  ;;  %v13469_v21 = vld [vmem:[#allocation43_spill] sm:$0xff] }
 0x8ab   :  { %v11777_v55 = vadd.f32 %v4809_v11, %v4202_v59  ;;  %v4244_v49 = vadd.f32 %v13468_v54, %v13467_v51  ;;  %v13470_v59 = vld [vmem:[#allocation169_spill] sm:$0xff]  ;;  %v4168_v51 = vadd.f32 %v11332_v58, %v13471_v57  ;;  %v13476_v57 = vld [vmem:[#allocation30_spill] sm:$0xff] }
 0x8ac   :  { %13464 = vst [vmem:[#allocation131_spill] sm:$0xff] %v11775_v1  ;;  %v4205_v11 = vadd.f32 %v13470_v59, %v13469_v21  ;;  %v13473_v21 = vld [vmem:[#allocation122_spill] sm:$0xff]  ;;  %v13474_v59 = vld [vmem:[#allocation24_spill] sm:$0xff] }
 0x8ae   :  { %5535 = vmatmul.bf16.vlgmr.msrb.gmra.mxu3 %v11549_v8 }
 0x8af   :  { %5496 = vmatmul.bf16.vlgmr.msrb.gmra.mxu2 %v11549_v8 }
 0x8b0   :  { %v4773_v44 = vpop.f32.mrf.mxu1 }
 0x8b1   :  { %v4734_v10 = vpop.f32.mrf.mxu0  ;;  %v11787_v36 = vadd.f32 %v4773_v44, %v4166_v15  ;;  %v4851_v27 = vpop.f32.mrf.mxu3  ;;  %v13472_v15 = vld [vmem:[#allocation40_spill] sm:$0xff] }
 0x8b2   :  { %v11791_v43 = vadd.f32 %v4734_v10, %v4127_v46  ;;  %v11793_v4 = vadd.f32 %v4851_v27, %v4244_v49  ;;  %v4812_v62 = vpop.f32.mrf.mxu2  ;;  %v4129_v44 = vadd.f32 %v11335_v13, %v13472_v15  ;;  %v4246_v46 = vadd.f32 %v11337_v42, %v13473_v21  ;;  %v13477_v42 = vld [vmem:[#allocation86_spill] sm:$0xff] }
 0x8b3   :  { %5457 = vmatmul.bf16.vlgmr.msrb.gmra.mxu1 %v11549_v8  ;;  %v11796_v37 = vadd.f32 %v4812_v62, %v4205_v11  ;;  %v4207_v27 = vadd.f32 %v11339_v5, %v13474_v59  ;;  %v4171_v13 = vadd.f32 %v11355_v45, %v13476_v57  ;;  %v13478_v5 = vld [vmem:[#allocation123_spill] sm:$0xff]  ;;  %v13482_v57 = vld [vmem:[#allocation38_spill] sm:$0xff] }
 0x8b4   :  { %5418 = vmatmul.bf16.vlgmr.msrb.gmra.mxu0 %v11549_v8 }
 0x8b8   :  { %v4775_v54 = vpop.f32.mrf.mxu1 }
 0x8b9   :  { %v4736_v10 = vpop.f32.mrf.mxu0  ;;  %v11805_v49 = vadd.f32 %v4775_v54, %v4168_v51  ;;  %v4853_v62 = vpop.f32.mrf.mxu3  ;;  %v4132_v51 = vadd.f32 %v11358_v32, %v13477_v42 }
 0x8ba   :  { %v11809_v11 = vadd.f32 %v4736_v10, %v4129_v44  ;;  %v11811_v8 = vadd.f32 %v4853_v62, %v4246_v46  ;;  %v4814_v1 = vpop.f32.mrf.mxu2  ;;  %v4249_v44 = vadd.f32 %v11360_v53, %v13478_v5  ;;  %v13479_v46 = vld [vmem:[#allocation69_spill] sm:$0xff]  ;;  %v13481_v62 = vld [vmem:[#allocation46_spill] sm:$0xff] }
 0x8bb   :  { %v11813_v58 = vadd.f32 %v4814_v1, %v4207_v27  ;;  %v4210_v1 = vadd.f32 %v11363_v48, %v13479_v46  ;;  %v4173_v53 = vadd.f32 %v11380_v63, %v13481_v62  ;;  %v13483_v48 = vld [vmem:[#allocation72_spill] sm:$0xff]  ;;  %v11854_v62 = vpop.permute.xlu2 %5676 }
 0x8bc   :  { %13475 = vst [vmem:[#allocation57_spill] sm:$0xff] %v11811_v8 }
 0x8be   :  { %5540 = vmatmul.bf16.gmra.mxu3 %v11587_v22 }
 0x8bf   :  { %5501 = vmatmul.bf16.gmra.mxu2 %v11587_v22 }
 0x8c0   :  { %v4778_v15 = vpop.f32.mrf.mxu1 }
 0x8c1   :  { %v4739_v54 = vpop.f32.mrf.mxu0  ;;  %v11823_v21 = vadd.f32 %v4778_v15, %v4171_v13  ;;  %v4856_v45 = vpop.f32.mrf.mxu3  ;;  %v4134_v13 = vadd.f32 %v11385_v9, %v13482_v57 }
 0x8c2   :  { %v11827_v10 = vadd.f32 %v4739_v54, %v4132_v51  ;;  %v11829_v59 = vadd.f32 %v4856_v45, %v4249_v44  ;;  %v4817_v27 = vpop.f32.mrf.mxu2  ;;  %v4251_v51 = vadd.f32 %v11387_v25, %v13483_v48  ;;  %v13484_v44 = vld [vmem:[#allocation31_spill] sm:$0xff] }
 0x8c3   :  { %5462 = vmatmul.bf16.gmra.mxu1 %v11587_v22  ;;  %v11832_v32 = vadd.f32 %v4817_v27, %v4210_v1  ;;  %v4212_v54 = vadd.f32 %v11389_v35, %v13484_v44 }
 0x8c4   :  { %13480 = vst [vmem:[#allocation132_spill] sm:$0xff] %v11829_v59  ;;  %5423 = vmatmul.bf16.gmra.mxu0 %v11587_v22 }
 0x8c8   :  { %v4780_v42 = vpop.f32.mrf.mxu1 }
 0x8c9   :  { %v4741_v15 = vpop.f32.mrf.mxu0  ;;  %v11841_v5 = vadd.f32 %v4780_v42, %v4173_v53  ;;  %v4858_v1 = vpop.f32.mrf.mxu3 }
 0x8ca   :  { %v11845_v46 = vadd.f32 %v4741_v15, %v4134_v13  ;;  %v11847_v22 = vadd.f32 %v4858_v1, %v4251_v51  ;;  %v4819_v45 = vpop.f32.mrf.mxu2 }
 0x8cb   :  { %v11849_v63 = vadd.f32 %v4819_v45, %v4212_v54  ;;  %v11864_v54 = vpop.permute.xlu0 %5681 }
 0x8cc   :  { %13485 = vst [vmem:[#allocation11_spill] sm:$0xff] %v11847_v22  ;;  %v13499_v22 = vld [vmem:[#allocation59_spill] sm:$0xff] }
 0x8ce   :  { %5545 = vmatmul.bf16.gmra.mxu3 %v11625_v41 }
 0x8cf   :  { %5506 = vmatmul.bf16.gmra.mxu2 %v11625_v41 }
 0x8d0   :  { %v5302_v9 = vpop.f32.mrf.mxu1 }
 0x8d1   :  { %v5263_v25 = vpop.f32.mrf.mxu0  ;;  %v5567_v27 = vadd.f32 %v5302_v9, %v11415_v6 }
 0x8d2   :  { %v5566_v35 = vadd.f32 %v5263_v25, %v11419_v60  ;;  %v5341_v51 = vpop.f32.mrf.mxu2 }
 0x8d3   :  { %v5735_v53 = vadd.f32 %v11854_v62, %v5567_v27  ;;  %5467 = vmatmul.bf16.gmra.mxu1 %v11625_v41 }
 0x8d4   :  { %v5734_v57 = vadd.f32 %v11854_v62, %v5566_v35  ;;  %5428 = vmatmul.bf16.gmra.mxu0 %v11625_v41 }
 0x8d5   :  { %v5831_v13 = vmax.f32 %v5735_v53, 0.0 }
 0x8d6   :  { %v5830_v42 = vmax.f32 %v5734_v57, 0.0  ;;  %v11874_v57 = vpop.permute.xlu1 %5686 }
 0x8d7   :  { %v5963_v48 = vsel %vm5926_vm8, %v5831_v13, -inf }
 0x8d8   :  { %5964 = vmax.xlane.f32.xlu1 %v5963_v48  ;;  %v5304_v6 = vpop.f32.mrf.mxu1  ;;  %v5927_v15 = vsel %vm5926_vm8, %v5830_v42, -inf }
 0x8d9   :  { %v5575_v60 = vadd.f32 %v5304_v6, %v11433_v40  ;;  %5928 = vmax.xlane.f32.xlu2 %v5927_v15  ;;  %v5265_v44 = vpop.f32.mrf.mxu0 }
 0x8da   :  { %v5574_v1 = vadd.f32 %v5265_v44, %v11437_v7  ;;  %v5343_v13 = vpop.f32.mrf.mxu2 }
 0x8db   :  { %v5743_v41 = vadd.f32 %v11864_v54, %v5575_v60 }
 0x8dc   :  { %v5742_v45 = vadd.f32 %v11864_v54, %v5574_v1 }
 0x8dd   :  { %v5839_v9 = vmax.f32 %v5743_v41, 0.0 }
 0x8de   :  { %v5838_v25 = vmax.f32 %v5742_v45, 0.0  ;;  %5550 = vmatmul.bf16.gmra.mxu3 %v11663_v56 }
 0x8df   :  { %v5966_v27 = vsel %vm5926_vm8, %v5839_v9, -inf  ;;  %5511 = vmatmul.bf16.gmra.mxu2 %v11663_v56 }
 0x8e0   :  { %v5307_v35 = vpop.f32.mrf.mxu1  ;;  %v5930_v40 = vsel %vm5926_vm8, %v5838_v25, -inf }
 0x8e1   :  { %v5583_v53 = vadd.f32 %v5307_v35, %v11451_v31  ;;  %5967 = vmax.xlane.f32.xlu2 %v5966_v27  ;;  %5931 = vmax.xlane.f32.xlu0 %v5930_v40  ;;  %v5268_v7 = vpop.f32.mrf.mxu0 }
 0x8e2   :  { %v5582_v42 = vadd.f32 %v5268_v7, %v11455_v47  ;;  %v11884_v47 = vpop.permute.xlu2 %5691  ;;  %v11889_v27 = vpop.f32.mrf.mxu2 }
 0x8e3   :  { %v5751_v48 = vadd.f32 %v11874_v57, %v5583_v53  ;;  %5472 = vmatmul.bf16.gmra.mxu1 %v11663_v56 }
 0x8e4   :  { %v5750_v6 = vadd.f32 %v11874_v57, %v5582_v42  ;;  %5433 = vmatmul.bf16.gmra.mxu0 %v11663_v56  ;;  %v5568_v56 = vadd.f32 %v5341_v51, %v11424_v61 }
 0x8e5   :  { %v5847_v15 = vmax.f32 %v5751_v48, 0.0  ;;  %v5380_v48 = vpop.f32.mrf.mxu3 }
 0x8e6   :  { %v5846_v60 = vmax.f32 %v5750_v6, 0.0  ;;  %v5736_v7 = vadd.f32 %v11854_v62, %v5568_v56  ;;  %v11898_v6 = vpop.permute.xlu0 %5696 }
 0x8e7   :  { %v5969_v31 = vsel %vm5926_vm8, %v5847_v15, -inf  ;;  %v5569_v15 = vadd.f32 %v5380_v48, %v11421_v33 }
 0x8e8   :  { %v5309_v44 = vpop.f32.mrf.mxu1  ;;  %v5933_v1 = vsel %vm5926_vm8, %v5846_v60, -inf  ;;  %v5832_v60 = vmax.f32 %v5736_v7, 0.0 }
 0x8e9   :  { %v5270_v41 = vpop.f32.mrf.mxu0  ;;  %v5591_v45 = vadd.f32 %v5309_v44, %v11469_v26  ;;  %5970 = vmax.xlane.f32.xlu0 %v5969_v31  ;;  %5934 = vmax.xlane.f32.xlu1 %v5933_v1  ;;  %v13486_v31 = vld [vmem:[#allocation85_spill] sm:$0xff] }
 0x8ea   :  { %v5590_v9 = vadd.f32 %v5270_v41, %v11473_v29  ;;  %v5348_v41 = vpop.f32.mrf.mxu2 }
 0x8eb   :  { %v5759_v25 = vadd.f32 %v11884_v47, %v5591_v45 }
 0x8ec   :  { %v5758_v35 = vadd.f32 %v11884_v47, %v5590_v9  ;;  %v5737_v9 = vadd.f32 %v11854_v62, %v5569_v15 }
 0x8ed   :  { %v5855_v40 = vmax.f32 %v5759_v25, 0.0  ;;  %v5382_v7 = vpop.f32.mrf.mxu3 }
 0x8ee   :  { %v5854_v53 = vmax.f32 %v5758_v35, 0.0  ;;  %5555 = vmatmul.bf16.gmra.mxu3 %v11701_v3  ;;  %v5999_v35 = vsel %vm5926_vm8, %v5832_v60, -inf }
 0x8ef   :  { %v5972_v26 = vsel %vm5926_vm8, %v5855_v40, -inf  ;;  %5516 = vmatmul.bf16.gmra.mxu2 %v11701_v3  ;;  %v13487_v40 = vld [vmem:[#allocation84_spill] sm:$0xff] }
 0x8f0   :  { %v5312_v42 = vpop.f32.mrf.mxu1  ;;  %v5936_v29 = vsel %vm5926_vm8, %v5854_v53, -inf }
 0x8f1   :  { %5937 = vmax.xlane.f32.xlu2 %v5936_v29  ;;  %v5273_v61 = vpop.f32.mrf.mxu0  ;;  %5973 = vmax.xlane.f32.xlu1 %v5972_v26  ;;  %v5599_v44 = vadd.f32 %v5312_v42, %v13486_v31  ;;  %v11910_v26 = vpop.permute.xlu1 %5701  ;;  %v13488_v42 = vld [vmem:[#allocation20_spill] sm:$0xff] }
 0x8f2   :  { %v5598_v51 = vadd.f32 %v5273_v61, %v11491_v18  ;;  %v5576_v29 = vadd.f32 %v5343_v13, %v13488_v42 }
 0x8f3   :  { %5477 = vmatmul.bf16.gmra.mxu1 %v11701_v3  ;;  %v5767_v25 = vadd.f32 %v11898_v6, %v5599_v44  ;;  %v11917_v44 = vpop.f32.mrf.mxu2 }
 0x8f4   :  { %v5766_v1 = vadd.f32 %v11898_v6, %v5598_v51  ;;  %5438 = vmatmul.bf16.gmra.mxu0 %v11701_v3  ;;  %v5833_v3 = vmax.f32 %v5737_v9, 0.0  ;;  %v13489_v51 = vld [vmem:[#allocation48_spill] sm:$0xff]  ;;  %v5744_v60 = vadd.f32 %v11864_v54, %v5576_v29  ;;  %v13492_v29 = vld [vmem:[#allocation74_spill] sm:$0xff] }
 0x8f5   :  { %v5863_v48 = vmax.f32 %v5767_v25, 0.0 }
 0x8f6   :  { %v5862_v45 = vmax.f32 %v5766_v1, 0.0  ;;  %v5840_v42 = vmax.f32 %v5744_v60, 0.0 }
 0x8f7   :  { %v5975_v1 = vsel %vm5926_vm8, %v5863_v48, -inf }
 0x8f8   :  { %v5314_v18 = vpop.f32.mrf.mxu1  ;;  %v5939_v56 = vsel %vm5926_vm8, %v5862_v45, -inf  ;;  %v6035_v45 = vsel %vm5926_vm8, %v5833_v3, -inf }
 0x8f9   :  { %5940 = vmax.xlane.f32.xlu2 %v5939_v56  ;;  %v5275_v33 = vpop.f32.mrf.mxu0  ;;  %6000 = vmax.xlane.f32.xlu1 %v5999_v35  ;;  %v5607_v15 = vadd.f32 %v5314_v18, %v13489_v51  ;;  %v13490_v56 = vld [vmem:[#allocation70_spill] sm:$0xff]  ;;  %v13493_v51 = vld [vmem:[#allocation63_spill] sm:$0xff] }
 0x8fa   :  { %v5606_v53 = vadd.f32 %v5275_v33, %v13487_v40  ;;  %v11925_v33 = vpop.permute.xlu2 %5706  ;;  %v13491_v40 = vld [vmem:[#allocation65_spill] sm:$0xff] }
 0x8fb   :  { %v5775_v9 = vadd.f32 %v11910_v26, %v5607_v15  ;;  %v5584_v15 = vadd.f32 %v11889_v27, %v13493_v51 }
 0x8fc   :  { %v5774_v61 = vadd.f32 %v11910_v26, %v5606_v53  ;;  %v5577_v53 = vadd.f32 %v5382_v7, %v13491_v40 }
 0x8fd   :  { %v5752_v60 = vadd.f32 %v11874_v57, %v5584_v15 }
 0x8fe   :  { %v5870_v31 = vmax.f32 %v5774_v61, 0.0  ;;  %5560 = vmatmul.bf16.gmra.mxu3 %v11739_v12  ;;  %v5385_v61 = vpop.f32.mrf.mxu3 }
 0x8ff   :  { %5521 = vmatmul.bf16.gmra.mxu2 %v11739_v12 }
 0x900   :  { %v5942_v13 = vsel %vm5926_vm8, %v5870_v31, -inf  ;;  %v5317_v25 = vpop.f32.mrf.mxu1  ;;  %v5871_v31 = vmax.f32 %v5775_v9, 0.0  ;;  %v13494_v9 = vld [vmem:[#allocation28_spill] sm:$0xff] }
 0x901   :  { %5976 = vmax.xlane.f32.xlu2 %v5975_v1  ;;  %v5278_v18 = vpop.f32.mrf.mxu0  ;;  %6036 = vmax.xlane.f32.xlu1 %v6035_v45  ;;  %v5615_v3 = vadd.f32 %v5317_v25, %v13492_v29  ;;  %v5745_v45 = vadd.f32 %v11864_v54, %v5577_v53  ;;  %v13495_v53 = vld [vmem:[#allocation21_spill] sm:$0xff] }
 0x902   :  { %v5614_v35 = vadd.f32 %v5278_v18, %v13490_v56  ;;  %5943 = vmax.xlane.f32.xlu0 %v5942_v13  ;;  %v6002_v18 = vsel %vm5926_vm8, %v5840_v42, -inf  ;;  %v11940_v56 = vpop.f32.mrf.mxu2 }
 0x903   :  { %5482 = vmatmul.bf16.gmra.mxu1 %v11739_v12  ;;  %v5783_v13 = vadd.f32 %v11925_v33, %v5615_v3  ;;  %v5841_v27 = vmax.f32 %v5745_v45, 0.0  ;;  %v13496_v3 = vld [vmem:[#allocation49_spill] sm:$0xff] }
 0x904   :  { %v5782_v48 = vadd.f32 %v11925_v33, %v5614_v35  ;;  %5443 = vmatmul.bf16.gmra.mxu0 %v11739_v12  ;;  %v5978_v12 = vsel %vm5926_vm8, %v5871_v31, -inf  ;;  %v5592_v35 = vadd.f32 %v5348_v41, %v13494_v9  ;;  %v5585_v42 = vadd.f32 %v5385_v61, %v13496_v3  ;;  %v13498_v9 = vld [vmem:[#allocation61_spill] sm:$0xff] }
 0x905   :  { %v5879_v40 = vmax.f32 %v5783_v13, 0.0 }
 0x906   :  { %v5878_v1 = vmax.f32 %v5782_v48, 0.0  ;;  %v5848_v48 = vmax.f32 %v5752_v60, 0.0  ;;  %v5387_v15 = vpop.f32.mrf.mxu3  ;;  %v5753_v41 = vadd.f32 %v11874_v57, %v5585_v42  ;;  %v13497_v60 = vld [vmem:[#allocation35_spill] sm:$0xff] }
 0x907   :  { %v5981_v45 = vsel %vm5926_vm8, %v5879_v40, -inf  ;;  %v11956_v40 = vpop.permute.xlu1 %5716 }
 0x908   :  { %v5945_v7 = vsel %vm5926_vm8, %v5878_v1, -inf  ;;  %v5319_v51 = vpop.f32.mrf.mxu1  ;;  %v11945_v1 = vpop.permute.xlu0 %5711  ;;  %v6005_v61 = vsel %vm5926_vm8, %v5848_v48, -inf  ;;  %v5849_v3 = vmax.f32 %v5753_v41, 0.0  ;;  %v13500_v41 = vld [vmem:[#allocation67_spill] sm:$0xff] }
 0x909   :  { %6003 = vmax.xlane.f32.xlu2 %v6002_v18  ;;  %v5280_v25 = vpop.f32.mrf.mxu0  ;;  %5946 = vmax.xlane.f32.xlu1 %v5945_v7  ;;  %v5760_v18 = vadd.f32 %v11884_v47, %v5592_v35  ;;  %v6038_v7 = vsel %vm5926_vm8, %v5841_v27, -inf }
 0x90a   :  { %5979 = vmax.xlane.f32.xlu0 %v5978_v12  ;;  %v5622_v29 = vadd.f32 %v5280_v25, %v13495_v53  ;;  %v5593_v25 = vadd.f32 %v5387_v15, %v13497_v60  ;;  %v5623_v53 = vadd.f32 %v5319_v51, %v13498_v9 }
 0x90b   :  { %v5856_v12 = vmax.f32 %v5760_v18, 0.0 }
 0x90c   :  { %v5790_v31 = vadd.f32 %v11945_v1, %v5622_v29  ;;  %v5356_v29 = vpop.f32.mrf.mxu2  ;;  %v5761_v42 = vadd.f32 %v11884_v47, %v5593_v25  ;;  %v13501_v25 = vld [vmem:[#allocation13_spill] sm:$0xff] }
 0x90e   :  { %v5886_v35 = vmax.f32 %v5790_v31, 0.0  ;;  %v5390_v15 = vpop.f32.mrf.mxu3  ;;  %v6041_v31 = vsel %vm5926_vm8, %v5849_v3, -inf }
 0x910   :  { %v5322_v59 = vpop.f32.mrf.mxu1  ;;  %v5948_v48 = vsel %vm5926_vm8, %v5886_v35, -inf }
 0x911   :  { %6039 = vmax.xlane.f32.xlu2 %v6038_v7  ;;  %v5283_v13 = vpop.f32.mrf.mxu0  ;;  %5982 = vmax.xlane.f32.xlu1 %v5981_v45  ;;  %v5791_v7 = vadd.f32 %v11945_v1, %v5623_v53  ;;  %v6008_v45 = vsel %vm5926_vm8, %v5856_v12, -inf  ;;  %v5631_v9 = vadd.f32 %v5322_v59, %v13501_v25  ;;  %v11968_v12 = vpop.permute.xlu2 %5721 }
 0x912   :  { %6006 = vmax.xlane.f32.xlu0 %v6005_v61  ;;  %v5630_v27 = vadd.f32 %v5283_v13, %v13499_v22  ;;  %v5857_v22 = vmax.f32 %v5761_v42, 0.0  ;;  %v5600_v13 = vadd.f32 %v11917_v44, %v13500_v41 }
 0x913   :  { %v5887_v61 = vmax.f32 %v5791_v7, 0.0  ;;  %v5799_v44 = vadd.f32 %v11956_v40, %v5631_v9 }
 0x914   :  { %v5798_v18 = vadd.f32 %v11956_v40, %v5630_v27  ;;  %v11970_v35 = vpop.f32.mrf.mxu2  ;;  %v5768_v27 = vadd.f32 %v11898_v6, %v5600_v13  ;;  %v6044_v42 = vsel %vm5926_vm8, %v5857_v22, -inf  ;;  %v13503_v13 = vld [vmem:[#allocation58_spill] sm:$0xff] }
 0x915   :  { %v5984_v3 = vsel %vm5926_vm8, %v5887_v61, -inf  ;;  %v5608_v61 = vadd.f32 %v11940_v56, %v13503_v13 }
 0x916   :  { %v5894_v53 = vmax.f32 %v5798_v18, 0.0  ;;  %v5392_v59 = vpop.f32.mrf.mxu3 }
 0x918   :  { %v5324_v7 = vpop.f32.mrf.mxu1 }
 0x919   :  { %5949 = vmax.xlane.f32.xlu2 %v5948_v48  ;;  %v5285_v51 = vpop.f32.mrf.mxu0  ;;  %6009 = vmax.xlane.f32.xlu1 %v6008_v45  ;;  %v13502_v45 = vld [vmem:[#allocation81_spill] sm:$0xff] }
 0x91a   :  { %6042 = vmax.xlane.f32.xlu0 %v6041_v31  ;;  %v5638_v60 = vadd.f32 %v5285_v51, %v11583_v39  ;;  %v5951_v39 = vsel %vm5926_vm8, %v5894_v53, -inf  ;;  %v5601_v18 = vadd.f32 %v5390_v15, %v13502_v45  ;;  %v5864_v51 = vmax.f32 %v5768_v27, 0.0  ;;  %v13504_v27 = vld [vmem:[#allocation87_spill] sm:$0xff] }
 0x91b   :  { %v5639_v31 = vadd.f32 %v5324_v7, %v11579_v28 }
 0x91c   :  { %v5806_v48 = vadd.f32 %v11968_v12, %v5638_v60  ;;  %v5895_v60 = vmax.f32 %v5799_v44, 0.0  ;;  %v5769_v25 = vadd.f32 %v11898_v6, %v5601_v18  ;;  %v11987_v15 = vpop.f32.mrf.mxu2 }
 0x91d   :  { %v5807_v9 = vadd.f32 %v11968_v12, %v5639_v31 }
 0x91e   :  { %v5902_v41 = vmax.f32 %v5806_v48, 0.0  ;;  %v5987_v28 = vsel %vm5926_vm8, %v5895_v60, -inf  ;;  %v5865_v56 = vmax.f32 %v5769_v25, 0.0  ;;  %v5616_v48 = vadd.f32 %v5356_v29, %v13504_v27 }
 0x91f   :  { %v5903_v44 = vmax.f32 %v5807_v9, 0.0 }
 0x920   :  { %v5954_v53 = vsel %vm5926_vm8, %v5902_v41, -inf  ;;  %v5327_v31 = vpop.f32.mrf.mxu1  ;;  %v11993_v41 = vpop.permute.xlu0 %5726  ;;  %v6047_v60 = vsel %vm5926_vm8, %v5865_v56, -inf }
 0x921   :  { %5985 = vmax.xlane.f32.xlu2 %v5984_v3  ;;  %6045 = vmax.xlane.f32.xlu1 %v6044_v42  ;;  %v5288_v22 = vpop.f32.mrf.mxu0  ;;  %v6011_v3 = vsel %vm5926_vm8, %v5864_v51, -inf  ;;  %v5776_v42 = vadd.f32 %v11910_v26, %v5608_v61  ;;  %v5395_v51 = vpop.f32.mrf.mxu3  ;;  %v5784_v61 = vadd.f32 %v11925_v33, %v5616_v48  ;;  %v5990_v25 = vsel %vm5926_vm8, %v5903_v44, -inf }
 0x922   :  { %5952 = vmax.xlane.f32.xlu0 %v5951_v39  ;;  %v5646_v7 = vadd.f32 %v5288_v22, %v11603_v24  ;;  %v13505_v39 = vld [vmem:[#allocation76_spill] sm:$0xff]  ;;  %v13506_v22 = vld [vmem:[#allocation41_spill] sm:$0xff]  ;;  %v12004_v44 = vpop.permute.xlu1 %5731 }
 0x923   :  { %v5609_v45 = vadd.f32 %v5392_v59, %v13505_v39  ;;  %v5872_v18 = vmax.f32 %v5776_v42, 0.0  ;;  %v5617_v9 = vadd.f32 %v5395_v51, %v13506_v22  ;;  %v13507_v42 = vld [vmem:[#allocation36_spill] sm:$0xff] }
 0x924   :  { %v5363_v59 = vpop.f32.mrf.mxu2 }
 0x925   :  { %v5777_v29 = vadd.f32 %v11910_v26, %v5609_v45  ;;  %v6014_v24 = vsel %vm5926_vm8, %v5872_v18, -inf  ;;  %v5785_v45 = vadd.f32 %v11925_v33, %v5617_v9 }
 0x927   :  { %v5873_v48 = vmax.f32 %v5777_v29, 0.0 }
 0x928   :  { %v5329_v39 = vpop.f32.mrf.mxu1 }
 0x929   :  { %6012 = vmax.xlane.f32.xlu2 %v6011_v3  ;;  %5955 = vmax.xlane.f32.xlu1 %v5954_v53  ;;  %v5290_v13 = vpop.f32.mrf.mxu0  ;;  %v5814_v3 = vadd.f32 %v11993_v41, %v5646_v7  ;;  %v5880_v53 = vmax.f32 %v5784_v61, 0.0  ;;  %v5397_v56 = vpop.f32.mrf.mxu3  ;;  %v5655_v9 = vadd.f32 %v5329_v39, %v11617_v2 }
 0x92a   :  { %5988 = vmax.xlane.f32.xlu0 %v5987_v28  ;;  %v5647_v28 = vadd.f32 %v5327_v31, %v13507_v42  ;;  %v5654_v7 = vadd.f32 %v5290_v13, %v11621_v20  ;;  %v6050_v31 = vsel %vm5926_vm8, %v5873_v48, -inf  ;;  %v5881_v20 = vmax.f32 %v5785_v45, 0.0  ;;  %v13508_v13 = vld [vmem:[#allocation29_spill] sm:$0xff] }
 0x92b   :  { %v5910_v27 = vmax.f32 %v5814_v3, 0.0  ;;  %v5624_v3 = vadd.f32 %v11970_v35, %v13508_v13  ;;  %v5823_v45 = vadd.f32 %v12004_v44, %v5655_v9 }
 0x92c   :  { %v5822_v51 = vadd.f32 %v12004_v44, %v5654_v7  ;;  %v12015_v22 = vpop.f32.mrf.mxu2  ;;  %v6053_v48 = vsel %vm5926_vm8, %v5881_v20, -inf }
 0x92d   :  { %v5957_v18 = vsel %vm5926_vm8, %v5910_v27, -inf  ;;  %v5792_v42 = vadd.f32 %v11945_v1, %v5624_v3 }
 0x92f   :  { %v5888_v39 = vmax.f32 %v5792_v42, 0.0 }
 0x930   :  { %v5458_v35 = vpop.f32.mrf.mxu1 }
 0x931   :  { %6048 = vmax.xlane.f32.xlu2 %v6047_v60  ;;  %5991 = vmax.xlane.f32.xlu1 %v5990_v25  ;;  %v5815_v60 = vadd.f32 %v11993_v41, %v5647_v28  ;;  %v6017_v25 = vsel %vm5926_vm8, %v5880_v53, -inf  ;;  %v5419_v61 = vpop.f32.mrf.mxu0  ;;  %v5918_v53 = vmax.f32 %v5822_v51, 0.0  ;;  %v5400_v7 = vpop.f32.mrf.mxu3  ;;  %v13510_v51 = vld [vmem:[#allocation71_spill] sm:$0xff] }
 0x932   :  { %6015 = vmax.xlane.f32.xlu0 %v6014_v24  ;;  %v5570_v24 = vadd.f32 %v5419_v61, %v11641_v50  ;;  %v5632_v61 = vadd.f32 %v11987_v15, %v13510_v51  ;;  %v13511_v15 = vld [vmem:[#allocation12_spill] sm:$0xff] }
 0x933   :  { %v5911_v29 = vmax.f32 %v5815_v60, 0.0  ;;  %v5960_v50 = vsel %vm5926_vm8, %v5918_v53, -inf  ;;  %v13509_v60 = vld [vmem:[#allocation23_spill] sm:$0xff]  ;;  %v5633_v53 = vadd.f32 %v5400_v7, %v13511_v15 }
 0x934   :  { %v5738_v28 = vadd.f32 %v11854_v62, %v5570_v24  ;;  %v5625_v2 = vadd.f32 %v5397_v56, %v13509_v60  ;;  %v12028_v13 = vpop.f32.mrf.mxu2  ;;  %v6020_v24 = vsel %vm5926_vm8, %v5888_v39, -inf  ;;  %v5800_v56 = vadd.f32 %v11956_v40, %v5632_v61 }
 0x935   :  { %v5993_v27 = vsel %vm5926_vm8, %v5911_v29, -inf }
 0x936   :  { %v5793_v3 = vadd.f32 %v11945_v1, %v5625_v2  ;;  %v5896_v2 = vmax.f32 %v5800_v56, 0.0 }
 0x938   :  { %v5460_v39 = vpop.f32.mrf.mxu1 }
 0x939   :  { %5958 = vmax.xlane.f32.xlu2 %v5957_v18  ;;  %6018 = vmax.xlane.f32.xlu1 %v6017_v25  ;;  %v5571_v18 = vadd.f32 %v5458_v35, %v11637_v17  ;;  %v5834_v25 = vmax.f32 %v5738_v28, 0.0  ;;  %v5421_v20 = vpop.f32.mrf.mxu0  ;;  %v5402_v42 = vpop.f32.mrf.mxu3  ;;  %v13512_v28 = vld [vmem:[#allocation27_spill] sm:$0xff]  ;;  %v5579_v15 = vadd.f32 %v5460_v39, %v11655_v23 }
 0x93a   :  { %6051 = vmax.xlane.f32.xlu0 %v6050_v31  ;;  %v5919_v31 = vmax.f32 %v5823_v45, 0.0  ;;  %v5889_v45 = vmax.f32 %v5793_v3, 0.0 }
 0x93b   :  { %v5739_v29 = vadd.f32 %v11854_v62, %v5571_v18  ;;  %v6071_v9 = vsel %vm5926_vm8, %v5834_v25, -inf  ;;  %v5801_v18 = vadd.f32 %v11956_v40, %v5633_v53 }
 0x93c   :  { %v5996_v17 = vsel %vm5926_vm8, %v5919_v31, -inf  ;;  %v6056_v31 = vsel %vm5926_vm8, %v5889_v45, -inf  ;;  %v12046_v3 = vpop.f32.mrf.mxu2 }
 0x93d   :  { %v5835_v35 = vmax.f32 %v5739_v29, 0.0 }
 0x941   :  { %5994 = vmax.xlane.f32.xlu2 %v5993_v27  ;;  %6054 = vmax.xlane.f32.xlu1 %v6053_v48  ;;  %v5640_v27 = vadd.f32 %v5363_v59, %v13512_v28  ;;  %v6227_v48 = vlaneseq  ;;  %v5424_v51 = vpop.f32.mrf.mxu0  ;;  %v6107_v59 = vsel %vm5926_vm8, %v5835_v35, -inf  ;;  %v5405_v45 = vpop.f32.mrf.mxu3 }
 0x942   :  { %5961 = vmax.xlane.f32.xlu0 %v5960_v50  ;;  %v5578_v50 = vadd.f32 %v5421_v20, %v11659_v0  ;;  %v6023_v0 = vsel %vm5926_vm8, %v5896_v2, -inf  ;;  %v5586_v28 = vadd.f32 %v5424_v51, %v11679_v38  ;;  %v5747_v38 = vadd.f32 %v11864_v54, %v5579_v15 }
 0x943   :  { %v5808_v25 = vadd.f32 %v11968_v12, %v5640_v27  ;;  %v12041_v61 = vand.u32 127, %v6227_v48 }
 0x944   :  { %v5746_v7 = vadd.f32 %v11864_v54, %v5578_v50 }
 0x945   :  { %v12050_v20 = vadd.s32 4294967288, %v12041_v61 }
 0x946   :  { %v5842_v53 = vmax.f32 %v5746_v7, 0.0 }
 0x948   :  { %v6074_v51 = vsel %vm5926_vm8, %v5842_v53, -inf  ;;  %v5843_v53 = vmax.f32 %v5747_v38, 0.0 }
 0x949   :  { %6021 = vmax.xlane.f32.xlu2 %v6020_v24  ;;  %6072 = vmax.xlane.f32.xlu1 %v6071_v9  ;;  %v5897_v24 = vmax.f32 %v5801_v18, 0.0  ;;  %v13513_v9 = vld [vmem:[#allocation39_spill] sm:$0xff] }
 0x94a   :  { %5997 = vmax.xlane.f32.xlu0 %v5996_v17  ;;  %v5641_v56 = vadd.f32 %v5402_v42, %v13513_v9  ;;  %v5904_v17 = vmax.f32 %v5808_v25, 0.0  ;;  %v5463_v25 = vpop.f32.mrf.mxu1  ;;  %v12070_v9 = vpop.f32.mrf.mxu2 }
 0x94b   :  { %v5965_v29 = vpop.xlane.xlu1 %5964 }
 0x94c   :  { %v5929_v60 = vpop.xlane.xlu2 %5928  ;;  %v6287_v50 = vperm.slane %v5965_v29, %v12041_v61  ;;  %v5809_v42 = vadd.f32 %v11968_v12, %v5641_v56  ;;  %v6026_v7 = vsel %vm5926_vm8, %v5904_v17, -inf  ;;  %v13514_v56 = vld [vmem:[#allocation33_spill] sm:$0xff] }
 0x94d   :  { %v6229_v35 = vperm.slane %v5929_v60, %v12041_v61  ;;  %v5754_v60 = vadd.f32 %v11874_v57, %v5586_v28  ;;  %v5648_v15 = vadd.f32 %v12015_v22, %v13514_v56 }
 0x94e   :  { %v5905_v29 = vmax.f32 %v5809_v42, 0.0 }
 0x94f   :  { %v5816_v22 = vadd.f32 %v11993_v41, %v5648_v15 }
 0x951   :  { %6057 = vmax.xlane.f32.xlu2 %v6056_v31  ;;  %6108 = vmax.xlane.f32.xlu1 %v6107_v59  ;;  %v5426_v31 = vpop.f32.mrf.mxu0  ;;  %v6059_v59 = vsel %vm5926_vm8, %v5897_v24, -inf }
 0x952   :  { %6024 = vmax.xlane.f32.xlu0 %v6023_v0  ;;  %v12068_v0 = vadd.s32 4294967280, %v12041_v61  ;;  %v5594_v17 = vadd.f32 %v5426_v31, %v11697_v52  ;;  %v6110_v52 = vsel %vm5926_vm8, %v5843_v53, -inf  ;;  %v5912_v31 = vmax.f32 %v5816_v22, 0.0 }
 0x954   :  { %v5968_v27 = vpop.xlane.xlu2 %5967  ;;  %v5932_v48 = vpop.xlane.xlu0 %5931  ;;  %v5762_v38 = vadd.f32 %v11884_v47, %v5594_v17  ;;  %v13517_v17 = vld [vmem:[#allocation66_spill] sm:$0xff] }
 0x955   :  { %v6288_v2 = vperm.slane %v5968_v27, %v12050_v20  ;;  %v6231_v18 = vperm.slane %v5932_v48, %v12050_v20  ;;  %v5587_v48 = vadd.f32 %v5463_v25, %v11675_v16  ;;  %v5465_v25 = vpop.f32.mrf.mxu1 }
 0x956   :  { %v5858_v15 = vmax.f32 %v5762_v38, 0.0 }
 0x957   :  { %v6289_v23 = vsel %vm6232_vm9, %v6288_v2, %v6287_v50  ;;  %v6233_v39 = vsel %vm6232_vm9, %v6231_v18, %v6229_v35  ;;  %v5850_v35 = vmax.f32 %v5754_v60, 0.0  ;;  %v5407_v2 = vpop.f32.mrf.mxu3  ;;  %v5755_v16 = vadd.f32 %v11874_v57, %v5587_v48  ;;  %v12093_v48 = vpop.f32.mrf.mxu2 }
 0x958   :  { %v12087_v60 = vadd.s32 4294967272, %v12041_v61 }
 0x959   :  { %6075 = vmax.xlane.f32.xlu2 %v6074_v51  ;;  %6027 = vmax.xlane.f32.xlu1 %v6026_v7  ;;  %v6062_v51 = vsel %vm5926_vm8, %v5905_v29, -inf  ;;  %v6077_v7 = vsel %vm5926_vm8, %v5850_v35, -inf  ;;  %v5429_v35 = vpop.f32.mrf.mxu0 }
 0x95a   :  { %6060 = vmax.xlane.f32.xlu0 %v6059_v59  ;;  %v13516_v59 = vld [vmem:[#allocation60_spill] sm:$0xff] }
 0x95b   :  { %v5595_v56 = vadd.f32 %v5465_v25, %v13516_v59 }
 0x95c   :  { %v5971_v28 = vpop.xlane.xlu0 %5970  ;;  %v5935_v27 = vpop.xlane.xlu1 %5934 }
 0x95d   :  { %v6290_v24 = vperm.slane %v5971_v28, %v12068_v0  ;;  %v6235_v50 = vperm.slane %v5935_v27, %v12068_v0  ;;  %v5656_v28 = vadd.f32 %v12028_v13, %v13517_v17  ;;  %v5851_v27 = vmax.f32 %v5755_v16, 0.0 }
 0x95e   :  { %v6080_v13 = vsel %vm5926_vm8, %v5858_v15, -inf }
 0x95f   :  { %v6291_v18 = vsel %vm6236_vm10, %v6290_v24, %v6289_v23  ;;  %v6237_v42 = vsel %vm6236_vm10, %v6235_v50, %v6233_v39  ;;  %v13515_v23 = vld [vmem:[#allocation37_spill] sm:$0xff]  ;;  %v5824_v16 = vadd.f32 %v12004_v44, %v5656_v28  ;;  %v5536_v25 = vpop.f32.mrf.mxu3 }
 0x960   :  { %v5649_v39 = vadd.f32 %v5405_v45, %v13515_v23  ;;  %v12106_v23 = vadd.s32 4294967264, %v12041_v61 }
 0x961   :  { %6111 = vmax.xlane.f32.xlu2 %v6110_v52  ;;  %6063 = vmax.xlane.f32.xlu1 %v6062_v51  ;;  %v5763_v52 = vadd.f32 %v11884_v47, %v5595_v56  ;;  %v6029_v51 = vsel %vm5926_vm8, %v5912_v31, -inf  ;;  %v13519_v56 = vld [vmem:[#allocation16_spill] sm:$0xff]  ;;  %v5920_v28 = vmax.f32 %v5824_v16, 0.0  ;;  %v12125_v16 = vadd.s32 4294967256, %v12041_v61 }
 0x962   :  { %6078 = vmax.xlane.f32.xlu0 %v6077_v7  ;;  %v5817_v45 = vadd.f32 %v11993_v41, %v5649_v39  ;;  %v6113_v7 = vsel %vm5926_vm8, %v5851_v27, -inf  ;;  %v13518_v39 = vld [vmem:[#allocation77_spill] sm:$0xff]  ;;  %v5602_v31 = vadd.f32 %v5429_v35, %v13519_v56 }
 0x963   :  { %v5859_v59 = vmax.f32 %v5763_v52, 0.0 }
 0x964   :  { %v5938_v53 = vpop.xlane.xlu2 %5937  ;;  %v5974_v29 = vpop.xlane.xlu1 %5973  ;;  %v5770_v52 = vadd.f32 %v11898_v6, %v5602_v31 }
 0x965   :  { %v6239_v24 = vperm.slane %v5938_v53, %v12087_v60  ;;  %v6292_v50 = vperm.slane %v5974_v29, %v12087_v60  ;;  %v13520_v29 = vld [vmem:[#allocation32_spill] sm:$0xff] }
 0x966   :  { %v5657_v17 = vadd.f32 %v5407_v2, %v13520_v29  ;;  %v6032_v2 = vsel %vm5926_vm8, %v5920_v28, -inf  ;;  %v5866_v29 = vmax.f32 %v5770_v52, 0.0 }
 0x967   :  { %v6241_v22 = vsel %vm6240_vm11, %v6239_v24, %v6237_v42  ;;  %v6293_v38 = vsel %vm6240_vm11, %v6292_v50, %v6291_v18  ;;  %v5913_v42 = vmax.f32 %v5817_v45, 0.0  ;;  %v5572_v18 = vadd.f32 %v12046_v3, %v13518_v39  ;;  %v5468_v24 = vpop.f32.mrf.mxu1  ;;  %v12115_v50 = vpop.f32.mrf.mxu2  ;;  %v13521_v39 = vld [vmem:[#allocation17_spill] sm:$0xff] }
 0x968   :  { %v5538_v56 = vpop.f32.mrf.mxu3 }
 0x969   :  { %6030 = vmax.xlane.f32.xlu2 %v6029_v51  ;;  %6081 = vmax.xlane.f32.xlu1 %v6080_v13  ;;  %v5431_v51 = vpop.f32.mrf.mxu0  ;;  %v5740_v3 = vadd.f32 %v11854_v62, %v5572_v18  ;;  %v6065_v35 = vsel %vm5926_vm8, %v5913_v42, -inf  ;;  %v6116_v13 = vsel %vm5926_vm8, %v5859_v59, -inf }
 0x96a   :  { %6114 = vmax.xlane.f32.xlu0 %v6113_v7  ;;  %v5825_v7 = vadd.f32 %v12004_v44, %v5657_v17  ;;  %v5610_v17 = vadd.f32 %v5431_v51, %v11735_v34 }
 0x96b   :  { %v5836_v18 = vmax.f32 %v5740_v3, 0.0 }
 0x96c   :  { %v5941_v15 = vpop.xlane.xlu2 %5940  ;;  %v12111_v53 = vpop.xlane.xlu1 %6000  ;;  %v5921_v59 = vmax.f32 %v5825_v7, 0.0  ;;  %v5778_v51 = vadd.f32 %v11910_v26, %v5610_v17 }
 0x96d   :  { %v6243_v27 = vperm.slane %v5941_v15, %v12106_v23  ;;  %v13522_v15 = vld [vmem:[#allocation127_spill] sm:$0xff]  ;;  %v6143_v7 = vsel %vm5926_vm8, %v5836_v18, -inf }
 0x96e   :  { %v5603_v31 = vadd.f32 %v5468_v24, %v13522_v15 }
 0x96f   :  { %v6245_v45 = vsel %vm6244_vm12, %v6243_v27, %v6241_v22  ;;  %v5573_v22 = vadd.f32 %v5536_v25, %v13521_v39  ;;  %v5470_v25 = vpop.f32.mrf.mxu1  ;;  %v6083_v39 = vsel %vm5926_vm8, %v5866_v29, -inf  ;;  %v12140_v34 = vpop.f32.mrf.mxu2 }
 0x970   :  { %v5771_v24 = vadd.f32 %v11898_v6, %v5603_v31  ;;  %v13523_v31 = vld [vmem:[#allocation50_spill] sm:$0xff]  ;;  %v5611_v18 = vadd.f32 %v5470_v25, %v11731_v19 }
 0x971   :  { %6066 = vmax.xlane.f32.xlu2 %v6065_v35  ;;  %6117 = vmax.xlane.f32.xlu1 %v6116_v13  ;;  %v5434_v15 = vpop.f32.mrf.mxu0 }
 0x972   :  { %6033 = vmax.xlane.f32.xlu0 %v6032_v2  ;;  %v5741_v2 = vadd.f32 %v11854_v62, %v5573_v22  ;;  %v6068_v62 = vsel %vm5926_vm8, %v5921_v59, -inf  ;;  %v12145_v22 = vadd.s32 4294967248, %v12041_v61  ;;  %v5867_v29 = vmax.f32 %v5771_v24, 0.0 }
 0x973   :  { %v6323_v59 = vperm.slane %v12111_v53, %v12041_v61 }
 0x974   :  { %v5977_v42 = vpop.xlane.xlu2 %5976  ;;  %v12129_v27 = vpop.xlane.xlu1 %6036  ;;  %v6119_v53 = vsel %vm5926_vm8, %v5867_v29, -inf }
 0x975   :  { %v6294_v35 = vperm.slane %v5977_v42, %v12106_v23  ;;  %v5944_v28 = vpop.xlane.xlu0 %5943  ;;  %v13524_v42 = vld [vmem:[#allocation54_spill] sm:$0xff] }
 0x976   :  { %v6247_v13 = vperm.slane %v5944_v28, %v12125_v16 }
 0x977   :  { %v6295_v3 = vsel %vm6244_vm12, %v6294_v35, %v6293_v38  ;;  %v5837_v38 = vmax.f32 %v5741_v2, 0.0  ;;  %v5618_v35 = vadd.f32 %v5434_v15, %v13524_v42  ;;  %v5779_v42 = vadd.f32 %v11910_v26, %v5611_v18 }
 0x978   :  { %v6249_v52 = vsel %vm6248_vm13, %v6247_v13, %v6245_v45  ;;  %v5580_v45 = vadd.f32 %v12070_v9, %v13523_v31  ;;  %v5541_v13 = vpop.f32.mrf.mxu3 }
 0x979   :  { %6084 = vmax.xlane.f32.xlu2 %v6083_v39  ;;  %6144 = vmax.xlane.f32.xlu1 %v6143_v7  ;;  %v5874_v39 = vmax.f32 %v5778_v51, 0.0  ;;  %v6179_v25 = vsel %vm5926_vm8, %v5837_v38, -inf  ;;  %v5786_v51 = vadd.f32 %v11925_v33, %v5618_v35  ;;  %v5875_v18 = vmax.f32 %v5779_v42, 0.0  ;;  %v5436_v8 = vpop.f32.mrf.mxu0 }
 0x97a   :  { %6069 = vmax.xlane.f32.xlu0 %v6068_v62  ;;  %v5748_v15 = vadd.f32 %v11864_v54, %v5580_v45  ;;  %v13526_v45 = vld [vmem:[#allocation124_spill] sm:$0xff] }
 0x97b   :  { %v5588_v35 = vadd.f32 %v12093_v48, %v13526_v45 }
 0x97c   :  { %v6004_v28 = vpop.xlane.xlu2 %6003  ;;  %v5947_v17 = vpop.xlane.xlu1 %5946  ;;  %v5844_v38 = vmax.f32 %v5748_v15, 0.0 }
 0x97d   :  { %v6324_v7 = vperm.slane %v6004_v28, %v12050_v20  ;;  %v5980_v62 = vpop.xlane.xlu0 %5979  ;;  %v6251_v2 = vperm.slane %v5947_v17, %v12145_v22  ;;  %v5473_v28 = vpop.f32.mrf.mxu1  ;;  %v6086_v17 = vsel %vm5926_vm8, %v5874_v39, -inf }
 0x97e   :  { %v6296_v9 = vperm.slane %v5980_v62, %v12125_v16  ;;  %v13527_v62 = vld [vmem:[#allocation129_spill] sm:$0xff] }
 0x97f   :  { %v6325_v24 = vsel %vm6232_vm9, %v6324_v7, %v6323_v59  ;;  %v6253_v19 = vsel %vm6252_vm14, %v6251_v2, %v6249_v52  ;;  %v13525_v59 = vld [vmem:[#allocation18_spill] sm:$0xff]  ;;  %v12166_v7 = vpop.f32.mrf.mxu2  ;;  %v5882_v2 = vmax.f32 %v5786_v51, 0.0 }
 0x980   :  { %v6297_v31 = vsel %vm6248_vm13, %v6296_v9, %v6295_v3  ;;  %v5581_v52 = vadd.f32 %v5538_v56, %v13525_v59  ;;  %v5619_v3 = vadd.f32 %v5473_v28, %v13527_v62  ;;  %v5543_v48 = vpop.f32.mrf.mxu3  ;;  %v5756_v62 = vadd.f32 %v11874_v57, %v5588_v35 }
 0x981   :  { %6120 = vmax.xlane.f32.xlu2 %v6119_v53  ;;  %6180 = vmax.xlane.f32.xlu1 %v6179_v25  ;;  %v6359_v25 = vperm.slane %v12129_v27, %v12041_v61  ;;  %v6146_v27 = vsel %vm5926_vm8, %v5844_v38, -inf  ;;  %v6089_v45 = vsel %vm5926_vm8, %v5882_v2, -inf  ;;  %v5626_v38 = vadd.f32 %v5436_v8, %v11773_v14 }
 0x982   :  { %6087 = vmax.xlane.f32.xlu0 %v6086_v17  ;;  %v5749_v17 = vadd.f32 %v11864_v54, %v5581_v52  ;;  %v5787_v42 = vadd.f32 %v11925_v33, %v5619_v3  ;;  %v12186_v54 = vadd.s32 4294967240, %v12041_v61  ;;  %v13529_v3 = vld [vmem:[#allocation14_spill] sm:$0xff] }
 0x984   :  { %v6040_v29 = vpop.xlane.xlu2 %6039  ;;  %v5983_v9 = vpop.xlane.xlu1 %5982  ;;  %v5845_v52 = vmax.f32 %v5749_v17, 0.0 }
 0x985   :  { %v6360_v39 = vperm.slane %v6040_v29, %v12050_v20  ;;  %v6007_v53 = vpop.xlane.xlu0 %6006  ;;  %v6298_v56 = vperm.slane %v5983_v9, %v12145_v22  ;;  %v6122_v29 = vsel %vm5926_vm8, %v5875_v18, -inf }
 0x986   :  { %v6326_v15 = vperm.slane %v6007_v53, %v12068_v0  ;;  %v5475_v53 = vpop.f32.mrf.mxu1  ;;  %v6182_v8 = vsel %vm5926_vm8, %v5845_v52, -inf }
 0x987   :  { %v6361_v28 = vsel %vm6232_vm9, %v6360_v39, %v6359_v25  ;;  %v6299_v51 = vsel %vm6252_vm14, %v6298_v56, %v6297_v31  ;;  %v13528_v31 = vld [vmem:[#allocation45_spill] sm:$0xff]  ;;  %v5883_v25 = vmax.f32 %v5787_v42, 0.0  ;;  %v5852_v39 = vmax.f32 %v5756_v62, 0.0 }
 0x988   :  { %v6327_v59 = vsel %vm6236_vm10, %v6326_v15, %v6325_v24  ;;  %v5589_v9 = vadd.f32 %v5541_v13, %v13528_v31  ;;  %v5596_v24 = vadd.f32 %v12115_v50, %v13529_v3  ;;  %v5439_v50 = vpop.f32.mrf.mxu0  ;;  %v5794_v62 = vadd.f32 %v11945_v1, %v5626_v38  ;;  %v5546_v3 = vpop.f32.mrf.mxu3 }
 0x989   :  { %6147 = vmax.xlane.f32.xlu2 %v6146_v27  ;;  %6090 = vmax.xlane.f32.xlu1 %v6089_v45  ;;  %v12196_v27 = vpop.f32.mrf.mxu2  ;;  %v6125_v31 = vsel %vm5926_vm8, %v5883_v25, -inf  ;;  %v5634_v25 = vadd.f32 %v5439_v50, %v11791_v43 }
 0x98a   :  { %6123 = vmax.xlane.f32.xlu0 %v6122_v29  ;;  %v5757_v13 = vadd.f32 %v11874_v57, %v5589_v9  ;;  %v5764_v45 = vadd.f32 %v11884_v47, %v5596_v24  ;;  %v6149_v57 = vsel %vm5926_vm8, %v5852_v39, -inf  ;;  %v5627_v24 = vadd.f32 %v5475_v53, %v11769_v30 }
 0x98b   :  { %v5890_v38 = vmax.f32 %v5794_v62, 0.0  ;;  %v5802_v62 = vadd.f32 %v11956_v40, %v5634_v25 }
 0x98c   :  { %v5950_v2 = vpop.xlane.xlu2 %5949  ;;  %v6010_v35 = vpop.xlane.xlu1 %6009  ;;  %v5853_v52 = vmax.f32 %v5757_v13, 0.0  ;;  %v5795_v53 = vadd.f32 %v11945_v1, %v5627_v24 }
 0x98d   :  { %v6255_v18 = vperm.slane %v5950_v2, %v12186_v54  ;;  %v6043_v56 = vpop.xlane.xlu0 %6042  ;;  %v6328_v15 = vperm.slane %v6010_v35, %v12087_v60  ;;  %v5860_v2 = vmax.f32 %v5764_v45, 0.0  ;;  %v6092_v43 = vsel %vm5926_vm8, %v5890_v38, -inf }
 0x98e   :  { %v6362_v17 = vperm.slane %v6043_v56, %v12068_v0 }
 0x98f   :  { %v6257_v42 = vsel %vm6256_vm15, %v6255_v18, %v6253_v19  ;;  %v6329_v14 = vsel %vm6240_vm11, %v6328_v15, %v6327_v59  ;;  %v12207_v19 = vadd.s32 4294967232, %v12041_v61  ;;  %v13530_v59 = vld [vmem:[#allocation125_spill] sm:$0xff]  ;;  %v6152_v50 = vsel %vm5926_vm8, %v5860_v2, -inf }
 0x990   :  { %v6363_v29 = vsel %vm6236_vm10, %v6362_v17, %v6361_v28  ;;  %v5597_v9 = vadd.f32 %v5543_v48, %v13530_v59  ;;  %v5478_v48 = vpop.f32.mrf.mxu1 }
 0x991   :  { %6183 = vmax.xlane.f32.xlu2 %v6182_v8  ;;  %6126 = vmax.xlane.f32.xlu1 %v6125_v31  ;;  %v12222_v45 = vpop.f32.mrf.mxu2  ;;  %v5441_v31 = vpop.f32.mrf.mxu0 }
 0x992   :  { %6150 = vmax.xlane.f32.xlu0 %v6149_v57  ;;  %v5765_v17 = vadd.f32 %v11884_v47, %v5597_v9  ;;  %v6185_v47 = vsel %vm5926_vm8, %v5853_v52, -inf  ;;  %v5548_v57 = vpop.f32.mrf.mxu3  ;;  %v5891_v9 = vmax.f32 %v5795_v53, 0.0  ;;  %v5642_v2 = vadd.f32 %v5441_v31, %v11809_v11 }
 0x994   :  { %v5986_v35 = vpop.xlane.xlu2 %5985  ;;  %v6046_v28 = vpop.xlane.xlu1 %6045 }
 0x995   :  { %v6300_v18 = vperm.slane %v5986_v35, %v12186_v54  ;;  %v5953_v56 = vpop.xlane.xlu0 %5952  ;;  %v6364_v39 = vperm.slane %v6046_v28, %v12087_v60  ;;  %v5635_v35 = vadd.f32 %v5478_v48, %v11787_v36  ;;  %v5898_v28 = vmax.f32 %v5802_v62, 0.0 }
 0x996   :  { %v6259_v15 = vperm.slane %v5953_v56, %v12207_v19  ;;  %v6128_v48 = vsel %vm5926_vm8, %v5891_v9, -inf }
 0x997   :  { %v6301_v13 = vsel %vm6256_vm15, %v6300_v18, %v6299_v51  ;;  %v6365_v30 = vsel %vm6240_vm11, %v6364_v39, %v6363_v29  ;;  %v12227_v51 = vadd.s32 4294967224, %v12041_v61  ;;  %v5861_v29 = vmax.f32 %v5765_v17, 0.0 }
 0x998   :  { %v6261_v8 = vsel %vm6260_vm1, %v6259_v15, %v6257_v42  ;;  %v13531_v42 = vld [vmem:[#allocation51_spill] sm:$0xff]  ;;  %v5810_v17 = vadd.f32 %v11968_v12, %v5642_v2  ;;  %v5803_v53 = vadd.f32 %v11956_v40, %v5635_v35 }
 0x999   :  { %6093 = vmax.xlane.f32.xlu2 %v6092_v43  ;;  %6153 = vmax.xlane.f32.xlu1 %v6152_v50  ;;  %v5604_v59 = vadd.f32 %v12140_v34, %v13531_v42  ;;  %v6188_v15 = vsel %vm5926_vm8, %v5861_v29, -inf  ;;  %v5480_v43 = vpop.f32.mrf.mxu1  ;;  %v6095_v50 = vsel %vm5926_vm8, %v5898_v28, -inf  ;;  %v5517_v62 = vpop.f32.mrf.mxu2 }
 0x99a   :  { %6186 = vmax.xlane.f32.xlu0 %v6185_v47  ;;  %v5643_v47 = vadd.f32 %v5480_v43, %v11805_v49  ;;  %v5906_v29 = vmax.f32 %v5810_v17, 0.0  ;;  %v5551_v2 = vpop.f32.mrf.mxu3  ;;  %v5444_v17 = vpop.f32.mrf.mxu0 }
 0x99b   :  { %v5772_v11 = vadd.f32 %v11898_v6, %v5604_v59 }
 0x99c   :  { %v6013_v24 = vpop.xlane.xlu2 %6012  ;;  %v5956_v38 = vpop.xlane.xlu1 %5955 }
 0x99d   :  { %v6330_v52 = vperm.slane %v6013_v24, %v12106_v23  ;;  %v5989_v25 = vpop.xlane.xlu0 %5988  ;;  %v6263_v18 = vperm.slane %v5956_v38, %v12227_v51  ;;  %v5868_v31 = vmax.f32 %v5772_v11, 0.0  ;;  %v5899_v24 = vmax.f32 %v5803_v53, 0.0 }
 0x99e   :  { %v6302_v56 = vperm.slane %v5989_v25, %v12207_v19 }
 0x99f   :  { %v6331_v39 = vsel %vm6244_vm12, %v6330_v52, %v6329_v14  ;;  %v6265_v34 = vsel %vm6264_vm2, %v6263_v18, %v6261_v8  ;;  %v13532_v14 = vld [vmem:[#allocation126_spill] sm:$0xff]  ;;  %v5811_v18 = vadd.f32 %v11968_v12, %v5643_v47 }
 0x9a0   :  { %v6303_v36 = vsel %vm6260_vm1, %v6302_v56, %v6301_v13  ;;  %v5605_v8 = vadd.f32 %v5546_v3, %v13532_v14  ;;  %v13533_v13 = vld [vmem:[#allocation83_spill] sm:$0xff] }
 0x9a1   :  { %6129 = vmax.xlane.f32.xlu2 %v6128_v48  ;;  %6189 = vmax.xlane.f32.xlu1 %v6188_v15  ;;  %v5612_v9 = vadd.f32 %v12166_v7, %v13533_v13  ;;  %v6155_v7 = vsel %vm5926_vm8, %v5868_v31, -inf  ;;  %v6098_v15 = vsel %vm5926_vm8, %v5906_v29, -inf  ;;  %v6131_v48 = vsel %vm5926_vm8, %v5899_v24, -inf  ;;  %v13535_v31 = vld [vmem:[#allocation78_spill] sm:$0xff]  ;;  %v12268_v29 = vpop.f32.mrf.mxu2 }
 0x9a2   :  { %6096 = vmax.xlane.f32.xlu0 %v6095_v50  ;;  %v5773_v3 = vadd.f32 %v11898_v6, %v5605_v8  ;;  %v12262_v6 = vadd.s32 4294967216, %v12041_v61  ;;  %v5907_v43 = vmax.f32 %v5811_v18, 0.0  ;;  %v5620_v47 = vadd.f32 %v12196_v27, %v13535_v31  ;;  %v12274_v24 = vpop.f32.mrf.mxu3  ;;  %v5483_v18 = vpop.f32.mrf.mxu1 }
 0x9a3   :  { %v5780_v11 = vadd.f32 %v11910_v26, %v5612_v9 }
 0x9a4   :  { %v6049_v42 = vpop.xlane.xlu2 %6048  ;;  %v5992_v59 = vpop.xlane.xlu1 %5991  ;;  %v5869_v53 = vmax.f32 %v5773_v3, 0.0  ;;  %v5788_v3 = vadd.f32 %v11925_v33, %v5620_v47 }
 0x9a5   :  { %v6366_v38 = vperm.slane %v6049_v42, %v12106_v23  ;;  %v6016_v35 = vpop.xlane.xlu0 %6015  ;;  %v6304_v28 = vperm.slane %v5992_v59, %v12227_v51  ;;  %v5876_v8 = vmax.f32 %v5780_v11, 0.0  ;;  %v5651_v11 = vadd.f32 %v5483_v18, %v11823_v21 }
 0x9a6   :  { %v6332_v52 = vperm.slane %v6016_v35, %v12125_v16 }
 0x9a7   :  { %v6367_v25 = vsel %vm6244_vm12, %v6366_v38, %v6365_v30  ;;  %v6305_v49 = vsel %vm6264_vm2, %v6304_v28, %v6303_v36  ;;  %v13534_v30 = vld [vmem:[#allocation128_spill] sm:$0xff]  ;;  %v6191_v28 = vsel %vm5926_vm8, %v5869_v53, -inf }
 0x9a8   :  { %v6333_v56 = vsel %vm6248_vm13, %v6332_v52, %v6331_v39  ;;  %v5613_v36 = vadd.f32 %v5548_v57, %v13534_v30  ;;  %v5650_v39 = vadd.f32 %v5444_v17, %v11827_v10  ;;  %v6134_v52 = vsel %vm5926_vm8, %v5907_v43, -inf }
 0x9a9   :  { %6156 = vmax.xlane.f32.xlu2 %v6155_v7  ;;  %6099 = vmax.xlane.f32.xlu1 %v6098_v15  ;;  %v13536_v7 = vld [vmem:[#allocation130_spill] sm:$0xff] }
 0x9aa   :  { %6132 = vmax.xlane.f32.xlu0 %v6131_v48  ;;  %v5781_v9 = vadd.f32 %v11910_v26, %v5613_v36  ;;  %v5818_v35 = vadd.f32 %v11993_v41, %v5650_v39  ;;  %v6158_v26 = vsel %vm5926_vm8, %v5876_v8, -inf  ;;  %v5621_v15 = vadd.f32 %v5551_v2, %v13536_v7 }
 0x9ab   :  { %v5884_v36 = vmax.f32 %v5788_v3, 0.0  ;;  %v5819_v8 = vadd.f32 %v11993_v41, %v5651_v11 }
 0x9ac   :  { %v5959_v50 = vpop.xlane.xlu2 %5958  ;;  %v6019_v14 = vpop.xlane.xlu1 %6018  ;;  %v5914_v17 = vmax.f32 %v5818_v35, 0.0 }
 0x9ad   :  { %v6267_v42 = vperm.slane %v5959_v50, %v12262_v6  ;;  %v6052_v59 = vpop.xlane.xlu0 %6051  ;;  %v6334_v13 = vperm.slane %v6019_v14, %v12145_v22  ;;  %v12293_v14 = vpop.f32.mrf.mxu2 }
 0x9ae   :  { %v6368_v57 = vperm.slane %v6052_v59, %v12125_v16  ;;  %v6101_v47 = vsel %vm5926_vm8, %v5914_v17, -inf  ;;  %v5556_v59 = vpop.f32.mrf.mxu3 }
 0x9af   :  { %v6269_v10 = vsel %vm6268_vm3, %v6267_v42, %v6265_v34  ;;  %v6335_v38 = vsel %vm6252_vm14, %v6334_v13, %v6333_v56  ;;  %v12285_v34 = vadd.s32 4294967208, %v12041_v61  ;;  %v5877_v56 = vmax.f32 %v5781_v9, 0.0 }
 0x9b0   :  { %v6369_v27 = vsel %vm6248_vm13, %v6368_v57, %v6367_v25  ;;  %v5636_v25 = vadd.f32 %v5517_v62, %v11796_v37  ;;  %v5789_v42 = vadd.f32 %v11925_v33, %v5621_v15  ;;  %v6161_v13 = vsel %vm5926_vm8, %v5884_v36, -inf }
 0x9b1   :  { %6192 = vmax.xlane.f32.xlu2 %v6191_v28  ;;  %6135 = vmax.xlane.f32.xlu1 %v6134_v52  ;;  %v6194_v21 = vsel %vm5926_vm8, %v5877_v56, -inf  ;;  %v5628_v57 = vadd.f32 %v12222_v45, %v11777_v55  ;;  %v5637_v9 = vadd.f32 %v5556_v59, %v11793_v4 }
 0x9b2   :  { %6159 = vmax.xlane.f32.xlu0 %v6158_v26  ;;  %v5804_v62 = vadd.f32 %v11956_v40, %v5636_v25  ;;  %v5885_v52 = vmax.f32 %v5789_v42, 0.0 }
 0x9b3   :  { %v5796_v56 = vadd.f32 %v11945_v1, %v5628_v57  ;;  %v5805_v55 = vadd.f32 %v11956_v40, %v5637_v9 }
 0x9b4   :  { %v5995_v48 = vpop.xlane.xlu2 %5994  ;;  %v6055_v30 = vpop.xlane.xlu1 %6054  ;;  %v5900_v35 = vmax.f32 %v5804_v62, 0.0  ;;  %v6197_v17 = vsel %vm5926_vm8, %v5885_v52, -inf }
 0x9b5   :  { %v6306_v53 = vperm.slane %v5995_v48, %v12262_v6  ;;  %v5962_v43 = vpop.xlane.xlu0 %5961  ;;  %v6370_v39 = vperm.slane %v6055_v30, %v12145_v22  ;;  %v5524_v25 = vpop.f32.mrf.mxu2  ;;  %v5892_v30 = vmax.f32 %v5796_v56, 0.0  ;;  %v5901_v36 = vmax.f32 %v5805_v55, 0.0 }
 0x9b6   :  { %v6271_v50 = vperm.slane %v5962_v43, %v12285_v34  ;;  %v6167_v15 = vsel %vm5926_vm8, %v5900_v35, -inf  ;;  %v5485_v48 = vpop.f32.mrf.mxu1 }
 0x9b7   :  { %v6307_v2 = vsel %vm6268_vm3, %v6306_v53, %v6305_v49  ;;  %v6371_v37 = vsel %vm6252_vm14, %v6370_v39, %v6369_v27  ;;  %v5446_v49 = vpop.f32.mrf.mxu0  ;;  %v5915_v27 = vmax.f32 %v5819_v8, 0.0  ;;  %v5660_v53 = vadd.f32 %v5524_v25, %v11849_v63  ;;  %v5558_v8 = vpop.f32.mrf.mxu3 }
 0x9b8   :  { %v6273_v31 = vsel %vm6272_vm4, %v6271_v50, %v6269_v10  ;;  %v5658_v3 = vadd.f32 %v5446_v49, %v11845_v46  ;;  %v6164_v63 = vsel %vm5926_vm8, %v5892_v30, -inf }
 0x9b9   :  { %6102 = vmax.xlane.f32.xlu2 %v6101_v47  ;;  %6195 = vmax.xlane.f32.xlu1 %v6194_v21  ;;  %v6137_v45 = vsel %vm5926_vm8, %v5915_v27, -inf }
 0x9ba   :  { %6162 = vmax.xlane.f32.xlu0 %v6161_v13  ;;  %v5826_v46 = vadd.f32 %v12004_v44, %v5658_v3  ;;  %v6203_v13 = vsel %vm5926_vm8, %v5901_v36, -inf }
 0x9bc   :  { %v6022_v28 = vpop.xlane.xlu2 %6021  ;;  %v6073_v10 = vpop.xlane.xlu1 %6072  ;;  %v5922_v50 = vmax.f32 %v5826_v46, 0.0  ;;  %v13539_v46 = vld [vmem:[#allocation132_spill] sm:$0xff] }
 0x9bd   :  { %v6336_v33 = vperm.slane %v6022_v28, %v12186_v54  ;;  %v5998_v18 = vpop.xlane.xlu0 %5997  ;;  %v6395_v52 = vperm.slane %v6073_v10, %v12041_v61 }
 0x9be   :  { %v6308_v26 = vperm.slane %v5998_v18, %v12285_v34  ;;  %v6104_v49 = vsel %vm5926_vm8, %v5922_v50, -inf }
 0x9bf   :  { %v6337_v7 = vsel %vm6256_vm15, %v6336_v33, %v6335_v38  ;;  %v13537_v38 = vld [vmem:[#allocation131_spill] sm:$0xff] }
 0x9c0   :  { %v6309_v4 = vsel %vm6272_vm4, %v6308_v26, %v6307_v2  ;;  %v5629_v40 = vadd.f32 %v12274_v24, %v13537_v38  ;;  %v5659_v2 = vadd.f32 %v5485_v48, %v11841_v5  ;;  %v5828_v24 = vadd.f32 %v12004_v44, %v5660_v53 }
 0x9c1   :  { %v12317_v11 = vsel %vm6527_vm5, %v6273_v31, %v6309_v4  ;;  %6138 = vmax.xlane.f32.xlu2 %v6137_v45  ;;  %6168 = vmax.xlane.f32.xlu1 %v6167_v15  ;;  %v13538_v45 = vld [vmem:[#allocation57_spill] sm:$0xff] }
 0x9c2   :  { %6198 = vmax.xlane.f32.xlu0 %v6197_v17  ;;  %v5797_v47 = vadd.f32 %v11945_v1, %v5629_v40  ;;  %v5827_v5 = vadd.f32 %v12004_v44, %v5659_v2  ;;  %v5644_v1 = vadd.f32 %v12268_v29, %v11813_v58  ;;  %v5924_v9 = vmax.f32 %v5828_v24, 0.0  ;;  %v5561_v29 = vpop.f32.mrf.mxu3 }
 0x9c3   :  { %v5645_v15 = vadd.f32 %v5558_v8, %v13538_v45  ;;  %v5653_v25 = vadd.f32 %v5561_v29, %v13539_v46 }
 0x9c4   :  { %v6058_v43 = vpop.xlane.xlu2 %6057  ;;  %v6109_v39 = vpop.xlane.xlu1 %6108  ;;  %v5893_v57 = vmax.f32 %v5797_v47, 0.0  ;;  %v5923_v28 = vmax.f32 %v5827_v5, 0.0  ;;  %v6176_v10 = vsel %vm5926_vm8, %v5924_v9, -inf  ;;  %v5812_v55 = vadd.f32 %v11968_v12, %v5644_v1  ;;  %v13540_v5 = vld [vmem:[#allocation11_spill] sm:$0xff] }
 0x9c5   :  { %v6372_v21 = vperm.slane %v6058_v43, %v12186_v54  ;;  %v6025_v62 = vpop.xlane.xlu0 %6024  ;;  %v6431_v30 = vperm.slane %v6109_v39, %v12041_v61  ;;  %v5813_v47 = vadd.f32 %v11968_v12, %v5645_v15 }
 0x9c6   :  { %v6338_v31 = vperm.slane %v6025_v62, %v12207_v19  ;;  %v6140_v4 = vsel %vm5926_vm8, %v5923_v28, -inf  ;;  %v5908_v40 = vmax.f32 %v5812_v55, 0.0  ;;  %v5821_v62 = vadd.f32 %v11993_v41, %v5653_v25 }
 0x9c7   :  { %v6373_v42 = vsel %vm6256_vm15, %v6372_v21, %v6371_v37  ;;  %v5652_v37 = vadd.f32 %v12293_v14, %v11832_v32 }
 0x9c8   :  { %v6339_v59 = vsel %vm6260_vm1, %v6338_v31, %v6337_v7  ;;  %v6200_v7 = vsel %vm5926_vm8, %v5893_v57, -inf  ;;  %v6170_v39 = vsel %vm5926_vm8, %v5908_v40, -inf  ;;  %v5917_v24 = vmax.f32 %v5821_v62, 0.0 }
 0x9c9   :  { %6165 = vmax.xlane.f32.xlu2 %v6164_v63  ;;  %6204 = vmax.xlane.f32.xlu1 %v6203_v13  ;;  %v5820_v32 = vadd.f32 %v11993_v41, %v5652_v37  ;;  %v5909_v13 = vmax.f32 %v5813_v47, 0.0 }
 0x9ca   :  { %6105 = vmax.xlane.f32.xlu0 %v6104_v49 }
 0x9cb   :  { %v5916_v17 = vmax.f32 %v5820_v32, 0.0 }
 0x9cc   :  { %v6076_v35 = vpop.xlane.xlu2 %6075  ;;  %v6028_v27 = vpop.xlane.xlu1 %6027 }
 0x9cd   :  { %v6396_v3 = vperm.slane %v6076_v35, %v12050_v20  ;;  %v6061_v33 = vpop.xlane.xlu0 %6060  ;;  %v6340_v18 = vperm.slane %v6028_v27, %v12227_v51  ;;  %v6173_v31 = vsel %vm5926_vm8, %v5916_v17, -inf  ;;  %v6209_v27 = vsel %vm5926_vm8, %v5917_v24, -inf }
 0x9ce   :  { %v6374_v26 = vperm.slane %v6061_v33, %v12207_v19 }
 0x9cf   :  { %v6397_v56 = vsel %vm6232_vm9, %v6396_v3, %v6395_v52  ;;  %v6341_v58 = vsel %vm6264_vm2, %v6340_v18, %v6339_v59  ;;  %v6206_v52 = vsel %vm5926_vm8, %v5909_v13, -inf }
 0x9d0   :  { %v6375_v14 = vsel %vm6260_vm1, %v6374_v26, %v6373_v42  ;;  %v5563_v42 = vpop.f32.mrf.mxu3 }
 0x9d1   :  { %6201 = vmax.xlane.f32.xlu2 %v6200_v7  ;;  %6177 = vmax.xlane.f32.xlu1 %v6176_v10  ;;  %v5661_v49 = vadd.f32 %v5563_v42, %v13540_v5 }
 0x9d2   :  { %6141 = vmax.xlane.f32.xlu0 %v6140_v4 }
 0x9d3   :  { %v5829_v28 = vadd.f32 %v12004_v44, %v5661_v49 }
 0x9d4   :  { %v6112_v48 = vpop.xlane.xlu2 %6111  ;;  %v6064_v38 = vpop.xlane.xlu1 %6063 }
 0x9d5   :  { %v6432_v36 = vperm.slane %v6112_v48, %v12050_v20  ;;  %v6079_v53 = vpop.xlane.xlu0 %6078  ;;  %v6376_v43 = vperm.slane %v6064_v38, %v12227_v51  ;;  %v5925_v18 = vmax.f32 %v5829_v28, 0.0 }
 0x9d6   :  { %v6398_v50 = vperm.slane %v6079_v53, %v12068_v0 }
 0x9d7   :  { %v6433_v2 = vsel %vm6232_vm9, %v6432_v36, %v6431_v30  ;;  %v6377_v21 = vsel %vm6264_vm2, %v6376_v43, %v6375_v14  ;;  %v6212_v10 = vsel %vm5926_vm8, %v5925_v18, -inf  ;;  %vm6533_vm8 = vcmask 1043456  }
 0x9d8   :  { %v6399_v8 = vsel %vm6236_vm10, %v6398_v50, %v6397_v56 }
 0x9d9   :  { %6174 = vmax.xlane.f32.xlu2 %v6173_v31 }
 0x9da   :  { %6171 = vmax.xlane.f32.xlu0 %v6170_v39 }
 0x9dc   :  { %v6031_v59 = vpop.xlane.xlu2 %6030  ;;  %v6082_v63 = vpop.xlane.xlu1 %6081 }
 0x9dd   :  { %v6342_v57 = vperm.slane %v6031_v59, %v12262_v6  ;;  %v6115_v41 = vpop.xlane.xlu0 %6114  ;;  %v6400_v1 = vperm.slane %v6082_v63, %v12087_v60 }
 0x9de   :  { %v6434_v37 = vperm.slane %v6115_v41, %v12068_v0 }
 0x9df   :  { %v6343_v12 = vsel %vm6268_vm3, %v6342_v57, %v6341_v58  ;;  %v6401_v9 = vsel %vm6240_vm11, %v6400_v1, %v6399_v8 }
 0x9e0   :  { %v6435_v35 = vsel %vm6236_vm10, %v6434_v37, %v6433_v2 }
 0x9e1   :  { %6210 = vmax.xlane.f32.xlu2 %v6209_v27 }
 0x9e2   :  { %6207 = vmax.xlane.f32.xlu0 %v6206_v52 }
 0x9e4   :  { %v6067_v3 = vpop.xlane.xlu2 %6066  ;;  %v6118_v33 = vpop.xlane.xlu1 %6117 }
 0x9e5   :  { %v6378_v26 = vperm.slane %v6067_v3, %v12262_v6  ;;  %v6034_v56 = vpop.xlane.xlu0 %6033  ;;  %v6436_v58 = vperm.slane %v6118_v33, %v12087_v60 }
 0x9e6   :  { %v6344_v29 = vperm.slane %v6034_v56, %v12285_v34 }
 0x9e7   :  { %v6379_v32 = vsel %vm6268_vm3, %v6378_v26, %v6377_v21  ;;  %v6437_v14 = vsel %vm6240_vm11, %v6436_v58, %v6435_v35 }
 0x9e8   :  { %v6345_v44 = vsel %vm6272_vm4, %v6344_v29, %v6343_v12 }
 0x9e9   :  { %v6530_v7 = vsel %vm6529_vm6, %v12317_v11, %v6345_v44 }
 0x9ea   :  { %6213 = vmax.xlane.f32.xlu0 %v6212_v10 }
 0x9ec   :  { %v6085_v55 = vpop.xlane.xlu2 %6084  ;;  %v6145_v4 = vpop.xlane.xlu1 %6144 }
 0x9ed   :  { %v6402_v45 = vperm.slane %v6085_v55, %v12106_v23  ;;  %v6070_v15 = vpop.xlane.xlu0 %6069  ;;  %v6467_v21 = vperm.slane %v6145_v4, %v12041_v61 }
 0x9ee   :  { %v6380_v46 = vperm.slane %v6070_v15, %v12285_v34 }
 0x9ef   :  { %v6403_v25 = vsel %vm6244_vm12, %v6402_v45, %v6401_v9 }
 0x9f0   :  { %v6381_v17 = vsel %vm6272_vm4, %v6380_v46, %v6379_v32 }
 0x9f1   :  { %v12385_v48 = vsel %vm6531_vm7, %v6530_v7, %v6381_v17 }
 0x9f4   :  { %v6121_v38 = vpop.xlane.xlu2 %6120  ;;  %v6181_v40 = vpop.xlane.xlu1 %6180 }
 0x9f5   :  { %v6438_v11 = vperm.slane %v6121_v38, %v12106_v23  ;;  %v6088_v30 = vpop.xlane.xlu0 %6087  ;;  %v6503_v13 = vperm.slane %v6181_v40, %v12041_v61 }
 0x9f6   :  { %v6404_v36 = vperm.slane %v6088_v30, %v12125_v16 }
 0x9f7   :  { %v6439_v53 = vsel %vm6244_vm12, %v6438_v11, %v6437_v14 }
 0x9f8   :  { %v6405_v43 = vsel %vm6248_vm13, %v6404_v36, %v6403_v25 }
 0x9fc   :  { %v6148_v50 = vpop.xlane.xlu2 %6147  ;;  %v6091_v2 = vpop.xlane.xlu1 %6090 }
 0x9fd   :  { %v6468_v62 = vperm.slane %v6148_v50, %v12050_v20  ;;  %v6124_v8 = vpop.xlane.xlu0 %6123  ;;  %v6406_v31 = vperm.slane %v6091_v2, %v12145_v22 }
 0x9fe   :  { %v6440_v47 = vperm.slane %v6124_v8, %v12125_v16 }
 0x9ff   :  { %v6469_v39 = vsel %vm6232_vm9, %v6468_v62, %v6467_v21  ;;  %v6407_v42 = vsel %vm6252_vm14, %v6406_v31, %v6405_v43 }
 0xa00   :  { %v6441_v24 = vsel %vm6248_vm13, %v6440_v47, %v6439_v53 }
 0xa04   :  { %v6184_v59 = vpop.xlane.xlu2 %6183  ;;  %v6127_v63 = vpop.xlane.xlu1 %6126 }
 0xa05   :  { %v6504_v5 = vperm.slane %v6184_v59, %v12050_v20  ;;  %v6151_v49 = vpop.xlane.xlu0 %6150  ;;  %v6442_v40 = vperm.slane %v6127_v63, %v12145_v22 }
 0xa06   :  { %v6470_v57 = vperm.slane %v6151_v49, %v12068_v0 }
 0xa07   :  { %v6505_v41 = vsel %vm6232_vm9, %v6504_v5, %v6503_v13  ;;  %v6443_v2 = vsel %vm6252_vm14, %v6442_v40, %v6441_v24  ;;  %vm6535_vm9 = vcmask 1044480  }
 0xa08   :  { %v6471_v1 = vsel %vm6236_vm10, %v6470_v57, %v6469_v39 }
 0xa0c   :  { %v6094_v37 = vpop.xlane.xlu2 %6093  ;;  %v6154_v12 = vpop.xlane.xlu1 %6153 }
 0xa0d   :  { %v6408_v9 = vperm.slane %v6094_v37, %v12186_v54  ;;  %v6187_v35 = vpop.xlane.xlu0 %6186  ;;  %v6472_v8 = vperm.slane %v6154_v12, %v12087_v60 }
 0xa0e   :  { %v6506_v27 = vperm.slane %v6187_v35, %v12068_v0 }
 0xa0f   :  { %v6409_v28 = vsel %vm6256_vm15, %v6408_v9, %v6407_v42  ;;  %v6473_v49 = vsel %vm6240_vm11, %v6472_v8, %v6471_v1 }
 0xa10   :  { %v12407_v61 = vsel %vm6236_vm10, %v6506_v27, %v6505_v41  ;;  %vm6537_vm10 = vcmask 1045504  }
 0xa14   :  { %v6130_v20 = vpop.xlane.xlu2 %6129  ;;  %v12409_v52 = vpop.xlane.xlu1 %6189 }
 0xa15   :  { %v6097_v3 = vpop.xlane.xlu0 %6096  ;;  %v6444_v30 = vperm.slane %v6130_v20, %v12186_v54 }
 0xa16   :  { %v6410_v33 = vperm.slane %v6097_v3, %v12207_v19 }
 0xa17   :  { %v6445_v31 = vsel %vm6256_vm15, %v6444_v30, %v6443_v2 }
 0xa18   :  { %v6411_v18 = vsel %vm6260_vm1, %v6410_v33, %v6409_v28 }
 0xa1c   :  { %v6157_v26 = vpop.xlane.xlu2 %6156  ;;  %v6100_v56 = vpop.xlane.xlu1 %6099 }
 0xa1d   :  { %v6133_v58 = vpop.xlane.xlu0 %6132  ;;  %v6412_v45 = vperm.slane %v6100_v56, %v12227_v51  ;;  %v6474_v39 = vperm.slane %v6157_v26, %v12106_v23  ;;  %v6508_v56 = vperm.slane %v12409_v52, %v12087_v60 }
 0xa1e   :  { %v6446_v53 = vperm.slane %v6133_v58, %v12207_v19 }
 0xa1f   :  { %v6413_v17 = vsel %vm6264_vm2, %v6412_v45, %v6411_v18  ;;  %v6475_v37 = vsel %vm6244_vm12, %v6474_v39, %v6473_v49  ;;  %v6509_v60 = vsel %vm6240_vm11, %v6508_v56, %v12407_v61  ;;  %vm6539_vm11 = vcmask 1046528  }
 0xa20   :  { %v6447_v42 = vsel %vm6260_vm1, %v6446_v53, %v6445_v31 }
 0xa24   :  { %v12413_v29 = vpop.xlane.xlu2 %6192  ;;  %v6136_v0 = vpop.xlane.xlu1 %6135 }
 0xa25   :  { %v6160_v32 = vpop.xlane.xlu0 %6159  ;;  %v6448_v50 = vperm.slane %v6136_v0, %v12227_v51  ;;  %v6510_v0 = vperm.slane %v12413_v29, %v12106_v23 }
 0xa26   :  { %v6476_v63 = vperm.slane %v6160_v32, %v12125_v16 }
 0xa28   :  { %v6477_v9 = vsel %vm6248_vm13, %v6476_v63, %v6475_v37 }
 0xa2c   :  { %v6103_v14 = vpop.xlane.xlu2 %6102  ;;  %v12415_v7 = vpop.xlane.xlu1 %6195 }
 0xa2d   :  { %v6163_v44 = vpop.xlane.xlu0 %6162  ;;  %v6414_v15 = vperm.slane %v6103_v14, %v12262_v6 }
 0xa2e   :  { %v6478_v13 = vperm.slane %v6163_v44, %v12145_v22  ;;  %v6512_v44 = vperm.slane %v12415_v7, %v12125_v16 }
 0xa2f   :  { %v6415_v11 = vsel %vm6268_vm3, %v6414_v15, %v6413_v17  ;;  %v6511_v15 = vsel %vm6244_vm12, %v6510_v0, %v6509_v60 }
 0xa30   :  { %v6479_v35 = vsel %vm6252_vm14, %v6478_v13, %v6477_v9  ;;  %v6513_v23 = vsel %vm6248_vm13, %v6512_v44, %v6511_v15 }
 0xa34   :  { %v6139_v10 = vpop.xlane.xlu2 %6138  ;;  %v6169_v4 = vpop.xlane.xlu1 %6168 }
 0xa35   :  { %v12417_v55 = vpop.xlane.xlu0 %6198  ;;  %v6450_v21 = vperm.slane %v6139_v10, %v12262_v6  ;;  %v6482_v20 = vperm.slane %v6169_v4, %v12207_v19 }
 0xa36   :  { %v6514_v4 = vperm.slane %v12417_v55, %v12145_v22 }
 0xa38   :  { %v6515_v29 = vsel %vm6252_vm14, %v6514_v4, %v6513_v23 }
 0xa3c   :  { %v6166_v46 = vpop.xlane.xlu2 %6165  ;;  %v6205_v62 = vpop.xlane.xlu1 %6204 }
 0xa3d   :  { %v6106_v25 = vpop.xlane.xlu0 %6105  ;;  %v6480_v57 = vperm.slane %v6166_v46, %v12186_v54  ;;  %v6518_v22 = vperm.slane %v6205_v62, %v12207_v19 }
 0xa3e   :  { %v6416_v38 = vperm.slane %v6106_v25, %v12285_v34 }
 0xa3f   :  { %v6481_v27 = vsel %vm6256_vm15, %v6480_v57, %v6479_v35 }
 0xa40   :  { %v6417_v36 = vsel %vm6272_vm4, %v6416_v38, %v6415_v11  ;;  %v6483_v26 = vsel %vm6260_vm1, %v6482_v20, %v6481_v27 }
 0xa41   :  { %v6534_v43 = vsel %vm6533_vm8, %v12385_v48, %v6417_v36  ;;  %v6449_v48 = vsel %vm6264_vm2, %v6448_v50, %v6447_v42 }
 0xa42   :  { %v6451_v5 = vsel %vm6268_vm3, %v6450_v21, %v6449_v48 }
 0xa44   :  { %v6202_v47 = vpop.xlane.xlu2 %6201  ;;  %v6178_v3 = vpop.xlane.xlu1 %6177 }
 0xa45   :  { %v6142_v59 = vpop.xlane.xlu0 %6141  ;;  %v6488_v58 = vperm.slane %v6178_v3, %v12285_v34  ;;  %v6516_v52 = vperm.slane %v6202_v47, %v12186_v54 }
 0xa46   :  { %v6452_v24 = vperm.slane %v6142_v59, %v12285_v34 }
 0xa47   :  { %v6517_v16 = vsel %vm6256_vm15, %v6516_v52, %v6515_v29 }
 0xa48   :  { %v6453_v41 = vsel %vm6272_vm4, %v6452_v24, %v6451_v5  ;;  %v6519_v61 = vsel %vm6260_vm1, %v6518_v22, %v6517_v16 }
 0xa49   :  { %v6536_v12 = vsel %vm6535_vm9, %v6534_v43, %v6453_v41 }
 0xa4c   :  { %v6175_v28 = vpop.xlane.xlu2 %6174 }
 0xa4d   :  { %v6486_v33 = vperm.slane %v6175_v28, %v12262_v6  ;;  %v6172_v1 = vpop.xlane.xlu0 %6171 }
 0xa4e   :  { %v6484_v18 = vperm.slane %v6172_v1, %v12227_v51 }
 0xa50   :  { %v6485_v32 = vsel %vm6264_vm2, %v6484_v18, %v6483_v26 }
 0xa51   :  { %v6487_v14 = vsel %vm6268_vm3, %v6486_v33, %v6485_v32 }
 0xa52   :  { %v6489_v10 = vsel %vm6272_vm4, %v6488_v58, %v6487_v14 }
 0xa53   :  { %v6538_v45 = vsel %vm6537_vm10, %v6536_v12, %v6489_v10 }
 0xa54   :  { %v6211_v7 = vpop.xlane.xlu2 %6210 }
 0xa55   :  { %v6208_v46 = vpop.xlane.xlu0 %6207  ;;  %v6522_v55 = vperm.slane %v6211_v7, %v12262_v6 }
 0xa56   :  { %v6520_v25 = vperm.slane %v6208_v46, %v12227_v51 }
 0xa58   :  { %v6521_v54 = vsel %vm6264_vm2, %v6520_v25, %v6519_v61 }
 0xa59   :  { %v6523_v51 = vsel %vm6268_vm3, %v6522_v55, %v6521_v54 }
 0xa5d   :  { %v6214_v17 = vpop.xlane.xlu0 %6213 }
 0xa5e   :  { %v6524_v38 = vperm.slane %v6214_v17, %v12285_v34 }
 0xa60   :  { %v6525_v19 = vsel %vm6272_vm4, %v6524_v38, %v6523_v51 }
 0xa61   :  { %v6540_v6 = vsel %vm6539_vm11, %v6538_v45, %v6525_v19 }
 0xa62   :  { %6541 = vst.msk [vmem:[#allocation7] sm:$0xff] %vm386_vm0, %v6540_v6 }
 0xa63   :  { %6552 = dma.vmem_to_hbm [thread:$0]  %s6548_s11, 128, %s6550_s13, [#allocation4]  }
 0xa64   :  { %7120 = dma.done.wait [#allocation4], 128  }
 0xa65   :  { %7121 = vsyncadd [#allocation4], 4294967168 }
 0xa66   :  { %6557 = vsyncpa [#allocation3], 1 }
 0xa67   :  { %6558 = vsyncpa [#allocation6], 1 }
 0xa68   :  { %6559 = vsyncpa [#allocation4], 1 }

</bundles_post_ra>
